<compile_context>
chip_gen: v7x
topology: tpu7x:2x2x1
jax: 0.10.0
libtpu: 0.0.40
codegen_flags: <defaults>
</compile_context>

<pallas_src>
import jax
import jax.numpy as jnp
import numpy as np
from jax import lax
from jax.experimental import pallas as pl
from jax.experimental.pallas import tpu as pltpu

LEAKY_SLOPE = 0.01   # nn.LeakyReLU() default negative_slope
BN_EPS = 1e-5        # nn.BatchNorm2d default eps
LANE = 128           # TPU lane width


def _round_up(x, m):
    return ((x + m - 1) // m) * m


# ----------------------------- Pallas kernel --------------------------------

def _upblock_kernel(x1_ref, x2_ref, w1x1_ref, b1x1_ref, ufull_ref, e2_ref,
                    wA_ref, sA_ref, bA_ref, wB_ref, sB_ref, bB_ref,
                    o_ref, pad1_ref, pad2_ref):
    # x1_ref:   (1, C1, h*w)        low-res decoder feature, NCHW-flattened
    # x2_ref:   (1, C2, H*W)        skip connection, NCHW-flattened (H=2h, W=2w)
    # w1x1:     (C1, Cp)  f32       1x1-conv weights, lane-placed at channels [C2:2*C2]
    # b1x1:     (1, Cp)   f32       1x1-conv bias, same placement
    # ufull:    (H*W, h*w) f32      kron(Uh, Uw) bilinear align_corners=True upsample matrix
    # e2:       (C2, Cp)  f32       selection matrix placing x2 channels at lanes [0:C2]
    # wA:       (9, Cp, Coutp) bf16 conv1 weights (tap-major), zero-padded channels
    # wB:       (9, Coutp, Coutp) bf16 conv2 weights
    # sA/sB, bA/bB: (1, Coutp) f32  BN scale / (conv-bias + BN) bias, zero-padded
    # o_ref:    (1, Cout, H*W)      channels-major output slab (lane-dense: H*W % 128 == 0)
    # pad1/pad2: bf16 halo scratches (H+2, W+2, Cp) / (H+2, W+2, Coutp)
    H2, W2, Cp = pad1_ref.shape
    H, W = H2 - 2, W2 - 2
    HW = H * W
    Coutp = pad2_ref.shape[2]
    Cout = o_ref.shape[1]
    f32 = jnp.float32

    # ---- 1x1 conv on x1 (channel mix + lane placement), one small MXU matmul ----
    # (C1, h*w) -> transpose (tiny) -> (h*w, C1) @ (C1, Cp) = (h*w, Cp)
    p = jnp.dot(x1_ref[0].T, w1x1_ref[...], preferred_element_type=f32) + b1x1_ref[...]

    # ---- bilinear upsample x2, align_corners=True, as ONE matmul (spatial-only operand) ----
    up = jnp.dot(ufull_ref[...], p, preferred_element_type=f32)          # (H*W, Cp)

    # ---- skip connection: NCHW -> channels-on-lanes + placement at [0:C2], via the MXU ----
    x2p = jnp.dot(x2_ref[0].T, e2_ref[...], preferred_element_type=f32)  # (H*W, Cp)

    # concat([x2, up(x1)], channel) is already realized by the lane placements above
    interior1 = (x2p + up).astype(pad1_ref.dtype).reshape(H, W, Cp)      # single bf16 cast

    # ---- halo buffers: zero only the 1-px border (interior fully rewritten each step) ----
    def _set_border(pad_ref):
        C = pad_ref.shape[2]
        zr = jnp.zeros((1, W + 2, C), pad_ref.dtype)
        pad_ref[0:1, :, :] = zr
        pad_ref[H + 1:H + 2, :, :] = zr
        zc = jnp.zeros((H + 2, 1, C), pad_ref.dtype)
        pad_ref[:, 0:1, :] = zc
        pad_ref[:, W + 1:W + 2, :] = zc

    _set_border(pad1_ref)
    _set_border(pad2_ref)
    pad1_ref[1:H + 1, 1:W + 1, :] = interior1

    def conv3x3_bn_lrelu(pad_ref, w_ref, s_ref, b_ref):
        # 3x3 SAME conv = 9 accumulating MXU matmuls over shifted lane-dense views (bf16 in,
        # f32 accumulation). BN (eval, running stats) + conv bias applied in the f32 epilogue.
        cin = pad_ref.shape[2]
        acc = None
        for k in range(9):
            ky, kx = divmod(k, 3)
            patch = pad_ref[ky:ky + H, kx:kx + W, :].reshape(HW, cin)
            d = jnp.dot(patch, w_ref[k], preferred_element_type=f32)
            acc = d if acc is None else acc + d
        y = acc * s_ref[...] + b_ref[...]
        return jnp.where(y >= 0, y, LEAKY_SLOPE * y)       # LeakyReLU(0.01)

    a1 = conv3x3_bn_lrelu(pad1_ref, wA_ref, sA_ref, bA_ref)              # (H*W, Coutp)

    # TODO(synk): Dropout(p) is identity in eval mode; training-mode masking not implemented.
    pad2_ref[1:H + 1, 1:W + 1, :] = a1.astype(pad2_ref.dtype).reshape(H, W, Coutp)

    a2 = conv3x3_bn_lrelu(pad2_ref, wB_ref, sB_ref, bB_ref)              # (H*W, Coutp)

    # channels-major store: (Cout, H*W) with H*W multiple of 128 -> unmasked lane-dense stores;
    # makes the wrapper's conversion back to NCHW a free reshape (no transpose, no extra HBM pass).
    o_ref[0] = a2.T[:Cout].astype(o_ref.dtype)


# ----------------------------- Wrapper ---------------------------------------

def _upsample_matrix_align_corners(n_in, n_out):
    # out[i] = sum_a U[i, a] * in[a]   (PyTorch Upsample bilinear, align_corners=True)
    U = np.zeros((n_out, n_in), np.float32)
    if n_in == 1:
        U[:, 0] = 1.0
        return U
    scale = (n_in - 1) / (n_out - 1)
    for i in range(n_out):
        src = i * scale
        i0 = min(int(np.floor(src)), n_in - 2)
        frac = src - i0
        U[i, i0] = 1.0 - frac
        U[i, i0 + 1] = frac
    return U


def _prep_conv_bn(params, i, cin, cinp, cout, coutp):
    # Raw conv weights -> (9, Cin_pad, Cout_pad) bf16 (tap-major, zero-padded channels).
    # BN scale stays f32 and is applied in the kernel's epilogue (tighter numerics than folding
    # it into the quantized weights).
    w = params[f"w{i}"].reshape(9, cin, cout)                                       # HWIO -> taps
    wp = jnp.zeros((9, cinp, coutp), jnp.float32).at[:, :cin, :cout].set(w)
    wp = wp.astype(jnp.bfloat16)
    scale = params[f"gamma{i}"] / jnp.sqrt(params[f"var{i}"] + BN_EPS)              # (Cout,)
    bias = (params[f"b{i}"] - params[f"mean{i}"]) * scale + params[f"beta{i}"]      # (Cout,)
    sp = jnp.zeros((1, coutp), jnp.float32).at[0, :cout].set(scale)
    bp = jnp.zeros((1, coutp), jnp.float32).at[0, :cout].set(bias)
    return wp, sp, bp


def upblock_forward(x1_nchw, x2_nchw, params):
    N, C1, h, w = x1_nchw.shape
    N2, C2, H, W = x2_nchw.shape
    assert N2 == N and H == 2 * h and W == 2 * w
    Cout = params["w1"].shape[-1]
    Ccat = 2 * C2
    Cp = _round_up(Ccat, LANE)       # lane-padded concat channels
    Coutp = _round_up(Cout, LANE)    # lane-padded output channels

    # Inputs stay NCHW; only free (contiguous) reshapes here — no activation transposes in XLA.
    x1f = x1_nchw.reshape(N, C1, h * w)
    x2f = x2_nchw.reshape(N, C2, H * W)

    # Upsample operator: kron(Uh, Uw) — spatial-only, independent of channel count.
    Uh = _upsample_matrix_align_corners(h, H)                          # (H, h)
    Uw = _upsample_matrix_align_corners(w, W)                          # (W, w)
    ufull = jnp.asarray(np.kron(Uh, Uw), jnp.float32)                  # (H*W, h*w)

    # 1x1-conv weights/bias lane-placed at channels [C2:2*C2] (torch.cat([x2, x1], dim=1) order)
    w1x1p = jnp.zeros((C1, Cp), jnp.float32).at[:, C2:Ccat].set(params["w1x1"])
    b1x1p = jnp.zeros((1, Cp), jnp.float32).at[0, C2:Ccat].set(params["b1x1"])
    # Selection matrix placing x2's channels at lanes [0:C2] (also does NCHW->lanes on the MXU)
    e2 = jnp.zeros((C2, Cp), jnp.float32).at[:, :C2].set(jnp.eye(C2, dtype=jnp.float32))

    wA, sA, bA = _prep_conv_bn(params, 1, Ccat, Cp, Cout, Coutp)
    wB, sB, bB = _prep_conv_bn(params, 2, Cout, Coutp, Cout, Coutp)

    out = pl.pallas_call(
        _upblock_kernel,
        out_shape=jax.ShapeDtypeStruct((N, Cout, H * W), x1_nchw.dtype),
        grid=(N,),
        in_specs=[
            pl.BlockSpec((1, C1, h * w), lambda n: (n, 0, 0)),
            pl.BlockSpec((1, C2, H * W), lambda n: (n, 0, 0)),
            pl.BlockSpec((C1, Cp), lambda n: (0, 0)),
            pl.BlockSpec((1, Cp), lambda n: (0, 0)),
            pl.BlockSpec((H * W, h * w), lambda n: (0, 0)),
            pl.BlockSpec((C2, Cp), lambda n: (0, 0)),
            pl.BlockSpec((9, Cp, Coutp), lambda n: (0, 0, 0)),
            pl.BlockSpec((1, Coutp), lambda n: (0, 0)),
            pl.BlockSpec((1, Coutp), lambda n: (0, 0)),
            pl.BlockSpec((9, Coutp, Coutp), lambda n: (0, 0, 0)),
            pl.BlockSpec((1, Coutp), lambda n: (0, 0)),
            pl.BlockSpec((1, Coutp), lambda n: (0, 0)),
        ],
        out_specs=pl.BlockSpec((1, Cout, H * W), lambda n: (n, 0, 0)),
        scratch_shapes=[
            pltpu.VMEM((H + 2, W + 2, Cp), jnp.bfloat16),     # halo tile for conv1 input
            pltpu.VMEM((H + 2, W + 2, Coutp), jnp.bfloat16),  # halo tile for conv2 input
        ],
        compiler_params=pltpu.CompilerParams(dimension_semantics=("parallel",)),
    )(x1f, x2f, w1x1p, b1x1p, ufull, e2, wA, sA, bA, wB, sB, bB)

    return out.reshape(N, Cout, H, W)   # free reshape: output is already channels-major (NCHW)


# ----------------------------- Parameters ------------------------------------

def init_upblock_params(key, in_channels1, in_channels2, out_channels):
    p = {}
    key, k = jax.random.split(key)
    p["w1x1"] = 0.1 * jax.random.normal(k, (in_channels1, in_channels2), jnp.float32)
    key, k = jax.random.split(key)
    p["b1x1"] = 0.1 * jax.random.normal(k, (in_channels2,), jnp.float32)
    cin = 2 * in_channels2
    for i in (1, 2):
        key, kw, kb, kg, kbe, km, kv = jax.random.split(key, 7)
        p[f"w{i}"] = 0.1 * jax.random.normal(kw, (3, 3, cin, out_channels), jnp.float32)  # HWIO
        p[f"b{i}"] = 0.1 * jax.random.normal(kb, (out_channels,), jnp.float32)
        p[f"gamma{i}"] = 1.0 + 0.1 * jax.random.normal(kg, (out_channels,), jnp.float32)
        p[f"beta{i}"] = 0.1 * jax.random.normal(kbe, (out_channels,), jnp.float32)
        p[f"mean{i}"] = 0.1 * jax.random.normal(km, (out_channels,), jnp.float32)   # running stats
        p[f"var{i}"] = 0.5 + jax.random.uniform(kv, (out_channels,), jnp.float32)
        cin = out_channels
    return p


# ----------------------------- Plain-JAX reference ---------------------------

def upblock_reference(x1_nchw, x2_nchw, params):
    N, C1, h, w = x1_nchw.shape
    H, W = 2 * h, 2 * w
    x1 = jnp.transpose(x1_nchw, (0, 2, 3, 1))
    x2 = jnp.transpose(x2_nchw, (0, 2, 3, 1))
    # conv1x1
    x1 = jnp.einsum("nhwc,cd->nhwd", x1, params["w1x1"]) + params["b1x1"]
    # bilinear upsample, align_corners=True
    Uh = jnp.asarray(_upsample_matrix_align_corners(h, H))
    Uw = jnp.asarray(_upsample_matrix_align_corners(w, W))
    x1 = jnp.einsum("Hh,nhwc->nHwc", Uh, x1)
    x1 = jnp.einsum("Ww,nHwc->nHWc", Uw, x1)
    # concat skip first (torch.cat([x2, x1], dim=1))
    x = jnp.concatenate([x2, x1], axis=-1)
    for i in (1, 2):
        y = lax.conv_general_dilated(
            x, params[f"w{i}"], (1, 1), "SAME",
            dimension_numbers=("NHWC", "HWIO", "NHWC")) + params[f"b{i}"]
        scale = params[f"gamma{i}"] / jnp.sqrt(params[f"var{i}"] + BN_EPS)
        y = (y - params[f"mean{i}"]) * scale + params[f"beta{i}"]
        x = jnp.where(y >= 0, y, LEAKY_SLOPE * y)
    return jnp.transpose(x, (0, 3, 1, 2))


# ----------------------------------- Main ------------------------------------

if __name__ == "__main__":
    key = jax.random.PRNGKey(0)
    k1, k2, kp = jax.random.split(key, 3)

    N, C1, C2, COUT, h, w = 2, 8, 4, 8, 8, 8
    x1 = jax.random.normal(k1, (N, C1, h, w), jnp.float32)          # decoder feature (NCHW)
    x2 = jax.random.normal(k2, (N, C2, 2 * h, 2 * w), jnp.float32)  # skip connection (NCHW)
    params = init_upblock_params(kp, C1, C2, COUT)

    out = jax.block_until_ready(upblock_forward(x1, x2, params))
    ref = jax.block_until_ready(upblock_reference(x1, x2, params))

    assert out.shape == (N, COUT, 2 * h, 2 * w), out.shape
    np.testing.assert_allclose(np.asarray(out), np.asarray(ref), rtol=2e-2, atol=2e-2)

    print("KERNEL_OK")
</pallas_src>

<mosaic_0001>
module attributes {stable_mosaic.version = 11 : i64} {
  func.func @_upblock_kernel(%arg0: i32, %arg1: memref<1x8x64xf32, #tpu.memory_space<vmem>>, %arg2: memref<1x4x256xf32, #tpu.memory_space<vmem>>, %arg3: memref<8x128xf32, #tpu.memory_space<vmem>>, %arg4: memref<1x128xf32, #tpu.memory_space<vmem>>, %arg5: memref<256x64xf32, #tpu.memory_space<vmem>>, %arg6: memref<4x128xf32, #tpu.memory_space<vmem>>, %arg7: memref<9x128x128xbf16, #tpu.memory_space<vmem>>, %arg8: memref<1x128xf32, #tpu.memory_space<vmem>>, %arg9: memref<1x128xf32, #tpu.memory_space<vmem>>, %arg10: memref<9x128x128xbf16, #tpu.memory_space<vmem>>, %arg11: memref<1x128xf32, #tpu.memory_space<vmem>>, %arg12: memref<1x128xf32, #tpu.memory_space<vmem>>, %arg13: memref<1x8x256xf32, #tpu.memory_space<vmem>>, %arg14: memref<18x18x128xbf16, #tpu.memory_space<vmem>>, %arg15: memref<18x18x128xbf16, #tpu.memory_space<vmem>>) attributes {dimension_semantics = [#tpu.dimension_semantics<parallel>], iteration_bounds = array<i64: 2>, scalar_prefetch = 0 : i64, scratch_operands = 2 : i64, tpu.core_type = #tpu.core_type<tc>, window_params = [{transform_indices = @transform_0, window_bounds = array<i64: 1, 8, 64>}, {transform_indices = @transform_1, window_bounds = array<i64: 1, 4, 256>}, {pipeline_mode = #tpu.pipeline_mode<synchronous>, transform_indices = @transform_2, window_bounds = array<i64: 8, 128>}, {pipeline_mode = #tpu.pipeline_mode<synchronous>, transform_indices = @transform_3, window_bounds = array<i64: 1, 128>}, {pipeline_mode = #tpu.pipeline_mode<synchronous>, transform_indices = @transform_4, window_bounds = array<i64: 256, 64>}, {pipeline_mode = #tpu.pipeline_mode<synchronous>, transform_indices = @transform_5, window_bounds = array<i64: 4, 128>}, {pipeline_mode = #tpu.pipeline_mode<synchronous>, transform_indices = @transform_6, window_bounds = array<i64: 9, 128, 128>}, {pipeline_mode = #tpu.pipeline_mode<synchronous>, transform_indices = @transform_7, window_bounds = array<i64: 1, 128>}, {pipeline_mode = #tpu.pipeline_mode<synchronous>, transform_indices = @transform_8, window_bounds = array<i64: 1, 128>}, {pipeline_mode = #tpu.pipeline_mode<synchronous>, transform_indices = @transform_9, window_bounds = array<i64: 9, 128, 128>}, {pipeline_mode = #tpu.pipeline_mode<synchronous>, transform_indices = @transform_10, window_bounds = array<i64: 1, 128>}, {pipeline_mode = #tpu.pipeline_mode<synchronous>, transform_indices = @transform_11, window_bounds = array<i64: 1, 128>}, {transform_indices = @transform_12, window_bounds = array<i64: 1, 8, 256>}]} {
    %c0 = arith.constant 0 : index
    %c0_0 = arith.constant 0 : index
    %c0_1 = arith.constant 0 : index
    %0 = vector.load %arg1[%c0, %c0_0, %c0_1] : memref<1x8x64xf32, #tpu.memory_space<vmem>>, vector<1x8x64xf32>
    %1 = vector.shape_cast %0 : vector<1x8x64xf32> to vector<8x64xf32>
    %2 = tpu.transpose %1, [1, 0] : vector<8x64xf32> -> vector<64x8xf32>
    %c0_2 = arith.constant 0 : index
    %c0_3 = arith.constant 0 : index
    %3 = vector.load %arg3[%c0_2, %c0_3] : memref<8x128xf32, #tpu.memory_space<vmem>>, vector<8x128xf32>
    %cst = arith.constant dense<0.000000e+00> : vector<64x128xf32>
    %4 = tpu.matmul %2, %3, %cst {dimension_numbers = #tpu.dot_dimension_numbers<[1], [0], [0], [1], [0, 0, 1, 1], [], []>} : vector<64x8xf32>, vector<8x128xf32>, vector<64x128xf32> -> vector<64x128xf32>
    %c0_4 = arith.constant 0 : index
    %c0_5 = arith.constant 0 : index
    %5 = vector.load %arg4[%c0_4, %c0_5] : memref<1x128xf32, #tpu.memory_space<vmem>>, vector<1x128xf32>
    %6 = vector.broadcast %5 : vector<1x128xf32> to vector<64x128xf32>
    %7 = arith.addf %4, %6 : vector<64x128xf32>
    %c0_6 = arith.constant 0 : index
    %c0_7 = arith.constant 0 : index
    %8 = vector.load %arg5[%c0_6, %c0_7] : memref<256x64xf32, #tpu.memory_space<vmem>>, vector<256x64xf32>
    %cst_8 = arith.constant dense<0.000000e+00> : vector<256x128xf32>
    %9 = tpu.matmul %8, %7, %cst_8 {dimension_numbers = #tpu.dot_dimension_numbers<[1], [0], [0], [1], [0, 0, 1, 1], [], []>} : vector<256x64xf32>, vector<64x128xf32>, vector<256x128xf32> -> vector<256x128xf32>
    %c0_9 = arith.constant 0 : index
    %c0_10 = arith.constant 0 : index
    %c0_11 = arith.constant 0 : index
    %10 = vector.load %arg2[%c0_9, %c0_10, %c0_11] : memref<1x4x256xf32, #tpu.memory_space<vmem>>, vector<1x4x256xf32>
    %11 = vector.shape_cast %10 : vector<1x4x256xf32> to vector<4x256xf32>
    %12 = tpu.transpose %11, [1, 0] : vector<4x256xf32> -> vector<256x4xf32>
    %c0_12 = arith.constant 0 : index
    %c0_13 = arith.constant 0 : index
    %13 = vector.load %arg6[%c0_12, %c0_13] : memref<4x128xf32, #tpu.memory_space<vmem>>, vector<4x128xf32>
    %cst_14 = arith.constant dense<0.000000e+00> : vector<256x128xf32>
    %14 = tpu.matmul %12, %13, %cst_14 {dimension_numbers = #tpu.dot_dimension_numbers<[1], [0], [0], [1], [0, 0, 1, 1], [], []>} : vector<256x4xf32>, vector<4x128xf32>, vector<256x128xf32> -> vector<256x128xf32>
    %15 = arith.addf %14, %9 : vector<256x128xf32>
    %16 = arith.truncf %15 : vector<256x128xf32> to vector<256x128xbf16>
    %17 = vector.shape_cast %16 : vector<256x128xbf16> to vector<16x16x128xbf16>
    %cst_15 = arith.constant 0.000000e+00 : bf16
    %18 = vector.broadcast %cst_15 : bf16 to vector<1x18x128xbf16>
    %c0_16 = arith.constant 0 : index
    %c0_17 = arith.constant 0 : index
    %c0_18 = arith.constant 0 : index
    %19 = vector.load %arg14[%c0_16, %c0_17, %c0_18] : memref<18x18x128xbf16, #tpu.memory_space<vmem>>, vector<1x18x128xbf16>
    tpu.vector_store %arg14[%c0_16, %c0_17, %c0_18], %18 {strides = array<i32>} : memref<18x18x128xbf16, #tpu.memory_space<vmem>>, vector<1x18x128xbf16>,
    %c17 = arith.constant 17 : index
    %c0_19 = arith.constant 0 : index
    %c0_20 = arith.constant 0 : index
    %20 = vector.load %arg14[%c17, %c0_19, %c0_20] : memref<18x18x128xbf16, #tpu.memory_space<vmem>>, vector<1x18x128xbf16>
    tpu.vector_store %arg14[%c17, %c0_19, %c0_20], %18 {strides = array<i32>} : memref<18x18x128xbf16, #tpu.memory_space<vmem>>, vector<1x18x128xbf16>,
    %cst_21 = arith.constant 0.000000e+00 : bf16
    %21 = vector.broadcast %cst_21 : bf16 to vector<18x1x128xbf16>
    %c0_22 = arith.constant 0 : index
    %c0_23 = arith.constant 0 : index
    %c0_24 = arith.constant 0 : index
    %22 = vector.load %arg14[%c0_22, %c0_23, %c0_24] : memref<18x18x128xbf16, #tpu.memory_space<vmem>>, vector<18x1x128xbf16>
    tpu.vector_store %arg14[%c0_22, %c0_23, %c0_24], %21 {strides = array<i32>} : memref<18x18x128xbf16, #tpu.memory_space<vmem>>, vector<18x1x128xbf16>,
    %c0_25 = arith.constant 0 : index
    %c17_26 = arith.constant 17 : index
    %c0_27 = arith.constant 0 : index
    %23 = vector.load %arg14[%c0_25, %c17_26, %c0_27] : memref<18x18x128xbf16, #tpu.memory_space<vmem>>, vector<18x1x128xbf16>
    tpu.vector_store %arg14[%c0_25, %c17_26, %c0_27], %21 {strides = array<i32>} : memref<18x18x128xbf16, #tpu.memory_space<vmem>>, vector<18x1x128xbf16>,
    %cst_28 = arith.constant 0.000000e+00 : bf16
    %24 = vector.broadcast %cst_28 : bf16 to vector<1x18x128xbf16>
    %c0_29 = arith.constant 0 : index
    %c0_30 = arith.constant 0 : index
    %c0_31 = arith.constant 0 : index
    %25 = vector.load %arg15[%c0_29, %c0_30, %c0_31] : memref<18x18x128xbf16, #tpu.memory_space<vmem>>, vector<1x18x128xbf16>
    tpu.vector_store %arg15[%c0_29, %c0_30, %c0_31], %24 {strides = array<i32>} : memref<18x18x128xbf16, #tpu.memory_space<vmem>>, vector<1x18x128xbf16>,
    %c17_32 = arith.constant 17 : index
    %c0_33 = arith.constant 0 : index
    %c0_34 = arith.constant 0 : index
    %26 = vector.load %arg15[%c17_32, %c0_33, %c0_34] : memref<18x18x128xbf16, #tpu.memory_space<vmem>>, vector<1x18x128xbf16>
    tpu.vector_store %arg15[%c17_32, %c0_33, %c0_34], %24 {strides = array<i32>} : memref<18x18x128xbf16, #tpu.memory_space<vmem>>, vector<1x18x128xbf16>,
    %cst_35 = arith.constant 0.000000e+00 : bf16
    %27 = vector.broadcast %cst_35 : bf16 to vector<18x1x128xbf16>
    %c0_36 = arith.constant 0 : index
    %c0_37 = arith.constant 0 : index
    %c0_38 = arith.constant 0 : index
    %28 = vector.load %arg15[%c0_36, %c0_37, %c0_38] : memref<18x18x128xbf16, #tpu.memory_space<vmem>>, vector<18x1x128xbf16>
    tpu.vector_store %arg15[%c0_36, %c0_37, %c0_38], %27 {strides = array<i32>} : memref<18x18x128xbf16, #tpu.memory_space<vmem>>, vector<18x1x128xbf16>,
    %c0_39 = arith.constant 0 : index
    %c17_40 = arith.constant 17 : index
    %c0_41 = arith.constant 0 : index
    %29 = vector.load %arg15[%c0_39, %c17_40, %c0_41] : memref<18x18x128xbf16, #tpu.memory_space<vmem>>, vector<18x1x128xbf16>
    tpu.vector_store %arg15[%c0_39, %c17_40, %c0_41], %27 {strides = array<i32>} : memref<18x18x128xbf16, #tpu.memory_space<vmem>>, vector<18x1x128xbf16>,
    %c1 = arith.constant 1 : index
    %c1_42 = arith.constant 1 : index
    %c0_43 = arith.constant 0 : index
    %30 = vector.load %arg14[%c1, %c1_42, %c0_43] : memref<18x18x128xbf16, #tpu.memory_space<vmem>>, vector<16x16x128xbf16>
    tpu.vector_store %arg14[%c1, %c1_42, %c0_43], %17 {strides = array<i32>} : memref<18x18x128xbf16, #tpu.memory_space<vmem>>, vector<16x16x128xbf16>,
    %c0_44 = arith.constant 0 : index
    %c0_45 = arith.constant 0 : index
    %c0_46 = arith.constant 0 : index
    %31 = vector.load %arg14[%c0_44, %c0_45, %c0_46] : memref<18x18x128xbf16, #tpu.memory_space<vmem>>, vector<16x16x128xbf16>
    %32 = vector.shape_cast %31 : vector<16x16x128xbf16> to vector<256x128xbf16>
    %c0_47 = arith.constant 0 : index
    %c0_48 = arith.constant 0 : index
    %c0_49 = arith.constant 0 : index
    %33 = vector.load %arg7[%c0_47, %c0_48, %c0_49] : memref<9x128x128xbf16, #tpu.memory_space<vmem>>, vector<1x128x128xbf16>
    %34 = vector.shape_cast %33 : vector<1x128x128xbf16> to vector<128x128xbf16>
    %cst_50 = arith.constant dense<0.000000e+00> : vector<256x128xf32>
    %35 = tpu.matmul %32, %34, %cst_50 {dimension_numbers = #tpu.dot_dimension_numbers<[1], [0], [0], [1], [0, 0, 1, 1], [], []>} : vector<256x128xbf16>, vector<128x128xbf16>, vector<256x128xf32> -> vector<256x128xf32>
    %c0_51 = arith.constant 0 : index
    %c1_52 = arith.constant 1 : index
    %c0_53 = arith.constant 0 : index
    %36 = vector.load %arg14[%c0_51, %c1_52, %c0_53] : memref<18x18x128xbf16, #tpu.memory_space<vmem>>, vector<16x16x128xbf16>
    %37 = vector.shape_cast %36 : vector<16x16x128xbf16> to vector<256x128xbf16>
    %c1_54 = arith.constant 1 : index
    %c0_55 = arith.constant 0 : index
    %c0_56 = arith.constant 0 : index
    %38 = vector.load %arg7[%c1_54, %c0_55, %c0_56] : memref<9x128x128xbf16, #tpu.memory_space<vmem>>, vector<1x128x128xbf16>
    %39 = vector.shape_cast %38 : vector<1x128x128xbf16> to vector<128x128xbf16>
    %cst_57 = arith.constant dense<0.000000e+00> : vector<256x128xf32>
    %40 = tpu.matmul %37, %39, %cst_57 {dimension_numbers = #tpu.dot_dimension_numbers<[1], [0], [0], [1], [0, 0, 1, 1], [], []>} : vector<256x128xbf16>, vector<128x128xbf16>, vector<256x128xf32> -> vector<256x128xf32>
    %41 = arith.addf %35, %40 : vector<256x128xf32>
    %c0_58 = arith.constant 0 : index
    %c2 = arith.constant 2 : index
    %c0_59 = arith.constant 0 : index
    %42 = vector.load %arg14[%c0_58, %c2, %c0_59] : memref<18x18x128xbf16, #tpu.memory_space<vmem>>, vector<16x16x128xbf16>
    %43 = vector.shape_cast %42 : vector<16x16x128xbf16> to vector<256x128xbf16>
    %c2_60 = arith.constant 2 : index
    %c0_61 = arith.constant 0 : index
    %c0_62 = arith.constant 0 : index
    %44 = vector.load %arg7[%c2_60, %c0_61, %c0_62] : memref<9x128x128xbf16, #tpu.memory_space<vmem>>, vector<1x128x128xbf16>
    %45 = vector.shape_cast %44 : vector<1x128x128xbf16> to vector<128x128xbf16>
    %cst_63 = arith.constant dense<0.000000e+00> : vector<256x128xf32>
    %46 = tpu.matmul %43, %45, %cst_63 {dimension_numbers = #tpu.dot_dimension_numbers<[1], [0], [0], [1], [0, 0, 1, 1], [], []>} : vector<256x128xbf16>, vector<128x128xbf16>, vector<256x128xf32> -> vector<256x128xf32>
    %47 = arith.addf %41, %46 : vector<256x128xf32>
    %c1_64 = arith.constant 1 : index
    %c0_65 = arith.constant 0 : index
    %c0_66 = arith.constant 0 : index
    %48 = vector.load %arg14[%c1_64, %c0_65, %c0_66] : memref<18x18x128xbf16, #tpu.memory_space<vmem>>, vector<16x16x128xbf16>
    %49 = vector.shape_cast %48 : vector<16x16x128xbf16> to vector<256x128xbf16>
    %c3 = arith.constant 3 : index
    %c0_67 = arith.constant 0 : index
    %c0_68 = arith.constant 0 : index
    %50 = vector.load %arg7[%c3, %c0_67, %c0_68] : memref<9x128x128xbf16, #tpu.memory_space<vmem>>, vector<1x128x128xbf16>
    %51 = vector.shape_cast %50 : vector<1x128x128xbf16> to vector<128x128xbf16>
    %cst_69 = arith.constant dense<0.000000e+00> : vector<256x128xf32>
    %52 = tpu.matmul %49, %51, %cst_69 {dimension_numbers = #tpu.dot_dimension_numbers<[1], [0], [0], [1], [0, 0, 1, 1], [], []>} : vector<256x128xbf16>, vector<128x128xbf16>, vector<256x128xf32> -> vector<256x128xf32>
    %53 = arith.addf %47, %52 : vector<256x128xf32>
    %c1_70 = arith.constant 1 : index
    %c1_71 = arith.constant 1 : index
    %c0_72 = arith.constant 0 : index
    %54 = vector.load %arg14[%c1_70, %c1_71, %c0_72] : memref<18x18x128xbf16, #tpu.memory_space<vmem>>, vector<16x16x128xbf16>
    %55 = vector.shape_cast %54 : vector<16x16x128xbf16> to vector<256x128xbf16>
    %c4 = arith.constant 4 : index
    %c0_73 = arith.constant 0 : index
    %c0_74 = arith.constant 0 : index
    %56 = vector.load %arg7[%c4, %c0_73, %c0_74] : memref<9x128x128xbf16, #tpu.memory_space<vmem>>, vector<1x128x128xbf16>
    %57 = vector.shape_cast %56 : vector<1x128x128xbf16> to vector<128x128xbf16>
    %cst_75 = arith.constant dense<0.000000e+00> : vector<256x128xf32>
    %58 = tpu.matmul %55, %57, %cst_75 {dimension_numbers = #tpu.dot_dimension_numbers<[1], [0], [0], [1], [0, 0, 1, 1], [], []>} : vector<256x128xbf16>, vector<128x128xbf16>, vector<256x128xf32> -> vector<256x128xf32>
    %59 = arith.addf %53, %58 : vector<256x128xf32>
    %c1_76 = arith.constant 1 : index
    %c2_77 = arith.constant 2 : index
    %c0_78 = arith.constant 0 : index
    %60 = vector.load %arg14[%c1_76, %c2_77, %c0_78] : memref<18x18x128xbf16, #tpu.memory_space<vmem>>, vector<16x16x128xbf16>
    %61 = vector.shape_cast %60 : vector<16x16x128xbf16> to vector<256x128xbf16>
    %c5 = arith.constant 5 : index
    %c0_79 = arith.constant 0 : index
    %c0_80 = arith.constant 0 : index
    %62 = vector.load %arg7[%c5, %c0_79, %c0_80] : memref<9x128x128xbf16, #tpu.memory_space<vmem>>, vector<1x128x128xbf16>
    %63 = vector.shape_cast %62 : vector<1x128x128xbf16> to vector<128x128xbf16>
    %cst_81 = arith.constant dense<0.000000e+00> : vector<256x128xf32>
    %64 = tpu.matmul %61, %63, %cst_81 {dimension_numbers = #tpu.dot_dimension_numbers<[1], [0], [0], [1], [0, 0, 1, 1], [], []>} : vector<256x128xbf16>, vector<128x128xbf16>, vector<256x128xf32> -> vector<256x128xf32>
    %65 = arith.addf %59, %64 : vector<256x128xf32>
    %c2_82 = arith.constant 2 : index
    %c0_83 = arith.constant 0 : index
    %c0_84 = arith.constant 0 : index
    %66 = vector.load %arg14[%c2_82, %c0_83, %c0_84] : memref<18x18x128xbf16, #tpu.memory_space<vmem>>, vector<16x16x128xbf16>
    %67 = vector.shape_cast %66 : vector<16x16x128xbf16> to vector<256x128xbf16>
    %c6 = arith.constant 6 : index
    %c0_85 = arith.constant 0 : index
    %c0_86 = arith.constant 0 : index
    %68 = vector.load %arg7[%c6, %c0_85, %c0_86] : memref<9x128x128xbf16, #tpu.memory_space<vmem>>, vector<1x128x128xbf16>
    %69 = vector.shape_cast %68 : vector<1x128x128xbf16> to vector<128x128xbf16>
    %cst_87 = arith.constant dense<0.000000e+00> : vector<256x128xf32>
    %70 = tpu.matmul %67, %69, %cst_87 {dimension_numbers = #tpu.dot_dimension_numbers<[1], [0], [0], [1], [0, 0, 1, 1], [], []>} : vector<256x128xbf16>, vector<128x128xbf16>, vector<256x128xf32> -> vector<256x128xf32>
    %71 = arith.addf %65, %70 : vector<256x128xf32>
    %c2_88 = arith.constant 2 : index
    %c1_89 = arith.constant 1 : index
    %c0_90 = arith.constant 0 : index
    %72 = vector.load %arg14[%c2_88, %c1_89, %c0_90] : memref<18x18x128xbf16, #tpu.memory_space<vmem>>, vector<16x16x128xbf16>
    %73 = vector.shape_cast %72 : vector<16x16x128xbf16> to vector<256x128xbf16>
    %c7 = arith.constant 7 : index
    %c0_91 = arith.constant 0 : index
    %c0_92 = arith.constant 0 : index
    %74 = vector.load %arg7[%c7, %c0_91, %c0_92] : memref<9x128x128xbf16, #tpu.memory_space<vmem>>, vector<1x128x128xbf16>
    %75 = vector.shape_cast %74 : vector<1x128x128xbf16> to vector<128x128xbf16>
    %cst_93 = arith.constant dense<0.000000e+00> : vector<256x128xf32>
    %76 = tpu.matmul %73, %75, %cst_93 {dimension_numbers = #tpu.dot_dimension_numbers<[1], [0], [0], [1], [0, 0, 1, 1], [], []>} : vector<256x128xbf16>, vector<128x128xbf16>, vector<256x128xf32> -> vector<256x128xf32>
    %77 = arith.addf %71, %76 : vector<256x128xf32>
    %c2_94 = arith.constant 2 : index
    %c2_95 = arith.constant 2 : index
    %c0_96 = arith.constant 0 : index
    %78 = vector.load %arg14[%c2_94, %c2_95, %c0_96] : memref<18x18x128xbf16, #tpu.memory_space<vmem>>, vector<16x16x128xbf16>
    %79 = vector.shape_cast %78 : vector<16x16x128xbf16> to vector<256x128xbf16>
    %c8 = arith.constant 8 : index
    %c0_97 = arith.constant 0 : index
    %c0_98 = arith.constant 0 : index
    %80 = vector.load %arg7[%c8, %c0_97, %c0_98] : memref<9x128x128xbf16, #tpu.memory_space<vmem>>, vector<1x128x128xbf16>
    %81 = vector.shape_cast %80 : vector<1x128x128xbf16> to vector<128x128xbf16>
    %cst_99 = arith.constant dense<0.000000e+00> : vector<256x128xf32>
    %82 = tpu.matmul %79, %81, %cst_99 {dimension_numbers = #tpu.dot_dimension_numbers<[1], [0], [0], [1], [0, 0, 1, 1], [], []>} : vector<256x128xbf16>, vector<128x128xbf16>, vector<256x128xf32> -> vector<256x128xf32>
    %83 = arith.addf %77, %82 : vector<256x128xf32>
    %c0_100 = arith.constant 0 : index
    %c0_101 = arith.constant 0 : index
    %84 = vector.load %arg8[%c0_100, %c0_101] : memref<1x128xf32, #tpu.memory_space<vmem>>, vector<1x128xf32>
    %85 = vector.broadcast %84 : vector<1x128xf32> to vector<256x128xf32>
    %86 = arith.mulf %83, %85 : vector<256x128xf32>
    %c0_102 = arith.constant 0 : index
    %c0_103 = arith.constant 0 : index
    %87 = vector.load %arg9[%c0_102, %c0_103] : memref<1x128xf32, #tpu.memory_space<vmem>>, vector<1x128xf32>
    %88 = vector.broadcast %87 : vector<1x128xf32> to vector<256x128xf32>
    %89 = arith.addf %86, %88 : vector<256x128xf32>
    %cst_104 = arith.constant 0.000000e+00 : f32
    %90 = vector.broadcast %cst_104 : f32 to vector<256x128xf32>
    %91 = arith.cmpf oge, %89, %90 : vector<256x128xf32>
    %cst_105 = arith.constant 0.00999999977 : f32
    %92 = vector.broadcast %cst_105 : f32 to vector<256x128xf32>
    %93 = arith.mulf %92, %89 : vector<256x128xf32>
    %94 = arith.select %91, %89, %93 : vector<256x128xi1>, vector<256x128xf32>
    %95 = arith.truncf %94 : vector<256x128xf32> to vector<256x128xbf16>
    %96 = vector.shape_cast %95 : vector<256x128xbf16> to vector<16x16x128xbf16>
    %c1_106 = arith.constant 1 : index
    %c1_107 = arith.constant 1 : index
    %c0_108 = arith.constant 0 : index
    %97 = vector.load %arg15[%c1_106, %c1_107, %c0_108] : memref<18x18x128xbf16, #tpu.memory_space<vmem>>, vector<16x16x128xbf16>
    tpu.vector_store %arg15[%c1_106, %c1_107, %c0_108], %96 {strides = array<i32>} : memref<18x18x128xbf16, #tpu.memory_space<vmem>>, vector<16x16x128xbf16>,
    %c0_109 = arith.constant 0 : index
    %c0_110 = arith.constant 0 : index
    %c0_111 = arith.constant 0 : index
    %98 = vector.load %arg15[%c0_109, %c0_110, %c0_111] : memref<18x18x128xbf16, #tpu.memory_space<vmem>>, vector<16x16x128xbf16>
    %99 = vector.shape_cast %98 : vector<16x16x128xbf16> to vector<256x128xbf16>
    %c0_112 = arith.constant 0 : index
    %c0_113 = arith.constant 0 : index
    %c0_114 = arith.constant 0 : index
    %100 = vector.load %arg10[%c0_112, %c0_113, %c0_114] : memref<9x128x128xbf16, #tpu.memory_space<vmem>>, vector<1x128x128xbf16>
    %101 = vector.shape_cast %100 : vector<1x128x128xbf16> to vector<128x128xbf16>
    %cst_115 = arith.constant dense<0.000000e+00> : vector<256x128xf32>
    %102 = tpu.matmul %99, %101, %cst_115 {dimension_numbers = #tpu.dot_dimension_numbers<[1], [0], [0], [1], [0, 0, 1, 1], [], []>} : vector<256x128xbf16>, vector<128x128xbf16>, vector<256x128xf32> -> vector<256x128xf32>
    %c0_116 = arith.constant 0 : index
    %c1_117 = arith.constant 1 : index
    %c0_118 = arith.constant 0 : index
    %103 = vector.load %arg15[%c0_116, %c1_117, %c0_118] : memref<18x18x128xbf16, #tpu.memory_space<vmem>>, vector<16x16x128xbf16>
    %104 = vector.shape_cast %103 : vector<16x16x128xbf16> to vector<256x128xbf16>
    %c1_119 = arith.constant 1 : index
    %c0_120 = arith.constant 0 : index
    %c0_121 = arith.constant 0 : index
    %105 = vector.load %arg10[%c1_119, %c0_120, %c0_121] : memref<9x128x128xbf16, #tpu.memory_space<vmem>>, vector<1x128x128xbf16>
    %106 = vector.shape_cast %105 : vector<1x128x128xbf16> to vector<128x128xbf16>
    %cst_122 = arith.constant dense<0.000000e+00> : vector<256x128xf32>
    %107 = tpu.matmul %104, %106, %cst_122 {dimension_numbers = #tpu.dot_dimension_numbers<[1], [0], [0], [1], [0, 0, 1, 1], [], []>} : vector<256x128xbf16>, vector<128x128xbf16>, vector<256x128xf32> -> vector<256x128xf32>
    %108 = arith.addf %102, %107 : vector<256x128xf32>
    %c0_123 = arith.constant 0 : index
    %c2_124 = arith.constant 2 : index
    %c0_125 = arith.constant 0 : index
    %109 = vector.load %arg15[%c0_123, %c2_124, %c0_125] : memref<18x18x128xbf16, #tpu.memory_space<vmem>>, vector<16x16x128xbf16>
    %110 = vector.shape_cast %109 : vector<16x16x128xbf16> to vector<256x128xbf16>
    %c2_126 = arith.constant 2 : index
    %c0_127 = arith.constant 0 : index
    %c0_128 = arith.constant 0 : index
    %111 = vector.load %arg10[%c2_126, %c0_127, %c0_128] : memref<9x128x128xbf16, #tpu.memory_space<vmem>>, vector<1x128x128xbf16>
    %112 = vector.shape_cast %111 : vector<1x128x128xbf16> to vector<128x128xbf16>
    %cst_129 = arith.constant dense<0.000000e+00> : vector<256x128xf32>
    %113 = tpu.matmul %110, %112, %cst_129 {dimension_numbers = #tpu.dot_dimension_numbers<[1], [0], [0], [1], [0, 0, 1, 1], [], []>} : vector<256x128xbf16>, vector<128x128xbf16>, vector<256x128xf32> -> vector<256x128xf32>
    %114 = arith.addf %108, %113 : vector<256x128xf32>
    %c1_130 = arith.constant 1 : index
    %c0_131 = arith.constant 0 : index
    %c0_132 = arith.constant 0 : index
    %115 = vector.load %arg15[%c1_130, %c0_131, %c0_132] : memref<18x18x128xbf16, #tpu.memory_space<vmem>>, vector<16x16x128xbf16>
    %116 = vector.shape_cast %115 : vector<16x16x128xbf16> to vector<256x128xbf16>
    %c3_133 = arith.constant 3 : index
    %c0_134 = arith.constant 0 : index
    %c0_135 = arith.constant 0 : index
    %117 = vector.load %arg10[%c3_133, %c0_134, %c0_135] : memref<9x128x128xbf16, #tpu.memory_space<vmem>>, vector<1x128x128xbf16>
    %118 = vector.shape_cast %117 : vector<1x128x128xbf16> to vector<128x128xbf16>
    %cst_136 = arith.constant dense<0.000000e+00> : vector<256x128xf32>
    %119 = tpu.matmul %116, %118, %cst_136 {dimension_numbers = #tpu.dot_dimension_numbers<[1], [0], [0], [1], [0, 0, 1, 1], [], []>} : vector<256x128xbf16>, vector<128x128xbf16>, vector<256x128xf32> -> vector<256x128xf32>
    %120 = arith.addf %114, %119 : vector<256x128xf32>
    %c1_137 = arith.constant 1 : index
    %c1_138 = arith.constant 1 : index
    %c0_139 = arith.constant 0 : index
    %121 = vector.load %arg15[%c1_137, %c1_138, %c0_139] : memref<18x18x128xbf16, #tpu.memory_space<vmem>>, vector<16x16x128xbf16>
    %122 = vector.shape_cast %121 : vector<16x16x128xbf16> to vector<256x128xbf16>
    %c4_140 = arith.constant 4 : index
    %c0_141 = arith.constant 0 : index
    %c0_142 = arith.constant 0 : index
    %123 = vector.load %arg10[%c4_140, %c0_141, %c0_142] : memref<9x128x128xbf16, #tpu.memory_space<vmem>>, vector<1x128x128xbf16>
    %124 = vector.shape_cast %123 : vector<1x128x128xbf16> to vector<128x128xbf16>
    %cst_143 = arith.constant dense<0.000000e+00> : vector<256x128xf32>
    %125 = tpu.matmul %122, %124, %cst_143 {dimension_numbers = #tpu.dot_dimension_numbers<[1], [0], [0], [1], [0, 0, 1, 1], [], []>} : vector<256x128xbf16>, vector<128x128xbf16>, vector<256x128xf32> -> vector<256x128xf32>
    %126 = arith.addf %120, %125 : vector<256x128xf32>
    %c1_144 = arith.constant 1 : index
    %c2_145 = arith.constant 2 : index
    %c0_146 = arith.constant 0 : index
    %127 = vector.load %arg15[%c1_144, %c2_145, %c0_146] : memref<18x18x128xbf16, #tpu.memory_space<vmem>>, vector<16x16x128xbf16>
    %128 = vector.shape_cast %127 : vector<16x16x128xbf16> to vector<256x128xbf16>
    %c5_147 = arith.constant 5 : index
    %c0_148 = arith.constant 0 : index
    %c0_149 = arith.constant 0 : index
    %129 = vector.load %arg10[%c5_147, %c0_148, %c0_149] : memref<9x128x128xbf16, #tpu.memory_space<vmem>>, vector<1x128x128xbf16>
    %130 = vector.shape_cast %129 : vector<1x128x128xbf16> to vector<128x128xbf16>
    %cst_150 = arith.constant dense<0.000000e+00> : vector<256x128xf32>
    %131 = tpu.matmul %128, %130, %cst_150 {dimension_numbers = #tpu.dot_dimension_numbers<[1], [0], [0], [1], [0, 0, 1, 1], [], []>} : vector<256x128xbf16>, vector<128x128xbf16>, vector<256x128xf32> -> vector<256x128xf32>
    %132 = arith.addf %126, %131 : vector<256x128xf32>
    %c2_151 = arith.constant 2 : index
    %c0_152 = arith.constant 0 : index
    %c0_153 = arith.constant 0 : index
    %133 = vector.load %arg15[%c2_151, %c0_152, %c0_153] : memref<18x18x128xbf16, #tpu.memory_space<vmem>>, vector<16x16x128xbf16>
    %134 = vector.shape_cast %133 : vector<16x16x128xbf16> to vector<256x128xbf16>
    %c6_154 = arith.constant 6 : index
    %c0_155 = arith.constant 0 : index
    %c0_156 = arith.constant 0 : index
    %135 = vector.load %arg10[%c6_154, %c0_155, %c0_156] : memref<9x128x128xbf16, #tpu.memory_space<vmem>>, vector<1x128x128xbf16>
    %136 = vector.shape_cast %135 : vector<1x128x128xbf16> to vector<128x128xbf16>
    %cst_157 = arith.constant dense<0.000000e+00> : vector<256x128xf32>
    %137 = tpu.matmul %134, %136, %cst_157 {dimension_numbers = #tpu.dot_dimension_numbers<[1], [0], [0], [1], [0, 0, 1, 1], [], []>} : vector<256x128xbf16>, vector<128x128xbf16>, vector<256x128xf32> -> vector<256x128xf32>
    %138 = arith.addf %132, %137 : vector<256x128xf32>
    %c2_158 = arith.constant 2 : index
    %c1_159 = arith.constant 1 : index
    %c0_160 = arith.constant 0 : index
    %139 = vector.load %arg15[%c2_158, %c1_159, %c0_160] : memref<18x18x128xbf16, #tpu.memory_space<vmem>>, vector<16x16x128xbf16>
    %140 = vector.shape_cast %139 : vector<16x16x128xbf16> to vector<256x128xbf16>
    %c7_161 = arith.constant 7 : index
    %c0_162 = arith.constant 0 : index
    %c0_163 = arith.constant 0 : index
    %141 = vector.load %arg10[%c7_161, %c0_162, %c0_163] : memref<9x128x128xbf16, #tpu.memory_space<vmem>>, vector<1x128x128xbf16>
    %142 = vector.shape_cast %141 : vector<1x128x128xbf16> to vector<128x128xbf16>
    %cst_164 = arith.constant dense<0.000000e+00> : vector<256x128xf32>
    %143 = tpu.matmul %140, %142, %cst_164 {dimension_numbers = #tpu.dot_dimension_numbers<[1], [0], [0], [1], [0, 0, 1, 1], [], []>} : vector<256x128xbf16>, vector<128x128xbf16>, vector<256x128xf32> -> vector<256x128xf32>
    %144 = arith.addf %138, %143 : vector<256x128xf32>
    %c2_165 = arith.constant 2 : index
    %c2_166 = arith.constant 2 : index
    %c0_167 = arith.constant 0 : index
    %145 = vector.load %arg15[%c2_165, %c2_166, %c0_167] : memref<18x18x128xbf16, #tpu.memory_space<vmem>>, vector<16x16x128xbf16>
    %146 = vector.shape_cast %145 : vector<16x16x128xbf16> to vector<256x128xbf16>
    %c8_168 = arith.constant 8 : index
    %c0_169 = arith.constant 0 : index
    %c0_170 = arith.constant 0 : index
    %147 = vector.load %arg10[%c8_168, %c0_169, %c0_170] : memref<9x128x128xbf16, #tpu.memory_space<vmem>>, vector<1x128x128xbf16>
    %148 = vector.shape_cast %147 : vector<1x128x128xbf16> to vector<128x128xbf16>
    %cst_171 = arith.constant dense<0.000000e+00> : vector<256x128xf32>
    %149 = tpu.matmul %146, %148, %cst_171 {dimension_numbers = #tpu.dot_dimension_numbers<[1], [0], [0], [1], [0, 0, 1, 1], [], []>} : vector<256x128xbf16>, vector<128x128xbf16>, vector<256x128xf32> -> vector<256x128xf32>
    %150 = arith.addf %144, %149 : vector<256x128xf32>
    %c0_172 = arith.constant 0 : index
    %c0_173 = arith.constant 0 : index
    %151 = vector.load %arg11[%c0_172, %c0_173] : memref<1x128xf32, #tpu.memory_space<vmem>>, vector<1x128xf32>
    %152 = vector.broadcast %151 : vector<1x128xf32> to vector<256x128xf32>
    %153 = arith.mulf %150, %152 : vector<256x128xf32>
    %c0_174 = arith.constant 0 : index
    %c0_175 = arith.constant 0 : index
    %154 = vector.load %arg12[%c0_174, %c0_175] : memref<1x128xf32, #tpu.memory_space<vmem>>, vector<1x128xf32>
    %155 = vector.broadcast %154 : vector<1x128xf32> to vector<256x128xf32>
    %156 = arith.addf %153, %155 : vector<256x128xf32>
    %cst_176 = arith.constant 0.000000e+00 : f32
    %157 = vector.broadcast %cst_176 : f32 to vector<256x128xf32>
    %158 = arith.cmpf oge, %156, %157 : vector<256x128xf32>
    %cst_177 = arith.constant 0.00999999977 : f32
    %159 = vector.broadcast %cst_177 : f32 to vector<256x128xf32>
    %160 = arith.mulf %159, %156 : vector<256x128xf32>
    %161 = arith.select %158, %156, %160 : vector<256x128xi1>, vector<256x128xf32>
    %162 = tpu.transpose %161, [1, 0] : vector<256x128xf32> -> vector<128x256xf32>
    %163 = vector.extract_strided_slice %162 {offsets = [0, 0], sizes = [8, 256], strides = [1, 1]} : vector<128x256xf32> to vector<8x256xf32>
    %c0_178 = arith.constant 0 : index
    %c0_179 = arith.constant 0 : index
    %c0_180 = arith.constant 0 : index
    %164 = vector.load %arg13[%c0_178, %c0_179, %c0_180] : memref<1x8x256xf32, #tpu.memory_space<vmem>>, vector<1x8x256xf32>
    %165 = vector.shape_cast %164 : vector<1x8x256xf32> to vector<8x256xf32>
    %166 = vector.shape_cast %163 : vector<8x256xf32> to vector<1x8x256xf32>
    tpu.vector_store %arg13[%c0_178, %c0_179, %c0_180], %166 {strides = array<i32>} : memref<1x8x256xf32, #tpu.memory_space<vmem>>, vector<1x8x256xf32>,
    return
  }
  func.func @transform_0(%arg0: i32) -> (i32, i32, i32) {
    %c0_i32 = arith.constant 0 : i32
    %c0_i32_0 = arith.constant 0 : i32
    %c0_i32_1 = arith.constant 0 : i32
    return %arg0, %c0_i32, %c0_i32_0 : i32, i32, i32
  }
  func.func @transform_1(%arg0: i32) -> (i32, i32, i32) {
    %c0_i32 = arith.constant 0 : i32
    %c0_i32_0 = arith.constant 0 : i32
    %c0_i32_1 = arith.constant 0 : i32
    return %arg0, %c0_i32, %c0_i32_0 : i32, i32, i32
  }
  func.func @transform_2(%arg0: i32) -> (i32, i32) {
    %c0_i32 = arith.constant 0 : i32
    %c0_i32_0 = arith.constant 0 : i32
    %c0_i32_1 = arith.constant 0 : i32
    return %c0_i32, %c0_i32_0 : i32, i32
  }
  func.func @transform_3(%arg0: i32) -> (i32, i32) {
    %c0_i32 = arith.constant 0 : i32
    %c0_i32_0 = arith.constant 0 : i32
    %c0_i32_1 = arith.constant 0 : i32
    return %c0_i32, %c0_i32_0 : i32, i32
  }
  func.func @transform_4(%arg0: i32) -> (i32, i32) {
    %c0_i32 = arith.constant 0 : i32
    %c0_i32_0 = arith.constant 0 : i32
    %c0_i32_1 = arith.constant 0 : i32
    return %c0_i32, %c0_i32_0 : i32, i32
  }
  func.func @transform_5(%arg0: i32) -> (i32, i32) {
    %c0_i32 = arith.constant 0 : i32
    %c0_i32_0 = arith.constant 0 : i32
    %c0_i32_1 = arith.constant 0 : i32
    return %c0_i32, %c0_i32_0 : i32, i32
  }
  func.func @transform_6(%arg0: i32) -> (i32, i32, i32) {
    %c0_i32 = arith.constant 0 : i32
    %c0_i32_0 = arith.constant 0 : i32
    %c0_i32_1 = arith.constant 0 : i32
    %c0_i32_2 = arith.constant 0 : i32
    return %c0_i32, %c0_i32_0, %c0_i32_1 : i32, i32, i32
  }
  func.func @transform_7(%arg0: i32) -> (i32, i32) {
    %c0_i32 = arith.constant 0 : i32
    %c0_i32_0 = arith.constant 0 : i32
    %c0_i32_1 = arith.constant 0 : i32
    return %c0_i32, %c0_i32_0 : i32, i32
  }
  func.func @transform_8(%arg0: i32) -> (i32, i32) {
    %c0_i32 = arith.constant 0 : i32
    %c0_i32_0 = arith.constant 0 : i32
    %c0_i32_1 = arith.constant 0 : i32
    return %c0_i32, %c0_i32_0 : i32, i32
  }
  func.func @transform_9(%arg0: i32) -> (i32, i32, i32) {
    %c0_i32 = arith.constant 0 : i32
    %c0_i32_0 = arith.constant 0 : i32
    %c0_i32_1 = arith.constant 0 : i32
    %c0_i32_2 = arith.constant 0 : i32
    return %c0_i32, %c0_i32_0, %c0_i32_1 : i32, i32, i32
  }
  func.func @transform_10(%arg0: i32) -> (i32, i32) {
    %c0_i32 = arith.constant 0 : i32
    %c0_i32_0 = arith.constant 0 : i32
    %c0_i32_1 = arith.constant 0 : i32
    return %c0_i32, %c0_i32_0 : i32, i32
  }
  func.func @transform_11(%arg0: i32) -> (i32, i32) {
    %c0_i32 = arith.constant 0 : i32
    %c0_i32_0 = arith.constant 0 : i32
    %c0_i32_1 = arith.constant 0 : i32
    return %c0_i32, %c0_i32_0 : i32, i32
  }
  func.func @transform_12(%arg0: i32) -> (i32, i32, i32) {
    %c0_i32 = arith.constant 0 : i32
    %c0_i32_0 = arith.constant 0 : i32
    %c0_i32_1 = arith.constant 0 : i32
    return %arg0, %c0_i32, %c0_i32_0 : i32, i32, i32
  }
}

</mosaic_0001>

<bundles_post_ra>
// kernel: tpu_custom_call.1
= control target key start
LH: loop header
LB: loop body
LE: loop exit
PB: predicated region body
PF: predicated region fallthrough
CT: control target
= control target key end

     0   :  { %17 = vsyncpa [#allocation5], 0  ;;  %s20057_s0 = inlined_call_operand.vmem [shape: f32[2,8,64], index: 0, kind: input, shape index: {}]   ;;  %s20058_s1 = inlined_call_operand.vmem [shape: f32[2,4,256], index: 1, kind: input, shape index: {}]   ;;  %s20059_s2 = inlined_call_operand.vmem [shape: f32[8,128], index: 2, kind: input, shape index: {}]   ;;  %s20060_s3 = inlined_call_operand.vmem [shape: f32[1,128], index: 3, kind: input, shape index: {}]   ;;  %s20061_s4 = inlined_call_operand.vmem [shape: f32[256,64], index: 4, kind: input, shape index: {}]   ;;  %s20062_s5 = inlined_call_operand.vmem [shape: f32[4,128], index: 5, kind: input, shape index: {}]   ;;  %s20063_s6 = inlined_call_operand.hbm [shape: bf16[9,128,128], index: 6, kind: input, shape index: {}]   ;;  %s20064_s7 = inlined_call_operand.vmem [shape: f32[1,128], index: 7, kind: input, shape index: {}]   ;;  %s20065_s8 = inlined_call_operand.vmem [shape: f32[1,128], index: 8, kind: input, shape index: {}]   ;;  %s20066_s9 = inlined_call_operand.hbm [shape: bf16[9,128,128], index: 9, kind: input, shape index: {}]   ;;  %s20067_s10 = inlined_call_operand.vmem [shape: f32[1,128], index: 10, kind: input, shape index: {}]   ;;  %s20068_s11 = inlined_call_operand.vmem [shape: f32[1,128], index: 11, kind: input, shape index: {}]   ;;  %s20069_s12 = inlined_call_operand.hbm [shape: f32[2,8,256], index: 12, kind: output, shape index: {}]  }
   0x1   :  { %18 = vsyncpa [#allocation8], 0 }
   0x2   :  { %19 = vsyncpa [#allocation6], 0 }
   0x3   :  { %21 = vsyncpa [#allocation6 + $0x1], 0  ;;  %s16213_s21 = smov 0   ;;  %s16215_s22 = smov 0  }
   0x4   :  { %s16217_s23 = smov 0   ;;  %s16219_s24 = smov 0  }
   0x5 LB: > { %20225 = sst [smem:[#allocation13_spill]] %s16128_s21  ;;  %s16234_s25 = sadd.s32 4294967295, %s16140_s24   ;;  %s16140_s24 = sphi %s16219_s24, %s20621_s24   ;;  %s16136_s23 = sphi %s16217_s23, %s20623_s23   ;;  %s16132_s22 = sphi %s16215_s22, %s20625_s22   ;;  %s16128_s21 = sphi %s16213_s21, %s20624_s21  }
   0x6   : > { %20226 = sst [smem:[#allocation14_spill]] %s16136_s23  ;;  %s12809_s26 = sadd.s32 4294967294, %s16140_s24  }
   0x7   : > { %20227 = sst [smem:[#allocation15_spill]] %s16140_s24  ;;  %s16238_s27 = sadd.s32 1, %s16140_s24  }
   0x8   : > { %20228 = sst [smem:[#allocation16_spill]] %s16238_s27  ;;  %s296_s28 = sadd.s32 1, %s16136_s23 }
   0x9   : > { %s293_s29 = ssub.s32 %s16140_s24, %s16238_s27  ;;  %p306_p0 = scmp.ne.s32.totalorder %s16136_s23, %s16132_s22 }
   0xa   : > { %p294_p1 = scmp.eq.s32.totalorder %s293_s29, 0  ;;  %p307_p2 = scmp.eq.s32.totalorder %s16234_s25, 1 }
   0xb   : > { %p312_p3 = scmp.ne.s32.totalorder %s16132_s22, %s16128_s21  ;;  %p313_p4 = scmp.eq.s32.totalorder %s12809_s26, 1 }
   0xc   : > { %s16249_s30 = scalar_select %p294_p1, %s16136_s23, %s296_s28  }
   0xd   : > { %p16251_p5 = por %p307_p2, %p306_p0  ;;  %p16255_p6 = por %p313_p4, %p312_p3 }
   0xe   : > { %20229 = sst [smem:[#allocation17_spill]] %s16249_s30  ;;  %p12810_p7 = scmp.ge.s32.totalorder %s16140_s24, 1 }
   0xf   : > { %s20230_s13 = scalar_select %p16251_p5, 1, 0 }
  0x10   : > { %s20231_s14 = scalar_select %p16255_p6, 1, 0 }
  0x11   : > { %p320_p8 = scmp.lt.s32.totalorder %s16140_s24, 3  ;;  %p20073_p9 = scmp.eq.s32.totalorder %s16234_s25, 0 }
  0x12   : > { %20232 = sst [smem:[#allocation18_spill]] %s20231_s14  ;;  %s16142_s16 = smov [#allocation4]  }
  0x13   : > { %p16262_p10 = pnand %p12810_p7, %p320_p8  ;;  %s344_s17 = sshll.u32 %s16142_s16, 4  ;;  %s345_s17 = int_to_ptr.vmem [resolvable:$true] %s344_s17 }
  0x14   : > { %s16143_s19 = smov [#allocation7]   ;;  %s16014_s29 = scalar_lea.hbm %s20063_s6, 9216 }
  0x15   : > { %s20233_s15 = scalar_select %p16262_p10, 1, 0 }
  0x16   : > { %p15638_p11 = pneg %p16262_p10  ;;  %s363_s20 = sshll.u32 %s16143_s19, 4  ;;  %s16274_s20 = int_to_ptr.vmem [resolvable:$true] %s363_s20 }
  0x17   : > { %p16015_p13 = scmp.ne.s32.totalorder %s20063_s6, %s16014_s29  ;;  %p16021_p3 = scmp.lt.u32.totalorder %s16014_s29, %s20063_s6 }
  0x18   : > { %p16270_p12 = pnand %p20073_p9, %p15638_p11 }
  0x1a   : > { %p16016_p0 = pneg %p16270_p12 }
  0x1c   : > { %p16017_p1 = pnand %p16016_p0, %p16015_p13 }
  0x1e   : > { %p16018_p2 = pneg %p16017_p1 }
  0x20   : > { %p16023_p4 = pnand %p16021_p3, %p16018_p2 }
  0x22   : > { %16026 = shalt.err (!%p16023_p4)
}
  0x23   : > { %s16027_s19 = scalar_lea.vmem %s345_s17, 9216  ;;  %p16035_p9 = scmp.lt.s32.totalorder %s345_s17, %s345_s17 }
  0x24   : > { %p16028_p7 = scmp.ne.s32.totalorder %s345_s17, %s16027_s19  ;;  %p16036_p6 = scmp.lt.s32.totalorder %s16027_s19, %s16027_s19 }
  0x26   : > { %p16030_p8 = pnand %p16028_p7, %p16016_p0  ;;  %p16037_p5 = por %p16036_p6, %p16035_p9 }
  0x28   : > { %p16031_p11 = pneg %p16030_p8 }
  0x2a   : > { %p16038_p10 = pnand %p16037_p5, %p16031_p11 }
  0x2c   : > { %16041 = shalt.err (!%p16038_p10)
}
  0x2d   : > { %s16144_s30 = smov 64   ;;  %s16145_s26 = smov 4  }
  0x2e   : > { %15641 = dma.hbm_to_vmem [thread:$0]  (!%p16270_p12), %s20063_s6, 9216, %s345_s17, [#allocation5], %s16144_s30, %s16144_s30, %s16145_s26  }
  0x2f   : > { %s16042_s16 = scalar_lea.hbm %s20066_s9, 9216 }
  0x30   : > { %p16043_p13 = scmp.ne.s32.totalorder %s20066_s9, %s16042_s16  ;;  %p16049_p9 = scmp.lt.u32.totalorder %s16042_s16, %s20066_s9 }
  0x32   : > { %p16045_p5 = pnand %p16043_p13, %p16016_p0 }
  0x34   : > { %p16046_p6 = pneg %p16045_p5 }
  0x36   : > { %p16051_p10 = pnand %p16049_p9, %p16046_p6 }
  0x38   : > { %16054 = shalt.err (!%p16051_p10)
}
  0x39   : > { %s16055_s17 = scalar_lea.vmem %s16274_s20, 9216  ;;  %p16063_p4 = scmp.lt.s32.totalorder %s16274_s20, %s16274_s20 }
  0x3a   : > { %p16056_p1 = scmp.ne.s32.totalorder %s16274_s20, %s16055_s17  ;;  %p16064_p7 = scmp.lt.s32.totalorder %s16055_s17, %s16055_s17 }
  0x3c   : > { %p16058_p2 = pnand %p16056_p1, %p16016_p0  ;;  %p16065_p8 = por %p16064_p7, %p16063_p4 }
  0x3e   : > { %p16059_p3 = pneg %p16058_p2 }
  0x40   : > { %p16066_p11 = pnand %p16065_p8, %p16059_p3 }
  0x42   : > { %16069 = shalt.err (!%p16066_p11)
}
  0x43   : > { %15644 = dma.hbm_to_vmem [thread:$0]  (!%p16270_p12), %s20066_s9, 9216, %s16274_s20, [#allocation8], %s16144_s30, %s16144_s30, %s16145_s26  }
  0x44   : > { %p20235_p13 = scmp.ne.s32.totalorder %s20233_s15, 0 }
  0x46   : > { %400 = sbr.rel (%p20235_p13) target bundleno = 2514 (0x9d2), region = 68 }
  0x4d   : > { %p20236_p5 = scmp.eq.s32.totalorder %s16234_s25, 0 }
  0x4f   : > { %16115 = dma.done.wait (%p20236_p5), [#allocation5], 9216   ;;  %p20237_p0 = pmov %p20236_p5 }
  0x51   : > { %16117 = vsyncadd (%p20237_p0), [#allocation5], 4294958080  ;;  %p20238_p6 = pmov %p20237_p0 }
  0x52   : > { %p20239_p9 = pmov %p20237_p0 }
  0x53   : > { %16119 = dma.done.wait (%p20238_p6), [#allocation8], 9216  }
  0x54   : > { %16121 = vsyncadd (%p20239_p9), [#allocation8], 4294958080  ;;  %p450_p10 = scmp.lt.s32.totalorder %s16234_s25, 1  ;;  %v493_v1 = vld [vmem:[%s20059_s2] sm:$0xff]  ;;  %vm501_vm0 = vcmask 64512   ;;  %vm1054_vm1 = vcmask 31744  }
  0x55   : > { %14076 = vmatprep.subr.mxu0 %v493_v1  ;;  %v1053_v19 = vld [vmem:[%s20062_s5] sm:$0xf]  ;;  %vm1151_vm2 = vcmask 1043456   ;;  %vm663_vm3 = vcmask 523264   ;;  %vm1460_vm4 = vsmask.f32 7938 }
  0x56   : > { %s451_s14 = scalar_select %p450_p10, %s16234_s25, 1  ;;  %14077 = vmatpush3.msra.mxu0 %v493_v1  ;;  %14154 = vmatprep.subr.msk.mxu1 %vm1151_vm2, %v1053_v19  ;;  %v631_v27 = vld [vmem:[%s20061_s4] sm:$0xff]  ;;  %v15693_v1 = vld [vmem:[#allocation4 + $0x40] sm:$0xff]   ;;  %vm1403_vm5 = vcmask 1040384   ;;  %vm1404_vm6 = vsmask.f32 256  ;;  %vm16671_vm13 = vmand %vm1151_vm2, %vm1460_vm4 }
  0x57   : > { %14155 = vmatpush3.msk.msra.mxu1 %vm1151_vm2, %v1053_v19  ;;  %v12821_v44 = vld [vmem:[%s20060_s3] ss:$0 sm:$0xff]  ;;  %v646_v19 = vld [vmem:[%s20061_s4 + $0x78] sm:$0xff]  ;;  %vm16531_vm7 = vmand %vm1403_vm5, %vm1460_vm4  ;;  %vm2212_vm9 = vsmask.f32 3328  ;;  %vm3242_vm15 = vcmask 1042432  }
  0x58   : > { %s12818_s18 = sshll.u32 %s451_s14, 3  ;;  %vm16538_vm8 = vmand %vm1403_vm5, %vm1404_vm6  ;;  %vm2213_vm10 = vsmask.f32 7440  ;;  %vm1711_vm12 = vsmask.f32 4368  ;;  %s447_s14 = sand.u32 1, %s16132_s22  }
  0x59   : > { %s453_s30 = scalar_lea.vmem %s20057_s0, %s12818_s18  ;;  %s458_s29 = scalar_lea.vmem %s20058_s1, %s12818_s18  ;;  %vm16606_vm11 = vmor %vm2212_vm9, %vm2213_vm10 }
  0x5a   : > { %v460_v0 = vld [vmem:[%s453_s30] sm:$0xff]  ;;  %vm16676_vm14 = vmor %vm1404_vm6, %vm1711_vm12  ;;  %s12817_s18 = sshll.u32 %s447_s14, 4  ;;  %s13561_s30 = sshll.u32 %s16234_s25, 8 }
  0x5b   : > { %461 = vxpose.xlu0.b32.start.end [1/1] (short) (narrow) %v460_v0, 64  ;;  %v985_v2 = vld [vmem:[%s458_s29] sm:$0xff]  ;;  %s449_s20 = scalar_lea.vmem [#allocation9], %s12817_s18  ;;  %s20017_s27 = scalar_lea.hbm %s20069_s12, %s13561_s30 }
  0x5c   : > { %v987_v3 = vcombine.high %v985_v2, %v985_v2  ;;  %s12716_s15 = sshll.u32 %s449_s20, 4  ;;  %s12702_s28 = scalar_lea.sflag [#allocation6], %s447_s14  ;;  %s20012_s15 = int_to_ptr.vmem [resolvable:$true] %s12716_s15 }
  0x5d   : > { %s16070_s29 = scalar_lea.vmem %s20012_s15, 256  ;;  %p20616_p1 = scmp.ne.s32.totalorder %s20230_s13, 0 }
  0x5e   : > { %1021 = vxpose.xlu1.b32.start.end [1/1] (short) %v987_v3, 128  ;;  %v633_v3 = vld [vmem:[%s20061_s4 + $0x10] sm:$0xff]  ;;  %p16071_p12 = scmp.ne.s32.totalorder %s20012_s15, %s16070_s29  ;;  %s16147_s16 = smov [#allocation9]  }
  0x5f   : > { %s16074_s25 = sshll.u32 %s16147_s16, 4  ;;  %s16075_s25 = int_to_ptr.vmem [resolvable:$false] %s16074_s25 }
  0x60   : > { %p16072_p2 = pnand %p16071_p12, %p20616_p1  ;;  %s16076_s19 = scalar_lea.vmem %s16075_s25, 512 }
  0x61   : > { %p16077_p4 = scmp.lt.s32.totalorder %s20012_s15, %s16075_s25  ;;  %p16078_p7 = scmp.lt.s32.totalorder %s16076_s19, %s16070_s29 }
  0x62   : > { %p16073_p3 = pneg %p16072_p2 }
  0x63   : > { %p16079_p8 = por %p16078_p7, %p16077_p4 }
  0x65   : > { %p16080_p11 = pnand %p16079_p8, %p16073_p3 }
  0x78   : > { %989 = vxpose.xlu0.b32.start.end [1/1] (short) %v985_v2, 128  ;;  %v632_v2 = vld [vmem:[%s20061_s4 + $0x8] sm:$0xff] }
  0xdb   : > { %v477_v4 = vpop.trf.xlu0 }
  0xdc   : > { %14078 = vmatprep.mubr.msk.f32.mxu0 %vm501_vm0, %v477_v4  ;;  %v15694_v4 = vld [vmem:[#allocation4 + $0x48] sm:$0xff]  }
  0xde   : > { %v1037_v29 = vpop.trf.xlu1 }
  0xdf   : > { %v478_v5 = vpop.trf.xlu0 }
  0xe0   : > { %14079 = vmatmul.mubr.msk.f32.vlgmr.msra.gmra.mrb[0].mxu0 %vm501_vm0, %v478_v5  ;;  %v634_v5 = vld [vmem:[%s20061_s4 + $0x18] sm:$0xff] }
  0xe2   : > { %v1038_v31 = vpop.trf.xlu1 }
  0xe3   : > { %v479_v6 = vpop.trf.xlu0 }
  0xe4   : > { %14081 = vmatprep.mubr.msk.f32.mxu0 %vm501_vm0, %v479_v6  ;;  %v635_v6 = vld [vmem:[%s20061_s4 + $0x20] sm:$0xff] }
  0xe6   : > { %v1039_v32 = vpop.trf.xlu1 }
  0xe7   : > { %v480_v7 = vpop.trf.xlu0 }
  0xe8   : > { %14082 = vmatmul.mubr.msk.f32.gmra.mrb[2].mxu0 %vm501_vm0, %v480_v7  ;;  %v15695_v7 = vld [vmem:[#allocation4 + $0x50] sm:$0xff]  }
  0xea   : > { %v1040_v33 = vpop.trf.xlu1 }
  0xeb   : > { %v481_v8 = vpop.trf.xlu0 }
  0xec   : > { %14084 = vmatprep.mubr.msk.f32.mxu0 %vm501_vm0, %v481_v8  ;;  %v636_v8 = vld [vmem:[%s20061_s4 + $0x28] sm:$0xff] }
  0xee   : > { %v1041_v34 = vpop.trf.xlu1 }
  0xef   : > { %v482_v9 = vpop.trf.xlu0 }
  0xf0   : > { %14085 = vmatmul.mubr.msk.f32.gmra.mrb[4].mxu0 %vm501_vm0, %v482_v9  ;;  %v637_v9 = vld [vmem:[%s20061_s4 + $0x30] sm:$0xff] }
  0xf2   : > { %v1042_v35 = vpop.trf.xlu1 }
  0xf3   : > { %v483_v10 = vpop.trf.xlu0 }
  0xf4   : > { %14087 = vmatprep.mubr.msk.f32.mxu0 %vm501_vm0, %v483_v10  ;;  %v15696_v10 = vld [vmem:[#allocation4 + $0x58] sm:$0xff]  }
  0xf6   : > { %v1043_v36 = vpop.trf.xlu1 }
  0xf7   : > { %v484_v11 = vpop.trf.xlu0 }
  0xf8   : > { %14088 = vmatmul.mubr.msk.f32.gmra.mrb[6].mxu0 %vm501_vm0, %v484_v11  ;;  %v638_v11 = vld [vmem:[%s20061_s4 + $0x38] sm:$0xff]  ;;  %vm3243_vm0 = vcmask 1046532  }
  0xf9   : > { %14106 = vmatprep.mubr.msk.f32.mxu0 %vm663_vm3, %v631_v27  ;;  %v654_v27 = vld [vmem:[%s20061_s4 + $0xb8] sm:$0xff] }
  0xfa   : > { %v1044_v37 = vpop.trf.xlu1 }
  0xfb   : > { %v1005_v12 = vpop.trf.xlu0 }
  0xfc   : > { %14156 = vmatprep.mubr.msk.f32.mxu1 %vm1054_vm1, %v1005_v12  ;;  %v639_v12 = vld [vmem:[%s20061_s4 + $0x40] sm:$0xff] }
  0xfe   : > { %v1045_v38 = vpop.trf.xlu1 }
  0xff   : > { %v1006_v13 = vpop.trf.xlu0 }
 0x100   : > { %14157 = vmatmul.mubr.msk.f32.vlgmr.msra.gmra.mrb[0].mxu1 %vm1054_vm1, %v1006_v13  ;;  %v640_v13 = vld [vmem:[%s20061_s4 + $0x48] sm:$0xff] }
 0x102   : > { %v1046_v39 = vpop.trf.xlu1 }
 0x103   : > { %v1007_v14 = vpop.trf.xlu0 }
 0x104   : > { %14159 = vmatprep.mubr.msk.f32.mxu1 %vm1054_vm1, %v1007_v14  ;;  %v641_v14 = vld [vmem:[%s20061_s4 + $0x50] sm:$0xff] }
 0x106   : > { %v1047_v40 = vpop.trf.xlu1 }
 0x107   : > { %v1008_v15 = vpop.trf.xlu0 }
 0x108   : > { %14160 = vmatmul.mubr.msk.f32.gmra.mrb[2].mxu1 %vm1054_vm1, %v1008_v15  ;;  %v642_v15 = vld [vmem:[%s20061_s4 + $0x58] sm:$0xff] }
 0x10a   : > { %v1048_v41 = vpop.trf.xlu1 }
 0x10b   : > { %v1009_v16 = vpop.trf.xlu0 }
 0x10c   : > { %14162 = vmatprep.mubr.msk.f32.mxu1 %vm1054_vm1, %v1009_v16  ;;  %v643_v16 = vld [vmem:[%s20061_s4 + $0x60] sm:$0xff] }
 0x10e   : > { %v1049_v42 = vpop.trf.xlu1 }
 0x10f   : > { %v1010_v17 = vpop.trf.xlu0 }
 0x110   : > { %14163 = vmatmul.mubr.msk.f32.gmra.mrb[4].mxu1 %vm1054_vm1, %v1010_v17  ;;  %v644_v17 = vld [vmem:[%s20061_s4 + $0x68] sm:$0xff] }
 0x112   : > { %v1050_v43 = vpop.trf.xlu1 }
 0x113   : > { %v1011_v18 = vpop.trf.xlu0 }
 0x114   : > { %14165 = vmatprep.mubr.msk.f32.mxu1 %vm1054_vm1, %v1011_v18  ;;  %v645_v18 = vld [vmem:[%s20061_s4 + $0x70] sm:$0xff] }
 0x117   : > { %v1012_v20 = vpop.trf.xlu0 }
 0x118   : > { %14166 = vmatmul.mubr.msk.f32.gmra.mrb[6].mxu1 %vm1054_vm1, %v1012_v20  ;;  %v647_v20 = vld [vmem:[%s20061_s4 + $0x80] sm:$0xff] }
 0x11b   : > { %v1013_v21 = vpop.trf.xlu0 }
 0x11c   : > { %14168 = vmatprep.mubr.msk.f32.mxu1 %vm1054_vm1, %v1013_v21  ;;  %v648_v21 = vld [vmem:[%s20061_s4 + $0x88] sm:$0xff] }
 0x11f   : > { %v1014_v22 = vpop.trf.xlu0 }
 0x120   : > { %14169 = vmatmul.mubr.msk.f32.gmra.mrb[8].mxu1 %vm1054_vm1, %v1014_v22  ;;  %v649_v22 = vld [vmem:[%s20061_s4 + $0x90] sm:$0xff] }
 0x123   : > { %v1015_v23 = vpop.trf.xlu0 }
 0x124   : > { %14171 = vmatprep.mubr.msk.f32.mxu1 %vm1054_vm1, %v1015_v23  ;;  %v650_v23 = vld [vmem:[%s20061_s4 + $0x98] sm:$0xff] }
 0x127   : > { %v1016_v24 = vpop.trf.xlu0 }
 0x128   : > { %14172 = vmatmul.mubr.msk.f32.gmra.mrb[10].mxu1 %vm1054_vm1, %v1016_v24  ;;  %v651_v24 = vld [vmem:[%s20061_s4 + $0xa0] sm:$0xff] }
 0x12b   : > { %v1017_v25 = vpop.trf.xlu0 }
 0x12c   : > { %14174 = vmatprep.mubr.msk.f32.mxu1 %vm1054_vm1, %v1017_v25  ;;  %v652_v25 = vld [vmem:[%s20061_s4 + $0xa8] sm:$0xff] }
 0x12f   : > { %v1018_v26 = vpop.trf.xlu0 }
 0x130   : > { %14175 = vmatmul.mubr.msk.f32.gmra.mrb[12].mxu1 %vm1054_vm1, %v1018_v26  ;;  %v653_v26 = vld [vmem:[%s20061_s4 + $0xb0] sm:$0xff] }
 0x133   : > { %v1019_v28 = vpop.trf.xlu0 }
 0x134   : > { %14177 = vmatprep.mubr.msk.f32.mxu1 %vm1054_vm1, %v1019_v28  ;;  %v655_v28 = vld [vmem:[%s20061_s4 + $0xc0] sm:$0xff] }
 0x137   : > { %v1020_v30 = vpop.trf.xlu0 }
 0x138   : > { %14178 = vmatmul.mubr.msk.f32.gmra.mrb[14].mxu1 %vm1054_vm1, %v1020_v30  ;;  %v657_v30 = vld [vmem:[%s20061_s4 + $0xd0] sm:$0xff] }
 0x139   : > { %14180 = vmatprep.mubr.msk.f32.mxu1 %vm1054_vm1, %v1037_v29  ;;  %v656_v29 = vld [vmem:[%s20061_s4 + $0xc8] sm:$0xff] }
 0x13c   : > { %14181 = vmatmul.mubr.msk.f32.gmra.mrb[16].mxu1 %vm1054_vm1, %v1038_v31  ;;  %v658_v31 = vld [vmem:[%s20061_s4 + $0xd8] sm:$0xff] }
 0x13d   : > { %14183 = vmatprep.mubr.msk.f32.mxu1 %vm1054_vm1, %v1039_v32  ;;  %v659_v32 = vld [vmem:[%s20061_s4 + $0xe0] sm:$0xff] }
 0x140   : > { %14184 = vmatmul.mubr.msk.f32.gmra.mrb[18].mxu1 %vm1054_vm1, %v1040_v33  ;;  %v660_v33 = vld [vmem:[%s20061_s4 + $0xe8] sm:$0xff] }
 0x141   : > { %14186 = vmatprep.mubr.msk.f32.mxu1 %vm1054_vm1, %v1041_v34 }
 0x144   : > { %14187 = vmatmul.mubr.msk.f32.gmra.mrb[20].mxu1 %vm1054_vm1, %v1042_v35 }
 0x145   : > { %14189 = vmatprep.mubr.msk.f32.mxu1 %vm1054_vm1, %v1043_v36 }
 0x148   : > { %14190 = vmatmul.mubr.msk.f32.gmra.mrb[22].mxu1 %vm1054_vm1, %v1044_v37 }
 0x149   : > { %14192 = vmatprep.mubr.msk.f32.mxu1 %vm1054_vm1, %v1045_v38 }
 0x14c   : > { %14193 = vmatmul.mubr.msk.f32.gmra.mrb[24].mxu1 %vm1054_vm1, %v1046_v39 }
 0x14d   : > { %14195 = vmatprep.mubr.msk.f32.mxu1 %vm1054_vm1, %v1047_v40 }
 0x150   : > { %14196 = vmatmul.mubr.msk.f32.gmra.mrb[26].mxu1 %vm1054_vm1, %v1048_v41 }
 0x151   : > { %14198 = vmatprep.mubr.msk.f32.mxu1 %vm1054_vm1, %v1049_v42 }
 0x154   : > { %14199 = vmatmul.mubr.msk.f32.gmra.mrb[28].mxu1 %vm1054_vm1, %v1050_v43 }
 0x1b3   : > { %v14080_v45 = vpop.f32.mrb[0].mxu0 }
 0x1b4   : > { %v598_v46 = vadd.f32 %v14080_v45, %v12821_v44  ;;  %v592_v47 = vpop.f32.mrb[1].mxu0  ;;  %v1465_v45 = vld [vmem:[#allocation2 + $0x14] sm:$0x1] }
 0x1b5   : > { %v593_v48 = vadd.f32 %v12821_v44, %v592_v47  ;;  %v20243_v47 = vmov 0 }
 0x1b6   : > { %v20244_v47 = vsel %vm16538_vm8, 4294967295, %v20243_v47 }
 0x1b7   : > { %v15068_v49 = vpack.c.bf16 %v598_v46, %v593_v48  ;;  %20245 = vst [vmem:[#allocation20_spill] sm:$0xff] %v20244_v47  ;;  %v1466_v48 = vsel %vm16531_vm7, 0, %v1465_v45 }
 0x1b8   : > { %1467 = vst [vmem:[#allocation2 + $0x14] sm:$0x1] %v1466_v48 }
 0x1b9   : > { %15069 = vmatprep.subr.bf16.mxu0 %v15068_v49 }
 0x1ba   : > { %15071 = vmatpush3.bf16.msra.mxu0 %v15068_v49  ;;  %v1409_v49 = vld [vmem:[#allocation2 + $0xc] sm:$0x1] }
 0x1bb   : > { %v14083_v50 = vpop.f32.mrb[2].mxu0 }
 0x1bc   : > { %v608_v51 = vadd.f32 %v14083_v50, %v12821_v44  ;;  %v602_v52 = vpop.f32.mrb[3].mxu0 }
 0x1bd   : > { %v603_v53 = vadd.f32 %v12821_v44, %v602_v52 }
 0x1bf   : > { %v15072_v54 = vpack.c.bf16 %v608_v51, %v603_v53  ;;  %v1410_v51 = vsel %vm16538_vm8, 0, %v1409_v49 }
 0x1c0   : > { %1411 = vst [vmem:[#allocation2 + $0xc] sm:$0x1] %v1410_v51 }
 0x1c1   : > { %15073 = vmatprep.subr.bf16.mxu0 %v15072_v54 }
 0x1c2   : > { %15075 = vmatpush3.bf16.msra.mxu0 %v15072_v54  ;;  %v1468_v54 = vld [vmem:[#allocation2 + $0x20] sm:$0x1] }
 0x1c3   : > { %v14086_v55 = vpop.f32.mrb[4].mxu0 }
 0x1c4   : > { %v618_v56 = vadd.f32 %v14086_v55, %v12821_v44  ;;  %v612_v57 = vpop.f32.mrb[5].mxu0 }
 0x1c5   : > { %v613_v58 = vadd.f32 %v12821_v44, %v612_v57  ;;  %v1412_v57 = vld [vmem:[#allocation2 + $0x18] sm:$0x1] }
 0x1c7   : > { %v15076_v59 = vpack.c.bf16 %v618_v56, %v613_v58  ;;  %v1469_v56 = vsel %vm16531_vm7, 0, %v1468_v54 }
 0x1c8   : > { %1470 = vst [vmem:[#allocation2 + $0x20] sm:$0x1] %v1469_v56 }
 0x1c9   : > { %15077 = vmatprep.subr.bf16.mxu0 %v15076_v59 }
 0x1ca   : > { %15079 = vmatpush3.bf16.msra.mxu0 %v15076_v59  ;;  %v1413_v59 = vsel %vm16538_vm8, 0, %v1412_v57 }
 0x1cb   : > { %v14089_v60 = vpop.f32.mrb[6].mxu0  ;;  %1414 = vst [vmem:[#allocation2 + $0x18] sm:$0x1] %v1413_v59  ;;  %v1483_v59 = vld [vmem:[#allocation2 + $0x5c] sm:$0x1] }
 0x1cc   : > { %v628_v61 = vadd.f32 %v14089_v60, %v12821_v44  ;;  %v622_v62 = vpop.f32.mrb[7].mxu0  ;;  %v16146_v60 = vmov 0  }
 0x1cd   : > { %v623_v63 = vadd.f32 %v12821_v44, %v622_v62  ;;  %v20240_v44 = vmov 0  ;;  %1396 = vst [vmem:[#allocation2] sm:$0xf] %v16146_v60  ;;  %1397 = vst [vmem:[#allocation2 + $0x4] sm:$0xf] %v16146_v60 }
 0x1ce   : > { %v20241_v44 = vsel %vm16531_vm7, 4294967295, %v20240_v44  ;;  %1398 = vst [vmem:[#allocation2 + $0x8] sm:$0x1] %v16146_v60  ;;  %1400 = vst [vmem:[#allocation2 + $0xcc] sm:$0xf] %v16146_v60 }
 0x1cf   : > { %v15080_v0 = vpack.c.bf16 %v628_v61, %v623_v63  ;;  %20242 = vst [vmem:[#allocation19_spill] sm:$0xff] %v20241_v44  ;;  %1401 = vst [vmem:[#allocation2 + $0xd0] sm:$0xf] %v16146_v60  ;;  %v1471_v63 = vld [vmem:[#allocation2 + $0x2c] sm:$0x1] }
 0x1d0   : > { %1402 = vst [vmem:[#allocation2 + $0xd4] sm:$0x1] %v16146_v60  ;;  %1516 = vst [vmem:[#allocation3] sm:$0xf] %v16146_v60 }
 0x1d1   : > { %15081 = vmatprep.subr.bf16.mxu0 %v15080_v0  ;;  %1517 = vst [vmem:[#allocation3 + $0x4] sm:$0xf] %v16146_v60  ;;  %1518 = vst [vmem:[#allocation3 + $0x8] sm:$0x1] %v16146_v60 }
 0x1d2   : > { %15083 = vmatpush3.bf16.msra.mxu0 %v15080_v0  ;;  %1520 = vst [vmem:[#allocation3 + $0xcc] sm:$0xf] %v16146_v60  ;;  %1521 = vst [vmem:[#allocation3 + $0xd0] sm:$0xf] %v16146_v60  ;;  %v15697_v0 = vld [vmem:[#allocation4 + $0x60] sm:$0xff]  }
 0x1d3   : > { %14204 = vmatprep.subr.bf16.mxu0 %v15693_v1  ;;  %v16509_v34 = vpop.f32.mrb[0].mxu1  ;;  %1522 = vst [vmem:[#allocation3 + $0xd4] sm:$0x1] %v16146_v60 }
 0x1d4   : > { %v16511_v35 = vpop.f32.mrb[1].mxu1 }
 0x1d5   : > { %14107 = vmatmul.mubr.msk.f32.vlgmr.msra.gmra.mrb[8].mxu0 %vm663_vm3, %v632_v2  ;;  %v1415_v2 = vld [vmem:[#allocation2 + $0x24] sm:$0x1] }
 0x1d6   : > { %14109 = vmatprep.mubr.msk.f32.mxu0 %vm663_vm3, %v633_v3  ;;  %14205 = vmatpush3.bf16.msra.mxu0 %v15693_v1  ;;  %v1472_v1 = vsel %vm16531_vm7, 0, %v1471_v63  ;;  %v1416_v3 = vsel %vm16538_vm8, 0, %v1415_v2  ;;  %v1484_v63 = vsel %vm16531_vm7, 0, %v1483_v59  ;;  %v1501_v59 = vld [vmem:[#allocation2 + $0xa4] sm:$0x1] }
 0x1d7   : > { %14206 = vmatprep.subr.bf16.mxu0 %v15694_v4  ;;  %1473 = vst [vmem:[#allocation2 + $0x2c] sm:$0x1] %v1472_v1  ;;  %1417 = vst [vmem:[#allocation2 + $0x24] sm:$0x1] %v1416_v3  ;;  %v1427_v1 = vld [vmem:[#allocation2 + $0x54] sm:$0x1] }
 0x1d8   : > { %1485 = vst [vmem:[#allocation2 + $0x5c] sm:$0x1] %v1484_v63  ;;  %v1428_v3 = vsel %vm16538_vm8, 0, %v1427_v1 }
 0x1d9   : > { %14110 = vmatmul.mubr.msk.f32.gmra.mrb[10].mxu0 %vm663_vm3, %v634_v5  ;;  %v1474_v5 = vld [vmem:[#allocation2 + $0x38] sm:$0x1]  ;;  %1429 = vst [vmem:[#allocation2 + $0x54] sm:$0x1] %v1428_v3  ;;  %v1504_v3 = vld [vmem:[#allocation2 + $0xb0] sm:$0x1] }
 0x1da   : > { %14112 = vmatprep.mubr.msk.f32.mxu0 %vm663_vm3, %v635_v6  ;;  %14207 = vmatpush3.bf16.msra.mxu0 %v15694_v4  ;;  %v1406_v4 = vld [vmem:[#allocation2] sm:$0x1] }
 0x1db   : > { %14208 = vmatprep.subr.bf16.mxu0 %v15695_v7  ;;  %v16514_v36 = vpop.f32.mrb[2].mxu1  ;;  %v1407_v6 = vsel %vm16538_vm8, 0, %v1406_v4 }
 0x1dc   : > { %v16516_v37 = vpop.f32.mrb[3].mxu1  ;;  %1408 = vst [vmem:[#allocation2] sm:$0x1] %v1407_v6  ;;  %v20246_v6 = vmov 0 }
 0x1dd   : > { %14113 = vmatmul.mubr.msk.f32.gmra.mrb[12].mxu0 %vm663_vm3, %v636_v8  ;;  %v1418_v8 = vld [vmem:[#allocation2 + $0x30] sm:$0x1]  ;;  %v20247_v6 = vsel %vm16606_vm11, 4294967295, %v20246_v6 }
 0x1de   : > { %14115 = vmatprep.mubr.msk.f32.mxu0 %vm663_vm3, %v637_v9  ;;  %14209 = vmatpush3.bf16.msra.mxu0 %v15695_v7  ;;  %v1475_v7 = vsel %vm16531_vm7, 0, %v1474_v5  ;;  %v1419_v9 = vsel %vm16538_vm8, 0, %v1418_v8  ;;  %20248 = vst [vmem:[#allocation21_spill] sm:$0xff] %v20247_v6  ;;  %v1486_v8 = vld [vmem:[#allocation2 + $0x68] sm:$0x1] }
 0x1df   : > { %14210 = vmatprep.subr.bf16.mxu0 %v15696_v10  ;;  %1476 = vst [vmem:[#allocation2 + $0x38] sm:$0x1] %v1475_v7  ;;  %1420 = vst [vmem:[#allocation2 + $0x30] sm:$0x1] %v1419_v9 }
 0x1e1   : > { %14116 = vmatmul.mubr.msk.f32.gmra.mrb[14].mxu0 %vm663_vm3, %v638_v11  ;;  %v1051_v11 = vpop.trf.xlu1 }
 0x1e2   : > { %14118 = vmatprep.mubr.msk.f32.mxu0 %vm663_vm3, %v639_v12  ;;  %14211 = vmatpush3.bf16.msra.mxu0 %v15696_v10 }
 0x1e3   : > { %v16518_v38 = vpop.f32.mrb[4].mxu1  ;;  %14212 = vmatprep.subr.bf16.mxu0 %v15697_v0  ;;  %14201 = vmatprep.mubr.msk.f32.mxu1 %vm1054_vm1, %v1051_v11  ;;  %v1487_v11 = vsel %vm16531_vm7, 0, %v1486_v8 }
 0x1e4   : > { %v16520_v39 = vpop.f32.mrb[5].mxu1  ;;  %1488 = vst [vmem:[#allocation2 + $0x68] sm:$0x1] %v1487_v11 }
 0x1e5   : > { %14119 = vmatmul.mubr.msk.f32.gmra.mrb[16].mxu0 %vm663_vm3, %v640_v13  ;;  %v1462_v13 = vld [vmem:[#allocation2 + $0x8] sm:$0x1] }
 0x1e6   : > { %14121 = vmatprep.mubr.msk.f32.mxu0 %vm663_vm3, %v641_v14  ;;  %14213 = vmatpush3.bf16.msra.mxu0 %v15697_v0  ;;  %v1477_v14 = vld [vmem:[#allocation2 + $0x44] sm:$0x1]  ;;  %v15700_v0 = vld [vmem:[#allocation4 + $0x78] sm:$0xff]  }
 0x1e9   : > { %14122 = vmatmul.mubr.msk.f32.gmra.mrb[18].mxu0 %vm663_vm3, %v642_v15  ;;  %v1463_v15 = vsel %vm16531_vm7, 0, %v1462_v13  ;;  %v1430_v13 = vld [vmem:[#allocation2 + $0x60] sm:$0x1] }
 0x1ea   : > { %14124 = vmatprep.mubr.msk.f32.mxu0 %vm663_vm3, %v643_v16  ;;  %v15698_v16 = vld [vmem:[#allocation4 + $0x68] sm:$0xff]   ;;  %1464 = vst [vmem:[#allocation2 + $0x8] sm:$0x1] %v1463_v15  ;;  %v1431_v15 = vsel %vm16538_vm8, 0, %v1430_v13 }
 0x1eb   : > { %v16522_v40 = vpop.f32.mrb[6].mxu1  ;;  %14214 = vmatprep.subr.bf16.mxu0 %v15698_v16  ;;  %1432 = vst [vmem:[#allocation2 + $0x60] sm:$0x1] %v1431_v15 }
 0x1ec   : > { %v16524_v41 = vpop.f32.mrb[7].mxu1  ;;  %14215 = vmatpush3.bf16.msra.mxu0 %v15698_v16 }
 0x1ed   : > { %14125 = vmatmul.mubr.msk.f32.gmra.mrb[20].mxu0 %vm663_vm3, %v644_v17  ;;  %v1478_v17 = vsel %vm16531_vm7, 0, %v1477_v14 }
 0x1ee   : > { %14127 = vmatprep.mubr.msk.f32.mxu0 %vm663_vm3, %v645_v18  ;;  %v1421_v18 = vld [vmem:[#allocation2 + $0x3c] sm:$0x1]  ;;  %1479 = vst [vmem:[#allocation2 + $0x44] sm:$0x1] %v1478_v17 }
 0x1f1   : > { %14128 = vmatmul.mubr.msk.f32.gmra.mrb[22].mxu0 %vm663_vm3, %v646_v19  ;;  %v1422_v19 = vsel %vm16538_vm8, 0, %v1421_v18  ;;  %v2196_v48 = vld [vmem:[#allocation2 + $0x8] sm:$0x1] }
 0x1f2   : > { %14130 = vmatprep.mubr.msk.f32.mxu0 %vm663_vm3, %v647_v20  ;;  %1423 = vst [vmem:[#allocation2 + $0x3c] sm:$0x1] %v1422_v19  ;;  %v1052_v20 = vpop.trf.xlu1  ;;  %v2235_v57 = vshll.u32 %v2196_v48, 16  ;;  %v1489_v19 = vld [vmem:[#allocation2 + $0x74] sm:$0x1] }
 0x1f3   : > { %v16526_v42 = vpop.f32.mrb[8].mxu1  ;;  %14202 = vmatmul.mubr.msk.f32.gmra.mrb[30].mxu1 %vm1054_vm1, %v1052_v20  ;;  %v1490_v20 = vsel %vm16531_vm7, 0, %v1489_v19  ;;  %vm17067_vm1 = vmor %vm3242_vm15, %vm3243_vm0 }
 0x1f4   : > { %v16528_v43 = vpop.f32.mrb[9].mxu1  ;;  %v2237_v5 = vrot.slane %v2235_v57, 5  ;;  %1491 = vst [vmem:[#allocation2 + $0x74] sm:$0x1] %v1490_v20 }
 0x1f5   : > { %14131 = vmatmul.mubr.msk.f32.gmra.mrb[24].mxu0 %vm663_vm3, %v648_v21  ;;  %v1480_v21 = vld [vmem:[#allocation2 + $0x50] sm:$0x1] }
 0x1f6   : > { %14133 = vmatprep.mubr.msk.f32.mxu0 %vm663_vm3, %v649_v22  ;;  %v661_v22 = vld [vmem:[%s20061_s4 + $0xf0] sm:$0xff] }
 0x1f9   : > { %14134 = vmatmul.mubr.msk.f32.gmra.mrb[26].mxu0 %vm663_vm3, %v650_v23  ;;  %v2148_v23 = vld [vmem:[#allocation2] sm:$0xf] }
 0x1fa   : > { %14136 = vmatprep.mubr.msk.f32.mxu0 %vm663_vm3, %v651_v24  ;;  %v15699_v24 = vld [vmem:[#allocation4 + $0x70] sm:$0xff]  }
 0x1fb   : > { %v16535_v46 = vpop.f32.mrb[10].mxu1  ;;  %14216 = vmatprep.subr.bf16.mxu0 %v15699_v24 }
 0x1fc   : > { %v16544_v50 = vpop.f32.mrb[11].mxu1  ;;  %14217 = vmatpush3.bf16.msra.mxu0 %v15699_v24 }
 0x1fd   : > { %14137 = vmatmul.mubr.msk.f32.gmra.mrb[28].mxu0 %vm663_vm3, %v652_v25  ;;  %v1481_v25 = vsel %vm16531_vm7, 0, %v1480_v21  ;;  %14218 = vmatprep.subr.bf16.mxu0 %v15700_v0  ;;  %v16622_v21 = vld [vmem:[#allocation4] sm:$0xff]  }
 0x1fe   : > { %14139 = vmatprep.mubr.msk.f32.mxu0 %vm663_vm3, %v653_v26  ;;  %v662_v26 = vld [vmem:[%s20061_s4 + $0xf8] sm:$0xff]  ;;  %1482 = vst [vmem:[#allocation2 + $0x50] sm:$0x1] %v1481_v25  ;;  %v1492_v25 = vld [vmem:[#allocation2 + $0x80] sm:$0x1] }
 0x200   : > { %14219 = vmatpush3.bf16.msra.mxu0 %v15700_v0  ;;  %v1445_v0 = vld [vmem:[#allocation2 + $0x9c] sm:$0x1] }
 0x201   : > { %14140 = vmatmul.mubr.msk.f32.gmra.mrb[30].mxu0 %vm663_vm3, %v654_v27  ;;  %v2216_v27 = vshrl.u32 %v2148_v23, 16  ;;  %14252 = vmatprep.subr.bf16.mxu0 %v16622_v21  ;;  %v1446_v1 = vsel %vm16538_vm8, 0, %v1445_v0  ;;  %v20252_v0 = vmov 0 }
 0x202   : > { %14142 = vmatprep.mubr.msk.f32.mxu0 %vm663_vm3, %v655_v28  ;;  %v1424_v28 = vld [vmem:[#allocation2 + $0x48] sm:$0x1]  ;;  %1447 = vst [vmem:[#allocation2 + $0x9c] sm:$0x1] %v1446_v1  ;;  %v20253_v0 = vsel %vm16676_vm14, 4294967295, %v20252_v0 }
 0x203   : > { %v16548_v52 = vpop.f32.mrb[12].mxu1  ;;  %20254 = vst [vmem:[#allocation23_spill] sm:$0xff] %v20253_v0 }
 0x204   : > { %v16550_v53 = vpop.f32.mrb[13].mxu1 }
 0x205   : > { %14143 = vmatmul.mubr.msk.f32.gmra.mrb[32].mxu0 %vm663_vm3, %v656_v29  ;;  %v2149_v29 = vld [vmem:[#allocation2 + $0x4] sm:$0xf] }
 0x206   : > { %14145 = vmatprep.mubr.msk.f32.mxu0 %vm663_vm3, %v657_v30  ;;  %v1425_v30 = vsel %vm16538_vm8, 0, %v1424_v28  ;;  %v2229_v49 = vshrl.u32 %v2149_v29, 16 }
 0x207   : > { %1426 = vst [vmem:[#allocation2 + $0x48] sm:$0x1] %v1425_v30 }
 0x208   : > { %v2231_v60 = vrot.slane %v2229_v49, 4  ;;  %v1498_v49 = vld [vmem:[#allocation2 + $0x98] sm:$0x1] }
 0x209   : > { %14146 = vmatmul.mubr.msk.f32.gmra.mrb[34].mxu0 %vm663_vm3, %v658_v31  ;;  %v2218_v31 = vrot.slane %v2216_v27, 4  ;;  %v1436_v27 = vld [vmem:[#allocation2 + $0x78] sm:$0x1] }
 0x20a   : > { %14148 = vmatprep.mubr.msk.f32.mxu0 %vm663_vm3, %v659_v32  ;;  %v2219_v32 = vshll.u32 %v2148_v23, 16  ;;  %v1437_v28 = vsel %vm16538_vm8, 0, %v1436_v27 }
 0x20b   : > { %v16552_v55 = vpop.f32.mrb[14].mxu1  ;;  %1438 = vst [vmem:[#allocation2 + $0x78] sm:$0x1] %v1437_v28 }
 0x20c   : > { %v16556_v58 = vpop.f32.mrb[15].mxu1  ;;  %v2221_v54 = vrot.slane %v2219_v32, 5  ;;  %v1439_v32 = vld [vmem:[#allocation2 + $0x84] sm:$0x1] }
 0x20d   : > { %14149 = vmatmul.mubr.msk.f32.gmra.mrb[36].mxu0 %vm663_vm3, %v660_v33  ;;  %v2225_v33 = vshll.u32 %v2149_v29, 16  ;;  %v1495_v29 = vld [vmem:[#allocation2 + $0x8c] sm:$0x1] }
 0x20e   : > { %14151 = vmatprep.mubr.msk.f32.mxu0 %vm663_vm3, %v661_v22  ;;  %v2222_v2 = vor.u32 %v2221_v54, %v2218_v31  ;;  %v1433_v22 = vld [vmem:[#allocation2 + $0x6c] sm:$0x1]  ;;  %v1496_v30 = vsel %vm16531_vm7, 0, %v1495_v29  ;;  %v1499_v54 = vsel %vm16531_vm7, 0, %v1498_v49 }
 0x20f   : > { %v16560_v61 = vpop.f32.mrb[16].mxu1  ;;  %v2227_v56 = vrot.slane %v2225_v33, 5  ;;  %v1434_v24 = vsel %vm16538_vm8, 0, %v1433_v22  ;;  %1497 = vst [vmem:[#allocation2 + $0x8c] sm:$0x1] %v1496_v30  ;;  %v1440_v33 = vsel %vm16538_vm8, 0, %v1439_v32 }
 0x210   : > { %v16562_v62 = vpop.f32.mrb[17].mxu1  ;;  %v2223_v7 = vrot.slane %v2222_v2, 4  ;;  %1435 = vst [vmem:[#allocation2 + $0x6c] sm:$0x1] %v1434_v24  ;;  %1441 = vst [vmem:[#allocation2 + $0x84] sm:$0x1] %v1440_v33 }
 0x211   : > { %14152 = vmatmul.mubr.msk.f32.gmra.mrb[38].mxu0 %vm663_vm3, %v662_v26  ;;  %v2232_v4 = vor.u32 %v2231_v60, %v2227_v56  ;;  %v1493_v26 = vsel %vm16531_vm7, 0, %v1492_v25  ;;  %1500 = vst [vmem:[#allocation2 + $0x98] sm:$0x1] %v1499_v54  ;;  %v1502_v60 = vsel %vm16531_vm7, 0, %v1501_v59 }
 0x212   : > { %v2228_v14 = vsel %vm16606_vm11, %v2223_v7, %v2227_v56  ;;  %1494 = vst [vmem:[#allocation2 + $0x80] sm:$0x1] %v1493_v26  ;;  %v1442_v56 = vld [vmem:[#allocation2 + $0x90] sm:$0x1]  ;;  %1503 = vst [vmem:[#allocation2 + $0xa4] sm:$0x1] %v1502_v60 }
 0x213   : > { %v16574_v10 = vpop.f32.mrb[18].mxu1  ;;  %v2233_v9 = vrot.slane %v2232_v4, 4  ;;  %v1443_v57 = vsel %vm16538_vm8, 0, %v1442_v56  ;;  %v1505_v4 = vsel %vm16531_vm7, 0, %v1504_v3 }
 0x214   : > { %v16576_v12 = vpop.f32.mrb[19].mxu1  ;;  %1444 = vst [vmem:[#allocation2 + $0x90] sm:$0x1] %v1443_v57  ;;  %1506 = vst [vmem:[#allocation2 + $0xb0] sm:$0x1] %v1505_v4 }
 0x215   : > { %v2238_v16 = vsel %vm16606_vm11, %v2233_v9, %v2237_v5  ;;  %v1448_v5 = vld [vmem:[#allocation2 + $0xa8] sm:$0x1]  ;;  %v1507_v9 = vld [vmem:[#allocation2 + $0xbc] sm:$0x1] }
 0x216   : > { %v12927_v18 = vcombine.low %v2228_v14, %v2238_v16  ;;  %v1449_v7 = vsel %vm16538_vm8, 0, %v1448_v5  ;;  %v1508_v11 = vsel %vm16531_vm7, 0, %v1507_v9  ;;  %v1451_v14 = vld [vmem:[#allocation2 + $0xb4] sm:$0x1] }
 0x217   : > { %v16598_v45 = vpop.f32.mrb[20].mxu1  ;;  %1450 = vst [vmem:[#allocation2 + $0xa8] sm:$0x1] %v1449_v7  ;;  %1509 = vst [vmem:[#allocation2 + $0xbc] sm:$0x1] %v1508_v11  ;;  %v1452_v15 = vsel %vm16538_vm8, 0, %v1451_v14 }
 0x218   : > { %v16600_v51 = vpop.f32.mrb[21].mxu1  ;;  %14220 = vmatprep.mubr.bf16.mxu0 %v12927_v18  ;;  %1453 = vst [vmem:[#allocation2 + $0xb4] sm:$0x1] %v1452_v15 }
 0x21b   : > { %v16618_v17 = vpop.f32.mrb[22].mxu1 }
 0x21c   : > { %v16624_v23 = vpop.f32.mrb[23].mxu1 }
 0x21f   : > { %v16635_v31 = vpop.f32.mrb[24].mxu1 }
 0x220   : > { %v16639_v48 = vpop.f32.mrb[25].mxu1 }
 0x223   : > { %v16647_v63 = vpop.f32.mrb[26].mxu1 }
 0x224   : > { %v16651_v2 = vpop.f32.mrb[27].mxu1 }
 0x227   : > { %v16657_v8 = vpop.f32.mrb[28].mxu1 }
 0x228   : > { %v16661_v13 = vpop.f32.mrb[29].mxu1 }
 0x2a8   : > { %v14108_v16 = vpop.f32.mrb[8].mxu0 }
 0x2a9   : > { %v1227_v18 = vadd.f32 %v16509_v34, %v14108_v16  ;;  %v826_v19 = vpop.f32.mrb[9].mxu0  ;;  %v20249_v34 = vmov 0 }
 0x2aa   : > { %v1222_v20 = vadd.f32 %v16511_v35, %v826_v19  ;;  %v20250_v34 = vsel %vm16671_vm13, 4294967295, %v20249_v34  ;;  %v2040_v35 = vld [vmem:[#allocation2 + $0x14] sm:$0x1] }
 0x2ab   : > { %v13498_v22 = vpack.c.bf16 %v1227_v18, %v1227_v18  ;;  %20251 = vst [vmem:[#allocation22_spill] sm:$0xff] %v20250_v34 }
 0x2ac   : > { %v13497_v24 = vpack.c.bf16 %v1222_v20, %v1222_v20  ;;  %v14111_v25 = vpop.f32.mrb[10].mxu0  ;;  %v2047_v20 = vld [vmem:[#allocation2 + $0x20] sm:$0x1] }
 0x2ad   : > { %v1722_v26 = vshrl.u32 %v13498_v22, 16  ;;  %v1237_v27 = vadd.f32 %v16514_v36, %v14111_v25  ;;  %v836_v28 = vpop.f32.mrb[11].mxu0  ;;  %v1725_v33 = vshll.u32 %v13498_v22, 16 }
 0x2ae   : > { %v1714_v29 = vshrl.u32 %v13497_v24, 16  ;;  %v1232_v30 = vadd.f32 %v16516_v37, %v836_v28  ;;  %v1717_v56 = vshll.u32 %v13497_v24, 16  ;;  %v2036_v37 = vld [vmem:[#allocation2 + $0xc] sm:$0xf]  ;;  %v2043_v28 = vld [vmem:[#allocation2 + $0x18] sm:$0xf] }
 0x2af   : > { %v1724_v32 = vrot.slane %v1722_v26, 7  ;;  %v13500_v49 = vpack.c.bf16 %v1237_v27, %v1237_v27 }
 0x2b0   : > { %v1716_v54 = vrot.slane %v1714_v29, 7  ;;  %v13499_v57 = vpack.c.bf16 %v1232_v30, %v1232_v30  ;;  %v14114_v59 = vpop.f32.mrb[12].mxu0 }
 0x2b1   : > { %v1727_v36 = vor.u32 %v1725_v33, %v1724_v32  ;;  %v1729_v60 = vrot.slane %v1724_v32, 4  ;;  %v1739_v1 = vshrl.u32 %v13500_v49, 16  ;;  %v846_v3 = vpop.f32.mrb[13].mxu0  ;;  %v1742_v7 = vshll.u32 %v13500_v49, 16 }
 0x2b2   : > { %v1719_v4 = vor.u32 %v1717_v56, %v1716_v54  ;;  %v1720_v5 = vrot.slane %v1716_v54, 4  ;;  %v1731_v9 = vshrl.u32 %v13499_v57, 16  ;;  %v1247_v15 = vadd.f32 %v16518_v38, %v14114_v59 }
 0x2b3   : > { %v2041_v11 = vsel %vm16538_vm8, %v1729_v60, %v2040_v35  ;;  %v1741_v14 = vrot.slane %v1739_v1, 7  ;;  %v1242_v16 = vadd.f32 %v16520_v39, %v846_v3  ;;  %v1734_v24 = vshll.u32 %v13499_v57, 16 }
 0x2b4   : > { %2042 = vst [vmem:[#allocation2 + $0x14] sm:$0x1] %v2041_v11  ;;  %v1728_v18 = vsel %vm16676_vm14, %v1720_v5, %v1727_v36  ;;  %v2037_v19 = vsel %vm16671_vm13, %v1719_v4, %v2036_v37  ;;  %v1733_v22 = vrot.slane %v1731_v9, 7  ;;  %v14117_v25 = vpop.f32.mrb[14].mxu0  ;;  %v13502_v29 = vpack.c.bf16 %v1247_v15, %v1247_v15  ;;  %v2050_v9 = vld [vmem:[#allocation2 + $0x24] sm:$0xf] }
 0x2b5   : > { %2038 = vst [vmem:[#allocation2 + $0xc] sm:$0xf] %v2037_v19  ;;  %2039 = vst [vmem:[#allocation2 + $0x10] sm:$0xf] %v1728_v18  ;;  %v1744_v26 = vor.u32 %v1742_v7, %v1741_v14  ;;  %v1746_v27 = vrot.slane %v1741_v14, 4  ;;  %v13501_v38 = vpack.c.bf16 %v1242_v16, %v1242_v16  ;;  %v856_v30 = vpop.f32.mrb[15].mxu0  ;;  %v1257_v33 = vadd.f32 %v16522_v40, %v14117_v25 }
 0x2b6   : > { %v1736_v39 = vor.u32 %v1734_v24, %v1733_v22  ;;  %v1737_v32 = vrot.slane %v1733_v22, 4  ;;  %v1252_v49 = vadd.f32 %v16524_v41, %v856_v30  ;;  %v1756_v54 = vshrl.u32 %v13502_v29, 16  ;;  %v2054_v7 = vld [vmem:[#allocation2 + $0x2c] sm:$0x1] }
 0x2b7   : > { %v2048_v35 = vsel %vm16538_vm8, %v1746_v27, %v2047_v20  ;;  %v1759_v56 = vshll.u32 %v13502_v29, 16  ;;  %v1748_v57 = vshrl.u32 %v13501_v38, 16  ;;  %v1751_v60 = vshll.u32 %v13501_v38, 16  ;;  %v2061_v38 = vld [vmem:[#allocation2 + $0x38] sm:$0x1] }
 0x2b8   : > { %2049 = vst [vmem:[#allocation2 + $0x20] sm:$0x1] %v2048_v35  ;;  %v1745_v59 = vsel %vm16676_vm14, %v1737_v32, %v1744_v26  ;;  %v2044_v36 = vsel %vm16671_vm13, %v1736_v39, %v2043_v28  ;;  %v13504_v37 = vpack.c.bf16 %v1257_v33, %v1257_v33  ;;  %v14120_v1 = vpop.f32.mrb[16].mxu0  ;;  %v1758_v40 = vrot.slane %v1756_v54, 7  ;;  %v2057_v35 = vld [vmem:[#allocation2 + $0x30] sm:$0xf] }
 0x2b9   : > { %2045 = vst [vmem:[#allocation2 + $0x18] sm:$0xf] %v2044_v36  ;;  %2046 = vst [vmem:[#allocation2 + $0x1c] sm:$0xf] %v1745_v59  ;;  %v1750_v41 = vrot.slane %v1748_v57, 7  ;;  %v13503_v3 = vpack.c.bf16 %v1252_v49, %v1252_v49  ;;  %v1267_v4 = vadd.f32 %v16526_v42, %v14120_v1  ;;  %v866_v5 = vpop.f32.mrb[17].mxu0 }
 0x2ba   : > { %v1773_v11 = vshrl.u32 %v13504_v37, 16  ;;  %v1776_v14 = vshll.u32 %v13504_v37, 16  ;;  %v1262_v15 = vadd.f32 %v16528_v43, %v866_v5  ;;  %v1761_v16 = vor.u32 %v1759_v56, %v1758_v40 }
 0x2bb   : > { %v1763_v18 = vrot.slane %v1758_v40, 4  ;;  %v1753_v19 = vor.u32 %v1751_v60, %v1750_v41  ;;  %v1754_v20 = vrot.slane %v1750_v41, 4  ;;  %v1765_v24 = vshrl.u32 %v13503_v3, 16  ;;  %v2068_v41 = vld [vmem:[#allocation2 + $0x44] sm:$0x1] }
 0x2bc   : > { %v1775_v22 = vrot.slane %v1773_v11, 7  ;;  %v1768_v25 = vshll.u32 %v13503_v3, 16  ;;  %v13506_v26 = vpack.c.bf16 %v1267_v4, %v1267_v4  ;;  %v14123_v27 = vpop.f32.mrb[18].mxu0  ;;  %v13505_v43 = vpack.c.bf16 %v1262_v15, %v1262_v15  ;;  %v2064_v4 = vld [vmem:[#allocation2 + $0x3c] sm:$0xf] }
 0x2bd   : > { %v2055_v28 = vsel %vm16538_vm8, %v1763_v18, %v2054_v7  ;;  %v1762_v42 = vsel %vm16676_vm14, %v1754_v20, %v1761_v16  ;;  %v2051_v29 = vsel %vm16671_vm13, %v1753_v19, %v2050_v9  ;;  %v876_v30 = vpop.f32.mrb[19].mxu0  ;;  %v1767_v33 = vrot.slane %v1765_v24, 7 }
 0x2be   : > { %2056 = vst [vmem:[#allocation2 + $0x2c] sm:$0x1] %v2055_v28  ;;  %2052 = vst [vmem:[#allocation2 + $0x24] sm:$0xf] %v2051_v29  ;;  %v1778_v39 = vor.u32 %v1776_v14, %v1775_v22  ;;  %v1780_v32 = vrot.slane %v1775_v22, 4  ;;  %v1790_v49 = vshrl.u32 %v13506_v26, 16  ;;  %v1277_v59 = vadd.f32 %v16535_v46, %v14123_v27 }
 0x2bf   : > { %2053 = vst [vmem:[#allocation2 + $0x28] sm:$0xf] %v1762_v42  ;;  %v1793_v54 = vshll.u32 %v13506_v26, 16  ;;  %v1782_v56 = vshrl.u32 %v13505_v43, 16  ;;  %v1785_v57 = vshll.u32 %v13505_v43, 16  ;;  %v1770_v60 = vor.u32 %v1768_v25, %v1767_v33 }
 0x2c0   : > { %v2062_v36 = vsel %vm16538_vm8, %v1780_v32, %v2061_v38  ;;  %v1771_v37 = vrot.slane %v1767_v33, 4  ;;  %v1792_v1 = vrot.slane %v1790_v49, 7  ;;  %v14126_v40 = vpop.f32.mrb[20].mxu0  ;;  %v13508_v5 = vpack.c.bf16 %v1277_v59, %v1277_v59  ;;  %v16721_v43 = vld [vmem:[#allocation2 + $0xc] sm:$0xf] }
 0x2c1   : > { %2063 = vst [vmem:[#allocation2 + $0x38] sm:$0x1] %v2062_v36  ;;  %v1784_v3 = vrot.slane %v1782_v56, 7  ;;  %v1272_v7 = vadd.f32 %v16544_v50, %v876_v30  ;;  %v1287_v9 = vadd.f32 %v16548_v52, %v14126_v40  ;;  %v886_v11 = vpop.f32.mrb[21].mxu0  ;;  %v2058_v14 = vsel %vm16671_vm13, %v1770_v60, %v2057_v35  ;;  %v2075_v30 = vld [vmem:[#allocation2 + $0x50] sm:$0x1] }
 0x2c2   : > { %v1779_v46 = vsel %vm16676_vm14, %v1771_v37, %v1778_v39  ;;  %v1795_v15 = vor.u32 %v1793_v54, %v1792_v1  ;;  %v1797_v16 = vrot.slane %v1792_v1, 4  ;;  %2059 = vst [vmem:[#allocation2 + $0x30] sm:$0xf] %v2058_v14  ;;  %v1807_v20 = vshrl.u32 %v13508_v5, 16  ;;  %v2071_v54 = vld [vmem:[#allocation2 + $0x48] sm:$0xf] }
 0x2c3   : > { %2060 = vst [vmem:[#allocation2 + $0x34] sm:$0xf] %v1779_v46  ;;  %v1787_v18 = vor.u32 %v1785_v57, %v1784_v3  ;;  %v1788_v19 = vrot.slane %v1784_v3, 4  ;;  %v1810_v22 = vshll.u32 %v13508_v5, 16  ;;  %v13507_v24 = vpack.c.bf16 %v1272_v7, %v1272_v7  ;;  %v2082_v60 = vld [vmem:[#allocation2 + $0x5c] sm:$0x1] }
 0x2c4   : > { %v2069_v50 = vsel %vm16538_vm8, %v1797_v16, %v2068_v41  ;;  %v13510_v52 = vpack.c.bf16 %v1287_v9, %v1287_v9  ;;  %v1282_v25 = vadd.f32 %v16550_v53, %v886_v11  ;;  %v14129_v26 = vpop.f32.mrb[22].mxu0  ;;  %v1809_v42 = vrot.slane %v1807_v20, 7 }
 0x2c5   : > { %2070 = vst [vmem:[#allocation2 + $0x44] sm:$0x1] %v2069_v50  ;;  %v1796_v27 = vsel %vm16676_vm14, %v1788_v19, %v1795_v15  ;;  %v2065_v28 = vsel %vm16671_vm13, %v1787_v18, %v2064_v4  ;;  %v1297_v29 = vadd.f32 %v16552_v55, %v14129_v26  ;;  %v896_v38 = vpop.f32.mrb[23].mxu0  ;;  %v1799_v39 = vshrl.u32 %v13507_v24, 16  ;;  %v2078_v15 = vld [vmem:[#allocation2 + $0x54] sm:$0xf] }
 0x2c6   : > { %2066 = vst [vmem:[#allocation2 + $0x3c] sm:$0xf] %v2065_v28  ;;  %2067 = vst [vmem:[#allocation2 + $0x40] sm:$0xf] %v1796_v27  ;;  %v1802_v32 = vshll.u32 %v13507_v24, 16  ;;  %v1824_v53 = vshrl.u32 %v13510_v52, 16  ;;  %v1812_v49 = vor.u32 %v1810_v22, %v1809_v42  ;;  %v13509_v56 = vpack.c.bf16 %v1282_v25, %v1282_v25 }
 0x2c7   : > { %v1827_v33 = vshll.u32 %v13510_v52, 16  ;;  %v1814_v35 = vrot.slane %v1809_v42, 4  ;;  %v13512_v57 = vpack.c.bf16 %v1297_v29, %v1297_v29  ;;  %v1801_v59 = vrot.slane %v1799_v39, 7  ;;  %v2089_v50 = vld [vmem:[#allocation2 + $0x68] sm:$0x1] }
 0x2c8   : > { %v1826_v36 = vrot.slane %v1824_v53, 7  ;;  %v1292_v55 = vadd.f32 %v16556_v58, %v896_v38  ;;  %v14132_v37 = vpop.f32.mrb[24].mxu0  ;;  %v2240_v1 = vshrl.u32 %v16721_v43, 16  ;;  %v1816_v41 = vshrl.u32 %v13509_v56, 16  ;;  %v2151_v42 = vld [vmem:[#allocation2 + $0x10] sm:$0xf] }
 0x2c9   : > { %v2076_v40 = vsel %vm16538_vm8, %v1814_v35, %v2075_v30  ;;  %v1819_v3 = vshll.u32 %v13509_v56, 16  ;;  %v1841_v4 = vshrl.u32 %v13512_v57, 16  ;;  %v906_v5 = vpop.f32.mrb[25].mxu0  ;;  %v1804_v7 = vor.u32 %v1802_v32, %v1801_v59  ;;  %v2197_v32 = vld [vmem:[#allocation2 + $0x14] sm:$0x1] }
 0x2ca   : > { %2077 = vst [vmem:[#allocation2 + $0x50] sm:$0x1] %v2076_v40  ;;  %v1805_v9 = vrot.slane %v1801_v59, 4  ;;  %v1829_v11 = vor.u32 %v1827_v33, %v1826_v36  ;;  %v1831_v46 = vrot.slane %v1826_v36, 4  ;;  %v1818_v14 = vrot.slane %v1816_v41, 7 }
 0x2cb   : > { %v1843_v16 = vrot.slane %v1841_v4, 7  ;;  %v1844_v18 = vshll.u32 %v13512_v57, 16  ;;  %v13511_v58 = vpack.c.bf16 %v1292_v55, %v1292_v55  ;;  %v2072_v20 = vsel %vm16671_vm13, %v1804_v7, %v2071_v54  ;;  %v2085_v35 = vld [vmem:[#allocation2 + $0x60] sm:$0xf]  ;;  %v2096_v55 = vld [vmem:[#allocation2 + $0x74] sm:$0x1] }
 0x2cc   : > { %v1813_v19 = vsel %vm16676_vm14, %v1805_v9, %v1812_v49  ;;  %v2083_v22 = vsel %vm16538_vm8, %v1831_v46, %v2082_v60  ;;  %v1307_v24 = vadd.f32 %v16560_v61, %v14132_v37  ;;  %v14135_v52 = vpop.f32.mrb[26].mxu0  ;;  %2073 = vst [vmem:[#allocation2 + $0x48] sm:$0xf] %v2072_v20  ;;  %v1821_v25 = vor.u32 %v1819_v3, %v1818_v14 }
 0x2cd   : > { %2074 = vst [vmem:[#allocation2 + $0x4c] sm:$0xf] %v1813_v19  ;;  %2084 = vst [vmem:[#allocation2 + $0x5c] sm:$0x1] %v2083_v22  ;;  %v1822_v26 = vrot.slane %v1818_v14, 4  ;;  %v1846_v27 = vor.u32 %v1844_v18, %v1843_v16  ;;  %v1848_v28 = vrot.slane %v1843_v16, 4  ;;  %v1302_v41 = vadd.f32 %v16562_v62, %v906_v5 }
 0x2ce   : > { %v16734_v29 = vpop.f32.mrb[27].mxu0  ;;  %v1833_v38 = vshrl.u32 %v13511_v58, 16  ;;  %v1836_v30 = vshll.u32 %v13511_v58, 16  ;;  %v13514_v39 = vpack.c.bf16 %v1307_v24, %v1307_v24  ;;  %v2242_v53 = vrot.slane %v2240_v1, 4  ;;  %v2152_v16 = vld [vmem:[#allocation2 + $0x18] sm:$0xf] }
 0x2cf   : > { %v1830_v33 = vsel %vm16676_vm14, %v1822_v26, %v1829_v11  ;;  %v2079_v61 = vsel %vm16671_vm13, %v1821_v25, %v2078_v15  ;;  %v2090_v49 = vsel %vm16538_vm8, %v1848_v28, %v2089_v50  ;;  %v2243_v54 = vshll.u32 %v16721_v43, 16  ;;  %v2153_v62 = vld [vmem:[#allocation2 + $0x1c] sm:$0xf] }
 0x2d0   : > { %2080 = vst [vmem:[#allocation2 + $0x54] sm:$0xf] %v2079_v61  ;;  %2081 = vst [vmem:[#allocation2 + $0x58] sm:$0xf] %v1830_v33  ;;  %v1835_v56 = vrot.slane %v1833_v38, 7  ;;  %v1858_v57 = vshrl.u32 %v13514_v39, 16  ;;  %v13513_v15 = vpack.c.bf16 %v1302_v41, %v1302_v41 }
 0x2d1   : > { %2091 = vst [vmem:[#allocation2 + $0x68] sm:$0x1] %v2090_v49  ;;  %v1861_v59 = vshll.u32 %v13514_v39, 16  ;;  %v2249_v36 = vshll.u32 %v2151_v42, 16  ;;  %v16743_v60 = vpop.f32.mrb[28].mxu0  ;;  %v2245_v37 = vrot.slane %v2243_v54, 5 }
 0x2d2   : > { %v2253_v1 = vshrl.u32 %v2151_v42, 16  ;;  %v2259_v40 = vshll.u32 %v2197_v32, 16  ;;  %v16746_v3 = vpop.f32.mrb[29].mxu0  ;;  %v1838_v4 = vor.u32 %v1836_v30, %v1835_v56  ;;  %v1839_v7 = vrot.slane %v1835_v56, 4  ;;  %v2198_v49 = vld [vmem:[#allocation2 + $0x20] sm:$0x1] }
 0x2d3   : > { %v1860_v43 = vrot.slane %v1858_v57, 7  ;;  %v2251_v9 = vrot.slane %v2249_v36, 5  ;;  %v2246_v11 = vor.u32 %v2245_v37, %v2242_v53  ;;  %v1850_v24 = vshrl.u32 %v13513_v15, 16  ;;  %v2092_v53 = vld [vmem:[#allocation2 + $0x6c] sm:$0xf] }
 0x2d4   : > { %v2255_v46 = vrot.slane %v2253_v1, 4  ;;  %v2261_v14 = vrot.slane %v2259_v40, 5  ;;  %v1847_v18 = vsel %vm16676_vm14, %v1839_v7, %v1846_v27  ;;  %v2086_v58 = vsel %vm16671_vm13, %v1838_v4, %v2085_v35  ;;  %v16752_v5 = vpop.f32.mrb[30].mxu0  ;;  %v2154_v7 = vld [vmem:[#allocation2 + $0x24] sm:$0xf] }
 0x2d5   : > { %v1863_v19 = vor.u32 %v1861_v59, %v1860_v43  ;;  %v1865_v20 = vrot.slane %v1860_v43, 4  ;;  %2087 = vst [vmem:[#allocation2 + $0x60] sm:$0xf] %v2086_v58  ;;  %2088 = vst [vmem:[#allocation2 + $0x64] sm:$0xf] %v1847_v18  ;;  %v2247_v22 = vrot.slane %v2246_v11, 4  ;;  %v1317_v27 = vadd.f32 %v16574_v10, %v14135_v52 }
 0x2d6   : > { %v2256_v50 = vor.u32 %v2255_v46, %v2251_v9  ;;  %v1853_v25 = vshll.u32 %v13513_v15, 16  ;;  %v16754_v26 = vpop.f32.mrb[31].mxu0  ;;  %v2264_v42 = vshrl.u32 %v2152_v16, 16  ;;  %v2267_v38 = vshll.u32 %v2152_v16, 16  ;;  %v2103_v15 = vld [vmem:[#allocation2 + $0x80] sm:$0x1] }
 0x2d7   : > { %v2097_v28 = vsel %vm16538_vm8, %v1865_v20, %v2096_v55  ;;  %v2252_v30 = vsel %vm16606_vm11, %v2247_v22, %v2251_v9  ;;  %v1852_v32 = vrot.slane %v1850_v24, 7  ;;  %v2273_v33 = vshll.u32 %v2153_v62, 16  ;;  %v15702_v55 = vld [vmem:[#allocation4 + $0x8] sm:$0xff]   ;;  %v16778_v22 = vld [vmem:[#allocation2 + $0x28] sm:$0xf] }
 0x2d8   : > { %2098 = vst [vmem:[#allocation2 + $0x74] sm:$0x1] %v2097_v28  ;;  %v2257_v39 = vrot.slane %v2256_v50, 4  ;;  %v13516_v61 = vpack.c.bf16 %v1317_v27, %v1317_v27  ;;  %v2266_v35 = vrot.slane %v2264_v42, 4  ;;  %v2269_v54 = vrot.slane %v2267_v38, 5  ;;  %v16761_v57 = vpop.f32.mrb[32].mxu0 }
 0x2d9   : > { %v2277_v56 = vshrl.u32 %v2153_v62, 16  ;;  %v1855_v52 = vor.u32 %v1853_v25, %v1852_v32  ;;  %v1856_v59 = vrot.slane %v1852_v32, 4  ;;  %v2275_v36 = vrot.slane %v2273_v33, 5  ;;  %v16765_v37 = vpop.f32.mrb[33].mxu0  ;;  %v2199_v42 = vld [vmem:[#allocation2 + $0x2c] sm:$0x1] }
 0x2da   : > { %v2262_v10 = vsel %vm16606_vm11, %v2257_v39, %v2261_v14  ;;  %v1875_v40 = vshrl.u32 %v13516_v61, 16  ;;  %v1878_v41 = vshll.u32 %v13516_v61, 16  ;;  %v2270_v4 = vor.u32 %v2269_v54, %v2266_v35 }
 0x2db   : > { %v12928_v1 = vcombine.low %v2252_v30, %v2262_v10  ;;  %v1864_v43 = vsel %vm16676_vm14, %v1856_v59, %v1863_v19  ;;  %v2093_v9 = vsel %vm16671_vm13, %v1855_v52, %v2092_v53  ;;  %v2279_v11 = vrot.slane %v2277_v56, 4 }
 0x2dc   : > { %v2283_v46 = vshll.u32 %v2198_v49, 16  ;;  %2094 = vst [vmem:[#allocation2 + $0x6c] sm:$0xf] %v2093_v9  ;;  %2095 = vst [vmem:[#allocation2 + $0x70] sm:$0xf] %v1864_v43  ;;  %v1877_v14 = vrot.slane %v1875_v40, 7  ;;  %v1312_v18 = vadd.f32 %v16576_v12, %v16734_v29  ;;  %v1327_v58 = vadd.f32 %v16598_v45, %v16743_v60 }
 0x2dd   : > { %14221 = vmatmul.mubr.bf16.vlgmr.msra.gmra.mrb[40].mxu0 %v12928_v1  ;;  %v2271_v16 = vrot.slane %v2270_v4, 4  ;;  %v16775_v20 = vpop.f32.mrb[34].mxu0  ;;  %v2280_v19 = vor.u32 %v2279_v11, %v2275_v36  ;;  %v2288_v50 = vshrl.u32 %v2154_v7, 16  ;;  %v2291_v24 = vshll.u32 %v2154_v7, 16  ;;  %v15703_v45 = vld [vmem:[#allocation4 + $0x10] sm:$0xff]  }
 0x2de   : > { %14253 = vmatpush3.bf16.msra.mxu0 %v16622_v21  ;;  %v2285_v62 = vrot.slane %v2283_v46, 5  ;;  %v16780_v25 = vpop.f32.mrb[35].mxu0  ;;  %v1880_v28 = vor.u32 %v1878_v41, %v1877_v14  ;;  %v1882_v27 = vrot.slane %v1877_v14, 4  ;;  %v13515_v29 = vpack.c.bf16 %v1312_v18, %v1312_v18  ;;  %v15704_v41 = vld [vmem:[#allocation4 + $0x18] sm:$0xff]   ;;  %v16800_v18 = vld [vmem:[#allocation2 + $0x34] sm:$0xf] }
 0x2df   : > { %v2276_v12 = vsel %vm16606_vm11, %v2271_v16, %v2275_v36  ;;  %14254 = vmatprep.subr.bf16.mxu0 %v15702_v55  ;;  %v2281_v60 = vrot.slane %v2280_v19, 4  ;;  %v13518_v38 = vpack.c.bf16 %v1327_v58, %v1327_v58  ;;  %v2290_v21 = vrot.slane %v2288_v50, 4  ;;  %v2099_v36 = vld [vmem:[#allocation2 + $0x78] sm:$0xf]  ;;  %v2110_v7 = vld [vmem:[#allocation2 + $0x8c] sm:$0x1] }
 0x2e0   : > { %v2293_v30 = vrot.slane %v2291_v24, 5  ;;  %v2104_v39 = vsel %vm16538_vm8, %v1882_v27, %v2103_v15  ;;  %v1867_v32 = vshrl.u32 %v13515_v29, 16  ;;  %v1870_v53 = vshll.u32 %v13515_v29, 16  ;;  %v16787_v61 = vpop.f32.mrb[36].mxu0  ;;  %v16798_v16 = vld [vmem:[#allocation2 + $0x30] sm:$0xf] }
 0x2e1   : > { %v2297_v33 = vshll.u32 %v16778_v22, 16  ;;  %2105 = vst [vmem:[#allocation2 + $0x80] sm:$0x1] %v2104_v39  ;;  %v2286_v49 = vsel %vm16606_vm11, %v2281_v60, %v2285_v62  ;;  %v1892_v35 = vshrl.u32 %v13518_v38, 16  ;;  %v1895_v54 = vshll.u32 %v13518_v38, 16  ;;  %v16791_v10 = vpop.f32.mrb[37].mxu0 }
 0x2e2   : > { %v2294_v56 = vor.u32 %v2293_v30, %v2290_v21  ;;  %14255 = vmatpush3.bf16.msra.mxu0 %v15702_v55  ;;  %v12929_v52 = vcombine.low %v2276_v12, %v2286_v49  ;;  %v1869_v59 = vrot.slane %v1867_v32, 7  ;;  %v2301_v40 = vshrl.u32 %v16778_v22, 16  ;;  %v2200_v38 = vld [vmem:[#allocation2 + $0x38] sm:$0x1] }
 0x2e3   : > { %v2299_v1 = vrot.slane %v2297_v33, 5  ;;  %14256 = vmatprep.subr.bf16.mxu0 %v15703_v45  ;;  %v1894_v4 = vrot.slane %v1892_v35, 7  ;;  %v2307_v9 = vshll.u32 %v2199_v42, 16  ;;  %v1322_v11 = vadd.f32 %v16600_v51, %v16746_v3 }
 0x2e4   : > { %v2295_v43 = vrot.slane %v2294_v56, 4  ;;  %14224 = vmatprep.mubr.bf16.mxu0 %v12929_v52  ;;  %v1872_v46 = vor.u32 %v1870_v53, %v1869_v59  ;;  %v1873_v55 = vrot.slane %v1869_v59, 4  ;;  %v2303_v14 = vrot.slane %v2301_v40, 4  ;;  %v2106_v52 = vld [vmem:[#allocation2 + $0x84] sm:$0xf]  ;;  %v15706_v40 = vld [vmem:[#allocation4 + $0x28] sm:$0xff]  }
 0x2e5   : > { %v1337_v15 = vadd.f32 %v16618_v17, %v16752_v5  ;;  %v1897_v58 = vor.u32 %v1895_v54, %v1894_v4  ;;  %v1899_v19 = vrot.slane %v1894_v4, 4  ;;  %v2309_v50 = vrot.slane %v2307_v9, 5  ;;  %v15705_v17 = vld [vmem:[#allocation4 + $0x20] sm:$0xff]  }
 0x2e6   : > { %v2300_v62 = vsel %vm16606_vm11, %v2295_v43, %v2299_v1  ;;  %14257 = vmatpush3.bf16.msra.mxu0 %v15703_v45  ;;  %v1881_v51 = vsel %vm16676_vm14, %v1873_v55, %v1880_v28  ;;  %v2100_v3 = vsel %vm16671_vm13, %v1872_v46, %v2099_v36  ;;  %v2304_v24 = vor.u32 %v2303_v14, %v2299_v1  ;;  %v2117_v43 = vld [vmem:[#allocation2 + $0x98] sm:$0x1] }
 0x2e7   : > { %v13517_v27 = vpack.c.bf16 %v1322_v11, %v1322_v11  ;;  %14258 = vmatprep.subr.bf16.mxu0 %v15704_v41  ;;  %2101 = vst [vmem:[#allocation2 + $0x78] sm:$0xf] %v2100_v3  ;;  %2102 = vst [vmem:[#allocation2 + $0x7c] sm:$0xf] %v1881_v51  ;;  %v2111_v5 = vsel %vm16538_vm8, %v1899_v19, %v2110_v7  ;;  %v13520_v12 = vpack.c.bf16 %v1337_v15, %v1337_v15  ;;  %v16818_v11 = vld [vmem:[#allocation2 + $0x3c] sm:$0xf] }
 0x2e8   : > { %v2312_v29 = vshrl.u32 %v16798_v16, 16  ;;  %v2315_v42 = vshll.u32 %v16798_v16, 16  ;;  %2112 = vst [vmem:[#allocation2 + $0x8c] sm:$0x1] %v2111_v5  ;;  %v2305_v45 = vrot.slane %v2304_v24, 4  ;;  %v2321_v21 = vshll.u32 %v16800_v18, 16 }
 0x2e9   : > { %v1884_v28 = vshrl.u32 %v13517_v27, 16  ;;  %v1887_v60 = vshll.u32 %v13517_v27, 16  ;;  %v1909_v30 = vshrl.u32 %v13520_v12, 16  ;;  %v1912_v39 = vshll.u32 %v13520_v12, 16  ;;  %v16824_v3 = vld [vmem:[#allocation2 + $0x40] sm:$0xf] }
 0x2ea   : > { %v2314_v32 = vrot.slane %v2312_v29, 4  ;;  %v2317_v53 = vrot.slane %v2315_v42, 5  ;;  %14259 = vmatpush3.bf16.msra.mxu0 %v15704_v41  ;;  %v2310_v33 = vsel %vm16606_vm11, %v2305_v45, %v2309_v50  ;;  %v2323_v35 = vrot.slane %v2321_v21, 5  ;;  %v15707_v5 = vld [vmem:[#allocation4 + $0x30] sm:$0xff]  }
 0x2eb   : > { %v1886_v49 = vrot.slane %v1884_v28, 7  ;;  %v2325_v54 = vshrl.u32 %v16800_v18, 16  ;;  %14260 = vmatprep.subr.bf16.mxu0 %v15705_v17  ;;  %v12930_v56 = vcombine.low %v2300_v62, %v2310_v33  ;;  %v1911_v59 = vrot.slane %v1909_v30, 7 }
 0x2ec   : > { %v2318_v36 = vor.u32 %v2317_v53, %v2314_v32  ;;  %v2331_v1 = vshll.u32 %v2200_v38, 16  ;;  %v1332_v41 = vadd.f32 %v16624_v23, %v16754_v26  ;;  %v1347_v24 = vadd.f32 %v16635_v31, %v16761_v57  ;;  %v2113_v32 = vld [vmem:[#allocation2 + $0x90] sm:$0xf] }
 0x2ed   : > { %v1889_v4 = vor.u32 %v1887_v60, %v1886_v49  ;;  %v1890_v7 = vrot.slane %v1886_v49, 4  ;;  %v2327_v9 = vrot.slane %v2325_v54, 4  ;;  %14225 = vmatmul.mubr.bf16.gmra.mrb[44].mxu0 %v12930_v56  ;;  %v1914_v46 = vor.u32 %v1912_v39, %v1911_v59 }
 0x2ee   : > { %v1916_v55 = vrot.slane %v1911_v59, 4  ;;  %v2319_v14 = vrot.slane %v2318_v36, 4  ;;  %v2333_v15 = vrot.slane %v2331_v1, 5  ;;  %v13519_v51 = vpack.c.bf16 %v1332_v41, %v1332_v41  ;;  %14261 = vmatpush3.bf16.msra.mxu0 %v15705_v17  ;;  %v2124_v41 = vld [vmem:[#allocation2 + $0xa4] sm:$0x1] }
 0x2ef   : > { %v1898_v19 = vsel %vm16676_vm14, %v1890_v7, %v1897_v58  ;;  %v2107_v62 = vsel %vm16671_vm13, %v1889_v4, %v2106_v52  ;;  %v2328_v50 = vor.u32 %v2327_v9, %v2323_v35  ;;  %v2201_v58 = vld [vmem:[#allocation2 + $0x44] sm:$0x1]  ;;  %v2336_v27 = vshrl.u32 %v16818_v11, 16  ;;  %14262 = vmatprep.subr.bf16.mxu0 %v15706_v40  ;;  %v16842_v7 = vld [vmem:[#allocation2 + $0x48] sm:$0xf] }
 0x2f0   : > { %2108 = vst [vmem:[#allocation2 + $0x84] sm:$0xf] %v2107_v62  ;;  %2109 = vst [vmem:[#allocation2 + $0x88] sm:$0xf] %v1898_v19  ;;  %v2118_v23 = vsel %vm16538_vm8, %v1916_v55, %v2117_v43  ;;  %v2324_v26 = vsel %vm16606_vm11, %v2319_v14, %v2323_v35  ;;  %v1901_v29 = vshrl.u32 %v13519_v51, 16  ;;  %v1904_v17 = vshll.u32 %v13519_v51, 16 }
 0x2f1   : > { %2119 = vst [vmem:[#allocation2 + $0x98] sm:$0x1] %v2118_v23  ;;  %v2329_v12 = vrot.slane %v2328_v50, 4  ;;  %v2339_v42 = vshll.u32 %v16818_v11, 16  ;;  %v13522_v45 = vpack.c.bf16 %v1347_v24, %v1347_v24  ;;  %v2338_v28 = vrot.slane %v2336_v27, 4  ;;  %v15708_v35 = vld [vmem:[#allocation4 + $0x38] sm:$0xff]  }
 0x2f2   : > { %v2345_v60 = vshll.u32 %v16824_v3, 16  ;;  %v2349_v38 = vshrl.u32 %v16824_v3, 16  ;;  %v1903_v57 = vrot.slane %v1901_v29, 7  ;;  %v2355_v30 = vshll.u32 %v2201_v58, 16  ;;  %14263 = vmatpush3.bf16.msra.mxu0 %v15706_v40  ;;  %v16848_v62 = vld [vmem:[#allocation2 + $0x4c] sm:$0xf] }
 0x2f3   : > { %v2334_v31 = vsel %vm16606_vm11, %v2329_v12, %v2333_v15  ;;  %v2341_v21 = vrot.slane %v2339_v42, 5  ;;  %v1926_v53 = vshrl.u32 %v13522_v45, 16  ;;  %v1929_v33 = vshll.u32 %v13522_v45, 16  ;;  %14264 = vmatprep.subr.bf16.mxu0 %v15707_v5 }
 0x2f4   : > { %v12931_v39 = vcombine.low %v2324_v26, %v2334_v31  ;;  %v2347_v49 = vrot.slane %v2345_v60, 5  ;;  %v1906_v54 = vor.u32 %v1904_v17, %v1903_v57  ;;  %v1907_v56 = vrot.slane %v1903_v57, 4  ;;  %v2131_v31 = vld [vmem:[#allocation2 + $0xb0] sm:$0x1] }
 0x2f5   : > { %v2342_v52 = vor.u32 %v2341_v21, %v2338_v28  ;;  %v2351_v59 = vrot.slane %v2349_v38, 4  ;;  %v1928_v36 = vrot.slane %v1926_v53, 7  ;;  %v2357_v1 = vrot.slane %v2355_v30, 5  ;;  %v2120_v38 = vld [vmem:[#allocation2 + $0x9c] sm:$0xf] }
 0x2f6   : > { %14228 = vmatprep.mubr.bf16.mxu0 %v12931_v39  ;;  %v1342_v4 = vadd.f32 %v16639_v48, %v16765_v37  ;;  %v1357_v40 = vadd.f32 %v16647_v63, %v16775_v20  ;;  %v1915_v43 = vsel %vm16676_vm14, %v1907_v56, %v1914_v46  ;;  %v2114_v9 = vsel %vm16671_vm13, %v1906_v54, %v2113_v32  ;;  %v16850_v63 = vld [vmem:[#allocation2 + $0x50] sm:$0x1] }
 0x2f7   : > { %v2343_v55 = vrot.slane %v2342_v52, 4  ;;  %v2352_v14 = vor.u32 %v2351_v59, %v2347_v49  ;;  %14265 = vmatpush3.bf16.msra.mxu0 %v15707_v5  ;;  %2115 = vst [vmem:[#allocation2 + $0x90] sm:$0xf] %v2114_v9  ;;  %2116 = vst [vmem:[#allocation2 + $0x94] sm:$0xf] %v1915_v43  ;;  %v1931_v15 = vor.u32 %v1929_v33, %v1928_v36  ;;  %v1933_v19 = vrot.slane %v1928_v36, 4 }
 0x2f8   : > { %v13521_v48 = vpack.c.bf16 %v1342_v4, %v1342_v4  ;;  %v13524_v37 = vpack.c.bf16 %v1357_v40, %v1357_v40  ;;  %14266 = vmatprep.subr.bf16.mxu0 %v15708_v35  ;;  %v16852_v20 = vld [vmem:[#allocation4 + $0x80] sm:$0xff]   ;;  %v2360_v51 = vshrl.u32 %v16842_v7, 16  ;;  %v2363_v23 = vshll.u32 %v16842_v7, 16  ;;  %v16870_v36 = vld [vmem:[#allocation2 + $0x58] sm:$0xf] }
 0x2f9   : > { %v2348_v46 = vsel %vm16606_vm11, %v2343_v55, %v2347_v49  ;;  %v2353_v50 = vrot.slane %v2352_v14, 4  ;;  %v2125_v26 = vsel %vm16538_vm8, %v1933_v19, %v2124_v41  ;;  %v2369_v60 = vshll.u32 %v16848_v62, 16  ;;  %v16882_v41 = vld [vmem:[#allocation2 + $0x5c] sm:$0x1] }
 0x2fa   : > { %v1918_v24 = vshrl.u32 %v13521_v48, 16  ;;  %v1921_v58 = vshll.u32 %v13521_v48, 16  ;;  %v1943_v27 = vshrl.u32 %v13524_v37, 16  ;;  %2126 = vst [vmem:[#allocation2 + $0xa4] sm:$0x1] %v2125_v26  ;;  %v1946_v12 = vshll.u32 %v13524_v37, 16 }
 0x2fb   : > { %v2358_v5 = vsel %vm16606_vm11, %v2353_v50, %v2357_v1  ;;  %v2362_v29 = vrot.slane %v2360_v51, 4  ;;  %v2365_v17 = vrot.slane %v2363_v23, 5  ;;  %14267 = vmatpush3.bf16.msra.mxu0 %v15708_v35  ;;  %v2373_v21 = vshrl.u32 %v16848_v62, 16  ;;  %v16868_v35 = vld [vmem:[#allocation2 + $0x54] sm:$0xf] }
 0x2fc   : > { %v12932_v42 = vcombine.low %v2348_v46, %v2358_v5  ;;  %v1920_v45 = vrot.slane %v1918_v24, 7  ;;  %v1945_v28 = vrot.slane %v1943_v27, 7  ;;  %14300 = vmatprep.subr.bf16.mxu0 %v16852_v20  ;;  %v2379_v30 = vshll.u32 %v16850_v63, 16  ;;  %v2127_v26 = vld [vmem:[#allocation2 + $0xa8] sm:$0xf] }
 0x2fd   : > { %v2366_v57 = vor.u32 %v2365_v17, %v2362_v29  ;;  %v1352_v39 = vadd.f32 %v16651_v2, %v16780_v25  ;;  %v2371_v56 = vrot.slane %v2369_v60, 5  ;;  %v2375_v52 = vrot.slane %v2373_v21, 4  ;;  %v16891_v29 = vld [vmem:[#allocation2 + $0x60] sm:$0xf]  ;;  %v16895_v21 = vld [vmem:[#allocation2 + $0x64] sm:$0xf] }
 0x2fe   : > { %14229 = vmatmul.mubr.bf16.gmra.mrb[48].mxu0 %v12932_v42  ;;  %v1923_v32 = vor.u32 %v1921_v58, %v1920_v45  ;;  %v1924_v53 = vrot.slane %v1920_v45, 4  ;;  %v1948_v33 = vor.u32 %v1946_v12, %v1945_v28  ;;  %v1950_v49 = vrot.slane %v1945_v28, 4 }
 0x2ff   : > { %v2367_v54 = vrot.slane %v2366_v57, 4  ;;  %v2381_v59 = vrot.slane %v2379_v30, 5  ;;  %v13523_v25 = vpack.c.bf16 %v1352_v39, %v1352_v39  ;;  %v2376_v43 = vor.u32 %v2375_v52, %v2371_v56 }
 0x300   : > { %v1932_v1 = vsel %vm16676_vm14, %v1924_v53, %v1931_v15  ;;  %v2121_v4 = vsel %vm16671_vm13, %v1923_v32, %v2120_v38  ;;  %v2132_v2 = vsel %vm16538_vm8, %v1950_v49, %v2131_v31  ;;  %v1367_v9 = vadd.f32 %v16657_v8, %v16787_v61  ;;  %v2138_v32 = vld [vmem:[#allocation2 + $0xbc] sm:$0x1] }
 0x301   : > { %2122 = vst [vmem:[#allocation2 + $0x9c] sm:$0xf] %v2121_v4  ;;  %2123 = vst [vmem:[#allocation2 + $0xa0] sm:$0xf] %v1932_v1  ;;  %v2372_v40 = vsel %vm16606_vm11, %v2367_v54, %v2371_v56  ;;  %v2384_v55 = vshrl.u32 %v16868_v35, 16  ;;  %v1935_v14 = vshrl.u32 %v13523_v25, 16  ;;  %v1362_v57 = vadd.f32 %v16661_v13, %v16791_v10 }
 0x302   : > { %2133 = vst [vmem:[#allocation2 + $0xb0] sm:$0x1] %v2132_v2  ;;  %v1938_v15 = vshll.u32 %v13523_v25, 16  ;;  %v2387_v19 = vshll.u32 %v16868_v35, 16  ;;  %v2393_v48 = vshll.u32 %v16870_v36, 16  ;;  %v2377_v37 = vrot.slane %v2376_v43, 4 }
 0x303   : > { %v13526_v46 = vpack.c.bf16 %v1367_v9, %v1367_v9  ;;  %v2386_v50 = vrot.slane %v2384_v55, 4  ;;  %v2397_v51 = vshrl.u32 %v16870_v36, 16  ;;  %v1937_v23 = vrot.slane %v1935_v14, 7  ;;  %v16902_v13 = vld [vmem:[#allocation2 + $0x68] sm:$0x1] }
 0x304   : > { %v2389_v24 = vrot.slane %v2387_v19, 5  ;;  %v2395_v58 = vrot.slane %v2393_v48, 5  ;;  %v2403_v8 = vshll.u32 %v16882_v41, 16  ;;  %v2382_v61 = vsel %vm16606_vm11, %v2377_v37, %v2381_v59  ;;  %v16904_v10 = vld [vmem:[#allocation2 + $0x6c] sm:$0xf] }
 0x305   : > { %v1960_v27 = vshrl.u32 %v13526_v46, 16  ;;  %v1963_v5 = vshll.u32 %v13526_v46, 16  ;;  %v2399_v12 = vrot.slane %v2397_v51, 4  ;;  %v12933_v17 = vcombine.low %v2372_v40, %v2382_v61  ;;  %v16914_v55 = vld [vmem:[#allocation2 + $0x70] sm:$0xf] }
 0x306   : > { %v1940_v42 = vor.u32 %v1938_v15, %v1937_v23  ;;  %v1941_v45 = vrot.slane %v1937_v23, 4  ;;  %v2390_v28 = vor.u32 %v2389_v24, %v2386_v50  ;;  %v2405_v31 = vrot.slane %v2403_v8, 5  ;;  %v2134_v46 = vld [vmem:[#allocation2 + $0xb4] sm:$0xf] }
 0x307   : > { %v1962_v60 = vrot.slane %v1960_v27, 7  ;;  %v2400_v38 = vor.u32 %v2399_v12, %v2395_v58  ;;  %14232 = vmatprep.mubr.bf16.mxu0 %v12933_v17  ;;  %v2408_v49 = vshrl.u32 %v16891_v29, 16  ;;  %v13525_v59 = vpack.c.bf16 %v1362_v57, %v1362_v57 }
 0x308   : > { %v1949_v30 = vsel %vm16676_vm14, %v1941_v45, %v1948_v33  ;;  %v2128_v39 = vsel %vm16671_vm13, %v1940_v42, %v2127_v26  ;;  %v2391_v53 = vrot.slane %v2390_v28, 4  ;;  %v2411_v4 = vshll.u32 %v16891_v29, 16  ;;  %v16924_v42 = vld [vmem:[#allocation2 + $0x78] sm:$0xf] }
 0x309   : > { %2129 = vst [vmem:[#allocation2 + $0xa8] sm:$0xf] %v2128_v39  ;;  %2130 = vst [vmem:[#allocation2 + $0xac] sm:$0xf] %v1949_v30  ;;  %v1965_v54 = vor.u32 %v1963_v5, %v1962_v60  ;;  %v1967_v56 = vrot.slane %v1962_v60, 4  ;;  %v2401_v52 = vrot.slane %v2400_v38, 4 }
 0x30a   : > { %v2396_v33 = vsel %vm16606_vm11, %v2391_v53, %v2395_v58  ;;  %v2410_v1 = vrot.slane %v2408_v49, 4  ;;  %v2417_v2 = vshll.u32 %v16895_v21, 16  ;;  %v1952_v43 = vshrl.u32 %v13525_v59, 16  ;;  %v16920_v58 = vld [vmem:[#allocation2 + $0x74] sm:$0x1] }
 0x30b   : > { %v2139_v25 = vsel %vm16538_vm8, %v1967_v56, %v2138_v32  ;;  %v2406_v40 = vsel %vm16606_vm11, %v2401_v52, %v2405_v31  ;;  %v1955_v9 = vshll.u32 %v13525_v59, 16  ;;  %v2413_v15 = vrot.slane %v2411_v4, 5  ;;  %v16926_v31 = vld [vmem:[#allocation2 + $0x7c] sm:$0xf]  ;;  %v16933_v53 = vld [vmem:[#allocation2 + $0x80] sm:$0x1] }
 0x30c   : > { %2140 = vst [vmem:[#allocation2 + $0xbc] sm:$0x1] %v2139_v25  ;;  %v12934_v14 = vcombine.low %v2396_v33, %v2406_v40  ;;  %v2419_v19 = vrot.slane %v2417_v2, 5  ;;  %v2421_v48 = vshrl.u32 %v16895_v21, 16  ;;  %v1954_v37 = vrot.slane %v1952_v43, 7 }
 0x30d   : > { %v2427_v50 = vshll.u32 %v16902_v13, 16  ;;  %v2432_v51 = vshrl.u32 %v16904_v10, 16  ;;  %v2435_v23 = vshll.u32 %v16904_v10, 16  ;;  %v2414_v26 = vor.u32 %v2413_v15, %v2410_v1  ;;  %v16940_v2 = vld [vmem:[#allocation2 + $0x84] sm:$0xf] }
 0x30e   : > { %14233 = vmatmul.mubr.bf16.gmra.mrb[52].mxu0 %v12934_v14  ;;  %v2423_v24 = vrot.slane %v2421_v48, 4  ;;  %v2441_v8 = vshll.u32 %v16914_v55, 16  ;;  %v2445_v61 = vshrl.u32 %v16914_v55, 16  ;;  %v1957_v27 = vor.u32 %v1955_v9, %v1954_v37  ;;  %v16945_v14 = vld [vmem:[#allocation2 + $0x88] sm:$0xf] }
 0x30f   : > { %v1958_v5 = vrot.slane %v1954_v37, 4  ;;  %v2429_v12 = vrot.slane %v2427_v50, 5  ;;  %v2434_v17 = vrot.slane %v2432_v51, 4  ;;  %v2415_v45 = vrot.slane %v2414_v26, 4 }
 0x310   : > { %v2424_v28 = vor.u32 %v2423_v24, %v2419_v19  ;;  %v2437_v60 = vrot.slane %v2435_v23, 5  ;;  %v2443_v38 = vrot.slane %v2441_v8, 5  ;;  %v2135_v30 = vsel %vm16671_vm13, %v1957_v27, %v2134_v46  ;;  %v16953_v8 = vld [vmem:[#allocation2 + $0x8c] sm:$0x1] }
 0x311   : > { %v1966_v57 = vsel %vm16676_vm14, %v1958_v5, %v1965_v54  ;;  %v2447_v39 = vrot.slane %v2445_v61, 4  ;;  %v2451_v32 = vshll.u32 %v16920_v58, 16  ;;  %2136 = vst [vmem:[#allocation2 + $0xb4] sm:$0xf] %v2135_v30  ;;  %v2420_v49 = vsel %vm16606_vm11, %v2415_v45, %v2419_v19  ;;  %v16957_v5 = vld [vmem:[#allocation2 + $0x90] sm:$0xf] }
 0x312   : > { %2137 = vst [vmem:[#allocation2 + $0xb8] sm:$0xf] %v1966_v57  ;;  %v2425_v56 = vrot.slane %v2424_v28, 4  ;;  %v2438_v52 = vor.u32 %v2437_v60, %v2434_v17  ;;  %v2456_v59 = vshrl.u32 %v16924_v42, 16  ;;  %v2459_v54 = vshll.u32 %v16924_v42, 16 }
 0x313   : > { %v2448_v33 = vor.u32 %v2447_v39, %v2443_v38  ;;  %v2453_v1 = vrot.slane %v2451_v32, 5  ;;  %v2465_v4 = vshll.u32 %v16926_v31, 16  ;;  %v2469_v9 = vshrl.u32 %v16926_v31, 16  ;;  %v16959_v60 = vld [vmem:[#allocation2 + $0x94] sm:$0xf] }
 0x314   : > { %v2430_v25 = vsel %vm16606_vm11, %v2425_v56, %v2429_v12  ;;  %v2439_v40 = vrot.slane %v2438_v52, 4  ;;  %v2458_v43 = vrot.slane %v2456_v59, 4  ;;  %v2461_v48 = vrot.slane %v2459_v54, 5  ;;  %v16962_v32 = vld [vmem:[#allocation2 + $0x98] sm:$0x1] }
 0x315   : > { %v12935_v15 = vcombine.low %v2420_v49, %v2430_v25  ;;  %v2449_v19 = vrot.slane %v2448_v33, 4  ;;  %v2467_v37 = vrot.slane %v2465_v4, 5  ;;  %v2471_v50 = vrot.slane %v2469_v9, 4  ;;  %v16967_v33 = vld [vmem:[#allocation2 + $0x9c] sm:$0xf] }
 0x316   : > { %v2444_v46 = vsel %vm16606_vm11, %v2439_v40, %v2443_v38  ;;  %v2475_v51 = vshll.u32 %v16933_v53, 16  ;;  %v2480_v23 = vshrl.u32 %v16940_v2, 16  ;;  %v2462_v24 = vor.u32 %v2461_v48, %v2458_v43  ;;  %v16972_v40 = vld [vmem:[#allocation2 + $0xa0] sm:$0xf] }
 0x317   : > { %14236 = vmatprep.mubr.bf16.mxu0 %v12935_v15  ;;  %v2454_v26 = vsel %vm16606_vm11, %v2449_v19, %v2453_v1  ;;  %v2483_v61 = vshll.u32 %v16940_v2, 16  ;;  %v2489_v27 = vshll.u32 %v16945_v14, 16  ;;  %v2472_v17 = vor.u32 %v2471_v50, %v2467_v37 }
 0x318   : > { %v12936_v12 = vcombine.low %v2444_v46, %v2454_v26  ;;  %v2477_v45 = vrot.slane %v2475_v51, 5  ;;  %v2482_v28 = vrot.slane %v2480_v23, 4  ;;  %v2463_v38 = vrot.slane %v2462_v24, 4 }
 0x319   : > { %v2485_v57 = vrot.slane %v2483_v61, 5  ;;  %v2491_v30 = vrot.slane %v2489_v27, 5  ;;  %v2493_v39 = vshrl.u32 %v16945_v14, 16  ;;  %v2473_v49 = vrot.slane %v2472_v17, 4 }
 0x31a   : > { %14237 = vmatmul.mubr.bf16.gmra.mrb[56].mxu0 %v12936_v12  ;;  %v2499_v56 = vshll.u32 %v16953_v8, 16  ;;  %v2504_v52 = vshrl.u32 %v16957_v5, 16  ;;  %v2507_v59 = vshll.u32 %v16957_v5, 16  ;;  %v2468_v1 = vsel %vm16606_vm11, %v2463_v38, %v2467_v37  ;;  %v16981_v12 = vld [vmem:[#allocation2 + $0xa4] sm:$0x1] }
 0x31b   : > { %v2486_v54 = vor.u32 %v2485_v57, %v2482_v28  ;;  %v2495_v4 = vrot.slane %v2493_v39, 4  ;;  %v2513_v25 = vshll.u32 %v16959_v60, 16  ;;  %v2478_v43 = vsel %vm16606_vm11, %v2473_v49, %v2477_v45  ;;  %v16985_v49 = vld [vmem:[#allocation2 + $0xa8] sm:$0xf] }
 0x31c   : > { %v2501_v9 = vrot.slane %v2499_v56, 5  ;;  %v2506_v15 = vrot.slane %v2504_v52, 4  ;;  %v2509_v19 = vrot.slane %v2507_v59, 5  ;;  %v12937_v48 = vcombine.low %v2468_v1, %v2478_v43  ;;  %v16990_v1 = vld [vmem:[#allocation2 + $0xac] sm:$0xf] }
 0x31d   : > { %v2487_v46 = vrot.slane %v2486_v54, 4  ;;  %v2496_v50 = vor.u32 %v2495_v4, %v2491_v30  ;;  %v2515_v51 = vrot.slane %v2513_v25, 5  ;;  %v2517_v26 = vshrl.u32 %v16959_v60, 16 }
 0x31e   : > { %v2510_v23 = vor.u32 %v2509_v19, %v2506_v15  ;;  %v2523_v37 = vshll.u32 %v16962_v32, 16  ;;  %v2528_v24 = vshrl.u32 %v16967_v33, 16  ;;  %14240 = vmatprep.mubr.bf16.mxu0 %v12937_v48  ;;  %v2531_v17 = vshll.u32 %v16967_v33, 16  ;;  %v16995_v15 = vld [vmem:[#allocation2 + $0xb0] sm:$0x1] }
 0x31f   : > { %v2492_v61 = vsel %vm16606_vm11, %v2487_v46, %v2491_v30  ;;  %v2497_v27 = vrot.slane %v2496_v50, 4  ;;  %v2537_v45 = vshll.u32 %v16972_v40, 16  ;;  %v2519_v38 = vrot.slane %v2517_v26, 4 }
 0x320   : > { %v2511_v28 = vrot.slane %v2510_v23, 4  ;;  %v2525_v57 = vrot.slane %v2523_v37, 5  ;;  %v2530_v39 = vrot.slane %v2528_v24, 4  ;;  %v2533_v52 = vrot.slane %v2531_v17, 5  ;;  %v17001_v24 = vld [vmem:[#allocation2 + $0xb4] sm:$0xf] }
 0x321   : > { %v2502_v56 = vsel %vm16606_vm11, %v2497_v27, %v2501_v9  ;;  %v2539_v59 = vrot.slane %v2537_v45, 5  ;;  %v2541_v30 = vshrl.u32 %v16972_v40, 16  ;;  %v2520_v25 = vor.u32 %v2519_v38, %v2515_v51  ;;  %v17003_v45 = vld [vmem:[#allocation2 + $0xb8] sm:$0xf] }
 0x322   : > { %v12938_v54 = vcombine.low %v2492_v61, %v2502_v56  ;;  %v2516_v4 = vsel %vm16606_vm11, %v2511_v28, %v2515_v51  ;;  %v2547_v43 = vshll.u32 %v16981_v12, 16  ;;  %v2534_v19 = vor.u32 %v2533_v52, %v2530_v39  ;;  %v17008_v52 = vld [vmem:[#allocation2 + $0xbc] sm:$0x1] }
 0x323   : > { %v2543_v48 = vrot.slane %v2541_v30, 4  ;;  %v2552_v46 = vshrl.u32 %v16985_v49, 16  ;;  %v2555_v9 = vshll.u32 %v16985_v49, 16  ;;  %v2521_v50 = vrot.slane %v2520_v25, 4 }
 0x324   : > { %14241 = vmatmul.mubr.bf16.gmra.mrb[60].mxu0 %v12938_v54  ;;  %v2549_v23 = vrot.slane %v2547_v43, 5  ;;  %v2561_v26 = vshll.u32 %v16990_v1, 16  ;;  %v2565_v37 = vshrl.u32 %v16990_v1, 16  ;;  %v2535_v51 = vrot.slane %v2534_v19, 4 }
 0x325   : > { %v2544_v61 = vor.u32 %v2543_v48, %v2539_v59  ;;  %v2554_v27 = vrot.slane %v2552_v46, 4  ;;  %v2557_v17 = vrot.slane %v2555_v9, 5  ;;  %v2526_v28 = vsel %vm16606_vm11, %v2521_v50, %v2525_v57 }
 0x326   : > { %v2563_v38 = vrot.slane %v2561_v26, 5  ;;  %v2567_v39 = vrot.slane %v2565_v37, 4  ;;  %v2571_v56 = vshll.u32 %v16995_v15, 16  ;;  %v12939_v30 = vcombine.low %v2516_v4, %v2526_v28 }
 0x327   : > { %v2540_v54 = vsel %vm16606_vm11, %v2535_v51, %v2539_v59  ;;  %v2545_v25 = vrot.slane %v2544_v61, 4  ;;  %v2558_v43 = vor.u32 %v2557_v17, %v2554_v27  ;;  %v2576_v46 = vshrl.u32 %v17001_v24, 16 }
 0x328   : > { %v2568_v19 = vor.u32 %v2567_v39, %v2563_v38  ;;  %v2573_v48 = vrot.slane %v2571_v56, 5  ;;  %v2579_v9 = vshll.u32 %v17001_v24, 16  ;;  %14244 = vmatprep.mubr.bf16.mxu0 %v12939_v30  ;;  %v2585_v26 = vshll.u32 %v17003_v45, 16 }
 0x329   : > { %v2550_v57 = vsel %vm16606_vm11, %v2545_v25, %v2549_v23  ;;  %v2559_v50 = vrot.slane %v2558_v43, 4  ;;  %v2589_v4 = vshrl.u32 %v17003_v45, 16  ;;  %v2578_v59 = vrot.slane %v2576_v46, 4 }
 0x32a   : > { %v12940_v37 = vcombine.low %v2540_v54, %v2550_v57  ;;  %v2569_v28 = vrot.slane %v2568_v19, 4  ;;  %v2581_v51 = vrot.slane %v2579_v9, 5  ;;  %v2587_v27 = vrot.slane %v2585_v26, 5  ;;  %v15933_v54 = vld [vmem:[#allocation2] sm:$0xf] }
 0x32b   : > { %v2564_v61 = vsel %vm16606_vm11, %v2559_v50, %v2563_v38  ;;  %v2591_v17 = vrot.slane %v2589_v4, 4  ;;  %v2595_v39 = vshll.u32 %v17008_v52, 16  ;;  %v17023_v19 = vld [vmem:[#allocation2 + $0x4] sm:$0xf]  ;;  %v15720_v4 = vld [vmem:[#allocation4 + $0x98] sm:$0xff]   ;;  %v3320_v57 = vrot.slane %v16933_v53, 5 }
 0x32c   : > { %14245 = vmatmul.mubr.bf16.gmra.mrb[64].mxu0 %v12940_v37  ;;  %v2574_v23 = vsel %vm16606_vm11, %v2569_v28, %v2573_v48  ;;  %v2582_v56 = vor.u32 %v2581_v51, %v2578_v59  ;;  %v12951_v46 = vcombine.low %v15933_v54, %v17023_v19  ;;  %v17053_v54 = vld [vmem:[#allocation2 + $0x1c] sm:$0xf]  ;;  %v3292_v51 = vrot.slane %v16850_v63, 5  ;;  %v3203_v63 = vld [vmem:[#allocation2 + $0x6c] sm:$0xe]  ;;  %v14203_v38 = vpop.f32.mrb[30].mxu1 }
 0x32d   : > { %v12941_v30 = vcombine.low %v2564_v61, %v2574_v23  ;;  %v2592_v25 = vor.u32 %v2591_v17, %v2587_v27  ;;  %v2597_v34 = vrot.slane %v2595_v39, 5  ;;  %v3200_v39 = vld [vmem:[#allocation2 + $0x48] sm:$0xe]  ;;  %v3201_v23 = vld [vmem:[#allocation2 + $0x54] sm:$0xe]  ;;  %v3296_v28 = vrot.slane %v16870_v36, 5 }
 0x32e   : > { %v2583_v43 = vrot.slane %v2582_v56, 4  ;;  %v15935_v56 = vld [vmem:[#allocation2 + $0xc] sm:$0xf]  ;;  %v12981_v61 = vrot.slane %v3200_v39, 9  ;;  %v12955_v39 = vcombine.low %v16798_v16, %v16800_v18  ;;  %v3204_v37 = vld [vmem:[#allocation2 + $0x78] sm:$0xe] }
 0x32f   : > { %14248 = vmatprep.mubr.bf16.mxu0 %v12941_v30  ;;  %v2593_v9 = vrot.slane %v2592_v25, 4  ;;  %v17050_v30 = vld [vmem:[#allocation2 + $0x10] sm:$0xf]  ;;  %v3298_v18 = vrot.slane %v3296_v28, 4  ;;  %v3306_v48 = vrot.slane %v16902_v13, 5 }
 0x330   : > { %v2588_v26 = vsel %vm16606_vm11, %v2583_v43, %v2587_v27  ;;  %v12952_v25 = vcombine.low %v15935_v56, %v17050_v30  ;;  %v15937_v43 = vld [vmem:[#allocation2 + $0x18] sm:$0xf] }
 0x331   : > { %v2598_v59 = vsel %vm16606_vm11, %v2593_v9, %v2597_v34  ;;  %v15714_v34 = vld [vmem:[#allocation4 + $0x88] sm:$0xff]   ;;  %v12953_v9 = vcombine.low %v15937_v43, %v17053_v54 }
 0x332   : > { %v12942_v17 = vcombine.low %v2588_v26, %v2598_v59  ;;  %v3289_v26 = vrot.slane %v16848_v62, 5  ;;  %v3202_v59 = vld [vmem:[#allocation2 + $0x60] sm:$0xe] }
 0x334   : > { %14249 = vmatmul.mubr.bf16.gmra.mrb[68].mxu0 %v12942_v17  ;;  %v15939_v17 = vld [vmem:[#allocation2 + $0x24] sm:$0xf]  ;;  %v3291_v27 = vrot.slane %v3289_v26, 4 }
 0x335   : > { %14268 = vmatprep.mubr.bf16.mxu0 %v12951_v46  ;;  %v12982_v46 = vrot.slane %v3201_v23, 9  ;;  %v12954_v56 = vcombine.low %v15939_v17, %v16778_v22  ;;  %v12983_v22 = vrot.slane %v3202_v59, 9  ;;  %v3303_v23 = vrot.slane %v16895_v21, 5 }
 0x336   : > { %v17078_v16 = vsel %vm17067_vm1, %v3291_v27, %v3292_v51  ;;  %v3299_v17 = vrot.slane %v16882_v41, 5  ;;  %v12984_v41 = vrot.slane %v3203_v63, 9  ;;  %v3310_v27 = vrot.slane %v16914_v55, 5 }
 0x337   : > { %v17085_v59 = vsel %vm17067_vm1, %v12982_v46, %v3296_v28  ;;  %v3305_v50 = vrot.slane %v3303_v23, 4  ;;  %v17094_v51 = vsel %vm17067_vm1, %v12983_v22, %v3303_v23  ;;  %v3317_v46 = vrot.slane %v16926_v31, 5 }
 0x338   : > { %v17108_v23 = vsel %vm17067_vm1, %v12984_v41, %v3310_v27  ;;  %v3312_v63 = vrot.slane %v3310_v27, 4  ;;  %v3207_v27 = vld [vmem:[#allocation2 + $0x9c] sm:$0xe] }
 0x339   : > { %v17101_v13 = vsel %vm17067_vm1, %v3305_v50, %v3306_v48  ;;  %v3319_v28 = vrot.slane %v3317_v46, 4  ;;  %v3324_v50 = vrot.slane %v16945_v14, 5 }
 0x33a   : > { %20258 = vst [vmem:[#allocation25_spill] sm:$0xff] %v17101_v13  ;;  %v3334_v13 = vrot.slane %v16962_v32, 5 }
 0x33c   : > { %14269 = vmatmul.mubr.bf16.vlgmr.msra.gmra.mrb[40].mxu0 %v12952_v25  ;;  %v15717_v25 = vld [vmem:[#allocation4 + $0x90] sm:$0xff]  }
 0x33d   : > { %14272 = vmatprep.mubr.bf16.mxu0 %v12953_v9  ;;  %14301 = vmatpush3.bf16.msra.mxu0 %v16852_v20  ;;  %v20255_v20 = vmov 0  ;;  %v17074_v9 = vsel %vm17067_vm1, %v12981_v61, %v3289_v26  ;;  %v17090_v61 = vsel %vm17067_vm1, %v3298_v18, %v3299_v17  ;;  %v3205_v26 = vld [vmem:[#allocation2 + $0x84] sm:$0xe]  ;;  %v3206_v18 = vld [vmem:[#allocation2 + $0x90] sm:$0xe]  ;;  %v3313_v17 = vrot.slane %v16920_v58, 5 }
 0x33e   : > { %14302 = vmatprep.subr.bf16.mxu0 %v15714_v34  ;;  %v20256_v20 = vsel %vm17067_vm1, 4294967295, %v20255_v20  ;;  %v12986_v48 = vrot.slane %v3205_v26, 9  ;;  %v12987_v58 = vrot.slane %v3206_v18, 9  ;;  %v15723_v26 = vld [vmem:[#allocation4 + $0xa0] sm:$0xff]  }
 0x33f   : > { %20257 = vst [vmem:[#allocation24_spill] sm:$0xff] %v20256_v20  ;;  %v17115_v22 = vsel %vm17067_vm1, %v3312_v63, %v3313_v17  ;;  %v3327_v63 = vrot.slane %v16953_v8, 5  ;;  %v3208_v17 = vld [vmem:[#allocation2 + $0xa8] sm:$0xe]  ;;  %v12988_v8 = vrot.slane %v3207_v27, 9  ;;  %v3341_v27 = vrot.slane %v16981_v12, 5 }
 0x340   : > { %20259 = vst [vmem:[#allocation26_spill] sm:$0xff] %v17115_v22  ;;  %v17133_v18 = vsel %vm17067_vm1, %v12986_v48, %v3324_v50  ;;  %v3209_v22 = vld [vmem:[#allocation2 + $0xb4] sm:$0xe]  ;;  %v12989_v32 = vrot.slane %v3208_v17, 9  ;;  %v3352_v17 = vrot.slane %v17003_v45, 5 }
 0x341   : > { %14303 = vmatpush3.bf16.msra.mxu0 %v15714_v34  ;;  %v12985_v34 = vrot.slane %v3204_v37, 9  ;;  %v14153_v37 = vpop.f32.mrb[38].mxu0  ;;  %20260 = vst [vmem:[#allocation27_spill] sm:$0xff] %v17133_v18  ;;  %v20262_v18 = vcombine.low %v16818_v11, %v16824_v3 }
 0x342   : > { %14304 = vmatprep.subr.bf16.mxu0 %v15717_v25  ;;  %v976_v53 = vpop.f32.mrb[39].mxu0  ;;  %v1377_v12 = vadd.f32 %v14203_v38, %v14153_v37  ;;  %v15729_v38 = vld [vmem:[#allocation4 + $0xb0] sm:$0xff]   ;;  %v17409_v37 = vld [vmem:[#allocation2 + $0x98] sm:$0x1] }
 0x343   : > { %v17119_v41 = vsel %vm17067_vm1, %v12985_v34, %v3317_v46  ;;  %v1371_v34 = vpop.f32.mrb[31].mxu1  ;;  %v15726_v46 = vld [vmem:[#allocation4 + $0xa8] sm:$0xff]  }
 0x344   : > { %14273 = vmatmul.mubr.bf16.gmra.mrb[44].mxu0 %v12954_v56  ;;  %v3331_v56 = vrot.slane %v16959_v60, 5 }
 0x345   : > { %14276 = vmatprep.mubr.bf16.mxu0 %v12955_v39  ;;  %14305 = vmatpush3.bf16.msra.mxu0 %v15717_v25  ;;  %v17126_v39 = vsel %vm17067_vm1, %v3319_v28, %v3320_v57  ;;  %v3326_v25 = vrot.slane %v3324_v50, 4  ;;  %v3338_v28 = vrot.slane %v16972_v40, 5 }
 0x346   : > { %14306 = vmatprep.subr.bf16.mxu0 %v15720_v4  ;;  %v3333_v6 = vrot.slane %v3331_v56, 4  ;;  %v17142_v57 = vsel %vm17067_vm1, %v12987_v58, %v3331_v56 }
 0x347   : > { %v17138_v43 = vsel %vm17067_vm1, %v3326_v25, %v3327_v63  ;;  %v3345_v25 = vrot.slane %v16990_v1, 5  ;;  %v1510_v63 = vld [vmem:[#allocation2 + $0xc8] sm:$0x1]  ;;  %v17156_v56 = vsel %vm17067_vm1, %v12988_v8, %v3338_v28 }
 0x348   : > { %20261 = vst [vmem:[#allocation28_spill] sm:$0xff] %v17138_v43  ;;  %v17149_v50 = vsel %vm17067_vm1, %v3333_v6, %v3334_v13  ;;  %v3348_v6 = vrot.slane %v16995_v15, 5  ;;  %v12990_v13 = vrot.slane %v3209_v22, 9  ;;  %v1454_v43 = vld [vmem:[#allocation2 + $0xc0] sm:$0x1]  ;;  %v1511_v15 = vsel %vm16531_vm7, 0, %v1510_v63 }
 0x349   : > { %14307 = vmatpush3.bf16.msra.mxu0 %v15720_v4  ;;  %v3340_v4 = vrot.slane %v3338_v28, 4  ;;  %v3347_v48 = vrot.slane %v3345_v25, 4  ;;  %v17170_v8 = vsel %vm17067_vm1, %v12989_v32, %v3345_v25  ;;  %v20263_v22 = vcombine.low %v16842_v7, %v16848_v62  ;;  %1512 = vst [vmem:[#allocation2 + $0xc8] sm:$0x1] %v1511_v15  ;;  %v20296_v0 = vld [vmem:[#allocation27_spill] sm:$0xff] }
 0x34a   : > { %14308 = vmatprep.subr.bf16.mxu0 %v15723_v26  ;;  %v3355_v28 = vrot.slane %v17008_v52, 5  ;;  %v13528_v32 = vpack.c.bf16 %v1377_v12, %v1377_v12  ;;  %v1372_v7 = vadd.f32 %v1371_v34, %v976_v53  ;;  %v1455_v62 = vsel %vm16538_vm8, 0, %v1454_v43  ;;  %v15732_v53 = vld [vmem:[#allocation4 + $0xb8] sm:$0xff]  }
 0x34b   : > { %v17166_v58 = vsel %vm17067_vm1, %v3340_v4, %v3341_v27  ;;  %v17181_v3 = vsel %vm17067_vm1, %v3347_v48, %v3348_v6  ;;  %1456 = vst [vmem:[#allocation2 + $0xc0] sm:$0x1] %v1455_v62  ;;  %v20264_v6 = vcombine.low %v16868_v35, %v16870_v36  ;;  %v17400_v52 = vld [vmem:[#allocation2 + $0x8c] sm:$0x1] }
 0x34c   : > { %14277 = vmatmul.mubr.bf16.gmra.mrb[48].mxu0 %v20262_v18  ;;  %v3354_v18 = vrot.slane %v3352_v17, 4  ;;  %v1977_v25 = vshrl.u32 %v13528_v32, 16  ;;  %v1980_v63 = vshll.u32 %v13528_v32, 16  ;;  %v13527_v4 = vpack.c.bf16 %v1372_v7, %v1372_v7 }
 0x34d   : > { %14280 = vmatprep.mubr.bf16.mxu0 %v20263_v22  ;;  %14309 = vmatpush3.bf16.msra.mxu0 %v15723_v26  ;;  %v17190_v26 = vsel %vm17067_vm1, %v12990_v13, %v3352_v17  ;;  %v20265_v22 = vcombine.low %v16891_v29, %v16895_v21  ;;  %v20267_v29 = vcombine.low %v16904_v10, %v16914_v55 }
 0x34e   : > { %14310 = vmatprep.subr.bf16.mxu0 %v15726_v46  ;;  %v17194_v48 = vsel %vm17067_vm1, %v3354_v18, %v3355_v28  ;;  %v1979_v34 = vrot.slane %v1977_v25, 7  ;;  %v1969_v43 = vshrl.u32 %v13527_v4, 16  ;;  %v1972_v27 = vshll.u32 %v13527_v4, 16  ;;  %v3194_v4 = vld [vmem:[#allocation2] sm:$0xe] }
 0x34f   : > { %v20268_v21 = vcombine.low %v16924_v42, %v16926_v31  ;;  %v20270_v25 = vcombine.low %v16957_v5, %v16959_v60  ;;  %v20271_v55 = vcombine.low %v16967_v33, %v16972_v40  ;;  %v20272_v42 = vcombine.low %v16985_v49, %v16990_v1  ;;  %v15941_v1 = vld [vmem:[#allocation2 + $0x14] sm:$0x1]  ;;  %v20297_v36 = vld [vmem:[#allocation28_spill] sm:$0xff] }
 0x350   : > { %v1982_v13 = vor.u32 %v1980_v63, %v1979_v34  ;;  %v1984_v17 = vrot.slane %v1979_v34, 4  ;;  %v2145_v12 = vld [vmem:[#allocation2 + $0xc8] sm:$0x1]  ;;  %v1971_v15 = vrot.slane %v1969_v43, 7  ;;  %v3247_v63 = vrot.slane %v17023_v19, 5 }
 0x351   : > { %14311 = vmatpush3.bf16.msra.mxu0 %v15726_v46  ;;  %v15733_v46 = vld [vmem:[#allocation4 + $0xc0] sm:$0xff]   ;;  %v15940_v43 = vld [vmem:[#allocation2 + $0x8] sm:$0x1]  ;;  %v3261_v5 = vrot.slane %v17053_v54, 5  ;;  %v3195_v19 = vld [vmem:[#allocation2 + $0xc] sm:$0xe]  ;;  %v20273_v33 = vcombine.low %v17001_v24, %v17003_v45  ;;  %v20298_v44 = vcombine.low %v20296_v0, %v20297_v36 }
 0x352   : > { %14312 = vmatprep.subr.bf16.mxu0 %v15729_v38  ;;  %v2146_v18 = vsel %vm16538_vm8, %v1984_v17, %v2145_v12  ;;  %v1974_v28 = vor.u32 %v1972_v27, %v1971_v15  ;;  %v1975_v32 = vrot.slane %v1971_v15, 4  ;;  %v2141_v7 = vld [vmem:[#allocation2 + $0xc0] sm:$0xf]  ;;  %v3249_v34 = vrot.slane %v3247_v63, 4  ;;  %v15943_v54 = vld [vmem:[#allocation2 + $0x28] sm:$0xf] }
 0x353   : > { %2147 = vst [vmem:[#allocation2 + $0xc8] sm:$0x1] %v2146_v18  ;;  %v3250_v10 = vrot.slane %v15940_v43, 5  ;;  %v3263_v40 = vrot.slane %v3261_v5, 4  ;;  %v12976_v49 = vrot.slane %v3195_v19, 9 }
 0x354   : > { %14281 = vmatmul.mubr.bf16.gmra.mrb[52].mxu0 %v20264_v6  ;;  %v1983_v35 = vsel %vm16676_vm14, %v1975_v32, %v1982_v13  ;;  %v2142_v62 = vsel %vm16671_vm13, %v1974_v28, %v2141_v7  ;;  %v3196_v6 = vld [vmem:[#allocation2 + $0x18] sm:$0xe]  ;;  %v3257_v13 = vrot.slane %v15941_v1, 5  ;;  %v15942_v12 = vld [vmem:[#allocation2 + $0x20] sm:$0x1] }
 0x355   : > { %14284 = vmatprep.mubr.bf16.mxu0 %v20265_v22  ;;  %14313 = vmatpush3.bf16.msra.mxu0 %v15729_v38  ;;  %2143 = vst [vmem:[#allocation2 + $0xc0] sm:$0xf] %v2142_v62  ;;  %2144 = vst [vmem:[#allocation2 + $0xc4] sm:$0xf] %v1983_v35  ;;  %v20269_v38 = vcombine.low %v16940_v2, %v16945_v14  ;;  %v3251_v2 = vsel %vm17067_vm1, %v3249_v34, %v3250_v10  ;;  %v3254_v14 = vrot.slane %v17050_v30, 5  ;;  %v15734_v62 = vld [vmem:[#allocation4 + $0xc8] sm:$0xff]  }
 0x356   : > { %14314 = vmatprep.subr.bf16.mxu0 %v15732_v53  ;;  %v12977_v17 = vrot.slane %v3196_v6, 9  ;;  %v3264_v15 = vrot.slane %v15942_v12, 5  ;;  %v3268_v22 = vrot.slane %v15943_v54, 5  ;;  %v15944_v28 = vld [vmem:[#allocation2 + $0x34] sm:$0xf]  ;;  %v20274_v54 = vcombine.low %v17074_v9, %v17078_v16 }
 0x357   : > { %v3256_v27 = vrot.slane %v3254_v14, 4  ;;  %v3275_v32 = vrot.slane %v15944_v28, 5  ;;  %v3255_v24 = vsel %vm17067_vm1, %v12976_v49, %v3254_v14  ;;  %v3197_v35 = vld [vmem:[#allocation2 + $0x24] sm:$0xe]  ;;  %v15946_v43 = vld [vmem:[#allocation2 + $0x38] sm:$0x1] }
 0x358   : > { %v3265_v18 = vsel %vm17067_vm1, %v3263_v40, %v3264_v15  ;;  %v3262_v7 = vsel %vm17067_vm1, %v12977_v17, %v3261_v5  ;;  %v3278_v10 = vrot.slane %v15946_v43, 5  ;;  %v3199_v19 = vld [vmem:[#allocation2 + $0x3c] sm:$0xe]  ;;  %v15948_v49 = vld [vmem:[#allocation2 + $0x44] sm:$0x1] }
 0x359   : > { %14315 = vmatpush3.bf16.msra.mxu0 %v15732_v53  ;;  %v12975_v53 = vrot.slane %v3194_v4, 9  ;;  %v3258_v30 = vsel %vm17067_vm1, %v3256_v27, %v3257_v13  ;;  %v15945_v4 = vld [vmem:[#allocation2 + $0x2c] sm:$0x1]  ;;  %v12980_v40 = vrot.slane %v3199_v19, 9  ;;  %v3285_v1 = vrot.slane %v15948_v49, 5  ;;  %v15737_v13 = vld [vmem:[#allocation4 + $0xe0] sm:$0xff]  }
 0x35a   : > { %14348 = vmatprep.subr.bf16.mxu0 %v15733_v46  ;;  %v12992_v45 = vcombine.low %v3255_v24, %v3258_v30  ;;  %v15736_v27 = vld [vmem:[#allocation4 + $0xd8] sm:$0xff]   ;;  %v15738_v30 = vld [vmem:[#allocation4 + $0xe8] sm:$0xff]   ;;  %v4821_v24 = vld [vmem:[#allocation2 + $0x24] sm:$0xe] }
 0x35b   : > { %v3248_v31 = vsel %vm17067_vm1, %v12975_v53, %v3247_v63  ;;  %v12978_v63 = vrot.slane %v3197_v35, 9  ;;  %v3271_v53 = vrot.slane %v15945_v4, 5  ;;  %v4820_v28 = vld [vmem:[#allocation2 + $0x18] sm:$0xe]  ;;  %v17267_v35 = vld [vmem:[#allocation2 + $0x2c] sm:$0x1] }
 0x35c   : > { %14285 = vmatmul.mubr.bf16.gmra.mrb[56].mxu0 %v20267_v29  ;;  %v12991_v60 = vcombine.low %v3248_v31, %v3251_v2  ;;  %v12993_v29 = vcombine.low %v3262_v7, %v3265_v18  ;;  %v15947_v31 = vld [vmem:[#allocation2 + $0x40] sm:$0xf]  ;;  %v17261_v18 = vld [vmem:[#allocation2 + $0x1c] sm:$0xf]  ;;  %v13064_v9 = vrot.slane %v4820_v28, 9 }
 0x35d   : > { %14288 = vmatprep.mubr.bf16.mxu0 %v20268_v21  ;;  %v3270_v21 = vrot.slane %v3268_v22, 4  ;;  %v3282_v2 = vrot.slane %v15947_v31, 5  ;;  %v3269_v5 = vsel %vm17067_vm1, %v12978_v63, %v3268_v22  ;;  %v15739_v22 = vld [vmem:[#allocation4 + $0xf0] sm:$0xff]   ;;  %v4892_v16 = vrot.slane %v17261_v18, 5  ;;  %v4822_v4 = vld [vmem:[#allocation2 + $0x30] sm:$0xe] }
 0x35e   : > { %v17265_v7 = vld [vmem:[#allocation2 + $0x20] sm:$0x1]  ;;  %v17283_v43 = vld [vmem:[#allocation2 + $0x44] sm:$0x1]  ;;  %v4824_v19 = vld [vmem:[#allocation2 + $0x48] sm:$0xe] }
 0x35f   : > { %v3283_v12 = vsel %vm17067_vm1, %v12980_v40, %v3282_v2  ;;  %v13068_v28 = vrot.slane %v4824_v19, 9  ;;  %v17430_v0 = vld [vmem:[#allocation2 + $0xac] sm:$0xf] }
 0x364   : > { %14289 = vmatmul.mubr.bf16.gmra.mrb[60].mxu0 %v20269_v38  ;;  %v3198_v38 = vld [vmem:[#allocation2 + $0x30] sm:$0xe] }
 0x365   : > { %14292 = vmatprep.mubr.bf16.mxu0 %v20270_v25  ;;  %v3277_v25 = vrot.slane %v3275_v32, 4  ;;  %v12979_v34 = vrot.slane %v3198_v38, 9  ;;  %v17277_v38 = vld [vmem:[#allocation2 + $0x40] sm:$0xf] }
 0x367   : > { %v3279_v14 = vsel %vm17067_vm1, %v3277_v25, %v3278_v10  ;;  %v13065_v25 = vrot.slane %v4821_v24, 9  ;;  %v4894_v10 = vrot.slane %v4892_v16, 4 }
 0x36c   : > { %14293 = vmatmul.mubr.bf16.gmra.mrb[64].mxu0 %v20271_v55  ;;  %v15735_v55 = vld [vmem:[#allocation4 + $0xd0] sm:$0xff]  }
 0x36d   : > { %14296 = vmatprep.mubr.bf16.mxu0 %v20272_v42  ;;  %v3272_v42 = vsel %vm17067_vm1, %v3270_v21, %v3271_v53  ;;  %v17275_v21 = vld [vmem:[#allocation2 + $0x38] sm:$0x1]  ;;  %v20276_v53 = vld [vmem:[#allocation25_spill] sm:$0xff] }
 0x374   : > { %14297 = vmatmul.mubr.bf16.gmra.mrb[68].mxu0 %v20273_v33  ;;  %v3284_v33 = vrot.slane %v3282_v2, 4  ;;  %v4902_v2 = vrot.slane %v17267_v35, 5 }
 0x375   : > { %14316 = vmatprep.mubr.bf16.mxu0 %v12991_v60  ;;  %v3276_v60 = vsel %vm17067_vm1, %v12979_v34, %v3275_v32  ;;  %v17263_v32 = vld [vmem:[#allocation2 + $0x28] sm:$0xf]  ;;  %v20277_v34 = vcombine.low %v17094_v51, %v20276_v53  ;;  %v17295_v51 = vsel %vm17067_vm1, %v13064_v9, %v4892_v16  ;;  %v17327_v9 = vld [vmem:[#allocation2 + $0x5c] sm:$0x1] }
 0x376   : > { %v12995_v6 = vcombine.low %v3276_v60, %v3279_v14  ;;  %v3286_v17 = vsel %vm17067_vm1, %v3284_v33, %v3285_v1  ;;  %v4899_v63 = vrot.slane %v17263_v32, 5  ;;  %v17291_v14 = vld [vmem:[#allocation2 + $0x50] sm:$0x1]  ;;  %20278 = vst [vmem:[#allocation25_spill] sm:$0xff] %v17295_v51  ;;  %v4825_v1 = vld [vmem:[#allocation2 + $0x54] sm:$0xe] }
 0x377   : > { %v12996_v15 = vcombine.low %v3283_v12, %v3286_v17  ;;  %v17391_v17 = vld [vmem:[#allocation2 + $0x94] sm:$0xf]  ;;  %v6460_v51 = vld [vmem:[#allocation2 + $0x30] sm:$0xe] }
 0x378   : > { %v4901_v31 = vrot.slane %v4899_v63, 4  ;;  %v17308_v33 = vsel %vm17067_vm1, %v13065_v25, %v4899_v63  ;;  %v4923_v25 = vrot.slane %v17291_v14, 5  ;;  %v13069_v63 = vrot.slane %v4825_v1, 9  ;;  %v4827_v1 = vld [vmem:[#allocation2 + $0x6c] sm:$0xe] }
 0x379   : > { %20280 = vst [vmem:[#allocation30_spill] sm:$0xff] %v17308_v33 }
 0x37a   : > { %v17312_v40 = vsel %vm17067_vm1, %v4901_v31, %v4902_v2  ;;  %v20287_v2 = vcombine.low %v17119_v41, %v17126_v39  ;;  %v13071_v41 = vrot.slane %v4827_v1, 9 }
 0x37b   : > { %20281 = vst [vmem:[#allocation31_spill] sm:$0xff] %v17312_v40 }
 0x37c   : > { %14317 = vmatmul.mubr.bf16.vlgmr.msra.gmra.mrb[40].mxu0 %v12992_v45  ;;  %v15740_v45 = vld [vmem:[#allocation4 + $0xf8] sm:$0xff]  }
 0x37d   : > { %14320 = vmatprep.mubr.bf16.mxu0 %v12993_v29  ;;  %14349 = vmatpush3.bf16.msra.mxu0 %v15733_v46  ;;  %v12994_v46 = vcombine.low %v3269_v5, %v3272_v42  ;;  %v20275_v29 = vcombine.low %v17085_v59, %v17090_v61  ;;  %v4823_v59 = vld [vmem:[#allocation2 + $0x3c] sm:$0xe]  ;;  %v17286_v61 = vld [vmem:[#allocation4 + $0x100] sm:$0xff]   ;;  %v17288_v42 = vld [vmem:[#allocation2 + $0x4c] sm:$0xf] }
 0x37e   : > { %14350 = vmatprep.subr.bf16.mxu0 %v15734_v62  ;;  %v13067_v49 = vrot.slane %v4823_v59, 9  ;;  %v4920_v24 = vrot.slane %v17288_v42, 5 }
 0x380   : > { %v4922_v59 = vrot.slane %v4920_v24, 4 }
 0x381   : > { %14351 = vmatpush3.bf16.msra.mxu0 %v15734_v62  ;;  %v17269_v62 = vld [vmem:[#allocation2 + $0x34] sm:$0xf] }
 0x382   : > { %14352 = vmatprep.subr.bf16.mxu0 %v15735_v55  ;;  %v4906_v60 = vrot.slane %v17269_v62, 5  ;;  %v17366_v39 = vsel %vm17067_vm1, %v4922_v59, %v4923_v25  ;;  %v17380_v25 = vld [vmem:[#allocation2 + $0x88] sm:$0xf] }
 0x383   : > { %20290 = vst [vmem:[#allocation36_spill] sm:$0xff] %v17366_v39  ;;  %v4955_v11 = vrot.slane %v17380_v25, 5 }
 0x384   : > { %14321 = vmatmul.mubr.bf16.gmra.mrb[44].mxu0 %v12994_v46  ;;  %v13066_v46 = vrot.slane %v4822_v4, 9  ;;  %v4908_v12 = vrot.slane %v4906_v60, 4  ;;  %v20284_v4 = vld [vmem:[#allocation26_spill] sm:$0xff] }
 0x385   : > { %14324 = vmatprep.mubr.bf16.mxu0 %v12995_v6  ;;  %14353 = vmatpush3.bf16.msra.mxu0 %v15735_v55  ;;  %v4895_v55 = vrot.slane %v17265_v7, 5  ;;  %v20285_v53 = vcombine.low %v17108_v23, %v20284_v4 }
 0x386   : > { %14354 = vmatprep.subr.bf16.mxu0 %v15736_v27 }
 0x387   : > { %v17299_v5 = vsel %vm17067_vm1, %v4894_v10, %v4895_v55  ;;  %v4829_v10 = vld [vmem:[#allocation2 + $0x84] sm:$0xe] }
 0x388   : > { %20279 = vst [vmem:[#allocation29_spill] sm:$0xff] %v17299_v5 }
 0x389   : > { %14355 = vmatpush3.bf16.msra.mxu0 %v15736_v27  ;;  %v17302_v27 = vld [vmem:[#allocation2 + $0x58] sm:$0xf] }
 0x38a   : > { %14356 = vmatprep.subr.bf16.mxu0 %v15737_v13  ;;  %v4927_v31 = vrot.slane %v17302_v27, 5 }
 0x38c   : > { %14325 = vmatmul.mubr.bf16.gmra.mrb[48].mxu0 %v12996_v15  ;;  %v4909_v15 = vrot.slane %v17275_v21, 5 }
 0x38d   : > { %14328 = vmatprep.mubr.bf16.mxu0 %v20274_v54  ;;  %14357 = vmatpush3.bf16.msra.mxu0 %v15737_v13  ;;  %v17314_v13 = vld [vmem:[#allocation2 + $0x64] sm:$0xf]  ;;  %v17323_v54 = vsel %vm17067_vm1, %v13066_v46, %v4906_v60  ;;  %v17349_v46 = vld [vmem:[#allocation2 + $0x70] sm:$0xf]  ;;  %v17357_v60 = vsel %vm17067_vm1, %v13068_v28, %v4920_v24  ;;  %v17371_v28 = vld [vmem:[#allocation2 + $0x80] sm:$0x1] }
 0x38e   : > { %14358 = vmatprep.subr.bf16.mxu0 %v15738_v30  ;;  %20282 = vst [vmem:[#allocation32_spill] sm:$0xff] %v17323_v54  ;;  %v17331_v16 = vsel %vm17067_vm1, %v4908_v12, %v4909_v15  ;;  %20289 = vst [vmem:[#allocation35_spill] sm:$0xff] %v17357_v60  ;;  %v17360_v12 = vld [vmem:[#allocation2 + $0x7c] sm:$0xf]  ;;  %v4929_v15 = vrot.slane %v4927_v31, 4  ;;  %v4941_v24 = vrot.slane %v17349_v46, 5 }
 0x38f   : > { %20283 = vst [vmem:[#allocation33_spill] sm:$0xff] %v17331_v16 }
 0x390   : > { %v4943_v1 = vrot.slane %v4941_v24, 4 }
 0x391   : > { %14359 = vmatpush3.bf16.msra.mxu0 %v15738_v30  ;;  %v4913_v30 = vrot.slane %v17277_v38, 5 }
 0x392   : > { %14360 = vmatprep.subr.bf16.mxu0 %v15739_v22 }
 0x393   : > { %v17343_v55 = vsel %vm17067_vm1, %v13067_v49, %v4913_v30  ;;  %v4934_v49 = vrot.slane %v17314_v13, 5 }
 0x394   : > { %14329 = vmatmul.mubr.bf16.gmra.mrb[52].mxu0 %v20275_v29  ;;  %v4915_v29 = vrot.slane %v4913_v30, 4  ;;  %20286 = vst [vmem:[#allocation26_spill] sm:$0xff] %v17343_v55  ;;  %v4930_v30 = vrot.slane %v17327_v9, 5 }
 0x395   : > { %14332 = vmatprep.mubr.bf16.mxu0 %v20277_v34  ;;  %14361 = vmatpush3.bf16.msra.mxu0 %v15739_v22  ;;  %v4916_v22 = vrot.slane %v17283_v43, 5  ;;  %v17337_v34 = vld [vmem:[#allocation2 + $0x68] sm:$0x1]  ;;  %v4936_v4 = vrot.slane %v4934_v49, 4 }
 0x396   : > { %14362 = vmatprep.subr.bf16.mxu0 %v15740_v45  ;;  %v17384_v59 = vsel %vm17067_vm1, %v4929_v15, %v4930_v30  ;;  %v4948_v15 = vrot.slane %v17360_v12, 5  ;;  %v4830_v30 = vld [vmem:[#allocation2 + $0x90] sm:$0xe] }
 0x397   : > { %v17353_v23 = vsel %vm17067_vm1, %v4915_v29, %v4916_v22  ;;  %v4828_v22 = vld [vmem:[#allocation2 + $0x78] sm:$0xe]  ;;  %v17369_v29 = vld [vmem:[#allocation2 + $0x74] sm:$0x1]  ;;  %20292 = vst [vmem:[#allocation38_spill] sm:$0xff] %v17384_v59  ;;  %v20301_v59 = vcombine.low %v17142_v57, %v17149_v50 }
 0x398   : > { %20288 = vst [vmem:[#allocation34_spill] sm:$0xff] %v17353_v23  ;;  %v13072_v6 = vrot.slane %v4828_v22, 9  ;;  %v4951_v22 = vrot.slane %v17371_v28, 5 }
 0x399   : > { %14363 = vmatpush3.bf16.msra.mxu0 %v15740_v45  ;;  %v4826_v45 = vld [vmem:[#allocation2 + $0x60] sm:$0xe] }
 0x39a   : > { %14396 = vmatprep.subr.bf16.mxu0 %v17286_v61  ;;  %v13070_v19 = vrot.slane %v4826_v45, 9  ;;  %v17377_v45 = vsel %vm17067_vm1, %v13069_v63, %v4927_v31  ;;  %v4944_v63 = vrot.slane %v17369_v29, 5 }
 0x39b   : > { %20291 = vst [vmem:[#allocation37_spill] sm:$0xff] %v17377_v45 }
 0x39c   : > { %14333 = vmatmul.mubr.bf16.gmra.mrb[56].mxu0 %v20285_v53  ;;  %v4937_v53 = vrot.slane %v17337_v34, 5 }
 0x39d   : > { %14336 = vmatprep.mubr.bf16.mxu0 %v20287_v2  ;;  %v17388_v2 = vsel %vm17067_vm1, %v13070_v19, %v4934_v49  ;;  %v17406_v49 = vsel %vm17067_vm1, %v13071_v41, %v4941_v24  ;;  %v17416_v19 = vld [vmem:[#allocation2 + $0xa0] sm:$0xf]  ;;  %v17420_v41 = vsel %vm17067_vm1, %v4943_v1, %v4944_v63  ;;  %v17424_v24 = vsel %vm17067_vm1, %v13072_v6, %v4948_v15 }
 0x39e   : > { %20293 = vst [vmem:[#allocation39_spill] sm:$0xff] %v17388_v2  ;;  %v17397_v31 = vsel %vm17067_vm1, %v4936_v4, %v4937_v53  ;;  %20295 = vst [vmem:[#allocation41_spill] sm:$0xff] %v17406_v49  ;;  %v4950_v4 = vrot.slane %v4948_v15, 4  ;;  %v13073_v53 = vrot.slane %v4829_v10, 9  ;;  %v4962_v2 = vrot.slane %v17391_v17, 5 }
 0x39f   : > { %20294 = vst [vmem:[#allocation40_spill] sm:$0xff] %v17397_v31  ;;  %20299 = vst [vmem:[#allocation27_spill] sm:$0xff] %v17420_v41  ;;  %v13074_v31 = vrot.slane %v4830_v30, 9  ;;  %v4831_v10 = vld [vmem:[#allocation2 + $0x9c] sm:$0xe]  ;;  %v4957_v63 = vrot.slane %v4955_v11, 4 }
 0x3a0   : > { %20300 = vst [vmem:[#allocation28_spill] sm:$0xff] %v17424_v24  ;;  %v17436_v36 = vsel %vm17067_vm1, %v4950_v4, %v4951_v22  ;;  %v4958_v6 = vrot.slane %v17400_v52, 5  ;;  %v4832_v15 = vld [vmem:[#allocation2 + $0xa8] sm:$0xe]  ;;  %v17439_v30 = vld [vmem:[#allocation2 + $0xa4] sm:$0x1]  ;;  %v17445_v57 = vsel %vm17067_vm1, %v13073_v53, %v4955_v11 }
 0x3a1   : > { %20302 = vst [vmem:[#allocation42_spill] sm:$0xff] %v17436_v36  ;;  %20303 = vst [vmem:[#allocation43_spill] sm:$0xff] %v17445_v57  ;;  %v4964_v50 = vrot.slane %v4962_v2, 4  ;;  %v17448_v41 = vld [vmem:[#allocation2 + $0xb8] sm:$0xf]  ;;  %v17456_v22 = vsel %vm17067_vm1, %v13074_v31, %v4962_v2  ;;  %v13075_v49 = vrot.slane %v4831_v10, 9 }
 0x3a2   : > { %v17452_v4 = vsel %vm17067_vm1, %v4957_v63, %v4958_v6  ;;  %20305 = vst [vmem:[#allocation45_spill] sm:$0xff] %v17456_v22  ;;  %v4969_v1 = vrot.slane %v17416_v19, 5  ;;  %v13076_v36 = vrot.slane %v4832_v15, 9  ;;  %v4976_v24 = vrot.slane %v17430_v0, 5  ;;  %v4833_v31 = vld [vmem:[#allocation2 + $0xb4] sm:$0xe] }
 0x3a3   : > { %20304 = vst [vmem:[#allocation44_spill] sm:$0xff] %v17452_v4  ;;  %v4972_v2 = vrot.slane %v17439_v30, 5  ;;  %v4109_v10 = vld [vmem:[#allocation2 + $0xbc] sm:$0x1]  ;;  %v4983_v60 = vrot.slane %v17448_v41, 5  ;;  %v15751_v4 = vld [vmem:[#allocation2 + $0x60] sm:$0xff]  }
 0x3a4   : > { %14337 = vmatmul.mubr.bf16.gmra.mrb[60].mxu0 %v20298_v44  ;;  %v4106_v44 = vld [vmem:[#allocation2 + $0xb0] sm:$0x1]  ;;  %v4971_v6 = vrot.slane %v4969_v1, 4  ;;  %v4978_v45 = vrot.slane %v4976_v24, 4  ;;  %v17472_v11 = vsel %vm17067_vm1, %v13075_v49, %v4969_v1  ;;  %v13077_v49 = vrot.slane %v4833_v31, 9  ;;  %v15744_v31 = vld [vmem:[#allocation2 + $0x24] sm:$0xff]  }
 0x3a5   : > { %14340 = vmatprep.mubr.bf16.mxu0 %v20301_v59  ;;  %v4965_v59 = vrot.slane %v17409_v37, 5  ;;  %v4979_v39 = vrot.slane %v4106_v44, 5  ;;  %20307 = vst [vmem:[#allocation47_spill] sm:$0xff] %v17472_v11  ;;  %v4985_v1 = vrot.slane %v4983_v60, 4  ;;  %v4080_v22 = vld [vmem:[#allocation2 + $0x48] sm:$0xf] }
 0x3a6   : > { %v17476_v15 = vsel %vm17067_vm1, %v4971_v6, %v4972_v2  ;;  %v20312_v6 = vcombine.low %v17170_v8, %v17181_v3  ;;  %v20315_v8 = vcombine.low %v17190_v26, %v17194_v48  ;;  %v15742_v3 = vld [vmem:[#allocation2 + $0x18] sm:$0xff]   ;;  %v15752_v26 = vld [vmem:[#allocation4 + $0x118] sm:$0xff]   ;;  %v4219_v57 = vshll.u32 %v17277_v38, 16 }
 0x3a7   : > { %v17463_v53 = vsel %vm17067_vm1, %v4964_v50, %v4965_v59  ;;  %20308 = vst [vmem:[#allocation48_spill] sm:$0xff] %v17476_v15  ;;  %v17480_v50 = vsel %vm17067_vm1, %v13076_v36, %v4976_v24  ;;  %v20310_v59 = vcombine.low %v17156_v56, %v17166_v58  ;;  %v17489_v63 = vsel %vm17067_vm1, %v4978_v45, %v4979_v39  ;;  %v15741_v45 = vld [vmem:[#allocation2 + $0xc] sm:$0xff]   ;;  %v15746_v2 = vld [vmem:[#allocation4 + $0x108] sm:$0xff]  }
 0x3a8   : > { %20306 = vst [vmem:[#allocation46_spill] sm:$0xff] %v17463_v53  ;;  %20309 = vst [vmem:[#allocation49_spill] sm:$0xff] %v17480_v50  ;;  %v4986_v36 = vrot.slane %v4109_v10, 5  ;;  %v17502_v56 = vsel %vm17067_vm1, %v13077_v49, %v4983_v60  ;;  %v4065_v10 = vld [vmem:[#allocation2 + $0xc] sm:$0xf]  ;;  %v15749_v60 = vld [vmem:[#allocation4 + $0x110] sm:$0xff]  }
 0x3a9   : > { %20311 = vst [vmem:[#allocation50_spill] sm:$0xff] %v17489_v63  ;;  %20314 = vst [vmem:[#allocation52_spill] sm:$0xff] %v17502_v56  ;;  %v4114_v49 = vshrl.u32 %v4065_v10, 16  ;;  %v15745_v39 = vld [vmem:[#allocation2 + $0x30] sm:$0xff]   ;;  %v15747_v24 = vld [vmem:[#allocation2 + $0x3c] sm:$0xff]   ;;  %v4234_v54 = vshrl.u32 %v4080_v22, 16 }
 0x3aa   : > { %v17498_v58 = vsel %vm17067_vm1, %v4985_v1, %v4986_v36  ;;  %v4117_v1 = vshll.u32 %v4065_v10, 16  ;;  %v15755_v10 = vld [vmem:[#allocation4 + $0x120] sm:$0xff]   ;;  %v4237_v40 = vshll.u32 %v4080_v22, 16 }
 0x3ab   : > { %20313 = vst [vmem:[#allocation51_spill] sm:$0xff] %v17498_v58  ;;  %v4116_v48 = vrot.slane %v4114_v49, 4  ;;  %v17512_v58 = vld [vmem:[#allocation2 + $0x14] sm:$0x1]  ;;  %v4147_v49 = vshll.u32 %v17261_v18, 16 }
 0x3ac   : > { %14341 = vmatmul.mubr.bf16.gmra.mrb[64].mxu0 %v20310_v59  ;;  %v4066_v59 = vld [vmem:[#allocation2 + $0x10] sm:$0xf]  ;;  %20316 = vst [vmem:[#allocation53_spill] sm:$0xff] %v17512_v58  ;;  %v15750_v56 = vld [vmem:[#allocation2 + $0x54] sm:$0xff]  }
 0x3ad   : > { %14344 = vmatprep.mubr.bf16.mxu0 %v20312_v6  ;;  %v4123_v6 = vshll.u32 %v4066_v59, 16  ;;  %v4127_v36 = vshrl.u32 %v4066_v59, 16  ;;  %v17518_v50 = vrot.slane %v4147_v49, 5  ;;  %v4074_v15 = vld [vmem:[#allocation2 + $0x30] sm:$0xf] }
 0x3ae   : > { %v4077_v49 = vld [vmem:[#allocation2 + $0x3c] sm:$0xf] }
 0x3af   : > { %v17510_v44 = vrot.slane %v4123_v6, 5  ;;  %v4133_v6 = vshll.u32 %v17512_v58, 16  ;;  %v4213_v53 = vshll.u32 %v4077_v49, 16 }
 0x3b4   : > { %14345 = vmatmul.mubr.bf16.gmra.mrb[68].mxu0 %v20315_v8  ;;  %v4068_v8 = vld [vmem:[#allocation2 + $0x18] sm:$0xf] }
 0x3b5   : > { %14364 = vmatprep.mubr.bf16.mxu0 %v15741_v45  ;;  %v4119_v45 = vrot.slane %v4117_v1, 5  ;;  %v4151_v1 = vshrl.u32 %v17261_v18, 16 }
 0x3bc   : > { %14365 = vmatmul.mubr.bf16.vlgmr.msra.gmra.mrb[40].mxu0 %v15742_v3  ;;  %v4129_v3 = vrot.slane %v4127_v36, 4 }
 0x3bd   : > { %14368 = vmatprep.mubr.bf16.mxu0 %v15744_v31  ;;  %14397 = vmatpush3.bf16.msra.mxu0 %v17286_v61  ;;  %v4138_v61 = vshrl.u32 %v4068_v8, 16  ;;  %v4141_v31 = vshll.u32 %v4068_v8, 16 }
 0x3be   : > { %14398 = vmatprep.subr.bf16.mxu0 %v15746_v2  ;;  %v4130_v59 = vor.u32 %v4129_v3, %v17510_v44  ;;  %v4135_v3 = vrot.slane %v4133_v6, 5  ;;  %v4175_v6 = vshrl.u32 %v17263_v32, 16 }
 0x3bf   : > { %v4140_v36 = vrot.slane %v4138_v61, 4  ;;  %v15761_v61 = vld [vmem:[#allocation4 + $0x130] sm:$0xff]  }
 0x3c0   : > { %v4131_v63 = vrot.slane %v4130_v59, 4 }
 0x3c1   : > { %14399 = vmatpush3.bf16.msra.mxu0 %v15746_v2  ;;  %v4120_v2 = vor.u32 %v4119_v45, %v4116_v48  ;;  %v4153_v48 = vrot.slane %v4151_v1, 4  ;;  %v4071_v45 = vld [vmem:[#allocation2 + $0x24] sm:$0xf] }
 0x3c2   : > { %14400 = vmatprep.subr.bf16.mxu0 %v15749_v60  ;;  %v4162_v11 = vshrl.u32 %v4071_v45, 16  ;;  %v4165_v59 = vshll.u32 %v4071_v45, 16  ;;  %v4136_v1 = vsel %vm16606_vm11, %v4131_v63, %v4135_v3  ;;  %v4210_v45 = vshrl.u32 %v4077_v49, 16  ;;  %v15764_v63 = vld [vmem:[#allocation4 + $0x138] sm:$0xff]  }
 0x3c3   : > { %v4121_v8 = vrot.slane %v4120_v2, 4 }
 0x3c4   : > { %14369 = vmatmul.mubr.bf16.gmra.mrb[44].mxu0 %v15745_v39  ;;  %v4143_v39 = vrot.slane %v4141_v31, 5  ;;  %v4167_v3 = vrot.slane %v4165_v59, 5  ;;  %v4215_v59 = vrot.slane %v4213_v53, 5  ;;  %v4083_v53 = vld [vmem:[#allocation2 + $0x54] sm:$0xf] }
 0x3c5   : > { %14372 = vmatprep.mubr.bf16.mxu0 %v15747_v24  ;;  %14401 = vmatpush3.bf16.msra.mxu0 %v15749_v60  ;;  %v15748_v24 = vld [vmem:[#allocation2 + $0x48] sm:$0xff]   ;;  %v15758_v60 = vld [vmem:[#allocation4 + $0x128] sm:$0xff]   ;;  %v4126_v2 = vsel %vm16606_vm11, %v4121_v8, %v17510_v44 }
 0x3c6   : > { %14402 = vmatprep.subr.bf16.mxu0 %v15752_v26  ;;  %v4144_v18 = vor.u32 %v4143_v39, %v4140_v36  ;;  %v4189_v36 = vshll.u32 %v4074_v15, 16  ;;  %v4195_v39 = vshll.u32 %v17269_v62, 16 }
 0x3c8   : > { %v4145_v44 = vrot.slane %v4144_v18, 4  ;;  %v17536_v49 = vrot.slane %v4195_v39, 5  ;;  %v4236_v39 = vrot.slane %v4234_v54, 4  ;;  %v4271_v54 = vshrl.u32 %v17302_v27, 16 }
 0x3c9   : > { %14403 = vmatpush3.bf16.msra.mxu0 %v15752_v26  ;;  %v4157_v26 = vshll.u32 %v17265_v7, 16  ;;  %v4186_v7 = vshrl.u32 %v4074_v15, 16  ;;  %v15753_v15 = vld [vmem:[#allocation2 + $0x6c] sm:$0xff]  }
 0x3ca   : > { %14404 = vmatprep.subr.bf16.mxu0 %v15755_v10 }
 0x3cb   : > { %v4159_v8 = vrot.slane %v4157_v26, 5  ;;  %v4188_v18 = vrot.slane %v4186_v7, 4  ;;  %v4191_v26 = vrot.slane %v4189_v36, 5 }
 0x3cc   : > { %14373 = vmatmul.mubr.bf16.gmra.mrb[48].mxu0 %v15748_v24  ;;  %v4199_v24 = vshrl.u32 %v17269_v62, 16  ;;  %v4177_v62 = vrot.slane %v4175_v6, 4 }
 0x3cd   : > { %14376 = vmatprep.mubr.bf16.mxu0 %v15750_v56  ;;  %14405 = vmatpush3.bf16.msra.mxu0 %v15755_v10  ;;  %v4154_v56 = vor.u32 %v4153_v48, %v17518_v50  ;;  %v4171_v10 = vshll.u32 %v17263_v32, 16  ;;  %v4164_v48 = vrot.slane %v4162_v11, 4  ;;  %v4223_v32 = vshrl.u32 %v17277_v38, 16 }
 0x3ce   : > { %14406 = vmatprep.subr.bf16.mxu0 %v15758_v60  ;;  %v4201_v16 = vrot.slane %v4199_v24, 4  ;;  %v4212_v11 = vrot.slane %v4210_v45, 4  ;;  %v17538_v38 = vcombine.low %v4126_v2, %v4136_v1  ;;  %v4192_v2 = vor.u32 %v4191_v26, %v4188_v18 }
 0x3cf   : > { %v4155_v23 = vrot.slane %v4154_v56, 4  ;;  %v17533_v55 = vrot.slane %v4171_v10, 5  ;;  %v17540_v56 = vld [vmem:[#allocation4 + $0x140] sm:$0xff]   ;;  %v17542_v10 = vrot.slane %v4219_v57, 5  ;;  %v4205_v57 = vshll.u32 %v17275_v21, 16 }
 0x3d0   : > { %v4202_v1 = vor.u32 %v4201_v16, %v17536_v49  ;;  %v4216_v36 = vor.u32 %v4215_v59, %v4212_v11  ;;  %v4239_v24 = vrot.slane %v4237_v40, 5  ;;  %v4258_v45 = vshrl.u32 %v4083_v53, 16 }
 0x3d1   : > { %14407 = vmatpush3.bf16.msra.mxu0 %v15758_v60  ;;  %v4181_v60 = vshll.u32 %v17267_v35, 16  ;;  %v4225_v35 = vrot.slane %v4223_v32, 4  ;;  %v4160_v6 = vsel %vm16606_vm11, %v4155_v23, %v4159_v8  ;;  %v4178_v22 = vor.u32 %v4177_v62, %v17533_v55 }
 0x3d2   : > { %14408 = vmatprep.subr.bf16.mxu0 %v15761_v61  ;;  %v4247_v8 = vshrl.u32 %v17288_v42, 16  ;;  %v4267_v21 = vshll.u32 %v17302_v27, 16  ;;  %v4207_v62 = vrot.slane %v4205_v57, 5  ;;  %v4217_v18 = vrot.slane %v4216_v36, 4 }
 0x3d3   : > { %v17549_v7 = vrot.slane %v4181_v60, 5  ;;  %v4226_v23 = vor.u32 %v4225_v35, %v17542_v10  ;;  %v4179_v40 = vrot.slane %v4178_v22, 4  ;;  %v4086_v60 = vld [vmem:[#allocation2 + $0x60] sm:$0xf]  ;;  %v4240_v26 = vor.u32 %v4239_v24, %v4236_v39 }
 0x3d4   : > { %14377 = vmatmul.mubr.bf16.gmra.mrb[52].mxu0 %v15751_v4  ;;  %v4150_v4 = vsel %vm16606_vm11, %v4145_v44, %v17518_v50  ;;  %v4243_v50 = vshll.u32 %v17288_v42, 16  ;;  %v15754_v44 = vld [vmem:[#allocation2 + $0x78] sm:$0xff]   ;;  %v4229_v42 = vshll.u32 %v17283_v43, 16  ;;  %v4249_v35 = vrot.slane %v4247_v8, 4 }
 0x3d5   : > { %14380 = vmatprep.mubr.bf16.mxu0 %v15753_v15  ;;  %14409 = vmatpush3.bf16.msra.mxu0 %v15761_v61  ;;  %v4168_v61 = vor.u32 %v4167_v3, %v4164_v48  ;;  %v4261_v48 = vshll.u32 %v4083_v53, 16  ;;  %v15756_v3 = vld [vmem:[#allocation2 + $0x84] sm:$0xff]   ;;  %v17558_v32 = vcombine.low %v4150_v4, %v4160_v6  ;;  %v4203_v15 = vrot.slane %v4202_v1, 4 }
 0x3d6   : > { %14410 = vmatprep.subr.bf16.mxu0 %v15764_v63  ;;  %v17563_v11 = vrot.slane %v4243_v50, 5  ;;  %v4227_v59 = vrot.slane %v4226_v23, 4  ;;  %v4260_v4 = vrot.slane %v4258_v45, 4  ;;  %v4273_v27 = vrot.slane %v4271_v54, 4  ;;  %v15759_v45 = vld [vmem:[#allocation2 + $0x9c] sm:$0xff]  }
 0x3d7   : > { %v4169_v16 = vrot.slane %v4168_v61, 4  ;;  %v4263_v6 = vrot.slane %v4261_v48, 5  ;;  %v17565_v61 = vrot.slane %v4267_v21, 5  ;;  %v4282_v53 = vshrl.u32 %v4086_v60, 16 }
 0x3d8   : > { %v4285_v22 = vshll.u32 %v4086_v60, 16  ;;  %v4184_v43 = vsel %vm16606_vm11, %v4179_v40, %v17549_v7  ;;  %v4291_v1 = vshll.u32 %v17314_v13, 16  ;;  %v4295_v57 = vshrl.u32 %v17314_v13, 16 }
 0x3d9   : > { %14411 = vmatpush3.bf16.msra.mxu0 %v15764_v63  ;;  %v4193_v63 = vrot.slane %v4192_v2, 4  ;;  %v4174_v2 = vsel %vm16606_vm11, %v4169_v16, %v17533_v55  ;;  %v4208_v39 = vsel %vm16606_vm11, %v4203_v15, %v4207_v62  ;;  %v4231_v24 = vrot.slane %v4229_v42, 5  ;;  %v15757_v55 = vld [vmem:[#allocation2 + $0x90] sm:$0xff]  }
 0x3da   : > { %14444 = vmatprep.subr.bf16.mxu0 %v17540_v56  ;;  %v4253_v50 = vshll.u32 %v17291_v14, 16  ;;  %v4222_v7 = vsel %vm16606_vm11, %v4217_v18, %v17542_v10  ;;  %v17584_v23 = vrot.slane %v4240_v26, 4  ;;  %v4250_v13 = vor.u32 %v4249_v35, %v17563_v11 }
 0x3db   : > { %v4198_v36 = vsel %vm16606_vm11, %v4193_v63, %v17536_v49  ;;  %v4264_v8 = vor.u32 %v4263_v6, %v4260_v4  ;;  %v4232_v49 = vsel %vm16606_vm11, %v4227_v59, %v4231_v24  ;;  %v4274_v48 = vor.u32 %v4273_v27, %v17565_v61  ;;  %v4092_v59 = vld [vmem:[#allocation2 + $0x78] sm:$0xf]  ;;  %v15760_v27 = vld [vmem:[#allocation2 + $0xa8] sm:$0xff]  }
 0x3dc   : > { %14381 = vmatmul.mubr.bf16.gmra.mrb[56].mxu0 %v15754_v44  ;;  %v4089_v44 = vld [vmem:[#allocation2 + $0x6c] sm:$0xf]  ;;  %v4287_v16 = vrot.slane %v4285_v22, 5  ;;  %v17590_v14 = vrot.slane %v4291_v1, 5  ;;  %v4297_v21 = vrot.slane %v4295_v57, 4  ;;  %v17592_v10 = vcombine.low %v4174_v2, %v4184_v43 }
 0x3dd   : > { %14384 = vmatprep.mubr.bf16.mxu0 %v15756_v3  ;;  %v4284_v3 = vrot.slane %v4282_v53, 4  ;;  %v4306_v54 = vshrl.u32 %v4089_v44, 16  ;;  %v4309_v40 = vshll.u32 %v4089_v44, 16  ;;  %v4277_v63 = vshll.u32 %v17327_v9, 16  ;;  %v6458_v24 = vld [vmem:[#allocation2 + $0x18] sm:$0xe] }
 0x3de   : > { %v4315_v15 = vshll.u32 %v17349_v46, 16  ;;  %v4319_v62 = vshrl.u32 %v17349_v46, 16  ;;  %v17597_v60 = vcombine.low %v4198_v36, %v4208_v39  ;;  %v17599_v18 = vrot.slane %v4250_v13, 4  ;;  %v17627_v39 = vld [vmem:[#allocation2 + $0x20] sm:$0x1] }
 0x3df   : > { %v17601_v42 = vrot.slane %v4264_v8, 4  ;;  %v4301_v26 = vshll.u32 %v17337_v34, 16  ;;  %v17604_v35 = vcombine.low %v4222_v7, %v4232_v49  ;;  %v17606_v4 = vrot.slane %v4253_v50, 5  ;;  %v17619_v34 = vld [vmem:[#allocation2 + $0x1c] sm:$0xf]  ;;  %20319 = vst [vmem:[#allocation54_spill] sm:$0xff] %v17627_v39 }
 0x3e0   : > { %v17608_v6 = vrot.slane %v4274_v48, 4  ;;  %v4288_v9 = vor.u32 %v4287_v16, %v4284_v3  ;;  %v4298_v53 = vor.u32 %v4297_v21, %v17590_v14  ;;  %v17615_v22 = vrot.slane %v4306_v54, 4  ;;  %20318 = vst [vmem:[#allocation21_spill] sm:$0xff] %v17619_v34  ;;  %v17639_v13 = vld [vmem:[#allocation2 + $0xc8] sm:$0x1] }
 0x3e1   : > { %v17617_v2 = vrot.slane %v4309_v40, 5  ;;  %v17621_v43 = vrot.slane %v4277_v63, 5  ;;  %v17623_v1 = vrot.slane %v4315_v15, 5  ;;  %v17625_v57 = vrot.slane %v4319_v62, 4  ;;  %20320 = vst [vmem:[#allocation55_spill] sm:$0xff] %v17639_v13 }
 0x3e2   : > { %v4330_v36 = vshrl.u32 %v4092_v59, 16  ;;  %v4333_v7 = vshll.u32 %v4092_v59, 16  ;;  %v17641_v8 = vld [vmem:[#allocation2 + $0x28] sm:$0xf]  ;;  %v17647_v48 = vrot.slane %v4288_v9, 4  ;;  %v4339_v3 = vshll.u32 %v17360_v12, 16 }
 0x3e3   : > { %20321 = vst [vmem:[#allocation56_spill] sm:$0xff] %v17641_v8  ;;  %v6524_v16 = vrot.slane %v17619_v34, 5  ;;  %v6459_v21 = vld [vmem:[#allocation2 + $0x24] sm:$0xe]  ;;  %v17651_v54 = vrot.slane %v4298_v53, 4  ;;  %v13151_v59 = vrot.slane %v6458_v24, 9 }
 0x3e4   : > { %14385 = vmatmul.mubr.bf16.gmra.mrb[60].mxu0 %v15757_v55  ;;  %v17637_v55 = vrot.slane %v4301_v26, 5  ;;  %v17656_v15 = vld [vmem:[#allocation2 + $0x84] sm:$0xf]  ;;  %v17660_v26 = vld [vmem:[#allocation2 + $0x2c] sm:$0x1]  ;;  %v17664_v44 = vrot.slane %v4330_v36, 4 }
 0x3e5   : > { %14388 = vmatprep.mubr.bf16.mxu0 %v15759_v45  ;;  %v15762_v45 = vld [vmem:[#allocation2 + $0xb4] sm:$0xff]   ;;  %v17658_v62 = vld [vmem:[#allocation2 + $0xc4] sm:$0xf]  ;;  %20323 = vst [vmem:[#allocation58_spill] sm:$0xff] %v17660_v26  ;;  %v4993_v40 = vrot.slane %v17639_v13, 5  ;;  %v17670_v63 = vrot.slane %v4333_v7, 5  ;;  %v17689_v58 = vsel %vm17067_vm1, %v13151_v59, %v6524_v16 }
 0x3e6   : > { %20322 = vst [vmem:[#allocation57_spill] sm:$0xff] %v17658_v62  ;;  %v4990_v53 = vrot.slane %v17658_v62, 5  ;;  %v17668_v49 = vld [vmem:[#allocation2 + $0x34] sm:$0xf]  ;;  %v17672_v50 = vld [vmem:[#allocation2 + $0x38] sm:$0x1] }
 0x3e7   : > { %20324 = vst [vmem:[#allocation59_spill] sm:$0xff] %v17668_v49  ;;  %20325 = vst [vmem:[#allocation60_spill] sm:$0xff] %v17672_v50  ;;  %v17674_v34 = vld [vmem:[#allocation2 + $0x40] sm:$0xf]  ;;  %v6526_v24 = vrot.slane %v6524_v16, 4  ;;  %v17677_v9 = vrot.slane %v4339_v3, 5 }
 0x3e8   : > { %20326 = vst [vmem:[#allocation61_spill] sm:$0xff] %v17674_v34  ;;  %v4992_v36 = vrot.slane %v4990_v53, 4  ;;  %v13152_v33 = vrot.slane %v6459_v21, 9  ;;  %v6531_v5 = vrot.slane %v17641_v8, 5  ;;  %20329 = vst [vmem:[#allocation64_spill] sm:$0xff] %v17689_v58  ;;  %v15763_v59 = vld [vmem:[#allocation2 + $0xc0] sm:$0xff]  }
 0x3e9   : > { %v6461_v21 = vld [vmem:[#allocation2 + $0x3c] sm:$0xe]  ;;  %v17700_v8 = vld [vmem:[#allocation2 + $0x4c] sm:$0xf]  ;;  %v6462_v16 = vld [vmem:[#allocation2 + $0x48] sm:$0xe] }
 0x3ea   : > { %v17698_v47 = vsel %vm17067_vm1, %v4992_v36, %v4993_v40  ;;  %20332 = vst [vmem:[#allocation67_spill] sm:$0xff] %v17700_v8  ;;  %v6533_v13 = vrot.slane %v6531_v5, 4  ;;  %v6538_v62 = vrot.slane %v17668_v49, 5  ;;  %v17712_v40 = vsel %vm17067_vm1, %v13152_v33, %v6531_v5  ;;  %v6463_v58 = vld [vmem:[#allocation2 + $0x54] sm:$0xe] }
 0x3eb   : > { %20331 = vst [vmem:[#allocation66_spill] sm:$0xff] %v17698_v47  ;;  %20334 = vst [vmem:[#allocation69_spill] sm:$0xff] %v17712_v40  ;;  %v6541_v36 = vrot.slane %v17672_v50, 5  ;;  %v13155_v47 = vrot.slane %v6462_v16, 9  ;;  %v5721_v5 = vld [vmem:[#allocation2 + $0x5c] sm:$0x1] }
 0x3ec   : > { %14389 = vmatmul.mubr.bf16.gmra.mrb[64].mxu0 %v15760_v27  ;;  %v4834_v27 = vld [vmem:[#allocation2 + $0xc0] sm:$0xe]  ;;  %v17724_v33 = vld [vmem:[#allocation2 + $0x64] sm:$0xf]  ;;  %v13156_v16 = vrot.slane %v6463_v58, 9  ;;  %v15766_v58 = vld [vmem:[#allocation4 + $0x148] sm:$0xff]  }
 0x3ed   : > { %14392 = vmatprep.mubr.bf16.mxu0 %v15762_v45  ;;  %v13078_v46 = vrot.slane %v4834_v27, 9  ;;  %v6527_v45 = vrot.slane %v17627_v39, 5  ;;  %v17685_v27 = vld [vmem:[#allocation2 + $0x44] sm:$0x1]  ;;  %v13153_v39 = vrot.slane %v6460_v51, 9  ;;  %v6540_v51 = vrot.slane %v6538_v62, 4 }
 0x3ee   : > { %20328 = vst [vmem:[#allocation63_spill] sm:$0xff] %v17685_v27  ;;  %v6548_v49 = vrot.slane %v17685_v27, 5  ;;  %20337 = vst [vmem:[#allocation72_spill] sm:$0xff] %v17724_v33 }
 0x3ef   : > { %v17683_v7 = vsel %vm17067_vm1, %v13078_v46, %v4990_v53  ;;  %v17693_v3 = vsel %vm17067_vm1, %v6526_v24, %v6527_v45  ;;  %v6534_v53 = vrot.slane %v17660_v26, 5  ;;  %v17707_v45 = vld [vmem:[#allocation2 + $0x58] sm:$0xf]  ;;  %v13154_v46 = vrot.slane %v6461_v21, 9  ;;  %v17716_v26 = vld [vmem:[#allocation2 + $0x50] sm:$0x1] }
 0x3f0   : > { %20327 = vst [vmem:[#allocation62_spill] sm:$0xff] %v17683_v7  ;;  %20330 = vst [vmem:[#allocation65_spill] sm:$0xff] %v17693_v3  ;;  %v6545_v3 = vrot.slane %v17674_v34, 5  ;;  %v17735_v27 = vsel %vm17067_vm1, %v6540_v51, %v6541_v36  ;;  %v6559_v50 = vrot.slane %v17707_v45, 5  ;;  %v6464_v21 = vld [vmem:[#allocation2 + $0x60] sm:$0xe] }
 0x3f1   : > { %20333 = vst [vmem:[#allocation68_spill] sm:$0xff] %v17707_v45  ;;  %20335 = vst [vmem:[#allocation70_spill] sm:$0xff] %v17716_v26  ;;  %v17720_v24 = vsel %vm17067_vm1, %v6533_v13, %v6534_v53  ;;  %v6552_v13 = vrot.slane %v17700_v8, 5  ;;  %v5724_v53 = vld [vmem:[#allocation2 + $0x68] sm:$0x1]  ;;  %v6555_v36 = vrot.slane %v17716_v26, 5 }
 0x3f2   : > { %20336 = vst [vmem:[#allocation71_spill] sm:$0xff] %v17720_v24  ;;  %v6547_v34 = vrot.slane %v6545_v3, 4  ;;  %20339 = vst [vmem:[#allocation74_spill] sm:$0xff] %v17735_v27  ;;  %v17742_v24 = vld [vmem:[#allocation2 + $0x70] sm:$0xf]  ;;  %v6561_v45 = vrot.slane %v6559_v50, 4 }
 0x3f3   : > { %v6554_v40 = vrot.slane %v6552_v13, 4  ;;  %v6465_v51 = vld [vmem:[#allocation2 + $0x6c] sm:$0xe]  ;;  %v5727_v8 = vld [vmem:[#allocation2 + $0x74] sm:$0x1]  ;;  %v6562_v7 = vrot.slane %v5721_v5, 5 }
 0x3f4   : > { %14393 = vmatmul.mubr.bf16.gmra.mrb[68].mxu0 %v15763_v59  ;;  %v17730_v59 = vsel %vm17067_vm1, %v13153_v39, %v6538_v62  ;;  %v17748_v62 = vsel %vm17067_vm1, %v6547_v34, %v6548_v49  ;;  %v5732_v39 = vld [vmem:[#allocation2 + $0x88] sm:$0xf]  ;;  %v17763_v49 = vsel %vm17067_vm1, %v13156_v16, %v6559_v50  ;;  %v13157_v27 = vrot.slane %v6464_v21, 9  ;;  %v6466_v26 = vld [vmem:[#allocation2 + $0x78] sm:$0xe] }
 0x3f5   : > { %14412 = vmatprep.mubr.bf16.mxu0 %v17538_v38  ;;  %20338 = vst [vmem:[#allocation73_spill] sm:$0xff] %v17730_v59  ;;  %v17739_v38 = vsel %vm17067_vm1, %v13154_v46, %v6545_v3  ;;  %20341 = vst [vmem:[#allocation76_spill] sm:$0xff] %v17748_v62  ;;  %v5729_v3 = vld [vmem:[#allocation2 + $0x7c] sm:$0xf]  ;;  %v17755_v46 = vsel %vm17067_vm1, %v13155_v47, %v6552_v13  ;;  %v17759_v34 = vsel %vm17067_vm1, %v6554_v40, %v6555_v36  ;;  %v6467_v36 = vld [vmem:[#allocation2 + $0x84] sm:$0xe] }
 0x3f6   : > { %20340 = vst [vmem:[#allocation75_spill] sm:$0xff] %v17739_v38  ;;  %20342 = vst [vmem:[#allocation77_spill] sm:$0xff] %v17755_v46  ;;  %v6566_v59 = vrot.slane %v17724_v33, 5  ;;  %v17770_v5 = vsel %vm17067_vm1, %v6561_v45, %v6562_v7  ;;  %v13158_v13 = vrot.slane %v6465_v51, 9  ;;  %v6573_v40 = vrot.slane %v17742_v24, 5 }
 0x3f7   : > { %20343 = vst [vmem:[#allocation78_spill] sm:$0xff] %v17759_v34  ;;  %20344 = vst [vmem:[#allocation79_spill] sm:$0xff] %v17763_v49  ;;  %v5730_v62 = vld [vmem:[#allocation2 + $0x80] sm:$0x1]  ;;  %v5733_v38 = vld [vmem:[#allocation2 + $0x8c] sm:$0x1] }
 0x3f8   : > { %20345 = vst [vmem:[#allocation80_spill] sm:$0xff] %v17770_v5  ;;  %v17777_v21 = vsel %vm17067_vm1, %v13157_v27, %v6566_v59  ;;  %v6568_v16 = vrot.slane %v6566_v59, 4  ;;  %v6569_v33 = vrot.slane %v5724_v53, 5  ;;  %v5735_v47 = vld [vmem:[#allocation2 + $0x94] sm:$0xf]  ;;  %v6575_v7 = vrot.slane %v6573_v40, 4 }
 0x3f9   : > { %v6576_v45 = vrot.slane %v5727_v8, 5  ;;  %v13159_v51 = vrot.slane %v6466_v26, 9  ;;  %v6580_v34 = vrot.slane %v5729_v3, 5  ;;  %v5738_v46 = vld [vmem:[#allocation2 + $0xa0] sm:$0xf]  ;;  %v17788_v27 = vsel %vm17067_vm1, %v13158_v13, %v6573_v40 }
 0x3fa   : > { %v17784_v50 = vsel %vm17067_vm1, %v6568_v16, %v6569_v33  ;;  %20347 = vst [vmem:[#allocation82_spill] sm:$0xff] %v17788_v27  ;;  %v13160_v59 = vrot.slane %v6467_v36, 9  ;;  %v6468_v53 = vld [vmem:[#allocation2 + $0x90] sm:$0xe]  ;;  %v15767_v8 = vld [vmem:[#allocation4 + $0x150] sm:$0xff]   ;;  %v6583_v3 = vrot.slane %v5730_v62, 5 }
 0x3fb   : > { %20346 = vst [vmem:[#allocation81_spill] sm:$0xff] %v17784_v50  ;;  %v6469_v33 = vld [vmem:[#allocation2 + $0x9c] sm:$0xe]  ;;  %v5736_v16 = vld [vmem:[#allocation2 + $0x98] sm:$0x1]  ;;  %v6590_v36 = vrot.slane %v5733_v38, 5 }
 0x3fc   : > { %14413 = vmatmul.mubr.bf16.vlgmr.msra.gmra.mrb[40].mxu0 %v17558_v32  ;;  %v6587_v32 = vrot.slane %v5732_v39, 5  ;;  %v5739_v5 = vld [vmem:[#allocation2 + $0xa4] sm:$0x1]  ;;  %v17800_v39 = vsel %vm17067_vm1, %v13159_v51, %v6580_v34  ;;  %v5741_v49 = vld [vmem:[#allocation2 + $0xac] sm:$0xf]  ;;  %v13162_v51 = vrot.slane %v6469_v33, 9 }
 0x3fd   : > { %14416 = vmatprep.mubr.bf16.mxu0 %v17592_v10  ;;  %14445 = vmatpush3.bf16.msra.mxu0 %v17540_v56  ;;  %v17794_v56 = vsel %vm17067_vm1, %v6575_v7, %v6576_v45  ;;  %v6582_v10 = vrot.slane %v6580_v34, 4  ;;  %v13161_v7 = vrot.slane %v6468_v53, 9  ;;  %v6594_v45 = vrot.slane %v5735_v47, 5  ;;  %v6470_v50 = vld [vmem:[#allocation2 + $0xa8] sm:$0xe] }
 0x3fe   : > { %14446 = vmatprep.subr.bf16.mxu0 %v15766_v58  ;;  %20348 = vst [vmem:[#allocation83_spill] sm:$0xff] %v17794_v56  ;;  %v6589_v40 = vrot.slane %v6587_v32, 4  ;;  %v17808_v62 = vsel %vm17067_vm1, %v13160_v59, %v6587_v32  ;;  %v5744_v13 = vld [vmem:[#allocation2 + $0xb8] sm:$0xf]  ;;  %v6601_v56 = vrot.slane %v5738_v46, 5  ;;  %v6597_v32 = vrot.slane %v5736_v16, 5 }
 0x3ff   : > { %v17804_v26 = vsel %vm17067_vm1, %v6582_v10, %v6583_v3  ;;  %v6471_v10 = vld [vmem:[#allocation2 + $0xb4] sm:$0xe]  ;;  %v15768_v3 = vld [vmem:[#allocation4 + $0x158] sm:$0xff]   ;;  %v5742_v27 = vld [vmem:[#allocation2 + $0xb0] sm:$0x1]  ;;  %v6596_v47 = vrot.slane %v6594_v45, 4 }
 0x400   : > { %20349 = vst [vmem:[#allocation84_spill] sm:$0xff] %v17804_v26  ;;  %v17814_v38 = vsel %vm17067_vm1, %v6589_v40, %v6590_v36  ;;  %v5745_v53 = vld [vmem:[#allocation2 + $0xbc] sm:$0x1]  ;;  %v6603_v34 = vrot.slane %v6601_v56, 4  ;;  %v6604_v26 = vrot.slane %v5739_v5, 5  ;;  %v13163_v40 = vrot.slane %v6470_v50, 9 }
 0x401   : > { %14447 = vmatpush3.bf16.msra.mxu0 %v15766_v58  ;;  %v17820_v58 = vsel %vm17067_vm1, %v13161_v7, %v6594_v45  ;;  %v6608_v36 = vrot.slane %v5741_v49, 5  ;;  %v17825_v46 = vsel %vm17067_vm1, %v6596_v47, %v6597_v32  ;;  %v17829_v33 = vsel %vm17067_vm1, %v13162_v51, %v6601_v56  ;;  %v15769_v16 = vld [vmem:[#allocation4 + $0x160] sm:$0xff]  }
 0x402   : > { %14448 = vmatprep.subr.bf16.mxu0 %v15767_v8  ;;  %v13164_v59 = vrot.slane %v6471_v10, 9  ;;  %v6615_v7 = vrot.slane %v5744_v13, 5  ;;  %v17836_v49 = vsel %vm17067_vm1, %v6603_v34, %v6604_v26  ;;  %v6611_v50 = vrot.slane %v5742_v27, 5 }
 0x403   : > { %v4357_v45 = vshll.u32 %v17656_v15, 16  ;;  %v6618_v51 = vrot.slane %v5745_v53, 5  ;;  %v17845_v10 = vsel %vm17067_vm1, %v13163_v40, %v6608_v36  ;;  %v20350_v26 = vshrl.u32 %v17360_v12, 16 }
 0x404   : > { %14417 = vmatmul.mubr.bf16.gmra.mrb[44].mxu0 %v17597_v60  ;;  %v6610_v60 = vrot.slane %v6608_v36, 4  ;;  %v6617_v13 = vrot.slane %v6615_v7, 4  ;;  %v17857_v32 = vsel %vm17067_vm1, %v13164_v59, %v6615_v7  ;;  %v20351_v53 = vsel %vm16606_vm11, %v17599_v18, %v17606_v4  ;;  %v4098_v4 = vld [vmem:[#allocation2 + $0x90] sm:$0xf] }
 0x405   : > { %14420 = vmatprep.mubr.bf16.mxu0 %v17604_v35  ;;  %14449 = vmatpush3.bf16.msra.mxu0 %v15767_v8  ;;  %v4363_v35 = vshll.u32 %v17380_v25, 16  ;;  %v4367_v8 = vshrl.u32 %v17380_v25, 16  ;;  %v4345_v34 = vrot.slane %v20350_v26, 4  ;;  %v20352_v12 = vsel %vm16606_vm11, %v17584_v23, %v17563_v11 }
 0x406   : > { %14450 = vmatprep.subr.bf16.mxu0 %v15768_v3  ;;  %v17849_v27 = vsel %vm17067_vm1, %v6610_v60, %v6611_v50  ;;  %v17861_v25 = vsel %vm17067_vm1, %v6617_v13, %v6618_v51  ;;  %v13044_v40 = vcombine.low %v20352_v12, %v20351_v53  ;;  %v20353_v59 = vsel %vm16606_vm11, %v17608_v6, %v17621_v43 }
 0x407   : > { %v20354_v36 = vsel %vm16606_vm11, %v17601_v42, %v17565_v61  ;;  %v4294_v18 = vsel %vm16606_vm11, %v17647_v48, %v17590_v14  ;;  %v4304_v23 = vsel %vm16606_vm11, %v17651_v54, %v17637_v55  ;;  %v20355_v6 = vor.u32 %v17617_v2, %v17615_v22  ;;  %v15770_v48 = vld [vmem:[#allocation4 + $0x168] sm:$0xff]  }
 0x408   : > { %v13045_v7 = vcombine.low %v20354_v36, %v20353_v59  ;;  %v20356_v42 = vor.u32 %v17625_v57, %v17623_v1  ;;  %v4336_v14 = vor.u32 %v17670_v63, %v17664_v44  ;;  %v20357_v60 = vshrl.u32 %v17656_v15, 16 }
 0x409   : > { %14451 = vmatpush3.bf16.msra.mxu0 %v15768_v3  ;;  %v4313_v61 = vrot.slane %v20355_v6, 4  ;;  %v4101_v3 = vld [vmem:[#allocation2 + $0x9c] sm:$0xf]  ;;  %v4359_v13 = vrot.slane %v4357_v45, 5  ;;  %v17903_v51 = vrot.slane %v4363_v35, 5  ;;  %v4369_v55 = vrot.slane %v4367_v8, 4 }
 0x40a   : > { %v4323_v43 = vrot.slane %v20356_v42, 4  ;;  %14452 = vmatprep.subr.bf16.mxu0 %v15769_v16  ;;  %v4356_v50 = vrot.slane %v20357_v60, 4  ;;  %v20358_v22 = vshll.u32 %v17369_v29, 16  ;;  %v4346_v57 = vor.u32 %v4345_v34, %v17677_v9  ;;  %v15771_v34 = vld [vmem:[#allocation4 + $0x170] sm:$0xff]   ;;  %v15772_v60 = vld [vmem:[#allocation4 + $0x178] sm:$0xff]  }
 0x40b   : > { %v4378_v54 = vshrl.u32 %v4098_v4, 16  ;;  %v4381_v26 = vshll.u32 %v4098_v4, 16  ;;  %v4387_v44 = vshll.u32 %v17391_v17, 16  ;;  %v4391_v63 = vshrl.u32 %v17391_v17, 16 }
 0x40c   : > { %14421 = vmatmul.mubr.bf16.gmra.mrb[48].mxu0 %v13044_v40  ;;  %v4327_v2 = vrot.slane %v20358_v22, 5  ;;  %v4402_v15 = vshrl.u32 %v4101_v3, 16  ;;  %v4405_v53 = vshll.u32 %v4101_v3, 16  ;;  %v4318_v45 = vsel %vm16606_vm11, %v4313_v61, %v17623_v1 }
 0x40d   : > { %14424 = vmatprep.mubr.bf16.mxu0 %v13045_v7  ;;  %14453 = vmatpush3.bf16.msra.mxu0 %v15769_v16  ;;  %v4349_v35 = vshll.u32 %v17371_v28, 16  ;;  %v4411_v29 = vshll.u32 %v17416_v19, 16  ;;  %v4415_v8 = vshrl.u32 %v17416_v19, 16  ;;  %v4337_v12 = vrot.slane %v4336_v14, 4  ;;  %v4104_v14 = vld [vmem:[#allocation2 + $0xa8] sm:$0xf] }
 0x40e   : > { %14454 = vmatprep.subr.bf16.mxu0 %v15770_v48  ;;  %v4328_v16 = vsel %vm16606_vm11, %v4323_v43, %v4327_v2  ;;  %v4360_v40 = vor.u32 %v4359_v13, %v4356_v50  ;;  %v4370_v17 = vor.u32 %v4369_v55, %v17903_v51  ;;  %v4347_v59 = vrot.slane %v4346_v57, 4 }
 0x40f   : > { %v4373_v36 = vshll.u32 %v17400_v52, 16  ;;  %v4380_v7 = vrot.slane %v4378_v54, 4  ;;  %v4383_v1 = vrot.slane %v4381_v26, 5  ;;  %v17920_v4 = vrot.slane %v4387_v44, 5  ;;  %v4107_v26 = vld [vmem:[#allocation2 + $0xb4] sm:$0xf] }
 0x410   : > { %v4393_v28 = vrot.slane %v4391_v63, 4  ;;  %v4404_v6 = vrot.slane %v4402_v15, 4  ;;  %v4407_v61 = vrot.slane %v4405_v53, 5  ;;  %v13046_v19 = vcombine.low %v4294_v18, %v4304_v23  ;;  %v17934_v53 = vld [vmem:[#allocation4 + $0x180] sm:$0xff]  }
 0x411   : > { %14455 = vmatpush3.bf16.msra.mxu0 %v15770_v48  ;;  %v4351_v42 = vrot.slane %v4349_v35, 5  ;;  %v17922_v3 = vrot.slane %v4411_v29, 5  ;;  %v4417_v43 = vrot.slane %v4415_v8, 4  ;;  %v13047_v50 = vcombine.low %v4318_v45, %v4328_v16 }
 0x412   : > { %14456 = vmatprep.subr.bf16.mxu0 %v15771_v34  ;;  %v4361_v13 = vrot.slane %v4360_v40, 4  ;;  %v4371_v55 = vrot.slane %v4370_v17, 4  ;;  %v4342_v52 = vsel %vm16606_vm11, %v4337_v12, %v17677_v9  ;;  %v4375_v48 = vrot.slane %v4373_v36, 5 }
 0x413   : > { %v4352_v22 = vsel %vm16606_vm11, %v4347_v59, %v4351_v42  ;;  %v4397_v18 = vshll.u32 %v17409_v37, 16  ;;  %v4384_v23 = vor.u32 %v4383_v1, %v4380_v7  ;;  %v4394_v2 = vor.u32 %v4393_v28, %v17920_v4 }
 0x414   : > { %14425 = vmatmul.mubr.bf16.gmra.mrb[52].mxu0 %v13046_v19  ;;  %v4408_v57 = vor.u32 %v4407_v61, %v4404_v6  ;;  %v4426_v54 = vshrl.u32 %v4104_v14, 16  ;;  %v4418_v44 = vor.u32 %v4417_v43, %v17922_v3  ;;  %v4429_v63 = vshll.u32 %v4104_v14, 16 }
 0x415   : > { %14428 = vmatprep.mubr.bf16.mxu0 %v13047_v50  ;;  %14457 = vmatpush3.bf16.msra.mxu0 %v15771_v34  ;;  %v4435_v15 = vshll.u32 %v17430_v0, 16  ;;  %v4439_v9 = vshrl.u32 %v17430_v0, 16  ;;  %v13048_v45 = vcombine.low %v4342_v52, %v4352_v22  ;;  %v4366_v37 = vsel %vm16606_vm11, %v4361_v13, %v17903_v51 }
 0x416   : > { %14458 = vmatprep.subr.bf16.mxu0 %v15772_v60  ;;  %v4376_v35 = vsel %vm16606_vm11, %v4371_v55, %v4375_v48  ;;  %v4421_v29 = vshll.u32 %v17439_v30, 16  ;;  %v4450_v8 = vshrl.u32 %v4107_v26, 16  ;;  %v4453_v34 = vshll.u32 %v4107_v26, 16  ;;  %v15949_v26 = vld [vmem:[#allocation2 + $0xb0] sm:$0x1] }
 0x417   : > { %v4459_v16 = vshll.u32 %v17448_v41, 16  ;;  %v4463_v12 = vshrl.u32 %v17448_v41, 16  ;;  %v4385_v0 = vrot.slane %v4384_v23, 4  ;;  %v4395_v40 = vrot.slane %v4394_v2, 4  ;;  %v4110_v41 = vld [vmem:[#allocation2 + $0xc0] sm:$0xf] }
 0x418   : > { %v4409_v17 = vrot.slane %v4408_v57, 4  ;;  %v4428_v59 = vrot.slane %v4426_v54, 4  ;;  %v4419_v36 = vrot.slane %v4418_v44, 4  ;;  %v4431_v7 = vrot.slane %v4429_v63, 5 }
 0x419   : > { %14459 = vmatpush3.bf16.msra.mxu0 %v15772_v60  ;;  %v4437_v1 = vrot.slane %v4435_v15, 5  ;;  %v4441_v51 = vrot.slane %v4439_v9, 4  ;;  %v13049_v28 = vcombine.low %v4366_v37, %v4376_v35  ;;  %v4399_v6 = vrot.slane %v4397_v18, 5  ;;  %v20359_v18 = vld [vmem:[#allocation57_spill] sm:$0xff] }
 0x41a   : > { %14492 = vmatprep.subr.bf16.mxu0 %v17934_v53  ;;  %v4423_v30 = vrot.slane %v4421_v29, 5  ;;  %v4452_v61 = vrot.slane %v4450_v8, 4  ;;  %v4455_v19 = vrot.slane %v4453_v34, 5  ;;  %v4461_v42 = vrot.slane %v4459_v16, 5 }
 0x41b   : > { %v4465_v43 = vrot.slane %v4463_v12, 4  ;;  %v4390_v14 = vsel %vm16606_vm11, %v4385_v0, %v17920_v4  ;;  %v4400_v60 = vsel %vm16606_vm11, %v4395_v40, %v4399_v6  ;;  %v4414_v50 = vsel %vm16606_vm11, %v4409_v17, %v17922_v3  ;;  %v15950_v3 = vld [vmem:[#allocation2 + $0xbc] sm:$0x1] }
 0x41c   : > { %14429 = vmatmul.mubr.bf16.gmra.mrb[56].mxu0 %v13048_v45  ;;  %v4424_v13 = vsel %vm16606_vm11, %v4419_v36, %v4423_v30  ;;  %v4432_v55 = vor.u32 %v4431_v7, %v4428_v59  ;;  %v4442_v52 = vor.u32 %v4441_v51, %v4437_v1  ;;  %v4474_v22 = vshrl.u32 %v4110_v41, 16  ;;  %v20360_v7 = vld [vmem:[#allocation55_spill] sm:$0xff] }
 0x41d   : > { %14432 = vmatprep.mubr.bf16.mxu0 %v13049_v28  ;;  %v4477_v48 = vshll.u32 %v4110_v41, 16  ;;  %v4483_v23 = vshll.u32 %v20359_v18, 16  ;;  %v4487_v2 = vshrl.u32 %v20359_v18, 16  ;;  %v4456_v57 = vor.u32 %v4455_v19, %v4452_v61  ;;  %v15951_v30 = vld [vmem:[#allocation2 + $0x10] sm:$0xf] }
 0x41e   : > { %v4466_v4 = vor.u32 %v4465_v43, %v4461_v42  ;;  %v13050_v54 = vcombine.low %v4390_v14, %v4400_v60  ;;  %v4445_v44 = vshll.u32 %v15949_v26, 16  ;;  %v13051_v63 = vcombine.low %v4414_v50, %v4424_v13  ;;  %v4819_v60 = vld [vmem:[#allocation2 + $0xc] sm:$0xe]  ;;  %v1457_v13 = vld [vmem:[#allocation2 + $0xcc] sm:$0x1]  ;;  %v15774_v26 = vld [vmem:[#allocation4 + $0x188] sm:$0xff]  }
 0x41f   : > { %v4433_v15 = vrot.slane %v4432_v55, 4  ;;  %v4443_v9 = vrot.slane %v4442_v52, 4  ;;  %v4469_v45 = vshll.u32 %v15950_v3, 16  ;;  %v4476_v37 = vrot.slane %v4474_v22, 4  ;;  %v20361_v52 = vld [vmem:[#allocation53_spill] sm:$0xff]  ;;  %v20367_v3 = vld [vmem:[#allocation31_spill] sm:$0xff] }
 0x420   : > { %v4479_v35 = vrot.slane %v4477_v48, 5  ;;  %v4485_v29 = vrot.slane %v4483_v23, 5  ;;  %v4489_v8 = vrot.slane %v4487_v2, 4  ;;  %v4457_v34 = vrot.slane %v4456_v57, 4 }
 0x421   : > { %v4467_v16 = vrot.slane %v4466_v4, 4  ;;  %v4447_v12 = vrot.slane %v4445_v44, 5  ;;  %v4438_v0 = vsel %vm16606_vm11, %v4433_v15, %v4437_v1  ;;  %v4471_v40 = vrot.slane %v4469_v45, 5  ;;  %v20363_v44 = vld [vmem:[#allocation25_spill] sm:$0xff] }
 0x422   : > { %v4480_v59 = vor.u32 %v4479_v35, %v4476_v37  ;;  %v4490_v36 = vor.u32 %v4489_v8, %v4485_v29  ;;  %v4493_v51 = vshll.u32 %v20360_v7, 16  ;;  %v4462_v28 = vsel %vm16606_vm11, %v4457_v34, %v4461_v42  ;;  %v15775_v37 = vld [vmem:[#allocation4 + $0x190] sm:$0xff]   ;;  %v15776_v35 = vld [vmem:[#allocation4 + $0x198] sm:$0xff]  }
 0x423   : > { %v4448_v17 = vsel %vm16606_vm11, %v4443_v9, %v4447_v12  ;;  %v4472_v6 = vsel %vm16606_vm11, %v4467_v16, %v4471_v40  ;;  %v4885_v61 = vrot.slane %v15951_v30, 5  ;;  %v13063_v55 = vrot.slane %v4819_v60, 9  ;;  %v20366_v9 = vld [vmem:[#allocation30_spill] sm:$0xff]  ;;  %v20370_v8 = vld [vmem:[#allocation33_spill] sm:$0xff]  ;;  %v15777_v40 = vld [vmem:[#allocation4 + $0x1a0] sm:$0xff]  }
 0x424   : > { %14433 = vmatmul.mubr.bf16.gmra.mrb[60].mxu0 %v13050_v54  ;;  %v13052_v19 = vcombine.low %v4438_v0, %v4448_v17  ;;  %v13053_v43 = vcombine.low %v4462_v28, %v4472_v6  ;;  %v4481_v41 = vrot.slane %v4480_v59, 4  ;;  %v4491_v1 = vrot.slane %v4490_v36, 4  ;;  %v20372_v16 = vld [vmem:[#allocation26_spill] sm:$0xff]  ;;  %v15778_v17 = vld [vmem:[#allocation4 + $0x1a8] sm:$0xff]   ;;  %v20378_v7 = vld [vmem:[#allocation37_spill] sm:$0xff] }
 0x425   : > { %14436 = vmatprep.mubr.bf16.mxu0 %v13051_v63  ;;  %v4495_v14 = vrot.slane %v4493_v51, 5  ;;  %v4887_v50 = vrot.slane %v4885_v61, 4  ;;  %v4888_v22 = vrot.slane %v20361_v52, 5  ;;  %v1458_v42 = vsel %vm16538_vm8, 0, %v1457_v13  ;;  %v20364_v63 = vld [vmem:[#allocation29_spill] sm:$0xff]  ;;  %v20373_v12 = vld [vmem:[#allocation34_spill] sm:$0xff] }
 0x426   : > { %v4486_v18 = vsel %vm16606_vm11, %v4481_v41, %v4485_v29  ;;  %1459 = vst [vmem:[#allocation2 + $0xcc] sm:$0x1] %v1458_v42  ;;  %v4886_v4 = vsel %vm17067_vm1, %v13063_v55, %v4885_v61  ;;  %v20365_v15 = vcombine.low %v20363_v44, %v20364_v63  ;;  %v20368_v45 = vcombine.low %v20366_v9, %v20367_v3  ;;  %v20369_v29 = vld [vmem:[#allocation32_spill] sm:$0xff]  ;;  %v20379_v51 = vld [vmem:[#allocation38_spill] sm:$0xff]  ;;  %v15779_v6 = vld [vmem:[#allocation4 + $0x1b0] sm:$0xff]  }
 0x427   : > { %v4496_v23 = vsel %vm16606_vm11, %v4491_v1, %v4495_v14  ;;  %v4889_v2 = vsel %vm17067_vm1, %v4887_v50, %v4888_v22  ;;  %v20371_v34 = vcombine.low %v20369_v29, %v20370_v8  ;;  %v20374_v0 = vcombine.low %v20372_v16, %v20373_v12  ;;  %v20376_v59 = vld [vmem:[#allocation36_spill] sm:$0xff]  ;;  %v15780_v30 = vld [vmem:[#allocation4 + $0x1b8] sm:$0xff]   ;;  %v17996_v61 = vld [vmem:[#allocation2 + $0xc4] sm:$0xf] }
 0x428   : > { %v13054_v57 = vcombine.low %v4486_v18, %v4496_v23  ;;  %v13079_v54 = vcombine.low %v4886_v4, %v4889_v2  ;;  %v20380_v28 = vcombine.low %v20378_v7, %v20379_v51  ;;  %v20381_v41 = vld [vmem:[#allocation39_spill] sm:$0xff]  ;;  %v20382_v1 = vld [vmem:[#allocation40_spill] sm:$0xff]  ;;  %v6472_v60 = vld [vmem:[#allocation2 + $0xc0] sm:$0xe] }
 0x429   : > { %v20383_v14 = vcombine.low %v20381_v41, %v20382_v1  ;;  %v20384_v50 = vld [vmem:[#allocation41_spill] sm:$0xff]  ;;  %v20385_v13 = vld [vmem:[#allocation27_spill] sm:$0xff]  ;;  %v13165_v52 = vrot.slane %v6472_v60, 9  ;;  %v20387_v4 = vld [vmem:[#allocation28_spill] sm:$0xff] }
 0x42a   : > { %v20386_v55 = vcombine.low %v20384_v50, %v20385_v13  ;;  %v15783_v18 = vld [vmem:[#allocation4 + $0x1c0] sm:$0xff]   ;;  %v20391_v63 = vld [vmem:[#allocation44_spill] sm:$0xff]  ;;  %v20393_v9 = vld [vmem:[#allocation45_spill] sm:$0xff] }
 0x42b   : > { %v20390_v44 = vld [vmem:[#allocation43_spill] sm:$0xff]  ;;  %v20394_v3 = vld [vmem:[#allocation46_spill] sm:$0xff]  ;;  %v20399_v8 = vld [vmem:[#allocation49_spill] sm:$0xff] }
 0x42c   : > { %14437 = vmatmul.mubr.bf16.gmra.mrb[64].mxu0 %v13052_v19  ;;  %v17998_v19 = vld [vmem:[#allocation2 + $0xc8] sm:$0x1]  ;;  %v20402_v12 = vld [vmem:[#allocation52_spill] sm:$0xff]  ;;  %v15789_v41 = vld [vmem:[#allocation4 + $0x1d0] sm:$0xff]  }
 0x42d   : > { %14440 = vmatprep.mubr.bf16.mxu0 %v13053_v43  ;;  %v6622_v43 = vrot.slane %v17996_v61, 5  ;;  %v6625_v42 = vrot.slane %v17998_v19, 5  ;;  %v20406_v7 = vld [vmem:[#allocation62_spill] sm:$0xff]  ;;  %v15785_v1 = vld [vmem:[#allocation2 + $0x3c] sm:$0xff]   ;;  %v15795_v50 = vld [vmem:[#allocation4 + $0x1e0] sm:$0xff]  }
 0x42e   : > { %v20407_v51 = vld [vmem:[#allocation66_spill] sm:$0xff]  ;;  %v15788_v13 = vld [vmem:[#allocation2 + $0x54] sm:$0xff]  }
 0x42f   : > { %v6624_v22 = vrot.slane %v6622_v43, 4  ;;  %v18010_v23 = vsel %vm17067_vm1, %v13165_v52, %v6622_v43  ;;  %v15784_v43 = vld [vmem:[#allocation2 + $0x30] sm:$0xff]   ;;  %v15787_v60 = vld [vmem:[#allocation2 + $0x48] sm:$0xff]   ;;  %v15790_v52 = vld [vmem:[#allocation2 + $0x60] sm:$0xff]  }
 0x431   : > { %v18014_v2 = vsel %vm17067_vm1, %v6624_v22, %v6625_v42  ;;  %v15801_v22 = vld [vmem:[#allocation4 + $0x1f0] sm:$0xff]   ;;  %v15791_v42 = vld [vmem:[#allocation2 + $0x6c] sm:$0xff]  }
 0x434   : > { %14441 = vmatmul.mubr.bf16.gmra.mrb[68].mxu0 %v13054_v57 }
 0x435   : > { %14460 = vmatprep.mubr.bf16.mxu0 %v13079_v54  ;;  %v20388_v54 = vld [vmem:[#allocation42_spill] sm:$0xff] }
 0x43c   : > { %14461 = vmatmul.mubr.bf16.vlgmr.msra.gmra.mrb[40].mxu0 %v20365_v15  ;;  %v20392_v15 = vcombine.low %v20390_v44, %v20391_v63  ;;  %v18041_v63 = vld [vmem:[#allocation4 + $0x200] sm:$0xff]  }
 0x43d   : > { %14464 = vmatprep.mubr.bf16.mxu0 %v20368_v45  ;;  %14493 = vmatpush3.bf16.msra.mxu0 %v17934_v53  ;;  %v20375_v53 = vld [vmem:[#allocation35_spill] sm:$0xff]  ;;  %v20395_v45 = vcombine.low %v20393_v9, %v20394_v3 }
 0x43e   : > { %14494 = vmatprep.subr.bf16.mxu0 %v15774_v26  ;;  %v20377_v36 = vcombine.low %v20375_v53, %v20376_v59 }
 0x441   : > { %14495 = vmatpush3.bf16.msra.mxu0 %v15774_v26  ;;  %v20389_v26 = vcombine.low %v20387_v4, %v20388_v54  ;;  %v15793_v4 = vld [vmem:[#allocation2 + $0x78] sm:$0xff]  }
 0x442   : > { %14496 = vmatprep.subr.bf16.mxu0 %v15775_v37  ;;  %v5704_v54 = vld [vmem:[#allocation2 + $0x18] sm:$0xf] }
 0x443   : > { %v5756_v44 = vshll.u32 %v5704_v54, 16 }
 0x444   : > { %14465 = vmatmul.mubr.bf16.gmra.mrb[44].mxu0 %v20371_v34  ;;  %v20400_v34 = vld [vmem:[#allocation50_spill] sm:$0xff] }
 0x445   : > { %14468 = vmatprep.mubr.bf16.mxu0 %v20374_v0  ;;  %14497 = vmatpush3.bf16.msra.mxu0 %v15775_v37  ;;  %v20396_v37 = vld [vmem:[#allocation47_spill] sm:$0xff]  ;;  %v20401_v16 = vcombine.low %v20399_v8, %v20400_v34 }
 0x446   : > { %14498 = vmatprep.subr.bf16.mxu0 %v15776_v35  ;;  %v20403_v0 = vld [vmem:[#allocation51_spill] sm:$0xff] }
 0x447   : > { %v15796_v8 = vld [vmem:[#allocation2 + $0x90] sm:$0xff]  }
 0x449   : > { %14499 = vmatpush3.bf16.msra.mxu0 %v15776_v35  ;;  %v20397_v35 = vld [vmem:[#allocation48_spill] sm:$0xff] }
 0x44a   : > { %14500 = vmatprep.subr.bf16.mxu0 %v15777_v40  ;;  %v20398_v29 = vcombine.low %v20396_v37, %v20397_v35  ;;  %v15794_v37 = vld [vmem:[#allocation2 + $0x84] sm:$0xff]  }
 0x44c   : > { %14469 = vmatmul.mubr.bf16.gmra.mrb[48].mxu0 %v20377_v36  ;;  %v15781_v36 = vld [vmem:[#allocation2 + $0x18] sm:$0xff]  }
 0x44d   : > { %14472 = vmatprep.mubr.bf16.mxu0 %v20380_v28  ;;  %14501 = vmatpush3.bf16.msra.mxu0 %v15777_v40  ;;  %v20404_v40 = vcombine.low %v20402_v12, %v20403_v0  ;;  %v20408_v28 = vcombine.low %v20406_v7, %v20407_v51 }
 0x44e   : > { %14502 = vmatprep.subr.bf16.mxu0 %v15778_v17 }
 0x451   : > { %14503 = vmatpush3.bf16.msra.mxu0 %v15778_v17  ;;  %v1513_v17 = vld [vmem:[#allocation2 + $0xd4] sm:$0x1] }
 0x452   : > { %14504 = vmatprep.subr.bf16.mxu0 %v15779_v6  ;;  %v1514_v59 = vsel %vm16531_vm7, 0, %v1513_v17 }
 0x453   : > { %1515 = vst [vmem:[#allocation2 + $0xd4] sm:$0x1] %v1514_v59 }
 0x454   : > { %14473 = vmatmul.mubr.bf16.gmra.mrb[52].mxu0 %v20383_v14  ;;  %v15792_v14 = vld [vmem:[#allocation4 + $0x1d8] sm:$0xff]  }
 0x455   : > { %14476 = vmatprep.mubr.bf16.mxu0 %v20386_v55  ;;  %14505 = vmatpush3.bf16.msra.mxu0 %v15779_v6  ;;  %v15782_v6 = vld [vmem:[#allocation2 + $0x24] sm:$0xff]   ;;  %v15798_v55 = vld [vmem:[#allocation4 + $0x1e8] sm:$0xff]  }
 0x456   : > { %14506 = vmatprep.subr.bf16.mxu0 %v15780_v30 }
 0x459   : > { %14507 = vmatpush3.bf16.msra.mxu0 %v15780_v30  ;;  %v15786_v30 = vld [vmem:[#allocation4 + $0x1c8] sm:$0xff]  }
 0x45a   : > { %14540 = vmatprep.subr.bf16.mxu0 %v15783_v18 }
 0x45c   : > { %14477 = vmatmul.mubr.bf16.gmra.mrb[56].mxu0 %v20389_v26  ;;  %v5753_v26 = vshrl.u32 %v5704_v54, 16 }
 0x45d   : > { %14480 = vmatprep.mubr.bf16.mxu0 %v20392_v15  ;;  %v20409_v15 = vld [vmem:[#allocation21_spill] sm:$0xff] }
 0x45e   : > { %v5762_v9 = vshll.u32 %v20409_v15, 16  ;;  %v5766_v3 = vshrl.u32 %v20409_v15, 16  ;;  %v5755_v35 = vrot.slane %v5753_v26, 4  ;;  %v5713_v15 = vld [vmem:[#allocation2 + $0x3c] sm:$0xf] }
 0x460   : > { %v5764_v34 = vrot.slane %v5762_v9, 5 }
 0x464   : > { %14481 = vmatmul.mubr.bf16.gmra.mrb[60].mxu0 %v20395_v45  ;;  %v5707_v45 = vld [vmem:[#allocation2 + $0x24] sm:$0xf] }
 0x465   : > { %14484 = vmatprep.mubr.bf16.mxu0 %v20398_v29  ;;  %v5758_v29 = vrot.slane %v5756_v44, 5  ;;  %v5777_v12 = vshrl.u32 %v5707_v45, 16  ;;  %v5780_v0 = vshll.u32 %v5707_v45, 16 }
 0x467   : > { %v5759_v7 = vor.u32 %v5758_v29, %v5755_v35 }
 0x46c   : > { %14485 = vmatmul.mubr.bf16.gmra.mrb[64].mxu0 %v20401_v16  ;;  %v5768_v16 = vrot.slane %v5766_v3, 4  ;;  %v20413_v3 = vld [vmem:[#allocation58_spill] sm:$0xff] }
 0x46d   : > { %14488 = vmatprep.mubr.bf16.mxu0 %v20404_v40  ;;  %v20410_v40 = vld [vmem:[#allocation56_spill] sm:$0xff]  ;;  %v5796_v45 = vshll.u32 %v20413_v3, 16 }
 0x46e   : > { %v5786_v17 = vshll.u32 %v20410_v40, 16  ;;  %v5790_v59 = vshrl.u32 %v20410_v40, 16  ;;  %v5769_v51 = vor.u32 %v5768_v16, %v5764_v34  ;;  %v5825_v40 = vshrl.u32 %v5713_v15, 16 }
 0x474   : > { %14489 = vmatmul.mubr.bf16.gmra.mrb[68].mxu0 %v20408_v28 }
 0x475   : > { %14508 = vmatprep.mubr.bf16.mxu0 %v15781_v36  ;;  %v5710_v36 = vld [vmem:[#allocation2 + $0x30] sm:$0xf] }
 0x476   : > { %v5801_v28 = vshrl.u32 %v5710_v36, 16 }
 0x47c   : > { %14509 = vmatmul.mubr.bf16.vlgmr.msra.gmra.mrb[40].mxu0 %v15782_v6  ;;  %v5804_v6 = vshll.u32 %v5710_v36, 16 }
 0x47d   : > { %14512 = vmatprep.mubr.bf16.mxu0 %v15784_v43  ;;  %14541 = vmatpush3.bf16.msra.mxu0 %v15783_v18  ;;  %v15804_v18 = vld [vmem:[#allocation4 + $0x1f8] sm:$0xff]   ;;  %v5782_v43 = vrot.slane %v5780_v0, 5 }
 0x47e   : > { %14542 = vmatprep.subr.bf16.mxu0 %v15786_v30  ;;  %v5806_v54 = vrot.slane %v5804_v6, 5  ;;  %v15800_v6 = vld [vmem:[#allocation2 + $0xb4] sm:$0xff]  }
 0x481   : > { %14543 = vmatpush3.bf16.msra.mxu0 %v15786_v30  ;;  %v5779_v30 = vrot.slane %v5777_v12, 4  ;;  %v20414_v12 = vld [vmem:[#allocation60_spill] sm:$0xff] }
 0x482   : > { %14544 = vmatprep.subr.bf16.mxu0 %v15789_v41  ;;  %v5820_v0 = vshll.u32 %v20414_v12, 16 }
 0x483   : > { %v5783_v26 = vor.u32 %v5782_v43, %v5779_v30  ;;  %v20415_v43 = vld [vmem:[#allocation61_spill] sm:$0xff] }
 0x484   : > { %14513 = vmatmul.mubr.bf16.gmra.mrb[44].mxu0 %v15785_v1  ;;  %v5792_v1 = vrot.slane %v5790_v59, 4 }
 0x485   : > { %14516 = vmatprep.mubr.bf16.mxu0 %v15787_v60  ;;  %14545 = vmatpush3.bf16.msra.mxu0 %v15789_v41  ;;  %v18048_v41 = vrot.slane %v5786_v17, 5  ;;  %v5716_v17 = vld [vmem:[#allocation2 + $0x48] sm:$0xf]  ;;  %v5784_v59 = vrot.slane %v5783_v26, 4 }
 0x486   : > { %14546 = vmatprep.subr.bf16.mxu0 %v15792_v14 }
 0x487   : > { %v5793_v44 = vor.u32 %v5792_v1, %v18048_v41  ;;  %v5834_v1 = vshll.u32 %v20415_v43, 16 }
 0x489   : > { %14547 = vmatpush3.bf16.msra.mxu0 %v15792_v14  ;;  %v20411_v14 = vld [vmem:[#allocation54_spill] sm:$0xff]  ;;  %v5794_v36 = vrot.slane %v5793_v44, 4  ;;  %v18076_v44 = vld [vmem:[#allocation2 + $0xd0] sm:$0xf] }
 0x48a   : > { %14548 = vmatprep.subr.bf16.mxu0 %v15795_v50  ;;  %v5772_v60 = vshll.u32 %v20411_v14, 16  ;;  %v5849_v14 = vshrl.u32 %v5716_v17, 16 }
 0x48c   : > { %14517 = vmatmul.mubr.bf16.gmra.mrb[48].mxu0 %v15788_v13  ;;  %v5774_v9 = vrot.slane %v5772_v60, 5  ;;  %v5719_v60 = vld [vmem:[#allocation2 + $0x54] sm:$0xf] }
 0x48d   : > { %14520 = vmatprep.mubr.bf16.mxu0 %v15790_v52  ;;  %14549 = vmatpush3.bf16.msra.mxu0 %v15795_v50  ;;  %v20412_v50 = vld [vmem:[#allocation59_spill] sm:$0xff]  ;;  %v15797_v52 = vld [vmem:[#allocation2 + $0x9c] sm:$0xff]  }
 0x48e   : > { %14550 = vmatprep.subr.bf16.mxu0 %v15798_v55  ;;  %v5810_v13 = vshll.u32 %v20412_v50, 16 }
 0x491   : > { %14551 = vmatpush3.bf16.msra.mxu0 %v15798_v55  ;;  %v5814_v55 = vshrl.u32 %v20412_v50, 16  ;;  %v15802_v50 = vld [vmem:[#allocation2 + $0xc0] sm:$0xff]  }
 0x492   : > { %14552 = vmatprep.subr.bf16.mxu0 %v15801_v22 }
 0x493   : > { %v5816_v35 = vrot.slane %v5814_v55, 4  ;;  %v18067_v55 = vrot.slane %v5820_v0, 5 }
 0x494   : > { %14521 = vmatmul.mubr.bf16.gmra.mrb[52].mxu0 %v15791_v42  ;;  %v15799_v42 = vld [vmem:[#allocation2 + $0xa8] sm:$0xff]  }
 0x495   : > { %14524 = vmatprep.mubr.bf16.mxu0 %v15793_v4  ;;  %14553 = vmatpush3.bf16.msra.mxu0 %v15801_v22  ;;  %v5760_v22 = vrot.slane %v5759_v7, 4  ;;  %v5803_v4 = vrot.slane %v5801_v28, 4  ;;  %v5798_v7 = vrot.slane %v5796_v45, 5  ;;  %v5828_v28 = vshll.u32 %v5713_v15, 16  ;;  %v18078_v15 = vld [vmem:[#allocation2 + $0xd4] sm:$0x1] }
 0x496   : > { %14554 = vmatprep.subr.bf16.mxu0 %v15804_v18  ;;  %v6473_v45 = vld [vmem:[#allocation2 + $0xcc] sm:$0xe] }
 0x497   : > { %v5765_v29 = vsel %vm16606_vm11, %v5760_v22, %v5764_v34  ;;  %v5807_v16 = vor.u32 %v5806_v54, %v5803_v4  ;;  %v5838_v34 = vshrl.u32 %v20415_v43, 16  ;;  %v5852_v22 = vshll.u32 %v5716_v17, 16  ;;  %v20416_v4 = vld [vmem:[#allocation67_spill] sm:$0xff] }
 0x498   : > { %v5858_v54 = vshll.u32 %v20416_v4, 16  ;;  %v5862_v26 = vshrl.u32 %v20416_v4, 16  ;;  %v5830_v3 = vrot.slane %v5828_v28, 5  ;;  %v13166_v12 = vrot.slane %v6473_v45, 9 }
 0x499   : > { %14555 = vmatpush3.bf16.msra.mxu0 %v15804_v18  ;;  %v5770_v18 = vrot.slane %v5769_v51, 4  ;;  %v5854_v0 = vrot.slane %v5852_v22, 5  ;;  %v5876_v17 = vshll.u32 %v5719_v60, 16 }
 0x49a   : > { %14588 = vmatprep.subr.bf16.mxu0 %v18041_v63 }
 0x49c   : > { %14525 = vmatmul.mubr.bf16.gmra.mrb[56].mxu0 %v15794_v37  ;;  %v18055_v37 = vrot.slane %v5810_v13, 5  ;;  %v18065_v13 = vrot.slane %v5807_v16, 4  ;;  %v5851_v16 = vrot.slane %v5849_v14, 4  ;;  %v5722_v14 = vld [vmem:[#allocation2 + $0x60] sm:$0xf] }
 0x49d   : > { %14528 = vmatprep.mubr.bf16.mxu0 %v15796_v8  ;;  %v5775_v8 = vsel %vm16606_vm11, %v5770_v18, %v5774_v9  ;;  %v5799_v18 = vsel %vm16606_vm11, %v5794_v36, %v5798_v7  ;;  %v15803_v36 = vld [vmem:[#allocation2 + $0xcc] sm:$0xff]   ;;  %v18086_v7 = vrot.slane %v5858_v54, 5 }
 0x49e   : > { %v5817_v51 = vor.u32 %v5816_v35, %v18055_v37  ;;  %v13127_v30 = vcombine.low %v5765_v29, %v5775_v8  ;;  %v6629_v35 = vrot.slane %v18076_v44, 5  ;;  %v18084_v29 = vrot.slane %v5834_v1, 5  ;;  %v20418_v54 = vld [vmem:[#allocation63_spill] sm:$0xff] }
 0x49f   : > { %v5840_v8 = vrot.slane %v5838_v34, 4  ;;  %v5813_v1 = vsel %vm16606_vm11, %v18065_v13, %v18055_v37  ;;  %v5855_v13 = vor.u32 %v5854_v0, %v5851_v16  ;;  %v5930_v0 = vshll.u32 %v17742_v24, 16 }
 0x4a0   : > { %v18080_v9 = vrot.slane %v5817_v51, 4  ;;  %v5864_v51 = vrot.slane %v5862_v26, 4  ;;  %v18091_v43 = vsel %vm17067_vm1, %v13166_v12, %v6629_v35 }
 0x4a1   : > { %v5841_v37 = vor.u32 %v5840_v8, %v18084_v29  ;;  %v1529_v8 = vld [vmem:[#allocation3 + $0x18] sm:$0x1] }
 0x4a2   : > { %v5823_v22 = vsel %vm16606_vm11, %v18080_v9, %v18067_v55  ;;  %v15813_v55 = vld [vmem:[#allocation7 + $0x40] sm:$0xff]  }
 0x4a3   : > { %14636 = vmatprep.subr.bf16.mxu1 %v15813_v55 }
 0x4a4   : > { %14529 = vmatmul.mubr.bf16.gmra.mrb[60].mxu0 %v15797_v52  ;;  %v5827_v52 = vrot.slane %v5825_v40, 4  ;;  %v5873_v40 = vshrl.u32 %v5719_v60, 16  ;;  %14637 = vmatpush3.bf16.msra.mxu1 %v15813_v55  ;;  %v13129_v55 = vcombine.low %v5813_v1, %v5823_v22  ;;  %v15953_v22 = vld [vmem:[#allocation2 + $0x68] sm:$0x1] }
 0x4a5   : > { %14532 = vmatprep.mubr.bf16.mxu0 %v15799_v42  ;;  %v5789_v42 = vsel %vm16606_vm11, %v5784_v59, %v18048_v41  ;;  %v6632_v41 = vrot.slane %v18078_v15, 5  ;;  %v6631_v59 = vrot.slane %v6629_v35, 4  ;;  %v5878_v35 = vrot.slane %v5876_v17, 5 }
 0x4a6   : > { %v5831_v4 = vor.u32 %v5830_v3, %v5827_v52  ;;  %v5875_v45 = vrot.slane %v5873_v40, 4  ;;  %v15814_v52 = vld [vmem:[#allocation7 + $0x48] sm:$0xff]   ;;  %v5934_v40 = vshrl.u32 %v17742_v24, 16  ;;  %v1530_v17 = vsel %vm16538_vm8, 0, %v1529_v8 }
 0x4a7   : > { %v18100_v60 = vsel %vm17067_vm1, %v6631_v59, %v6632_v41  ;;  %v5865_v41 = vor.u32 %v5864_v51, %v18086_v7  ;;  %v5897_v59 = vshrl.u32 %v5722_v14, 16  ;;  %v20419_v3 = vld [vmem:[#allocation72_spill] sm:$0xff]  ;;  %v5842_v51 = vrot.slane %v5841_v37, 4  ;;  %1531 = vst [vmem:[#allocation3 + $0x18] sm:$0x1] %v1530_v17  ;;  %14638 = vmatprep.subr.bf16.mxu1 %v15814_v52 }
 0x4a8   : > { %v5910_v26 = vshrl.u32 %v20419_v3, 16  ;;  %v5879_v11 = vor.u32 %v5878_v35, %v5875_v45  ;;  %v15806_v8 = vld [vmem:[#allocation4 + $0x208] sm:$0xff]   ;;  %14639 = vmatpush3.bf16.msra.mxu1 %v15814_v52 }
 0x4a9   : > { %v5899_v47 = vrot.slane %v5897_v59, 4  ;;  %v15816_v59 = vld [vmem:[#allocation7 + $0x58] sm:$0xff]  }
 0x4aa   : > { %v5912_v20 = vrot.slane %v5910_v26, 4  ;;  %v18136_v1 = vrot.slane %v5879_v11, 4 }
 0x4ac   : > { %14533 = vmatmul.mubr.bf16.gmra.mrb[64].mxu0 %v15800_v6  ;;  %v20417_v6 = vld [vmem:[#allocation68_spill] sm:$0xff] }
 0x4ad   : > { %14536 = vmatprep.mubr.bf16.mxu0 %v15802_v50  ;;  %v5882_v28 = vshll.u32 %v20417_v6, 16  ;;  %v13128_v50 = vcombine.low %v5789_v42, %v5799_v18  ;;  %v5886_v34 = vshrl.u32 %v20417_v6, 16  ;;  %v5844_v42 = vshll.u32 %v20418_v54, 16  ;;  %v5725_v18 = vld [vmem:[#allocation2 + $0x6c] sm:$0xf] }
 0x4ae   : > { %v5900_v6 = vshll.u32 %v5722_v14, 16  ;;  %v5906_v54 = vshll.u32 %v20419_v3, 16  ;;  %v5921_v57 = vshrl.u32 %v5725_v18, 16  ;;  %v5924_v16 = vshll.u32 %v5725_v18, 16  ;;  %v15815_v18 = vld [vmem:[#allocation7 + $0x50] sm:$0xff]  }
 0x4af   : > { %v18111_v12 = vrot.slane %v5882_v28, 5  ;;  %v5888_v9 = vrot.slane %v5886_v34, 4  ;;  %v5846_v28 = vrot.slane %v5844_v42, 5  ;;  %v5856_v14 = vrot.slane %v5855_v13, 4  ;;  %14640 = vmatprep.subr.bf16.mxu1 %v15815_v18 }
 0x4b0   : > { %v5866_v3 = vrot.slane %v5865_v41, 4  ;;  %v5902_v24 = vrot.slane %v5900_v6, 5  ;;  %v18121_v5 = vrot.slane %v5906_v54, 5  ;;  %v5926_v37 = vrot.slane %v5924_v16, 5  ;;  %v5728_v41 = vld [vmem:[#allocation2 + $0x78] sm:$0xf]  ;;  %14641 = vmatpush3.bf16.msra.mxu1 %v15815_v18 }
 0x4b1   : > { %v5889_v56 = vor.u32 %v5888_v9, %v18111_v12  ;;  %v18123_v42 = vrot.slane %v5930_v0, 5  ;;  %v5847_v45 = vsel %vm16606_vm11, %v5842_v51, %v5846_v28  ;;  %v5861_v26 = vsel %vm16606_vm11, %v5856_v14, %v18086_v7  ;;  %v15807_v7 = vld [vmem:[#allocation4 + $0x210] sm:$0xff]   ;;  %14642 = vmatprep.subr.bf16.mxu1 %v15816_v59  ;;  %v15955_v14 = vld [vmem:[#allocation2 + $0x74] sm:$0x1] }
 0x4b2   : > { %v5916_v6 = vshll.u32 %v15953_v22, 16  ;;  %v5913_v9 = vor.u32 %v5912_v20, %v18121_v5  ;;  %v5945_v0 = vshrl.u32 %v5728_v41, 16 }
 0x4b3   : > { %v18138_v52 = vrot.slane %v5889_v56, 4  ;;  %v5885_v56 = vsel %vm16606_vm11, %v18136_v1, %v18111_v12 }
 0x4b4   : > { %14537 = vmatmul.mubr.bf16.gmra.mrb[68].mxu0 %v15803_v36  ;;  %v5832_v36 = vrot.slane %v5831_v4, 4  ;;  %v5923_v4 = vrot.slane %v5921_v57, 4  ;;  %v15952_v57 = vld [vmem:[#allocation2 + $0x5c] sm:$0x1]  ;;  %v5914_v18 = vrot.slane %v5913_v9, 4  ;;  %14643 = vmatpush3.bf16.msra.mxu1 %v15816_v59  ;;  %v15809_v9 = vld [vmem:[#allocation4 + $0x220] sm:$0xff]  }
 0x4b5   : > { %14556 = vmatprep.mubr.bf16.mxu0 %v13127_v30  ;;  %v20420_v30 = vld [vmem:[#allocation70_spill] sm:$0xff]  ;;  %v5892_v35 = vshll.u32 %v15952_v57, 16 }
 0x4b6   : > { %v5868_v34 = vshll.u32 %v20420_v30, 16  ;;  %v5936_v30 = vrot.slane %v5934_v40, 4  ;;  %v5837_v13 = vsel %vm16606_vm11, %v5832_v36, %v18084_v29  ;;  %v5903_v29 = vor.u32 %v5902_v24, %v5899_v47  ;;  %v5731_v24 = vld [vmem:[#allocation2 + $0x84] sm:$0xf] }
 0x4b7   : > { %v5927_v54 = vor.u32 %v5926_v37, %v5923_v4  ;;  %v5948_v40 = vshll.u32 %v5728_v41, 16  ;;  %v13130_v11 = vcombine.low %v5837_v13, %v5847_v45  ;;  %v5894_v47 = vrot.slane %v5892_v35, 5  ;;  %v15956_v35 = vld [vmem:[#allocation2 + $0x88] sm:$0xf] }
 0x4b8   : > { %v5870_v17 = vrot.slane %v5868_v34, 5  ;;  %v5937_v16 = vor.u32 %v5936_v30, %v18123_v42  ;;  %v5904_v20 = vrot.slane %v5903_v29, 4  ;;  %v5918_v34 = vrot.slane %v5916_v6, 5 }
 0x4b9   : > { %v5895_v4 = vsel %vm16606_vm11, %v18138_v52, %v5894_v47  ;;  %v5928_v37 = vrot.slane %v5927_v54, 4  ;;  %v5950_v13 = vrot.slane %v5948_v40, 5  ;;  %v5972_v57 = vshll.u32 %v5731_v24, 16  ;;  %v15957_v54 = vld [vmem:[#allocation2 + $0x94] sm:$0xf] }
 0x4ba   : > { %v5938_v30 = vrot.slane %v5937_v16, 4  ;;  %v5978_v41 = vshll.u32 %v15956_v35, 16  ;;  %v5909_v1 = vsel %vm16606_vm11, %v5904_v20, %v18121_v5  ;;  %v5919_v52 = vsel %vm16606_vm11, %v5914_v18, %v5918_v34  ;;  %v15810_v18 = vld [vmem:[#allocation4 + $0x228] sm:$0xff]  }
 0x4bb   : > { %v5933_v59 = vsel %vm16606_vm11, %v5928_v37, %v18123_v42  ;;  %v6002_v16 = vshll.u32 %v15957_v54, 16  ;;  %v13132_v34 = vcombine.low %v5885_v56, %v5895_v4  ;;  %v13133_v37 = vcombine.low %v5909_v1, %v5919_v52 }
 0x4bc   : > { %14557 = vmatmul.mubr.bf16.vlgmr.msra.gmra.mrb[40].mxu0 %v13128_v50  ;;  %v5871_v50 = vsel %vm16606_vm11, %v5866_v3, %v5870_v17  ;;  %v5940_v3 = vshll.u32 %v15955_v14, 16  ;;  %v5947_v17 = vrot.slane %v5945_v0, 4  ;;  %v6006_v0 = vshrl.u32 %v15957_v54, 16 }
 0x4bd   : > { %14560 = vmatprep.mubr.bf16.mxu0 %v13129_v55  ;;  %14589 = vmatpush3.bf16.msra.mxu0 %v18041_v63  ;;  %v15954_v63 = vld [vmem:[#allocation2 + $0x7c] sm:$0xf]  ;;  %v13131_v28 = vcombine.low %v5861_v26, %v5871_v50  ;;  %v15808_v55 = vld [vmem:[#allocation4 + $0x218] sm:$0xff]   ;;  %v5969_v26 = vshrl.u32 %v5731_v24, 16  ;;  %v5982_v50 = vshrl.u32 %v15956_v35, 16  ;;  %v18164_v14 = vrot.slane %v6002_v16, 5 }
 0x4be   : > { %14590 = vmatprep.subr.bf16.mxu0 %v15806_v8  ;;  %v5954_v36 = vshll.u32 %v15954_v63, 16  ;;  %v5958_v51 = vshrl.u32 %v15954_v63, 16  ;;  %v5942_v29 = vrot.slane %v5940_v3, 5  ;;  %v5951_v5 = vor.u32 %v5950_v13, %v5947_v17  ;;  %v15958_v63 = vld [vmem:[#allocation2 + $0x80] sm:$0x1] }
 0x4bf   : > { %v5984_v47 = vrot.slane %v5982_v50, 4  ;;  %v6008_v3 = vrot.slane %v6006_v0, 4  ;;  %v5737_v24 = vld [vmem:[#allocation2 + $0x9c] sm:$0xf]  ;;  %v5740_v17 = vld [vmem:[#allocation2 + $0xa8] sm:$0xf] }
 0x4c0   : > { %v18149_v45 = vrot.slane %v5954_v36, 5  ;;  %v5960_v12 = vrot.slane %v5958_v51, 4  ;;  %v5943_v40 = vsel %vm16606_vm11, %v5938_v30, %v5942_v29  ;;  %v5964_v36 = vshll.u32 %v15958_v63, 16  ;;  %v15959_v35 = vld [vmem:[#allocation2 + $0xa0] sm:$0xf] }
 0x4c1   : > { %14591 = vmatpush3.bf16.msra.mxu0 %v15806_v8  ;;  %v5734_v8 = vld [vmem:[#allocation2 + $0x90] sm:$0xf]  ;;  %v5971_v51 = vrot.slane %v5969_v26, 4  ;;  %v13134_v30 = vcombine.low %v5933_v59, %v5943_v40  ;;  %v6017_v56 = vshrl.u32 %v5737_v24, 16  ;;  %v6020_v4 = vshll.u32 %v5737_v24, 16  ;;  %v15812_v24 = vld [vmem:[#allocation4 + $0x238] sm:$0xff]  }
 0x4c2   : > { %14592 = vmatprep.subr.bf16.mxu0 %v15807_v7  ;;  %v5993_v22 = vshrl.u32 %v5734_v8, 16  ;;  %v5996_v6 = vshll.u32 %v5734_v8, 16  ;;  %v5952_v8 = vrot.slane %v5951_v5, 4  ;;  %v6009_v50 = vor.u32 %v6008_v3, %v18164_v14  ;;  %v15960_v59 = vld [vmem:[#allocation2 + $0x8c] sm:$0x1] }
 0x4c3   : > { %v6030_v29 = vshrl.u32 %v15959_v35, 16  ;;  %v6041_v1 = vshrl.u32 %v5740_v17, 16  ;;  %v5988_v54 = vshll.u32 %v15960_v59, 16  ;;  %v15961_v16 = vld [vmem:[#allocation2 + $0xac] sm:$0xf] }
 0x4c4   : > { %14561 = vmatmul.mubr.bf16.gmra.mrb[44].mxu0 %v13130_v11  ;;  %v5974_v11 = vrot.slane %v5972_v57, 5  ;;  %v5995_v42 = vrot.slane %v5993_v22, 4  ;;  %v5998_v20 = vrot.slane %v5996_v6, 5  ;;  %v6044_v22 = vshll.u32 %v5740_v17, 16  ;;  %v15811_v6 = vld [vmem:[#allocation4 + $0x230] sm:$0xff]  }
 0x4c5   : > { %14564 = vmatprep.mubr.bf16.mxu0 %v13131_v28  ;;  %14593 = vmatpush3.bf16.msra.mxu0 %v15807_v7  ;;  %v5961_v7 = vor.u32 %v5960_v12, %v18149_v45  ;;  %v18162_v28 = vrot.slane %v5978_v41, 5  ;;  %v5966_v12 = vrot.slane %v5964_v36, 5  ;;  %v6026_v41 = vshll.u32 %v15959_v35, 16  ;;  %v15962_v63 = vld [vmem:[#allocation2 + $0x98] sm:$0x1] }
 0x4c6   : > { %14594 = vmatprep.subr.bf16.mxu0 %v15808_v55  ;;  %v5975_v26 = vor.u32 %v5974_v11, %v5971_v51  ;;  %v5957_v52 = vsel %vm16606_vm11, %v5952_v8, %v18149_v45  ;;  %v6050_v0 = vshll.u32 %v15961_v16, 16  ;;  %v6012_v36 = vshll.u32 %v15962_v63, 16 }
 0x4c7   : > { %v5962_v13 = vrot.slane %v5961_v7, 4  ;;  %v5985_v57 = vor.u32 %v5984_v47, %v18162_v28  ;;  %v6019_v11 = vrot.slane %v6017_v56, 4  ;;  %v6022_v47 = vrot.slane %v6020_v4, 5  ;;  %v15963_v4 = vld [vmem:[#allocation2 + $0xa4] sm:$0x1] }
 0x4c8   : > { %v5976_v5 = vrot.slane %v5975_v26, 4  ;;  %v6032_v45 = vrot.slane %v6030_v29, 4  ;;  %v6046_v3 = vrot.slane %v6044_v22, 5  ;;  %v5990_v8 = vrot.slane %v5988_v54, 5 }
 0x4c9   : > { %14595 = vmatpush3.bf16.msra.mxu0 %v15808_v55  ;;  %v5999_v55 = vor.u32 %v5998_v20, %v5995_v42  ;;  %v5967_v40 = vsel %vm16606_vm11, %v5962_v13, %v5966_v12  ;;  %v5986_v7 = vrot.slane %v5985_v57, 4  ;;  %v18173_v42 = vrot.slane %v6026_v41, 5  ;;  %v5743_v12 = vld [vmem:[#allocation2 + $0xb4] sm:$0xf]  ;;  %v5746_v41 = vld [vmem:[#allocation2 + $0xc0] sm:$0xf] }
 0x4ca   : > { %14596 = vmatprep.subr.bf16.mxu0 %v15809_v9  ;;  %v6010_v20 = vrot.slane %v6009_v50, 4  ;;  %v18175_v17 = vrot.slane %v6050_v0, 5  ;;  %v5981_v26 = vsel %vm16606_vm11, %v5976_v5, %v18162_v28  ;;  %v6014_v57 = vrot.slane %v6012_v36, 5 }
 0x4cb   : > { %v6000_v51 = vrot.slane %v5999_v55, 4  ;;  %v6023_v56 = vor.u32 %v6022_v47, %v6019_v11  ;;  %v6036_v35 = vshll.u32 %v15963_v4, 16  ;;  %v6033_v50 = vor.u32 %v6032_v45, %v18173_v42 }
 0x4cc   : > { %14565 = vmatmul.mubr.bf16.gmra.mrb[48].mxu0 %v13132_v34  ;;  %v6043_v34 = vrot.slane %v6041_v1, 4  ;;  %v6065_v29 = vshrl.u32 %v5743_v12, 16  ;;  %v6068_v22 = vshll.u32 %v5743_v12, 16  ;;  %v6098_v0 = vshll.u32 %v17996_v61, 16 }
 0x4cd   : > { %14568 = vmatprep.mubr.bf16.mxu0 %v13133_v37  ;;  %14597 = vmatpush3.bf16.msra.mxu0 %v15809_v9  ;;  %v6054_v9 = vshrl.u32 %v15961_v16, 16  ;;  %v13135_v37 = vcombine.low %v5957_v52, %v5967_v40  ;;  %v6005_v55 = vsel %vm16606_vm11, %v6000_v51, %v18164_v14  ;;  %v15964_v52 = vld [vmem:[#allocation2 + $0xb8] sm:$0xf]  ;;  %v6089_v14 = vshrl.u32 %v5746_v41, 16 }
 0x4ce   : > { %14598 = vmatprep.subr.bf16.mxu0 %v15810_v18  ;;  %v6047_v28 = vor.u32 %v6046_v3, %v6043_v34  ;;  %v6074_v59 = vshll.u32 %v15964_v52, 16  ;;  %v6078_v54 = vshrl.u32 %v15964_v52, 16  ;;  %v6092_v16 = vshll.u32 %v5746_v41, 16 }
 0x4cf   : > { %v6056_v13 = vrot.slane %v6054_v9, 4  ;;  %v6024_v40 = vrot.slane %v6023_v56, 4  ;;  %v6038_v5 = vrot.slane %v6036_v35, 5  ;;  %v6034_v51 = vrot.slane %v6033_v50, 4  ;;  %v15966_v50 = vld [vmem:[#allocation2 + $0xbc] sm:$0x1] }
 0x4d0   : > { %v6048_v11 = vrot.slane %v6047_v28, 4  ;;  %v6067_v47 = vrot.slane %v6065_v29, 4  ;;  %v6070_v34 = vrot.slane %v6068_v22, 5  ;;  %v6076_v3 = vrot.slane %v6074_v59, 5 }
 0x4d1   : > { %14599 = vmatpush3.bf16.msra.mxu0 %v15810_v18  ;;  %v5991_v18 = vsel %vm16606_vm11, %v5986_v7, %v5990_v8  ;;  %v6057_v1 = vor.u32 %v6056_v13, %v18175_v17  ;;  %v15965_v7 = vld [vmem:[#allocation2 + $0xb0] sm:$0x1]  ;;  %v6091_v8 = vrot.slane %v6089_v14, 4  ;;  %v6094_v13 = vrot.slane %v6092_v16, 5 }
 0x4d2   : > { %14600 = vmatprep.subr.bf16.mxu0 %v15811_v6  ;;  %v13136_v9 = vcombine.low %v5981_v26, %v5991_v18  ;;  %v6060_v63 = vshll.u32 %v15965_v7, 16  ;;  %v6100_v12 = vrot.slane %v6098_v0, 5  ;;  %v6122_v18 = vshll.u32 %v18076_v44, 16 }
 0x4d3   : > { %v6058_v45 = vrot.slane %v6057_v1, 4  ;;  %v6039_v56 = vsel %vm16606_vm11, %v6034_v51, %v6038_v5  ;;  %v6053_v35 = vsel %vm16606_vm11, %v6048_v11, %v18175_v17  ;;  %v6071_v41 = vor.u32 %v6070_v34, %v6067_v47 }
 0x4d4   : > { %14569 = vmatmul.mubr.bf16.gmra.mrb[52].mxu0 %v13134_v30  ;;  %v6015_v30 = vsel %vm16606_vm11, %v6010_v20, %v6014_v57  ;;  %v5749_v20 = vld [vmem:[#allocation2 + $0xcc] sm:$0xf]  ;;  %v6062_v4 = vrot.slane %v6060_v63, 5  ;;  %v6084_v28 = vshll.u32 %v15966_v50, 16  ;;  %v6108_v22 = vshll.u32 %v17998_v19, 16  ;;  %v20433_v50 = vld [vmem:[#allocation77_spill] sm:$0xff] }
 0x4d5   : > { %14572 = vmatprep.mubr.bf16.mxu0 %v13135_v37  ;;  %14601 = vmatpush3.bf16.msra.mxu0 %v15811_v6  ;;  %v6102_v6 = vshrl.u32 %v17996_v61, 16  ;;  %v13137_v36 = vcombine.low %v6005_v55, %v6015_v30  ;;  %v6080_v37 = vrot.slane %v6078_v54, 4  ;;  %v6113_v26 = vshrl.u32 %v5749_v20, 16 }
 0x4d6   : > { %14602 = vmatprep.subr.bf16.mxu0 %v15812_v24  ;;  %v6116_v57 = vshll.u32 %v5749_v20, 16  ;;  %v6029_v55 = vsel %vm16606_vm11, %v6024_v40, %v18173_v42  ;;  %v6063_v29 = vsel %vm16606_vm11, %v6058_v45, %v6062_v4  ;;  %v6124_v59 = vrot.slane %v6122_v18, 5  ;;  %v20425_v18 = vld [vmem:[#allocation71_spill] sm:$0xff] }
 0x4d7   : > { %v6104_v61 = vrot.slane %v6102_v6, 4  ;;  %v6081_v30 = vor.u32 %v6080_v37, %v6076_v3  ;;  %v6115_v42 = vrot.slane %v6113_v26, 4  ;;  %v13138_v14 = vcombine.low %v6029_v55, %v6039_v56  ;;  %v20427_v55 = vld [vmem:[#allocation73_spill] sm:$0xff]  ;;  %v20428_v56 = vld [vmem:[#allocation74_spill] sm:$0xff] }
 0x4d8   : > { %v6118_v52 = vrot.slane %v6116_v57, 5  ;;  %v13139_v16 = vcombine.low %v6053_v35, %v6063_v29  ;;  %v6072_v0 = vrot.slane %v6071_v41, 4  ;;  %v6110_v40 = vrot.slane %v6108_v22, 5  ;;  %v20424_v57 = vld [vmem:[#allocation69_spill] sm:$0xff]  ;;  %v20430_v35 = vld [vmem:[#allocation75_spill] sm:$0xff]  ;;  %v20431_v41 = vld [vmem:[#allocation76_spill] sm:$0xff] }
 0x4d9   : > { %14603 = vmatpush3.bf16.msra.mxu0 %v15812_v24  ;;  %v6126_v24 = vshrl.u32 %v18076_v44, 16  ;;  %v6095_v44 = vor.u32 %v6094_v13, %v6091_v8  ;;  %v6105_v1 = vor.u32 %v6104_v61, %v6100_v12  ;;  %v6082_v6 = vrot.slane %v6081_v30, 4  ;;  %v20421_v61 = vld [vmem:[#allocation64_spill] sm:$0xff] }
 0x4da   : > { %v6086_v5 = vrot.slane %v6084_v28, 5  ;;  %v6119_v7 = vor.u32 %v6118_v52, %v6115_v42  ;;  %v6077_v19 = vsel %vm16606_vm11, %v6072_v0, %v6076_v3  ;;  %v20429_v4 = vcombine.low %v20427_v55, %v20428_v56  ;;  %v20434_v28 = vld [vmem:[#allocation78_spill] sm:$0xff]  ;;  %v20439_v42 = vld [vmem:[#allocation81_spill] sm:$0xff] }
 0x4db   : > { %v6128_v54 = vrot.slane %v6126_v24, 4  ;;  %v6096_v17 = vrot.slane %v6095_v44, 4  ;;  %v20426_v24 = vcombine.low %v20424_v57, %v20425_v18  ;;  %v20432_v30 = vcombine.low %v20430_v35, %v20431_v41  ;;  %v20436_v44 = vld [vmem:[#allocation79_spill] sm:$0xff]  ;;  %v15820_v18 = vld [vmem:[#allocation7 + $0x78] sm:$0xff]   ;;  %v1550_v56 = vld [vmem:[#allocation3 + $0x6c] sm:$0x1] }
 0x4dc   : > { %14573 = vmatmul.mubr.bf16.gmra.mrb[56].mxu0 %v13136_v9  ;;  %v6106_v9 = vrot.slane %v6105_v1, 4  ;;  %v6087_v51 = vsel %vm16606_vm11, %v6082_v6, %v6086_v5  ;;  %v6120_v20 = vrot.slane %v6119_v7, 4  ;;  %v20435_v29 = vcombine.low %v20433_v50, %v20434_v28  ;;  %v20437_v1 = vld [vmem:[#allocation80_spill] sm:$0xff]  ;;  %v1586_v5 = vld [vmem:[#allocation3 + $0x2c] sm:$0x1] }
 0x4dd   : > { %14576 = vmatprep.mubr.bf16.mxu0 %v13137_v36  ;;  %v6129_v63 = vor.u32 %v6128_v54, %v6124_v59  ;;  %v6132_v36 = vshll.u32 %v18078_v15, 16  ;;  %v6101_v11 = vsel %vm16606_vm11, %v6096_v17, %v6100_v12  ;;  %v13140_v37 = vcombine.low %v6077_v19, %v6087_v51  ;;  %v20422_v12 = vld [vmem:[#allocation65_spill] sm:$0xff]  ;;  %v20442_v54 = vld [vmem:[#allocation83_spill] sm:$0xff]  ;;  %v15818_v7 = vld [vmem:[#allocation7 + $0x68] sm:$0xff]  }
 0x4de   : > { %v6111_v47 = vsel %vm16606_vm11, %v6106_v9, %v6110_v40  ;;  %v6125_v15 = vsel %vm16606_vm11, %v6120_v20, %v6124_v59  ;;  %v20423_v26 = vcombine.low %v20421_v61, %v20422_v12  ;;  %v20438_v22 = vcombine.low %v20436_v44, %v20437_v1  ;;  %v20441_v59 = vld [vmem:[#allocation82_spill] sm:$0xff]  ;;  %v1538_v51 = vld [vmem:[#allocation3 + $0x3c] sm:$0x1]  ;;  %v1601_v61 = vld [vmem:[#allocation3 + $0x68] sm:$0x1] }
 0x4df   : > { %v6130_v45 = vrot.slane %v6129_v63, 4  ;;  %v6134_v34 = vrot.slane %v6132_v36, 5  ;;  %v13141_v8 = vcombine.low %v6101_v11, %v6111_v47  ;;  %v20440_v52 = vcombine.low %v17777_v21, %v20439_v42  ;;  %v1541_v63 = vld [vmem:[#allocation3 + $0x48] sm:$0x1]  ;;  %v1595_v47 = vld [vmem:[#allocation3 + $0x50] sm:$0x1] }
 0x4e0   : > { %v20446_v6 = vcombine.low %v17808_v62, %v17814_v38  ;;  %v20447_v17 = vcombine.low %v17820_v58, %v17825_v46  ;;  %v20448_v21 = vcombine.low %v17829_v33, %v17836_v49  ;;  %v20449_v9 = vcombine.low %v17845_v10, %v17849_v27  ;;  %v1526_v58 = vld [vmem:[#allocation3 + $0xc] sm:$0x1]  ;;  %v1583_v33 = vld [vmem:[#allocation3 + $0x20] sm:$0x1]  ;;  %v1580_v10 = vld [vmem:[#allocation3 + $0x14] sm:$0x1] }
 0x4e1   : > { %v6135_v3 = vsel %vm16606_vm11, %v6130_v45, %v6134_v34  ;;  %v20451_v62 = vcombine.low %v18010_v23, %v18014_v2  ;;  %v20452_v38 = vcombine.low %v18091_v43, %v18100_v60  ;;  %v1527_v46 = vsel %vm16538_vm8, 0, %v1526_v58  ;;  %v1532_v2 = vld [vmem:[#allocation3 + $0x24] sm:$0x1]  ;;  %v1589_v60 = vld [vmem:[#allocation3 + $0x38] sm:$0x1] }
 0x4e2   : > { %v13142_v13 = vcombine.low %v6125_v15, %v6135_v3  ;;  %1528 = vst [vmem:[#allocation3 + $0xc] sm:$0x1] %v1527_v46  ;;  %v1584_v49 = vsel %vm16531_vm7, 0, %v1583_v33  ;;  %v1581_v27 = vsel %vm16531_vm7, 0, %v1580_v10  ;;  %v1533_v43 = vsel %vm16538_vm8, 0, %v1532_v2 }
 0x4e3   : > { %1585 = vst [vmem:[#allocation3 + $0x20] sm:$0x1] %v1584_v49  ;;  %1582 = vst [vmem:[#allocation3 + $0x14] sm:$0x1] %v1581_v27  ;;  %v1590_v40 = vsel %vm16531_vm7, 0, %v1589_v60  ;;  %v1587_v36 = vsel %vm16531_vm7, 0, %v1586_v5 }
 0x4e4   : > { %14577 = vmatmul.mubr.bf16.gmra.mrb[60].mxu0 %v13138_v14  ;;  %v20443_v14 = vcombine.low %v20441_v59, %v20442_v54  ;;  %1534 = vst [vmem:[#allocation3 + $0x24] sm:$0x1] %v1533_v43  ;;  %1591 = vst [vmem:[#allocation3 + $0x38] sm:$0x1] %v1590_v40  ;;  %v1542_v19 = vsel %vm16538_vm8, 0, %v1541_v63  ;;  %v1539_v11 = vsel %vm16538_vm8, 0, %v1538_v51 }
 0x4e5   : > { %14580 = vmatprep.mubr.bf16.mxu0 %v13139_v16  ;;  %v20444_v16 = vld [vmem:[#allocation84_spill] sm:$0xff]  ;;  %1588 = vst [vmem:[#allocation3 + $0x2c] sm:$0x1] %v1587_v36  ;;  %1543 = vst [vmem:[#allocation3 + $0x48] sm:$0x1] %v1542_v19  ;;  %v1596_v20 = vsel %vm16531_vm7, 0, %v1595_v47 }
 0x4e6   : > { %v20445_v0 = vcombine.low %v17800_v39, %v20444_v16  ;;  %v20450_v39 = vcombine.low %v17857_v32, %v17861_v25  ;;  %v15817_v32 = vld [vmem:[#allocation7 + $0x60] sm:$0xff]   ;;  %v1535_v25 = vld [vmem:[#allocation3 + $0x30] sm:$0x1]  ;;  %1540 = vst [vmem:[#allocation3 + $0x3c] sm:$0x1] %v1539_v11  ;;  %v1602_v12 = vsel %vm16531_vm7, 0, %v1601_v61 }
 0x4e7   : > { %v1536_v23 = vsel %vm16538_vm8, 0, %v1535_v25  ;;  %14644 = vmatprep.subr.bf16.mxu1 %v15817_v32  ;;  %1597 = vst [vmem:[#allocation3 + $0x50] sm:$0x1] %v1596_v20  ;;  %v1592_v45 = vld [vmem:[#allocation3 + $0x44] sm:$0x1]  ;;  %v18307_v59 = vld [vmem:[#allocation7] sm:$0xff]  }
 0x4e8   : > { %1537 = vst [vmem:[#allocation3 + $0x30] sm:$0x1] %v1536_v23  ;;  %14645 = vmatpush3.bf16.msra.mxu1 %v15817_v32  ;;  %v1593_v34 = vsel %vm16531_vm7, 0, %v1592_v45  ;;  %v1544_v3 = vld [vmem:[#allocation3 + $0x54] sm:$0x1] }
 0x4e9   : > { %14646 = vmatprep.subr.bf16.mxu1 %v15818_v7  ;;  %1594 = vst [vmem:[#allocation3 + $0x44] sm:$0x1] %v1593_v34  ;;  %1603 = vst [vmem:[#allocation3 + $0x68] sm:$0x1] %v1602_v12  ;;  %v1607_v35 = vld [vmem:[#allocation3 + $0x80] sm:$0x1] }
 0x4ea   : > { %v1608_v41 = vsel %vm16531_vm7, 0, %v1607_v35  ;;  %v1523_v28 = vld [vmem:[#allocation3] sm:$0x1]  ;;  %v7660_v44 = vld [vmem:[#allocation3 + $0x4] sm:$0xf] }
 0x4eb   : > { %1609 = vst [vmem:[#allocation3 + $0x80] sm:$0x1] %v1608_v41  ;;  %v1524_v1 = vsel %vm16538_vm8, 0, %v1523_v28  ;;  %v7733_v42 = vshll.u32 %v7660_v44, 16  ;;  %v1559_v54 = vld [vmem:[#allocation3 + $0x90] sm:$0x1] }
 0x4ec   : > { %14581 = vmatmul.mubr.bf16.gmra.mrb[64].mxu0 %v13140_v37  ;;  %14647 = vmatpush3.bf16.msra.mxu1 %v15818_v7  ;;  %v15819_v37 = vld [vmem:[#allocation7 + $0x70] sm:$0xff]   ;;  %1525 = vst [vmem:[#allocation3] sm:$0x1] %v1524_v1  ;;  %v1556_v58 = vld [vmem:[#allocation3 + $0x84] sm:$0x1] }
 0x4ed   : > { %14584 = vmatprep.mubr.bf16.mxu0 %v13141_v8  ;;  %v1547_v8 = vld [vmem:[#allocation3 + $0x60] sm:$0x1]  ;;  %14648 = vmatprep.subr.bf16.mxu1 %v15819_v37  ;;  %v1557_v10 = vsel %vm16538_vm8, 0, %v1556_v58  ;;  %v1613_v23 = vld [vmem:[#allocation3 + $0x98] sm:$0x1] }
 0x4ee   : > { %v1548_v15 = vsel %vm16538_vm8, 0, %v1547_v8  ;;  %1558 = vst [vmem:[#allocation3 + $0x84] sm:$0x1] %v1557_v10  ;;  %v1614_v2 = vsel %vm16531_vm7, 0, %v1613_v23  ;;  %v1610_v43 = vld [vmem:[#allocation3 + $0x8c] sm:$0x1] }
 0x4ef   : > { %1549 = vst [vmem:[#allocation3 + $0x60] sm:$0x1] %v1548_v15  ;;  %1615 = vst [vmem:[#allocation3 + $0x98] sm:$0x1] %v1614_v2  ;;  %v1611_v40 = vsel %vm16531_vm7, 0, %v1610_v43 }
 0x4f0   : > { %14649 = vmatpush3.bf16.msra.mxu1 %v15819_v37  ;;  %1612 = vst [vmem:[#allocation3 + $0x8c] sm:$0x1] %v1611_v40  ;;  %v1565_v7 = vld [vmem:[#allocation3 + $0xa8] sm:$0x1]  ;;  %v1562_v36 = vld [vmem:[#allocation3 + $0x9c] sm:$0x1] }
 0x4f1   : > { %14650 = vmatprep.subr.bf16.mxu1 %v15820_v18  ;;  %v1566_v63 = vsel %vm16538_vm8, 0, %v1565_v7  ;;  %v1563_v19 = vsel %vm16538_vm8, 0, %v1562_v36  ;;  %v1619_v51 = vld [vmem:[#allocation3 + $0xb0] sm:$0x1]  ;;  %v1616_v11 = vld [vmem:[#allocation3 + $0xa4] sm:$0x1] }
 0x4f2   : > { %1567 = vst [vmem:[#allocation3 + $0xa8] sm:$0x1] %v1566_v63  ;;  %1564 = vst [vmem:[#allocation3 + $0x9c] sm:$0x1] %v1563_v19  ;;  %v1620_v47 = vsel %vm16531_vm7, 0, %v1619_v51  ;;  %v1617_v20 = vsel %vm16531_vm7, 0, %v1616_v11 }
 0x4f3   : > { %1621 = vst [vmem:[#allocation3 + $0xb0] sm:$0x1] %v1620_v47  ;;  %1618 = vst [vmem:[#allocation3 + $0xa4] sm:$0x1] %v1617_v20  ;;  %v1571_v45 = vld [vmem:[#allocation3 + $0xc0] sm:$0x1] }
 0x4f4   : > { %14585 = vmatmul.mubr.bf16.gmra.mrb[68].mxu0 %v13142_v13  ;;  %v1545_v13 = vsel %vm16538_vm8, 0, %v1544_v3  ;;  %14651 = vmatpush3.bf16.msra.mxu1 %v15820_v18  ;;  %v1572_v34 = vsel %vm16538_vm8, 0, %v1571_v45  ;;  %v18335_v37 = vld [vmem:[%s20064_s7] ss:$0 sm:$0xff]  ;;  %v1568_v8 = vld [vmem:[#allocation3 + $0xb4] sm:$0x1] }
 0x4f5   : > { %14604 = vmatprep.mubr.bf16.mxu0 %v20423_v26  ;;  %1546 = vst [vmem:[#allocation3 + $0x54] sm:$0x1] %v1545_v13  ;;  %v1598_v26 = vld [vmem:[#allocation3 + $0x5c] sm:$0x1]  ;;  %14684 = vmatprep.subr.bf16.mxu1 %v18307_v59  ;;  %1573 = vst [vmem:[#allocation3 + $0xc0] sm:$0x1] %v1572_v34 }
 0x4f6   : > { %v1599_v57 = vsel %vm16531_vm7, 0, %v1598_v26  ;;  %v1569_v15 = vsel %vm16538_vm8, 0, %v1568_v8  ;;  %v18342_v13 = vld [vmem:[%s20065_s8] ss:$0 sm:$0xff]  ;;  %v1622_v28 = vld [vmem:[#allocation3 + $0xbc] sm:$0x1] }
 0x4f7   : > { %1600 = vst [vmem:[#allocation3 + $0x5c] sm:$0x1] %v1599_v57  ;;  %1570 = vst [vmem:[#allocation3 + $0xb4] sm:$0x1] %v1569_v15  ;;  %v1625_v35 = vld [vmem:[#allocation3 + $0xc8] sm:$0x1] }
 0x4f8   : > { %v1623_v1 = vsel %vm16531_vm7, 0, %v1622_v28  ;;  %v7554_v43 = vld [vmem:[#allocation3 + $0x18] sm:$0xf]  ;;  %v7547_v36 = vld [vmem:[#allocation3 + $0xc] sm:$0xf] }
 0x4f9   : > { %1624 = vst [vmem:[#allocation3 + $0xbc] sm:$0x1] %v1623_v1  ;;  %v7558_v20 = vld [vmem:[#allocation3 + $0x20] sm:$0x1] }
 0x4fc   : > { %14605 = vmatmul.mubr.bf16.vlgmr.msra.gmra.mrb[40].mxu0 %v20426_v24  ;;  %v1553_v24 = vld [vmem:[#allocation3 + $0x78] sm:$0x1] }
 0x4fd   : > { %14608 = vmatprep.mubr.bf16.mxu0 %v20429_v4  ;;  %v1554_v55 = vsel %vm16538_vm8, 0, %v1553_v24  ;;  %v1551_v4 = vsel %vm16538_vm8, 0, %v1550_v56 }
 0x4fe   : > { %1555 = vst [vmem:[#allocation3 + $0x78] sm:$0x1] %v1554_v55  ;;  %1552 = vst [vmem:[#allocation3 + $0x6c] sm:$0x1] %v1551_v4 }
 0x504   : > { %14609 = vmatmul.mubr.bf16.gmra.mrb[44].mxu0 %v20432_v30  ;;  %v1604_v30 = vld [vmem:[#allocation3 + $0x74] sm:$0x1] }
 0x505   : > { %14612 = vmatprep.mubr.bf16.mxu0 %v20435_v29  ;;  %v1605_v50 = vsel %vm16531_vm7, 0, %v1604_v30  ;;  %v1577_v29 = vld [vmem:[#allocation3 + $0x8] sm:$0x1] }
 0x506   : > { %1606 = vst [vmem:[#allocation3 + $0x74] sm:$0x1] %v1605_v50  ;;  %v1626_v50 = vsel %vm16531_vm7, 0, %v1625_v35 }
 0x507   : > { %1627 = vst [vmem:[#allocation3 + $0xc8] sm:$0x1] %v1626_v50 }
 0x50c   : > { %14613 = vmatmul.mubr.bf16.gmra.mrb[48].mxu0 %v20438_v22  ;;  %v1578_v22 = vsel %vm16531_vm7, 0, %v1577_v29 }
 0x50d   : > { %14616 = vmatprep.mubr.bf16.mxu0 %v20440_v52  ;;  %v7737_v52 = vshrl.u32 %v7660_v44, 16  ;;  %1579 = vst [vmem:[#allocation3 + $0x8] sm:$0x1] %v1578_v22 }
 0x50f   : > { %v7739_v16 = vrot.slane %v7737_v52, 4 }
 0x514   : > { %14617 = vmatmul.mubr.bf16.gmra.mrb[52].mxu0 %v20443_v14  ;;  %v7735_v14 = vrot.slane %v7733_v42, 5 }
 0x515   : > { %14620 = vmatprep.mubr.bf16.mxu0 %v20445_v0  ;;  %v1560_v0 = vsel %vm16538_vm8, 0, %v1559_v54 }
 0x516   : > { %1561 = vst [vmem:[#allocation3 + $0x90] sm:$0x1] %v1560_v0 }
 0x51c   : > { %14621 = vmatmul.mubr.bf16.gmra.mrb[56].mxu0 %v20446_v6  ;;  %v7740_v6 = vor.u32 %v7739_v16, %v7735_v14 }
 0x51d   : > { %14624 = vmatprep.mubr.bf16.mxu0 %v20447_v17  ;;  %v7659_v17 = vld [vmem:[#allocation3] sm:$0xf] }
 0x524   : > { %14625 = vmatmul.mubr.bf16.gmra.mrb[60].mxu0 %v20448_v21  ;;  %v7707_v21 = vld [vmem:[#allocation3 + $0x8] sm:$0x1] }
 0x525   : > { %14628 = vmatprep.mubr.bf16.mxu0 %v20449_v9  ;;  %v7724_v9 = vshrl.u32 %v7659_v17, 16 }
 0x527   : > { %v7726_v46 = vrot.slane %v7724_v9, 4 }
 0x52c   : > { %14629 = vmatmul.mubr.bf16.gmra.mrb[64].mxu0 %v20450_v39  ;;  %v7727_v39 = vshll.u32 %v7659_v17, 16 }
 0x52d   : > { %14632 = vmatprep.mubr.bf16.mxu0 %v20451_v62  ;;  %v7743_v62 = vshll.u32 %v7707_v21, 16 }
 0x52e   : > { %v7729_v33 = vrot.slane %v7727_v39, 5 }
 0x52f   : > { %v7745_v49 = vrot.slane %v7743_v62, 5 }
 0x530   : > { %v7730_v27 = vor.u32 %v7729_v33, %v7726_v46 }
 0x532   : > { %v7731_v32 = vrot.slane %v7730_v27, 4 }
 0x534   : > { %14633 = vmatmul.mubr.bf16.gmra.mrb[68].mxu0 %v20452_v38  ;;  %v7741_v38 = vrot.slane %v7740_v6, 4  ;;  %v7736_v60 = vsel %vm16606_vm11, %v7731_v32, %v7735_v14 }
 0x536   : > { %v7746_v25 = vsel %vm16606_vm11, %v7741_v38, %v7745_v49 }
 0x537   : > { %v13225_v5 = vcombine.low %v7736_v60, %v7746_v25 }
 0x539   : > { %14652 = vmatprep.mubr.bf16.mxu1 %v13225_v5 }
 0x5cf   : > { %v14606_v3 = vpop.f32.mrb[40].mxu0 }
 0x5d0   : > { %v6965_v61 = vmul.f32 %v14606_v3, %v18335_v37  ;;  %v6797_v12 = vpop.f32.mrb[41].mxu0 }
 0x5d1   : > { %v6963_v26 = vmul.f32 %v18335_v37, %v6797_v12  ;;  %v14607_v57 = vpop.f32.mrb[42].mxu0  ;;  %v7551_v12 = vld [vmem:[#allocation3 + $0x14] sm:$0x1] }
 0x5d2   : > { %v7004_v18 = vadd.f32 %v18342_v13, %v6965_v61  ;;  %v6966_v24 = vmul.f32 %v14607_v57, %v18335_v37  ;;  %v6800_v55 = vpop.f32.mrb[43].mxu0 }
 0x5d3   : > { %v7002_v56 = vadd.f32 %v18342_v13, %v6963_v26  ;;  %v6964_v4 = vmul.f32 %v18335_v37, %v6800_v55 }
 0x5d4   : > { %vm7036_vm2 = vcmp.ge.f32.partialorder %v7004_v18, 0.0  ;;  %v7068_v41 = vmul.f32 0.01, %v7004_v18  ;;  %v7005_v30 = vadd.f32 %v18342_v13, %v6966_v24 }
 0x5d5   : > { %vm7034_vm3 = vcmp.ge.f32.partialorder %v7002_v56, 0.0  ;;  %v7066_v29 = vmul.f32 0.01, %v7002_v56  ;;  %v7003_v44 = vadd.f32 %v18342_v13, %v6964_v4 }
 0x5d6   : > { %v7100_v22 = vsel %vm7036_vm2, %v7004_v18, %v7068_v41  ;;  %vm7037_vm4 = vcmp.ge.f32.partialorder %v7005_v30, 0.0  ;;  %v7069_v42 = vmul.f32 0.01, %v7005_v30 }
 0x5d7   : > { %v13531_v52 = vpack.c.bf16 %v7100_v22, %v7100_v22  ;;  %v7098_v54 = vsel %vm7034_vm3, %v7002_v56, %v7066_v29  ;;  %vm7035_vm5 = vcmp.ge.f32.partialorder %v7003_v44, 0.0  ;;  %v7067_v14 = vmul.f32 0.01, %v7003_v44  ;;  %v14610_v16 = vpop.f32.mrb[44].mxu0 }
 0x5d8   : > { %v13529_v0 = vpack.c.bf16 %v7098_v54, %v7098_v54  ;;  %v7101_v6 = vsel %vm7037_vm4, %v7005_v30, %v7069_v42  ;;  %v6969_v17 = vmul.f32 %v14610_v16, %v18335_v37  ;;  %v6813_v21 = vpop.f32.mrb[45].mxu0 }
 0x5d9   : > { %v7244_v9 = vshrl.u32 %v13531_v52, 16  ;;  %v7247_v39 = vshll.u32 %v13531_v52, 16  ;;  %v13532_v62 = vpack.c.bf16 %v7101_v6, %v7101_v6  ;;  %v7099_v38 = vsel %vm7035_vm5, %v7003_v44, %v7067_v14  ;;  %v14611_v58 = vpop.f32.mrb[46].mxu0 }
 0x5da   : > { %v7227_v46 = vshrl.u32 %v13529_v0, 16  ;;  %v7230_v33 = vshll.u32 %v13529_v0, 16  ;;  %v13530_v49 = vpack.c.bf16 %v7099_v38, %v7099_v38  ;;  %v7008_v10 = vadd.f32 %v18342_v13, %v6969_v17  ;;  %v6816_v27 = vpop.f32.mrb[47].mxu0 }
 0x5db   : > { %v7246_v32 = vrot.slane %v7244_v9, 7  ;;  %v7252_v25 = vshrl.u32 %v13532_v62, 16  ;;  %v7255_v23 = vshll.u32 %v13532_v62, 16  ;;  %v6967_v2 = vmul.f32 %v18335_v37, %v6813_v21  ;;  %v7568_v9 = vld [vmem:[#allocation3 + $0x30] sm:$0xf] }
 0x5dc   : > { %v7229_v60 = vrot.slane %v7227_v46, 7  ;;  %v7235_v40 = vshrl.u32 %v13530_v49, 16  ;;  %v7238_v5 = vshll.u32 %v13530_v49, 16  ;;  %vm7040_vm6 = vcmp.ge.f32.partialorder %v7008_v10, 0.0 }
 0x5dd   : > { %v7249_v7 = vor.u32 %v7247_v39, %v7246_v32  ;;  %v7250_v63 = vrot.slane %v7246_v32, 4  ;;  %v7254_v19 = vrot.slane %v7252_v25, 7  ;;  %v7072_v51 = vmul.f32 0.01, %v7008_v10 }
 0x5de   : > { %v7232_v11 = vor.u32 %v7230_v33, %v7229_v60  ;;  %v7233_v47 = vrot.slane %v7229_v60, 4  ;;  %v7237_v45 = vrot.slane %v7235_v40, 7  ;;  %v7006_v34 = vadd.f32 %v18342_v13, %v6967_v2  ;;  %v7561_v60 = vld [vmem:[#allocation3 + $0x24] sm:$0xf] }
 0x5df   : > { %v7555_v15 = vsel %vm16671_vm13, %v7249_v7, %v7554_v43  ;;  %v7257_v3 = vor.u32 %v7255_v23, %v7254_v19  ;;  %v7259_v61 = vrot.slane %v7254_v19, 4  ;;  %v7104_v26 = vsel %vm7040_vm6, %v7008_v10, %v7072_v51  ;;  %v14614_v57 = vpop.f32.mrb[48].mxu0 }
 0x5e0   : > { %7556 = vst [vmem:[#allocation3 + $0x18] sm:$0xf] %v7555_v15  ;;  %v7548_v18 = vsel %vm16671_vm13, %v7232_v11, %v7547_v36  ;;  %v7240_v24 = vor.u32 %v7238_v5, %v7237_v45  ;;  %v7242_v55 = vrot.slane %v7237_v45, 4  ;;  %v13535_v56 = vpack.c.bf16 %v7104_v26, %v7104_v26  ;;  %v6829_v4 = vpop.f32.mrb[49].mxu0 }
 0x5e1   : > { %7549 = vst [vmem:[#allocation3 + $0xc] sm:$0xf] %v7548_v18  ;;  %v7258_v41 = vsel %vm16676_vm14, %v7250_v63, %v7257_v3  ;;  %v7559_v30 = vsel %vm16538_vm8, %v7259_v61, %v7558_v20  ;;  %vm7038_vm9 = vcmp.ge.f32.partialorder %v7006_v34, 0.0  ;;  %v7070_v50 = vmul.f32 0.01, %v7006_v34  ;;  %v14615_v28 = vpop.f32.mrb[50].mxu0 }
 0x5e2   : > { %7557 = vst [vmem:[#allocation3 + $0x1c] sm:$0xf] %v7258_v41  ;;  %7560 = vst [vmem:[#allocation3 + $0x20] sm:$0x1] %v7559_v30  ;;  %v7241_v29 = vsel %vm16676_vm14, %v7233_v47, %v7240_v24  ;;  %v7552_v44 = vsel %vm16538_vm8, %v7242_v55, %v7551_v12  ;;  %v7278_v1 = vshrl.u32 %v13535_v56, 16  ;;  %v7281_v22 = vshll.u32 %v13535_v56, 16 }
 0x5e3   : > { %v6832_v42 = vpop.f32.mrb[51].mxu0  ;;  %7550 = vst [vmem:[#allocation3 + $0x10] sm:$0xf] %v7241_v29  ;;  %7553 = vst [vmem:[#allocation3 + $0x14] sm:$0x1] %v7552_v44  ;;  %v7102_v52 = vsel %vm7038_vm9, %v7006_v34, %v7070_v50  ;;  %v6970_v54 = vmul.f32 %v14611_v58, %v18335_v37  ;;  %v6968_v14 = vmul.f32 %v18335_v37, %v6816_v27 }
 0x5e4   : > { %v6973_v16 = vmul.f32 %v14614_v57, %v18335_v37  ;;  %v18375_v0 = vrot.slane %v7278_v1, 7  ;;  %v13533_v6 = vpack.c.bf16 %v7102_v52, %v7102_v52  ;;  %v6971_v17 = vmul.f32 %v18335_v37, %v6829_v4  ;;  %v7572_v57 = vld [vmem:[#allocation3 + $0x38] sm:$0x1]  ;;  %v7565_v24 = vld [vmem:[#allocation3 + $0x2c] sm:$0x1] }
 0x5e5   : > { %v6974_v21 = vmul.f32 %v14615_v28, %v18335_v37  ;;  %v7009_v39 = vadd.f32 %v18342_v13, %v6970_v54  ;;  %v7007_v62 = vadd.f32 %v18342_v13, %v6968_v14  ;;  %v6972_v58 = vmul.f32 %v18335_v37, %v6832_v42 }
 0x5e6   : > { %v7012_v38 = vadd.f32 %v18342_v13, %v6973_v16  ;;  %v7283_v46 = vor.u32 %v7281_v22, %v18375_v0  ;;  %v7284_v33 = vrot.slane %v18375_v0, 4  ;;  %v7261_v49 = vshrl.u32 %v13533_v6, 16  ;;  %v7582_v0 = vld [vmem:[#allocation3 + $0x48] sm:$0xf] }
 0x5e7   : > { %v7264_v10 = vshll.u32 %v13533_v6, 16  ;;  %vm7041_vm10 = vcmp.ge.f32.partialorder %v7009_v39, 0.0  ;;  %v7073_v27 = vmul.f32 0.01, %v7009_v39  ;;  %vm7039_vm12 = vcmp.ge.f32.partialorder %v7007_v62, 0.0  ;;  %v14618_v43 = vpop.f32.mrb[52].mxu0 }
 0x5e8   : > { %v7071_v32 = vmul.f32 0.01, %v7007_v62  ;;  %v7569_v25 = vsel %vm16671_vm13, %v7283_v46, %v7568_v9  ;;  %v7263_v23 = vrot.slane %v7261_v49, 7  ;;  %vm7044_vm15 = vcmp.ge.f32.partialorder %v7012_v38, 0.0  ;;  %v18389_v36 = vpop.f32.mrb[53].mxu0 }
 0x5e9   : > { %v7076_v2 = vmul.f32 0.01, %v7012_v38  ;;  %7570 = vst [vmem:[#allocation3 + $0x30] sm:$0xf] %v7569_v25  ;;  %v7105_v40 = vsel %vm7041_vm10, %v7009_v39, %v7073_v27  ;;  %v7010_v7 = vadd.f32 %v18342_v13, %v6971_v17  ;;  %v7013_v63 = vadd.f32 %v18342_v13, %v6974_v21  ;;  %v18391_v20 = vpop.f32.mrb[54].mxu0 }
 0x5ea   : > { %v7103_v5 = vsel %vm7039_vm12, %v7007_v62, %v7071_v32  ;;  %v7266_v19 = vor.u32 %v7264_v10, %v7263_v23  ;;  %v7267_v51 = vrot.slane %v7263_v23, 4  ;;  %v13536_v11 = vpack.c.bf16 %v7105_v40, %v7105_v40  ;;  %v18393_v15 = vpop.f32.mrb[55].mxu0  ;;  %v7575_v10 = vld [vmem:[#allocation3 + $0x3c] sm:$0xf] }
 0x5eb   : > { %v13534_v47 = vpack.c.bf16 %v7103_v5, %v7103_v5  ;;  %v7108_v45 = vsel %vm7044_vm15, %v7012_v38, %v7076_v2  ;;  %vm7042_vm0 = vcmp.ge.f32.partialorder %v7010_v7, 0.0  ;;  %v7074_v34 = vmul.f32 0.01, %v7010_v7 }
 0x5ec   : > { %vm7045_vm2 = vcmp.ge.f32.partialorder %v7013_v63, 0.0  ;;  %v7562_v3 = vsel %vm16671_vm13, %v7266_v19, %v7561_v60  ;;  %v7286_v61 = vshrl.u32 %v13536_v11, 16  ;;  %v7289_v12 = vshll.u32 %v13536_v11, 16 }
 0x5ed   : > { %v7269_v26 = vshrl.u32 %v13534_v47, 16  ;;  %7563 = vst [vmem:[#allocation3 + $0x24] sm:$0xf] %v7562_v3  ;;  %v7272_v18 = vshll.u32 %v13534_v47, 16  ;;  %v13539_v55 = vpack.c.bf16 %v7108_v45, %v7108_v45  ;;  %v7106_v56 = vsel %vm7042_vm0, %v7010_v7, %v7074_v34 }
 0x5ee   : > { %v7077_v4 = vmul.f32 0.01, %v7013_v63  ;;  %v7288_v41 = vrot.slane %v7286_v61, 7  ;;  %v13537_v50 = vpack.c.bf16 %v7106_v56, %v7106_v56  ;;  %v7011_v28 = vadd.f32 %v18342_v13, %v6972_v58 }
 0x5ef   : > { %v7271_v30 = vrot.slane %v7269_v26, 7  ;;  %v7312_v29 = vshrl.u32 %v13539_v55, 16  ;;  %v7315_v44 = vshll.u32 %v13539_v55, 16  ;;  %v6977_v22 = vmul.f32 %v14618_v43, %v18335_v37  ;;  %v18400_v42 = vpop.f32.mrb[56].mxu0  ;;  %v7586_v43 = vld [vmem:[#allocation3 + $0x50] sm:$0x1] }
 0x5f0   : > { %v7109_v1 = vsel %vm7045_vm2, %v7013_v63, %v7077_v4  ;;  %v7291_v52 = vor.u32 %v7289_v12, %v7288_v41  ;;  %v7293_v54 = vrot.slane %v7288_v41, 4  ;;  %v6861_v6 = vpop.f32.mrb[57].mxu0  ;;  %v7295_v21 = vshrl.u32 %v13537_v50, 16 }
 0x5f1   : > { %v7274_v14 = vor.u32 %v7272_v18, %v7271_v30  ;;  %v7276_v16 = vrot.slane %v7271_v30, 4  ;;  %v7314_v17 = vrot.slane %v7312_v29, 7  ;;  %v7298_v9 = vshll.u32 %v13537_v50, 16  ;;  %v18402_v62 = vpop.f32.mrb[58].mxu0 }
 0x5f2   : > { %v13540_v39 = vpack.c.bf16 %v7109_v1, %v7109_v1  ;;  %v7292_v38 = vsel %vm16676_vm14, %v7284_v33, %v7291_v52  ;;  %v7573_v58 = vsel %vm16538_vm8, %v7293_v54, %v7572_v57  ;;  %v18412_v27 = vpop.f32.mrb[59].mxu0  ;;  %v7297_v23 = vrot.slane %v7295_v21, 7  ;;  %v7579_v52 = vld [vmem:[#allocation3 + $0x44] sm:$0x1] }
 0x5f3   : > { %v7275_v46 = vsel %vm16676_vm14, %v7267_v51, %v7274_v14  ;;  %v7566_v49 = vsel %vm16538_vm8, %v7276_v16, %v7565_v24  ;;  %7571 = vst [vmem:[#allocation3 + $0x34] sm:$0xf] %v7292_v38  ;;  %7574 = vst [vmem:[#allocation3 + $0x38] sm:$0x1] %v7573_v58  ;;  %v7317_v32 = vor.u32 %v7315_v44, %v7314_v17  ;;  %v7318_v25 = vrot.slane %v7314_v17, 4 }
 0x5f4   : > { %7564 = vst [vmem:[#allocation3 + $0x28] sm:$0xf] %v7275_v46  ;;  %7567 = vst [vmem:[#allocation3 + $0x2c] sm:$0x1] %v7566_v49  ;;  %v7320_v33 = vshrl.u32 %v13540_v39, 16  ;;  %v7323_v2 = vshll.u32 %v13540_v39, 16  ;;  %v7016_v40 = vadd.f32 %v18342_v13, %v6977_v22  ;;  %v7300_v7 = vor.u32 %v7298_v9, %v7297_v23 }
 0x5f5   : > { %vm7043_vm3 = vcmp.ge.f32.partialorder %v7011_v28, 0.0  ;;  %v7075_v60 = vmul.f32 0.01, %v7011_v28  ;;  %v7583_v5 = vsel %vm16671_vm13, %v7317_v32, %v7582_v0  ;;  %v7301_v63 = vrot.slane %v7297_v23, 4 }
 0x5f6   : > { %v7322_v19 = vrot.slane %v7320_v33, 7  ;;  %7584 = vst [vmem:[#allocation3 + $0x48] sm:$0xf] %v7583_v5  ;;  %vm7048_vm4 = vcmp.ge.f32.partialorder %v7016_v40, 0.0  ;;  %v7080_v11 = vmul.f32 0.01, %v7016_v40  ;;  %v6975_v47 = vmul.f32 %v18335_v37, %v18389_v36 }
 0x5f7   : > { %v7107_v51 = vsel %vm7043_vm3, %v7011_v28, %v7075_v60  ;;  %v7576_v45 = vsel %vm16671_vm13, %v7300_v7, %v7575_v10  ;;  %v18421_v12 = vpop.f32.mrb[60].mxu0  ;;  %v6978_v18 = vmul.f32 %v18391_v20, %v18335_v37  ;;  %v6976_v24 = vmul.f32 %v18335_v37, %v18393_v15 }
 0x5f8   : > { %v7325_v34 = vor.u32 %v7323_v2, %v7322_v19  ;;  %v7327_v3 = vrot.slane %v7322_v19, 4  ;;  %v13538_v61 = vpack.c.bf16 %v7107_v51, %v7107_v51  ;;  %7577 = vst [vmem:[#allocation3 + $0x3c] sm:$0xf] %v7576_v45  ;;  %v7112_v26 = vsel %vm7048_vm4, %v7016_v40, %v7080_v11  ;;  %v18428_v55 = vpop.f32.mrb[61].mxu0  ;;  %v7589_v40 = vld [vmem:[#allocation3 + $0x54] sm:$0xf] }
 0x5f9   : > { %v7014_v57 = vadd.f32 %v18342_v13, %v6975_v47  ;;  %v18434_v30 = vpop.f32.mrb[62].mxu0  ;;  %v13543_v50 = vpack.c.bf16 %v7112_v26, %v7112_v26  ;;  %v7017_v28 = vadd.f32 %v18342_v13, %v6978_v18  ;;  %v7015_v44 = vadd.f32 %v18342_v13, %v6976_v24  ;;  %v18460_v45 = vld [vmem:[#allocation3 + $0xc] sm:$0xf] }
 0x5fa   : > { %v7326_v36 = vsel %vm16676_vm14, %v7318_v25, %v7325_v34  ;;  %v7587_v56 = vsel %vm16538_vm8, %v7327_v3, %v7586_v43  ;;  %v7303_v4 = vshrl.u32 %v13538_v61, 16  ;;  %v7306_v41 = vshll.u32 %v13538_v61, 16  ;;  %v18437_v15 = vpop.f32.mrb[63].mxu0 }
 0x5fb   : > { %7585 = vst [vmem:[#allocation3 + $0x4c] sm:$0xf] %v7326_v36  ;;  %7588 = vst [vmem:[#allocation3 + $0x50] sm:$0x1] %v7587_v56  ;;  %vm7046_vm5 = vcmp.ge.f32.partialorder %v7014_v57, 0.0  ;;  %v6981_v1 = vmul.f32 %v18400_v42, %v18335_v37  ;;  %v6979_v22 = vmul.f32 %v18335_v37, %v6861_v6  ;;  %v7346_v54 = vshrl.u32 %v13543_v50, 16 }
 0x5fc   : > { %v7078_v20 = vmul.f32 0.01, %v7014_v57  ;;  %v7305_v29 = vrot.slane %v7303_v4, 7  ;;  %v7349_v14 = vshll.u32 %v13543_v50, 16  ;;  %vm7049_vm6 = vcmp.ge.f32.partialorder %v7017_v28, 0.0 }
 0x5fd   : > { %v7081_v9 = vmul.f32 0.01, %v7017_v28  ;;  %v7348_v39 = vrot.slane %v7346_v54, 7  ;;  %vm7047_vm9 = vcmp.ge.f32.partialorder %v7015_v44, 0.0  ;;  %v7079_v38 = vmul.f32 0.01, %v7015_v44 }
 0x5fe   : > { %v7110_v16 = vsel %vm7046_vm5, %v7014_v57, %v7078_v20  ;;  %v7308_v0 = vor.u32 %v7306_v41, %v7305_v29  ;;  %v7310_v17 = vrot.slane %v7305_v29, 4  ;;  %v7020_v58 = vadd.f32 %v18342_v13, %v6981_v1  ;;  %v7596_v6 = vld [vmem:[#allocation3 + $0x60] sm:$0xf] }
 0x5ff   : > { %v13541_v21 = vpack.c.bf16 %v7110_v16, %v7110_v16  ;;  %v18448_v32 = vpop.f32.mrb[64].mxu0  ;;  %v7351_v25 = vor.u32 %v7349_v14, %v7348_v39  ;;  %v7352_v23 = vrot.slane %v7348_v39, 4  ;;  %v7113_v33 = vsel %vm7049_vm6, %v7017_v28, %v7081_v9 }
 0x600   : > { %v7309_v46 = vsel %vm16676_vm14, %v7301_v63, %v7308_v0  ;;  %v7580_v42 = vsel %vm16538_vm8, %v7310_v17, %v7579_v52  ;;  %v7111_v2 = vsel %vm7047_vm9, %v7015_v44, %v7079_v38  ;;  %v18451_v43 = vpop.f32.mrb[65].mxu0  ;;  %v13544_v5 = vpack.c.bf16 %v7113_v33, %v7113_v33  ;;  %v7593_v52 = vld [vmem:[#allocation3 + $0x5c] sm:$0x1]  ;;  %v7708_v33 = vld [vmem:[#allocation3 + $0x14] sm:$0x1] }
 0x601   : > { %v7329_v49 = vshrl.u32 %v13541_v21, 16  ;;  %v7332_v10 = vshll.u32 %v13541_v21, 16  ;;  %7578 = vst [vmem:[#allocation3 + $0x40] sm:$0xf] %v7309_v46  ;;  %7581 = vst [vmem:[#allocation3 + $0x44] sm:$0x1] %v7580_v42  ;;  %v13542_v7 = vpack.c.bf16 %v7111_v2, %v7111_v2  ;;  %v7597_v19 = vsel %vm16671_vm13, %v7351_v25, %v7596_v6 }
 0x602   : > { %vm7052_vm10 = vcmp.ge.f32.partialorder %v7020_v58, 0.0  ;;  %v18453_v63 = vpop.f32.mrb[66].mxu0  ;;  %v7084_v51 = vmul.f32 0.01, %v7020_v58  ;;  %v7018_v11 = vadd.f32 %v18342_v13, %v6979_v22  ;;  %v6982_v47 = vmul.f32 %v18402_v62, %v18335_v37  ;;  %7598 = vst [vmem:[#allocation3 + $0x60] sm:$0xf] %v7597_v19 }
 0x603   : > { %v7331_v60 = vrot.slane %v7329_v49, 7  ;;  %v18462_v34 = vpop.f32.mrb[67].mxu0  ;;  %v7354_v26 = vshrl.u32 %v13544_v5, 16  ;;  %v7357_v57 = vshll.u32 %v13544_v5, 16  ;;  %v7337_v18 = vshrl.u32 %v13542_v7, 16 }
 0x604   : > { %v7340_v24 = vshll.u32 %v13542_v7, 16  ;;  %v7116_v36 = vsel %vm7052_vm10, %v7020_v58, %v7084_v51  ;;  %vm7050_vm12 = vcmp.ge.f32.partialorder %v7018_v11, 0.0  ;;  %v7082_v50 = vmul.f32 0.01, %v7018_v11  ;;  %v7600_v62 = vld [vmem:[#allocation3 + $0x68] sm:$0x1] }
 0x605   : > { %v7334_v3 = vor.u32 %v7332_v10, %v7331_v60  ;;  %v7335_v61 = vrot.slane %v7331_v60, 4  ;;  %v7356_v4 = vrot.slane %v7354_v26, 7  ;;  %v13547_v41 = vpack.c.bf16 %v7116_v36, %v7116_v36  ;;  %v7610_v21 = vld [vmem:[#allocation3 + $0x78] sm:$0xf]  ;;  %v7662_v42 = vld [vmem:[#allocation3 + $0x10] sm:$0xf] }
 0x606   : > { %v7339_v20 = vrot.slane %v7337_v18, 7  ;;  %v7021_v28 = vadd.f32 %v18342_v13, %v6982_v47  ;;  %v6980_v29 = vmul.f32 %v18335_v37, %v18412_v27  ;;  %v7748_v44 = vshrl.u32 %v18460_v45, 16 }
 0x607   : > { %v7590_v56 = vsel %vm16671_vm13, %v7334_v3, %v7589_v40  ;;  %v7359_v1 = vor.u32 %v7357_v57, %v7356_v4  ;;  %v7361_v22 = vrot.slane %v7356_v4, 4  ;;  %v7380_v54 = vshrl.u32 %v13547_v41, 16  ;;  %v18470_v16 = vpop.f32.mrb[68].mxu0  ;;  %v7663_v4 = vld [vmem:[#allocation3 + $0x18] sm:$0xf] }
 0x608   : > { %7591 = vst [vmem:[#allocation3 + $0x54] sm:$0xf] %v7590_v56  ;;  %v7383_v14 = vshll.u32 %v13547_v41, 16  ;;  %v7342_v0 = vor.u32 %v7340_v24, %v7339_v20  ;;  %v7344_v17 = vrot.slane %v7339_v20, 4  ;;  %v7114_v9 = vsel %vm7050_vm12, %v7018_v11, %v7082_v50  ;;  %v18473_v39 = vpop.f32.mrb[69].mxu0 }
 0x609   : > { %vm7053_vm15 = vcmp.ge.f32.partialorder %v7021_v28, 0.0  ;;  %v7360_v27 = vsel %vm16676_vm14, %v7352_v23, %v7359_v1  ;;  %v7601_v38 = vsel %vm16538_vm8, %v7361_v22, %v7600_v62  ;;  %v18479_v58 = vrot.slane %v7380_v54, 7  ;;  %v18481_v6 = vpop.f32.mrb[70].mxu0 }
 0x60a   : > { %v13545_v46 = vpack.c.bf16 %v7114_v9, %v7114_v9  ;;  %7599 = vst [vmem:[#allocation3 + $0x64] sm:$0xf] %v7360_v27  ;;  %7602 = vst [vmem:[#allocation3 + $0x68] sm:$0x1] %v7601_v38  ;;  %v7343_v49 = vsel %vm16676_vm14, %v7335_v61, %v7342_v0  ;;  %v7594_v10 = vsel %vm16538_vm8, %v7344_v17, %v7593_v52  ;;  %v7085_v25 = vmul.f32 0.01, %v7021_v28 }
 0x60b   : > { %v7019_v23 = vadd.f32 %v18342_v13, %v6980_v29  ;;  %v18488_v2 = vpop.f32.mrb[71].mxu0  ;;  %7592 = vst [vmem:[#allocation3 + $0x58] sm:$0xf] %v7343_v49  ;;  %7595 = vst [vmem:[#allocation3 + $0x5c] sm:$0x1] %v7594_v10  ;;  %v7385_v60 = vor.u32 %v7383_v14, %v18479_v58  ;;  %v7386_v40 = vrot.slane %v18479_v58, 4 }
 0x60c   : > { %v7363_v5 = vshrl.u32 %v13545_v46, 16  ;;  %v7366_v7 = vshll.u32 %v13545_v46, 16  ;;  %v7117_v19 = vsel %vm7053_vm15, %v7021_v28, %v7085_v25  ;;  %v7750_v11 = vrot.slane %v7748_v44, 4  ;;  %v7603_v61 = vld [vmem:[#allocation3 + $0x6c] sm:$0xf] }
 0x60d   : > { %vm7051_vm0 = vcmp.ge.f32.partialorder %v7019_v23, 0.0  ;;  %v7083_v51 = vmul.f32 0.01, %v7019_v23  ;;  %v7611_v47 = vsel %vm16671_vm13, %v7385_v60, %v7610_v21  ;;  %v13548_v26 = vpack.c.bf16 %v7117_v19, %v7117_v19  ;;  %v7614_v14 = vld [vmem:[#allocation3 + $0x80] sm:$0x1] }
 0x60e   : > { %v7365_v3 = vrot.slane %v7363_v5, 7  ;;  %v7751_v57 = vshll.u32 %v18460_v45, 16  ;;  %7612 = vst [vmem:[#allocation3 + $0x78] sm:$0xf] %v7611_v47  ;;  %v7757_v24 = vshll.u32 %v7662_v42, 16  ;;  %v7761_v36 = vshrl.u32 %v7662_v42, 16 }
 0x60f   : > { %v7115_v18 = vsel %vm7051_vm0, %v7019_v23, %v7083_v51  ;;  %v7767_v56 = vshll.u32 %v7708_v33, 16  ;;  %v7388_v62 = vshrl.u32 %v13548_v26, 16  ;;  %v7391_v20 = vshll.u32 %v13548_v26, 16  ;;  %v7607_v58 = vld [vmem:[#allocation3 + $0x74] sm:$0x1] }
 0x610   : > { %v7368_v41 = vor.u32 %v7366_v7, %v7365_v3  ;;  %v7369_v50 = vrot.slane %v7365_v3, 4  ;;  %v13546_v28 = vpack.c.bf16 %v7115_v18, %v7115_v18  ;;  %v7753_v29 = vrot.slane %v7751_v57, 5  ;;  %v7664_v42 = vld [vmem:[#allocation3 + $0x1c] sm:$0xf]  ;;  %v7709_v7 = vld [vmem:[#allocation3 + $0x20] sm:$0x1] }
 0x611   : > { %v7759_v44 = vrot.slane %v7757_v24, 5  ;;  %v7763_v1 = vrot.slane %v7761_v36, 4  ;;  %v7390_v52 = vrot.slane %v7388_v62, 7  ;;  %v7769_v54 = vrot.slane %v7767_v56, 5  ;;  %v15822_v3 = vld [vmem:[#allocation7 + $0x8] sm:$0xff]  }
 0x612   : > { %v7604_v22 = vsel %vm16671_vm13, %v7368_v41, %v7603_v61  ;;  %v6985_v45 = vmul.f32 %v18421_v12, %v18335_v37  ;;  %v7371_v0 = vshrl.u32 %v13546_v28, 16  ;;  %v7374_v17 = vshll.u32 %v13546_v28, 16  ;;  %v7665_v28 = vld [vmem:[#allocation3 + $0x24] sm:$0xf] }
 0x613   : > { %7605 = vst [vmem:[#allocation3 + $0x6c] sm:$0xf] %v7604_v22  ;;  %v7754_v21 = vor.u32 %v7753_v29, %v7750_v11  ;;  %v7764_v9 = vor.u32 %v7763_v1, %v7759_v44  ;;  %v7393_v27 = vor.u32 %v7391_v20, %v7390_v52  ;;  %v7395_v38 = vrot.slane %v7390_v52, 4 }
 0x614   : > { %v7024_v46 = vadd.f32 %v18342_v13, %v6985_v45  ;;  %v7772_v49 = vshrl.u32 %v7663_v4, 16  ;;  %v7373_v10 = vrot.slane %v7371_v0, 7  ;;  %v7775_v33 = vshll.u32 %v7663_v4, 16 }
 0x615   : > { %v7755_v25 = vrot.slane %v7754_v21, 4  ;;  %v7765_v23 = vrot.slane %v7764_v9, 4  ;;  %v7394_v12 = vsel %vm16676_vm14, %v7386_v40, %v7393_v27  ;;  %v7615_v60 = vsel %vm16538_vm8, %v7395_v38, %v7614_v14  ;;  %v15823_v14 = vld [vmem:[#allocation7 + $0x10] sm:$0xff]   ;;  %v7624_v9 = vld [vmem:[#allocation3 + $0x90] sm:$0xf] }
 0x616   : > { %vm7056_vm2 = vcmp.ge.f32.partialorder %v7024_v46, 0.0  ;;  %v7088_v5 = vmul.f32 0.01, %v7024_v46  ;;  %7613 = vst [vmem:[#allocation3 + $0x7c] sm:$0xf] %v7394_v12  ;;  %v7376_v19 = vor.u32 %v7374_v17, %v7373_v10  ;;  %v7378_v51 = vrot.slane %v7373_v10, 4 }
 0x617   : > { %7616 = vst [vmem:[#allocation3 + $0x80] sm:$0x1] %v7615_v60  ;;  %v7760_v11 = vsel %vm16606_vm11, %v7755_v25, %v7759_v44  ;;  %v7770_v47 = vsel %vm16606_vm11, %v7765_v23, %v7769_v54  ;;  %v7774_v40 = vrot.slane %v7772_v49, 4  ;;  %v7777_v57 = vrot.slane %v7775_v33, 5  ;;  %v15824_v25 = vld [vmem:[#allocation7 + $0x18] sm:$0xff]  }
 0x618   : > { %v13226_v61 = vcombine.low %v7760_v11, %v7770_v47  ;;  %v7120_v26 = vsel %vm7056_vm2, %v7024_v46, %v7088_v5  ;;  %v7377_v18 = vsel %vm16676_vm14, %v7369_v50, %v7376_v19  ;;  %v7608_v24 = vsel %vm16538_vm8, %v7378_v51, %v7607_v58  ;;  %v18531_v60 = vld [vmem:[#allocation3 + $0x28] sm:$0xf]  ;;  %v7710_v5 = vld [vmem:[#allocation3 + $0x2c] sm:$0x1] }
 0x619   : > { %v13551_v36 = vpack.c.bf16 %v7120_v26, %v7120_v26  ;;  %v7781_v56 = vshll.u32 %v7664_v42, 16  ;;  %7606 = vst [vmem:[#allocation3 + $0x70] sm:$0xf] %v7377_v18  ;;  %7609 = vst [vmem:[#allocation3 + $0x74] sm:$0x1] %v7608_v24  ;;  %v7778_v4 = vor.u32 %v7777_v57, %v7774_v40  ;;  %v7785_v41 = vshrl.u32 %v7664_v42, 16 }
 0x61a   : > { %14653 = vmatmul.mubr.bf16.vlgmr.msra.gmra.mrb[32].mxu1 %v13226_v61  ;;  %v7791_v62 = vshll.u32 %v7709_v7, 16  ;;  %v6983_v20 = vmul.f32 %v18335_v37, %v18428_v55  ;;  %v6986_v50 = vmul.f32 %v18434_v30, %v18335_v37  ;;  %v6984_v17 = vmul.f32 %v18335_v37, %v18437_v15 }
 0x61b   : > { %v7414_v29 = vshrl.u32 %v13551_v36, 16  ;;  %v7417_v44 = vshll.u32 %v13551_v36, 16  ;;  %v7783_v1 = vrot.slane %v7781_v56, 5  ;;  %14685 = vmatpush3.bf16.msra.mxu1 %v18307_v59  ;;  %v7779_v22 = vrot.slane %v7778_v4, 4  ;;  %v15825_v36 = vld [vmem:[#allocation7 + $0x20] sm:$0xff]  }
 0x61c   : > { %v7787_v52 = vrot.slane %v7785_v41, 4  ;;  %v7793_v54 = vrot.slane %v7791_v62, 5  ;;  %v7022_v45 = vadd.f32 %v18342_v13, %v6983_v20  ;;  %14686 = vmatprep.subr.bf16.mxu1 %v15822_v3  ;;  %v7025_v55 = vadd.f32 %v18342_v13, %v6986_v50  ;;  %v7617_v20 = vld [vmem:[#allocation3 + $0x84] sm:$0xf] }
 0x61d   : > { %v18519_v0 = vrot.slane %v7414_v29, 7  ;;  %v7796_v21 = vshrl.u32 %v7665_v28, 16  ;;  %v7784_v59 = vsel %vm16606_vm11, %v7779_v22, %v7783_v1  ;;  %v7023_v10 = vadd.f32 %v18342_v13, %v6984_v17 }
 0x61e   : > { %v7788_v30 = vor.u32 %v7787_v52, %v7783_v1  ;;  %vm7054_vm3 = vcmp.ge.f32.partialorder %v7022_v45, 0.0  ;;  %v7086_v27 = vmul.f32 0.01, %v7022_v45  ;;  %vm7057_vm4 = vcmp.ge.f32.partialorder %v7025_v55, 0.0  ;;  %v7628_v52 = vld [vmem:[#allocation3 + $0x98] sm:$0x1] }
 0x61f   : > { %v7419_v38 = vor.u32 %v7417_v44, %v18519_v0  ;;  %v7420_v58 = vrot.slane %v18519_v0, 4  ;;  %v7089_v46 = vmul.f32 0.01, %v7025_v55  ;;  %14687 = vmatpush3.bf16.msra.mxu1 %v15822_v3  ;;  %v7798_v15 = vrot.slane %v7796_v21, 4  ;;  %v18539_v21 = vld [vmem:[#allocation3 + $0x30] sm:$0xf] }
 0x620   : > { %v7789_v42 = vrot.slane %v7788_v30, 4  ;;  %v7118_v49 = vsel %vm7054_vm3, %v7022_v45, %v7086_v27  ;;  %14688 = vmatprep.subr.bf16.mxu1 %v15823_v14  ;;  %v7799_v7 = vshll.u32 %v7665_v28, 16  ;;  %vm7055_vm5 = vcmp.ge.f32.partialorder %v7023_v10, 0.0 }
 0x621   : > { %v7625_v23 = vsel %vm16671_vm13, %v7419_v38, %v7624_v9  ;;  %v13549_v33 = vpack.c.bf16 %v7118_v49, %v7118_v49  ;;  %v7121_v12 = vsel %vm7057_vm4, %v7025_v55, %v7089_v46  ;;  %v7087_v11 = vmul.f32 0.01, %v7023_v10  ;;  %v15826_v9 = vld [vmem:[#allocation7 + $0x28] sm:$0xff]  }
 0x622   : > { %7626 = vst [vmem:[#allocation3 + $0x90] sm:$0xf] %v7625_v23  ;;  %v7794_v19 = vsel %vm16606_vm11, %v7789_v42, %v7793_v54  ;;  %v13552_v51 = vpack.c.bf16 %v7121_v12, %v7121_v12  ;;  %v7801_v26 = vrot.slane %v7799_v7, 5  ;;  %v7805_v24 = vshll.u32 %v18531_v60, 16  ;;  %v7621_v42 = vld [vmem:[#allocation3 + $0x8c] sm:$0x1] }
 0x623   : > { %v13227_v47 = vcombine.low %v7784_v59, %v7794_v19  ;;  %v7397_v3 = vshrl.u32 %v13549_v33, 16  ;;  %v7400_v61 = vshll.u32 %v13549_v33, 16  ;;  %14689 = vmatpush3.bf16.msra.mxu1 %v15823_v14  ;;  %v7119_v18 = vsel %vm7055_vm5, %v7023_v10, %v7087_v11  ;;  %v15827_v23 = vld [vmem:[#allocation7 + $0x30] sm:$0xff]   ;;  %v7711_v12 = vld [vmem:[#allocation3 + $0x38] sm:$0x1] }
 0x624   : > { %v7422_v40 = vshrl.u32 %v13552_v51, 16  ;;  %v7425_v57 = vshll.u32 %v13552_v51, 16  ;;  %14690 = vmatprep.subr.bf16.mxu1 %v15824_v25  ;;  %v13550_v4 = vpack.c.bf16 %v7119_v18, %v7119_v18  ;;  %v7802_v41 = vor.u32 %v7801_v26, %v7798_v15 }
 0x625   : > { %14656 = vmatprep.mubr.bf16.mxu1 %v13227_v47  ;;  %v7399_v56 = vrot.slane %v7397_v3, 7  ;;  %v7809_v62 = vshrl.u32 %v18531_v60, 16  ;;  %v7807_v29 = vrot.slane %v7805_v24, 5  ;;  %v7815_v44 = vshll.u32 %v7710_v5, 16 }
 0x626   : > { %v7424_v28 = vrot.slane %v7422_v40, 7  ;;  %v6989_v1 = vmul.f32 %v18448_v32, %v18335_v37  ;;  %v7405_v54 = vshrl.u32 %v13550_v4, 16  ;;  %v7408_v45 = vshll.u32 %v13550_v4, 16  ;;  %v18544_v32 = vld [vmem:[#allocation3 + $0x34] sm:$0xf] }
 0x627   : > { %v7402_v50 = vor.u32 %v7400_v61, %v7399_v56  ;;  %v7403_v22 = vrot.slane %v7399_v56, 4  ;;  %14691 = vmatpush3.bf16.msra.mxu1 %v15824_v25  ;;  %v7803_v55 = vrot.slane %v7802_v41, 4  ;;  %v7811_v17 = vrot.slane %v7809_v62, 4  ;;  %v18562_v56 = vld [vmem:[#allocation3 + $0x3c] sm:$0xf] }
 0x628   : > { %v7427_v14 = vor.u32 %v7425_v57, %v7424_v28  ;;  %v7429_v0 = vrot.slane %v7424_v28, 4  ;;  %14692 = vmatprep.subr.bf16.mxu1 %v15825_v36  ;;  %v7407_v30 = vrot.slane %v7405_v54, 7  ;;  %v7817_v27 = vrot.slane %v7815_v44, 5  ;;  %v7638_v54 = vld [vmem:[#allocation3 + $0xa8] sm:$0xf] }
 0x629   : > { %v7618_v59 = vsel %vm16671_vm13, %v7402_v50, %v7617_v20  ;;  %v7028_v37 = vadd.f32 %v18342_v13, %v6989_v1  ;;  %v7808_v49 = vsel %vm16606_vm11, %v7803_v55, %v7807_v29  ;;  %v7812_v10 = vor.u32 %v7811_v17, %v7807_v29  ;;  %v18567_v20 = vld [vmem:[%s20064_s7] ss:$0 sm:$0xff]  ;;  %v15828_v29 = vld [vmem:[#allocation7 + $0x38] sm:$0xff]   ;;  %v18584_v55 = vld [vmem:[#allocation7 + $0x80] sm:$0xff]  }
 0x62a   : > { %7619 = vst [vmem:[#allocation3 + $0x84] sm:$0xf] %v7618_v59  ;;  %v7428_v38 = vsel %vm16676_vm14, %v7420_v58, %v7427_v14  ;;  %v7629_v46 = vsel %vm16538_vm8, %v7429_v0, %v7628_v52  ;;  %v7410_v15 = vor.u32 %v7408_v45, %v7407_v30  ;;  %v7412_v25 = vrot.slane %v7407_v30, 4  ;;  %v18580_v14 = vld [vmem:[%s20065_s8] ss:$0 sm:$0xff] }
 0x62b   : > { %7627 = vst [vmem:[#allocation3 + $0x94] sm:$0xf] %v7428_v38  ;;  %7630 = vst [vmem:[#allocation3 + $0x98] sm:$0x1] %v7629_v46  ;;  %vm7060_vm6 = vcmp.ge.f32.partialorder %v7028_v37, 0.0  ;;  %14693 = vmatpush3.bf16.msra.mxu1 %v15825_v36  ;;  %v7813_v33 = vrot.slane %v7812_v10, 4  ;;  %v6987_v28 = vmul.f32 %v18567_v20, %v18451_v43  ;;  %v6990_v50 = vmul.f32 %v18567_v20, %v18453_v63 }
 0x62c   : > { %v7092_v13 = vmul.f32 0.01, %v7028_v37  ;;  %v7820_v58 = vshrl.u32 %v18539_v21, 16  ;;  %v7823_v5 = vshll.u32 %v18539_v21, 16  ;;  %v7829_v7 = vshll.u32 %v18544_v32, 16  ;;  %14694 = vmatprep.subr.bf16.mxu1 %v15826_v9 }
 0x62d   : > { %v7411_v19 = vsel %vm16676_vm14, %v7403_v22, %v7410_v15  ;;  %v7622_v51 = vsel %vm16538_vm8, %v7412_v25, %v7621_v42  ;;  %v7833_v47 = vshrl.u32 %v18544_v32, 16  ;;  %v7818_v3 = vsel %vm16606_vm11, %v7813_v33, %v7817_v27  ;;  %v7712_v25 = vld [vmem:[#allocation3 + $0x44] sm:$0x1] }
 0x62e   : > { %v7124_v11 = vsel %vm7060_vm6, %v7028_v37, %v7092_v13  ;;  %7620 = vst [vmem:[#allocation3 + $0x88] sm:$0xf] %v7411_v19  ;;  %7623 = vst [vmem:[#allocation3 + $0x8c] sm:$0x1] %v7622_v51  ;;  %v7822_v26 = vrot.slane %v7820_v58, 4  ;;  %v7825_v40 = vrot.slane %v7823_v5, 5  ;;  %v13228_v57 = vcombine.low %v7808_v49, %v7818_v3 }
 0x62f   : > { %v13555_v61 = vpack.c.bf16 %v7124_v11, %v7124_v11  ;;  %v7831_v18 = vrot.slane %v7829_v7, 5  ;;  %v7835_v24 = vrot.slane %v7833_v47, 4  ;;  %v7839_v36 = vshll.u32 %v7711_v12, 16  ;;  %14695 = vmatpush3.bf16.msra.mxu1 %v15826_v9  ;;  %v18588_v9 = vld [vmem:[#allocation3 + $0x40] sm:$0xf] }
 0x630   : > { %v7826_v62 = vor.u32 %v7825_v40, %v7822_v26  ;;  %14696 = vmatprep.subr.bf16.mxu1 %v15827_v23  ;;  %14657 = vmatmul.mubr.bf16.gmra.mrb[36].mxu1 %v13228_v57  ;;  %v6988_v22 = vmul.f32 %v18567_v20, %v18462_v34  ;;  %v7026_v43 = vadd.f32 %v18580_v14, %v6987_v28  ;;  %v7844_v0 = vshrl.u32 %v18562_v56, 16 }
 0x631   : > { %v7448_v4 = vshrl.u32 %v13555_v61, 16  ;;  %v7451_v41 = vshll.u32 %v13555_v61, 16  ;;  %v7836_v44 = vor.u32 %v7835_v24, %v7831_v18  ;;  %v7841_v1 = vrot.slane %v7839_v36, 5 }
 0x632   : > { %v7827_v45 = vrot.slane %v7826_v62, 4  ;;  %v7029_v63 = vadd.f32 %v18580_v14, %v6990_v50  ;;  %v7027_v34 = vadd.f32 %v18580_v14, %v6988_v22  ;;  %v7847_v59 = vshll.u32 %v18562_v56, 16  ;;  %v7642_v50 = vld [vmem:[#allocation3 + $0xb0] sm:$0x1] }
 0x633   : > { %v18575_v52 = vrot.slane %v7448_v4, 7  ;;  %v7837_v17 = vrot.slane %v7836_v44, 4  ;;  %14697 = vmatpush3.bf16.msra.mxu1 %v15827_v23  ;;  %vm7058_vm9 = vcmp.ge.f32.partialorder %v7026_v43, 0.0  ;;  %v7090_v46 = vmul.f32 0.01, %v7026_v43 }
 0x634   : > { %v7832_v37 = vsel %vm16606_vm11, %v7827_v45, %v7831_v18  ;;  %14698 = vmatprep.subr.bf16.mxu1 %v15828_v29  ;;  %vm7061_vm10 = vcmp.ge.f32.partialorder %v7029_v63, 0.0  ;;  %v7093_v42 = vmul.f32 0.01, %v7029_v63  ;;  %vm7059_vm12 = vcmp.ge.f32.partialorder %v7027_v34, 0.0  ;;  %v18602_v18 = vld [vmem:[#allocation3 + $0x48] sm:$0xf] }
 0x635   : > { %v7453_v30 = vor.u32 %v7451_v41, %v18575_v52  ;;  %v7454_v27 = vrot.slane %v18575_v52, 4  ;;  %v7842_v38 = vsel %vm16606_vm11, %v7837_v17, %v7841_v1  ;;  %v7091_v15 = vmul.f32 0.01, %v7027_v34  ;;  %v7631_v1 = vld [vmem:[#allocation3 + $0x9c] sm:$0xf] }
 0x636   : > { %v13229_v10 = vcombine.low %v7832_v37, %v7842_v38  ;;  %v7122_v13 = vsel %vm7058_vm9, %v7026_v43, %v7090_v46  ;;  %v7125_v23 = vsel %vm7061_vm10, %v7029_v63, %v7093_v42  ;;  %v7846_v33 = vrot.slane %v7844_v0, 4  ;;  %v18610_v46 = vld [vmem:[#allocation3 + $0x4c] sm:$0xf] }
 0x637   : > { %v7639_v49 = vsel %vm16671_vm13, %v7453_v30, %v7638_v54  ;;  %v7849_v12 = vrot.slane %v7847_v59, 5  ;;  %14699 = vmatpush3.bf16.msra.mxu1 %v15828_v29  ;;  %v13553_v58 = vpack.c.bf16 %v7122_v13, %v7122_v13  ;;  %v13556_v5 = vpack.c.bf16 %v7125_v23, %v7125_v23 }
 0x638   : > { %7640 = vst [vmem:[#allocation3 + $0xa8] sm:$0xf] %v7639_v49  ;;  %14660 = vmatprep.mubr.bf16.mxu1 %v13229_v10  ;;  %v7123_v7 = vsel %vm7059_vm12, %v7027_v34, %v7091_v15  ;;  %v7853_v19 = vshll.u32 %v18588_v9, 16  ;;  %14732 = vmatprep.subr.bf16.mxu1 %v18584_v55  ;;  %v7857_v47 = vshrl.u32 %v18588_v9, 16  ;;  %v7863_v3 = vshll.u32 %v7712_v25, 16 }
 0x639   : > { %v13554_v51 = vpack.c.bf16 %v7123_v7, %v7123_v7  ;;  %v7850_v11 = vor.u32 %v7849_v12, %v7846_v33  ;;  %v7431_v61 = vshrl.u32 %v13553_v58, 16  ;;  %v7434_v26 = vshll.u32 %v13553_v58, 16  ;;  %v7635_v34 = vld [vmem:[#allocation3 + $0xa4] sm:$0x1]  ;;  %v18618_v10 = vld [vmem:[#allocation3 + $0x50] sm:$0x1] }
 0x63a   : > { %v7456_v40 = vshrl.u32 %v13556_v5, 16  ;;  %v7459_v57 = vshll.u32 %v13556_v5, 16  ;;  %v7855_v41 = vrot.slane %v7853_v19, 5  ;;  %v7859_v29 = vrot.slane %v7857_v47, 4 }
 0x63b   : > { %v7439_v24 = vshrl.u32 %v13554_v51, 16  ;;  %v7442_v36 = vshll.u32 %v13554_v51, 16  ;;  %v7851_v4 = vrot.slane %v7850_v11, 4  ;;  %v7433_v62 = vrot.slane %v7431_v61, 7  ;;  %v18634_v11 = vld [vmem:[#allocation3 + $0x54] sm:$0xf] }
 0x63c   : > { %v7458_v28 = vrot.slane %v7456_v40, 7  ;;  %v7865_v44 = vrot.slane %v7863_v3, 5  ;;  %v6993_v54 = vmul.f32 %v18567_v20, %v18470_v16  ;;  %v7868_v45 = vshrl.u32 %v18602_v18, 16 }
 0x63d   : > { %v7441_v22 = vrot.slane %v7439_v24, 7  ;;  %v7856_v52 = vsel %vm16606_vm11, %v7851_v4, %v7855_v41  ;;  %v7436_v43 = vor.u32 %v7434_v26, %v7433_v62  ;;  %v7437_v0 = vrot.slane %v7433_v62, 4 }
 0x63e   : > { %v7461_v17 = vor.u32 %v7459_v57, %v7458_v28  ;;  %v7463_v63 = vrot.slane %v7458_v28, 4  ;;  %v7860_v37 = vor.u32 %v7859_v29, %v7855_v41  ;;  %v7032_v38 = vadd.f32 %v18580_v14, %v6993_v54 }
 0x63f   : > { %v7444_v59 = vor.u32 %v7442_v36, %v7441_v22  ;;  %v7446_v30 = vrot.slane %v7441_v22, 4  ;;  %v7632_v42 = vsel %vm16671_vm13, %v7436_v43, %v7631_v1  ;;  %v7870_v15 = vrot.slane %v7868_v45, 4  ;;  %v7652_v43 = vld [vmem:[#allocation3 + $0xc0] sm:$0xf] }
 0x640   : > { %v7462_v16 = vsel %vm16676_vm14, %v7454_v27, %v7461_v17  ;;  %v7643_v49 = vsel %vm16538_vm8, %v7463_v63, %v7642_v50  ;;  %7633 = vst [vmem:[#allocation3 + $0x9c] sm:$0xf] %v7632_v42  ;;  %v7861_v23 = vrot.slane %v7860_v37, 4  ;;  %vm7064_vm15 = vcmp.ge.f32.partialorder %v7032_v38, 0.0  ;;  %v18647_v37 = vld [vmem:[#allocation3 + $0x58] sm:$0xf] }
 0x641   : > { %7641 = vst [vmem:[#allocation3 + $0xac] sm:$0xf] %v7462_v16  ;;  %7644 = vst [vmem:[#allocation3 + $0xb0] sm:$0x1] %v7643_v49  ;;  %v7445_v25 = vsel %vm16676_vm14, %v7437_v0, %v7444_v59  ;;  %v7636_v13 = vsel %vm16538_vm8, %v7446_v30, %v7635_v34  ;;  %v7096_v27 = vmul.f32 0.01, %v7032_v38  ;;  %v6991_v19 = vmul.f32 %v18567_v20, %v18473_v39 }
 0x642   : > { %7634 = vst [vmem:[#allocation3 + $0xa0] sm:$0xf] %v7445_v25  ;;  %7637 = vst [vmem:[#allocation3 + $0xa4] sm:$0x1] %v7636_v13  ;;  %v7871_v33 = vshll.u32 %v18602_v18, 16  ;;  %v7877_v12 = vshll.u32 %v18610_v46, 16  ;;  %v7866_v5 = vsel %vm16606_vm11, %v7861_v23, %v7865_v44  ;;  %v6994_v51 = vmul.f32 %v18567_v20, %v18481_v6 }
 0x643   : > { %v7881_v58 = vshrl.u32 %v18610_v46, 16  ;;  %v7887_v7 = vshll.u32 %v18618_v10, 16  ;;  %v13230_v47 = vcombine.low %v7856_v52, %v7866_v5  ;;  %v7128_v3 = vsel %vm7064_vm15, %v7032_v38, %v7096_v27  ;;  %v18649_v38 = vld [vmem:[#allocation3 + $0x60] sm:$0xf]  ;;  %v18651_v49 = vld [vmem:[#allocation3 + $0x5c] sm:$0x1] }
 0x644   : > { %v7873_v61 = vrot.slane %v7871_v33, 5  ;;  %v7879_v26 = vrot.slane %v7877_v12, 5  ;;  %v13559_v40 = vpack.c.bf16 %v7128_v3, %v7128_v3  ;;  %v7030_v36 = vadd.f32 %v18580_v14, %v6991_v19  ;;  %v7656_v19 = vld [vmem:[#allocation3 + $0xc8] sm:$0x1] }
 0x645   : > { %v7883_v57 = vrot.slane %v7881_v58, 4  ;;  %v7889_v24 = vrot.slane %v7887_v7, 5  ;;  %14661 = vmatmul.mubr.bf16.gmra.mrb[40].mxu1 %v13230_v47  ;;  %v7033_v41 = vadd.f32 %v18580_v14, %v6994_v51  ;;  %v6992_v39 = vmul.f32 %v18567_v20, %v18488_v2  ;;  %v7645_v7 = vld [vmem:[#allocation3 + $0xb4] sm:$0xf] }
 0x646   : > { %v7874_v4 = vor.u32 %v7873_v61, %v7870_v15  ;;  %v7892_v6 = vshrl.u32 %v18634_v11, 16  ;;  %v7482_v62 = vshrl.u32 %v13559_v40, 16  ;;  %v7485_v28 = vshll.u32 %v13559_v40, 16 }
 0x647   : > { %v7884_v29 = vor.u32 %v7883_v57, %v7879_v26  ;;  %vm7062_vm0 = vcmp.ge.f32.partialorder %v7030_v36, 0.0  ;;  %v7094_v1 = vmul.f32 0.01, %v7030_v36  ;;  %vm7065_vm2 = vcmp.ge.f32.partialorder %v7033_v41, 0.0  ;;  %v18658_v57 = vld [vmem:[#allocation3 + $0x64] sm:$0xf] }
 0x648   : > { %v7875_v44 = vrot.slane %v7874_v4, 4  ;;  %v7097_v50 = vmul.f32 0.01, %v7033_v41  ;;  %v7484_v22 = vrot.slane %v7482_v62, 7  ;;  %v7031_v54 = vadd.f32 %v18580_v14, %v6992_v39  ;;  %v18663_v62 = vld [vmem:[#allocation3 + $0x6c] sm:$0xf] }
 0x649   : > { %v7885_v52 = vrot.slane %v7884_v29, 4  ;;  %v7894_v45 = vrot.slane %v7892_v6, 4  ;;  %v7126_v2 = vsel %vm7062_vm0, %v7030_v36, %v7094_v1  ;;  %v7895_v17 = vshll.u32 %v18634_v11, 16  ;;  %v18661_v6 = vld [vmem:[#allocation3 + $0x68] sm:$0x1] }
 0x64a   : > { %v7880_v0 = vsel %vm16606_vm11, %v7875_v44, %v7879_v26  ;;  %v7129_v20 = vsel %vm7065_vm2, %v7033_v41, %v7097_v50  ;;  %v7487_v63 = vor.u32 %v7485_v28, %v7484_v22  ;;  %v7488_v34 = vrot.slane %v7484_v22, 4 }
 0x64b   : > { %v7890_v59 = vsel %vm16606_vm11, %v7885_v52, %v7889_v24  ;;  %v13557_v30 = vpack.c.bf16 %v7126_v2, %v7126_v2  ;;  %v13560_v42 = vpack.c.bf16 %v7129_v20, %v7129_v20  ;;  %vm7063_vm3 = vcmp.ge.f32.partialorder %v7031_v54, 0.0 }
 0x64c   : > { %v13231_v14 = vcombine.low %v7880_v0, %v7890_v59  ;;  %v7095_v16 = vmul.f32 0.01, %v7031_v54  ;;  %v7653_v15 = vsel %vm16671_vm13, %v7487_v63, %v7652_v43  ;;  %v7897_v23 = vrot.slane %v7895_v17, 5  ;;  %v7649_v0 = vld [vmem:[#allocation3 + $0xbc] sm:$0x1] }
 0x64d   : > { %v7465_v25 = vshrl.u32 %v13557_v30, 16  ;;  %v7468_v13 = vshll.u32 %v13557_v30, 16  ;;  %7654 = vst [vmem:[#allocation3 + $0xc0] sm:$0xf] %v7653_v15  ;;  %v7490_v27 = vshrl.u32 %v13560_v42, 16  ;;  %v7493_v33 = vshll.u32 %v13560_v42, 16 }
 0x64e   : > { %14664 = vmatprep.mubr.bf16.mxu1 %v13231_v14  ;;  %v7127_v12 = vsel %vm7063_vm3, %v7031_v54, %v7095_v16  ;;  %v7901_v58 = vshll.u32 %v18647_v37, 16  ;;  %v7898_v47 = vor.u32 %v7897_v23, %v7894_v45  ;;  %v7905_v3 = vshrl.u32 %v18647_v37, 16  ;;  %v18673_v17 = vld [vmem:[#allocation3 + $0x70] sm:$0xf] }
 0x64f   : > { %v7467_v5 = vrot.slane %v7465_v25, 7  ;;  %v13558_v51 = vpack.c.bf16 %v7127_v12, %v7127_v12  ;;  %v7492_v61 = vrot.slane %v7490_v27, 7  ;;  %v7911_v40 = vshll.u32 %v18651_v49, 16  ;;  %v18684_v27 = vld [vmem:[#allocation3 + $0x74] sm:$0x1] }
 0x650   : > { %v7903_v26 = vrot.slane %v7901_v58, 5  ;;  %v7916_v24 = vshrl.u32 %v18649_v38, 16  ;;  %v7899_v44 = vrot.slane %v7898_v47, 4  ;;  %v7907_v1 = vrot.slane %v7905_v3, 4  ;;  %v18692_v3 = vld [vmem:[#allocation3 + $0x7c] sm:$0xf] }
 0x651   : > { %v7470_v36 = vor.u32 %v7468_v13, %v7467_v5  ;;  %v7471_v4 = vrot.slane %v7467_v5, 4  ;;  %v7473_v41 = vshrl.u32 %v13558_v51, 16  ;;  %v7476_v39 = vshll.u32 %v13558_v51, 16 }
 0x652   : > { %v7495_v28 = vor.u32 %v7493_v33, %v7492_v61  ;;  %v7497_v29 = vrot.slane %v7492_v61, 4  ;;  %v7913_v52 = vrot.slane %v7911_v40, 5  ;;  %v7918_v54 = vrot.slane %v7916_v24, 4  ;;  %v18686_v33 = vld [vmem:[#allocation3 + $0x78] sm:$0xf] }
 0x653   : > { %v7646_v50 = vsel %vm16671_vm13, %v7470_v36, %v7645_v7  ;;  %v7475_v22 = vrot.slane %v7473_v41, 7  ;;  %v7904_v2 = vsel %vm16606_vm11, %v7899_v44, %v7903_v26  ;;  %v7908_v20 = vor.u32 %v7907_v1, %v7903_v26  ;;  %v18696_v24 = vld [vmem:[#allocation3 + $0x80] sm:$0x1] }
 0x654   : > { %7647 = vst [vmem:[#allocation3 + $0xb4] sm:$0xf] %v7646_v50  ;;  %v7496_v45 = vsel %vm16676_vm14, %v7488_v34, %v7495_v28  ;;  %v7657_v43 = vsel %vm16538_vm8, %v7497_v29, %v7656_v19  ;;  %v7919_v59 = vshll.u32 %v18649_v38, 16  ;;  %v7925_v30 = vshll.u32 %v18658_v57, 16  ;;  %v18700_v29 = vld [vmem:[#allocation3 + $0x84] sm:$0xf] }
 0x655   : > { %7655 = vst [vmem:[#allocation3 + $0xc4] sm:$0xf] %v7496_v45  ;;  %7658 = vst [vmem:[#allocation3 + $0xc8] sm:$0x1] %v7657_v43  ;;  %v7478_v8 = vor.u32 %v7476_v39, %v7475_v22  ;;  %v7480_v63 = vrot.slane %v7475_v22, 4  ;;  %v7909_v14 = vrot.slane %v7908_v20, 4 }
 0x656   : > { %v7929_v34 = vshrl.u32 %v18658_v57, 16  ;;  %v7935_v42 = vshll.u32 %v18661_v6, 16  ;;  %v7940_v16 = vshrl.u32 %v18663_v62, 16  ;;  %v7921_v13 = vrot.slane %v7919_v59, 5 }
 0x657   : > { %v7479_v15 = vsel %vm16676_vm14, %v7471_v4, %v7478_v8  ;;  %v7650_v25 = vsel %vm16538_vm8, %v7480_v63, %v7649_v0  ;;  %v7927_v23 = vrot.slane %v7925_v30, 5  ;;  %v7914_v12 = vsel %vm16606_vm11, %v7909_v14, %v7913_v52  ;;  %v18709_v63 = vld [vmem:[#allocation3 + $0x88] sm:$0xf] }
 0x658   : > { %7648 = vst [vmem:[#allocation3 + $0xb8] sm:$0xf] %v7479_v15  ;;  %7651 = vst [vmem:[#allocation3 + $0xbc] sm:$0x1] %v7650_v25  ;;  %v7931_v58 = vrot.slane %v7929_v34, 4  ;;  %v7937_v5 = vrot.slane %v7935_v42, 5  ;;  %v13232_v19 = vcombine.low %v7904_v2, %v7914_v12  ;;  %v7922_v35 = vor.u32 %v7921_v13, %v7918_v54 }
 0x659   : > { %v7942_v7 = vrot.slane %v7940_v16, 4  ;;  %v7943_v51 = vshll.u32 %v18663_v62, 16  ;;  %v7949_v47 = vshll.u32 %v18673_v17, 16  ;;  %v7953_v26 = vshrl.u32 %v18673_v17, 16  ;;  %v18712_v13 = vld [vmem:[#allocation3 + $0x90] sm:$0xf] }
 0x65a   : > { %v7932_v61 = vor.u32 %v7931_v58, %v7927_v23  ;;  %v7959_v40 = vshll.u32 %v18684_v27, 16  ;;  %v7964_v36 = vshrl.u32 %v18686_v33, 16  ;;  %14665 = vmatmul.mubr.bf16.gmra.mrb[44].mxu1 %v13232_v19  ;;  %v7923_v4 = vrot.slane %v7922_v35, 4  ;;  %v18716_v58 = vld [vmem:[#allocation3 + $0x8c] sm:$0x1] }
 0x65b   : > { %v7945_v41 = vrot.slane %v7943_v51, 5  ;;  %v7951_v39 = vrot.slane %v7949_v47, 5  ;;  %v7967_v28 = vshll.u32 %v18686_v33, 16  ;;  %v7955_v1 = vrot.slane %v7953_v26, 4 }
 0x65c   : > { %v7933_v44 = vrot.slane %v7932_v61, 4  ;;  %v7961_v50 = vrot.slane %v7959_v40, 5  ;;  %v7966_v22 = vrot.slane %v7964_v36, 4  ;;  %v7928_v52 = vsel %vm16606_vm11, %v7923_v4, %v7927_v23  ;;  %v18723_v61 = vld [vmem:[#allocation3 + $0x94] sm:$0xf] }
 0x65d   : > { %v7946_v54 = vor.u32 %v7945_v41, %v7942_v7  ;;  %v7969_v45 = vrot.slane %v7967_v28, 5  ;;  %v7973_v43 = vshll.u32 %v18692_v3, 16  ;;  %v7956_v2 = vor.u32 %v7955_v1, %v7951_v39 }
 0x65e   : > { %v7938_v0 = vsel %vm16606_vm11, %v7933_v44, %v7937_v5  ;;  %v7977_v20 = vshrl.u32 %v18692_v3, 16  ;;  %v7983_v8 = vshll.u32 %v18696_v24, 16  ;;  %v7988_v25 = vshrl.u32 %v18700_v29, 16  ;;  %v18728_v44 = vld [vmem:[#allocation3 + $0x98] sm:$0x1] }
 0x65f   : > { %v13233_v59 = vcombine.low %v7928_v52, %v7938_v0  ;;  %v7947_v30 = vrot.slane %v7946_v54, 4  ;;  %v7970_v14 = vor.u32 %v7969_v45, %v7966_v22  ;;  %v7975_v34 = vrot.slane %v7973_v43, 5  ;;  %v18734_v45 = vld [vmem:[#allocation3 + $0x9c] sm:$0xf] }
 0x660   : > { %v7957_v42 = vrot.slane %v7956_v2, 4  ;;  %v7979_v16 = vrot.slane %v7977_v20, 4  ;;  %v7985_v15 = vrot.slane %v7983_v8, 5  ;;  %v7991_v5 = vshll.u32 %v18700_v29, 16  ;;  %v18738_v8 = vld [vmem:[#allocation3 + $0xa0] sm:$0xf] }
 0x661   : > { %14668 = vmatprep.mubr.bf16.mxu1 %v13233_v59  ;;  %v7952_v23 = vsel %vm16606_vm11, %v7947_v30, %v7951_v39  ;;  %v7971_v12 = vrot.slane %v7970_v14, 4  ;;  %v7997_v7 = vshll.u32 %v18709_v63, 16  ;;  %v7990_v51 = vrot.slane %v7988_v25, 4 }
 0x662   : > { %v7962_v19 = vsel %vm16606_vm11, %v7957_v42, %v7961_v50  ;;  %v7980_v35 = vor.u32 %v7979_v16, %v7975_v34  ;;  %v8001_v47 = vshrl.u32 %v18709_v63, 16  ;;  %v7993_v36 = vrot.slane %v7991_v5, 5 }
 0x663   : > { %v13234_v26 = vcombine.low %v7952_v23, %v7962_v19  ;;  %v7976_v40 = vsel %vm16606_vm11, %v7971_v12, %v7975_v34  ;;  %v7999_v4 = vrot.slane %v7997_v7, 5  ;;  %v8007_v28 = vshll.u32 %v18716_v58, 16  ;;  %v18744_v7 = vld [vmem:[#allocation3 + $0xa8] sm:$0xf] }
 0x664   : > { %v7981_v41 = vrot.slane %v7980_v35, 4  ;;  %v8003_v39 = vrot.slane %v8001_v47, 4  ;;  %v8012_v1 = vshrl.u32 %v18712_v13, 16  ;;  %v7994_v50 = vor.u32 %v7993_v36, %v7990_v51  ;;  %v18750_v47 = vld [vmem:[#allocation3 + $0xa4] sm:$0x1] }
 0x665   : > { %14669 = vmatmul.mubr.bf16.gmra.mrb[48].mxu1 %v13234_v26  ;;  %v8015_v22 = vshll.u32 %v18712_v13, 16  ;;  %v8021_v52 = vshll.u32 %v18723_v61, 16  ;;  %v8025_v54 = vshrl.u32 %v18723_v61, 16  ;;  %v8009_v2 = vrot.slane %v8007_v28, 5 }
 0x666   : > { %v7986_v43 = vsel %vm16606_vm11, %v7981_v41, %v7985_v15  ;;  %v8004_v0 = vor.u32 %v8003_v39, %v7999_v4  ;;  %v8014_v20 = vrot.slane %v8012_v1, 4  ;;  %v7995_v30 = vrot.slane %v7994_v50, 4 }
 0x667   : > { %v13235_v59 = vcombine.low %v7976_v40, %v7986_v43  ;;  %v8017_v14 = vrot.slane %v8015_v22, 5  ;;  %v8023_v34 = vrot.slane %v8021_v52, 5  ;;  %v8027_v16 = vrot.slane %v8025_v54, 4  ;;  %v18752_v40 = vld [vmem:[#allocation3 + $0xac] sm:$0xf] }
 0x668   : > { %v8005_v42 = vrot.slane %v8004_v0, 4  ;;  %v8031_v25 = vshll.u32 %v18728_v44, 16  ;;  %v8036_v23 = vshrl.u32 %v18734_v45, 16  ;;  %v8039_v5 = vshll.u32 %v18734_v45, 16 }
 0x669   : > { %14672 = vmatprep.mubr.bf16.mxu1 %v13235_v59  ;;  %v8018_v12 = vor.u32 %v8017_v14, %v8014_v20  ;;  %v8045_v15 = vshll.u32 %v18738_v8, 16  ;;  %v8000_v19 = vsel %vm16606_vm11, %v7995_v30, %v7999_v4  ;;  %v8028_v51 = vor.u32 %v8027_v16, %v8023_v34 }
 0x66a   : > { %v8010_v35 = vsel %vm16606_vm11, %v8005_v42, %v8009_v2  ;;  %v8038_v26 = vrot.slane %v8036_v23, 4  ;;  %v8033_v39 = vrot.slane %v8031_v25, 5  ;;  %v8041_v28 = vrot.slane %v8039_v5, 5  ;;  %v18759_v2 = vld [vmem:[#allocation3 + $0xb4] sm:$0xf] }
 0x66b   : > { %v13236_v36 = vcombine.low %v8000_v19, %v8010_v35  ;;  %v8019_v41 = vrot.slane %v8018_v12, 4  ;;  %v8029_v1 = vrot.slane %v8028_v51, 4  ;;  %v8047_v50 = vrot.slane %v8045_v15, 5  ;;  %v18765_v42 = vld [vmem:[#allocation3 + $0xb8] sm:$0xf] }
 0x66c   : > { %v8049_v22 = vshrl.u32 %v18738_v8, 16  ;;  %v8060_v52 = vshrl.u32 %v18744_v7, 16  ;;  %v8042_v4 = vor.u32 %v8041_v28, %v8038_v26  ;;  %v8055_v54 = vshll.u32 %v18750_v47, 16  ;;  %v18767_v23 = vld [vmem:[#allocation3 + $0xb0] sm:$0x1] }
 0x66d   : > { %14673 = vmatmul.mubr.bf16.gmra.mrb[52].mxu1 %v13236_v36  ;;  %v8063_v43 = vshll.u32 %v18744_v7, 16  ;;  %v8069_v0 = vshll.u32 %v18752_v40, 16  ;;  %v8024_v20 = vsel %vm16606_vm11, %v8019_v41, %v8023_v34  ;;  %v8034_v59 = vsel %vm16606_vm11, %v8029_v1, %v8033_v39  ;;  %v18771_v26 = vld [vmem:[#allocation3 + $0xbc] sm:$0x1] }
 0x66e   : > { %v8051_v30 = vrot.slane %v8049_v22, 4  ;;  %v8062_v14 = vrot.slane %v8060_v52, 4  ;;  %v13237_v16 = vcombine.low %v8024_v20, %v8034_v59  ;;  %v8043_v25 = vrot.slane %v8042_v4, 4 }
 0x66f   : > { %v8065_v12 = vrot.slane %v8063_v43, 5  ;;  %v8071_v15 = vrot.slane %v8069_v0, 5  ;;  %v8073_v19 = vshrl.u32 %v18752_v40, 16  ;;  %v8084_v35 = vshrl.u32 %v18759_v2, 16 }
 0x670   : > { %v8052_v5 = vor.u32 %v8051_v30, %v8047_v50  ;;  %14676 = vmatprep.mubr.bf16.mxu1 %v13237_v16  ;;  %v8057_v34 = vrot.slane %v8055_v54, 5  ;;  %v8087_v36 = vshll.u32 %v18759_v2, 16  ;;  %v8093_v41 = vshll.u32 %v18765_v42, 16 }
 0x671   : > { %v8066_v51 = vor.u32 %v8065_v12, %v8062_v14  ;;  %v8075_v28 = vrot.slane %v8073_v19, 4  ;;  %v8079_v1 = vshll.u32 %v18767_v23, 16  ;;  %v8086_v22 = vrot.slane %v8084_v35, 4 }
 0x672   : > { %v8053_v39 = vrot.slane %v8052_v5, 4  ;;  %v8048_v52 = vsel %vm16606_vm11, %v8043_v25, %v8047_v50  ;;  %v8089_v4 = vrot.slane %v8087_v36, 5  ;;  %v8095_v43 = vrot.slane %v8093_v41, 5 }
 0x673   : > { %v8097_v0 = vshrl.u32 %v18765_v42, 16  ;;  %v8067_v20 = vrot.slane %v8066_v51, 4  ;;  %v8076_v59 = vor.u32 %v8075_v28, %v8071_v15  ;;  %v8103_v30 = vshll.u32 %v18771_v26, 16 }
 0x674   : > { %v8058_v54 = vsel %vm16606_vm11, %v8053_v39, %v8057_v34  ;;  %v8090_v16 = vor.u32 %v8089_v4, %v8086_v22  ;;  %v8081_v19 = vrot.slane %v8079_v1, 5  ;;  %v13256_v34 = vcombine.low %v18634_v11, %v18647_v37 }
 0x675   : > { %v13238_v14 = vcombine.low %v8048_v52, %v8058_v54  ;;  %v8099_v12 = vrot.slane %v8097_v0, 4  ;;  %v8077_v5 = vrot.slane %v8076_v59, 4  ;;  %v8072_v50 = vsel %vm16606_vm11, %v8067_v20, %v8071_v15  ;;  %v18808_v20 = vld [vmem:[#allocation3 + $0x4] sm:$0xf]  ;;  %v15970_v59 = vld [vmem:[#allocation3] sm:$0xf] }
 0x676   : > { %v8091_v35 = vrot.slane %v8090_v16, 4  ;;  %v8105_v36 = vrot.slane %v8103_v30, 5  ;;  %v13257_v28 = vcombine.low %v18649_v38, %v18658_v57  ;;  %v13258_v1 = vcombine.low %v18663_v62, %v18673_v17  ;;  %v18811_v16 = vld [vmem:[#allocation3 + $0x10] sm:$0xf]  ;;  %v8715_v52 = vld [vmem:[#allocation3 + $0x9c] sm:$0xe] }
 0x677   : > { %14677 = vmatmul.mubr.bf16.gmra.mrb[56].mxu1 %v13238_v14  ;;  %v8100_v53 = vor.u32 %v8099_v12, %v8095_v43  ;;  %v8082_v25 = vsel %vm16606_vm11, %v8077_v5, %v8081_v19  ;;  %v13259_v15 = vcombine.low %v18686_v33, %v18692_v3  ;;  %v13249_v30 = vcombine.low %v15970_v59, %v18808_v20  ;;  %v15971_v14 = vld [vmem:[#allocation3 + $0xc] sm:$0xf]  ;;  %v15834_v5 = vld [vmem:[#allocation7 + $0x88] sm:$0xff]   ;;  %v8709_v19 = vld [vmem:[#allocation3 + $0x54] sm:$0xe] }
 0x678   : > { %v13239_v51 = vcombine.low %v8072_v50, %v8082_v25  ;;  %v8096_v41 = vsel %vm16606_vm11, %v8091_v35, %v8095_v43  ;;  %v13250_v12 = vcombine.low %v15971_v14, %v18811_v16  ;;  %v15973_v35 = vld [vmem:[#allocation3 + $0x18] sm:$0xf]  ;;  %v18814_v50 = vld [vmem:[#allocation3 + $0x1c] sm:$0xf]  ;;  %v8804_v0 = vrot.slane %v18651_v49, 5 }
 0x679   : > { %v8101_v39 = vrot.slane %v8100_v53, 4  ;;  %v13251_v25 = vcombine.low %v15973_v35, %v18814_v50  ;;  %v8712_v43 = vld [vmem:[#allocation3 + $0x78] sm:$0xe]  ;;  %v8811_v53 = vrot.slane %v18661_v6, 5  ;;  %v20456_v11 = vcombine.low %v18700_v29, %v18709_v63 }
 0x67a   : > { %14680 = vmatprep.mubr.bf16.mxu1 %v13239_v51  ;;  %v8801_v51 = vrot.slane %v18647_v37, 5  ;;  %v13283_v6 = vrot.slane %v8712_v43, 9  ;;  %v20457_v37 = vcombine.low %v18712_v13, %v18723_v61  ;;  %v8752_v38 = vrot.slane %v18808_v20, 5  ;;  %v8704_v20 = vld [vmem:[#allocation3 + $0x18] sm:$0xe] }
 0x67b   : > { %v8106_v4 = vsel %vm16606_vm11, %v8101_v39, %v8105_v36  ;;  %v8710_v36 = vld [vmem:[#allocation3 + $0x60] sm:$0xe]  ;;  %v8808_v39 = vrot.slane %v18658_v57, 5  ;;  %v20459_v33 = vcombine.low %v18744_v7, %v18752_v40  ;;  %v8766_v13 = vrot.slane %v18814_v50, 5  ;;  %v15977_v7 = vld [vmem:[#allocation3 + $0x14] sm:$0x1] }
 0x67c   : > { %v13240_v54 = vcombine.low %v8096_v41, %v8106_v4  ;;  %v13280_v41 = vrot.slane %v8709_v19, 9  ;;  %v8711_v4 = vld [vmem:[#allocation3 + $0x6c] sm:$0xe]  ;;  %v8803_v14 = vrot.slane %v8801_v51, 4  ;;  %v13281_v35 = vrot.slane %v8710_v36, 9 }
 0x67d   : > { %v8810_v19 = vrot.slane %v8808_v39, 4  ;;  %v13282_v49 = vrot.slane %v8711_v4, 9  ;;  %v8815_v36 = vrot.slane %v18673_v17, 5  ;;  %v8702_v57 = vld [vmem:[#allocation3] sm:$0xe]  ;;  %v20458_v17 = vcombine.low %v18734_v45, %v18738_v8 }
 0x67e   : > { %v20460_v45 = vcombine.low %v18759_v2, %v18765_v42  ;;  %v15980_v2 = vld [vmem:[#allocation3 + $0x34] sm:$0xf] }
 0x67f   : > { %14681 = vmatmul.mubr.bf16.gmra.mrb[60].mxu1 %v13240_v54  ;;  %v15975_v54 = vld [vmem:[#allocation3 + $0x24] sm:$0xf]  ;;  %v18849_v4 = vsel %vm17067_vm1, %v13282_v49, %v8815_v36 }
 0x680   : > { %14700 = vmatprep.mubr.bf16.mxu1 %v13249_v30  ;;  %v13252_v59 = vcombine.low %v15975_v54, %v18531_v60  ;;  %v15837_v30 = vld [vmem:[#allocation7 + $0x90] sm:$0xff]   ;;  %v18831_v60 = vsel %vm17067_vm1, %v8803_v14, %v8804_v0  ;;  %v18835_v54 = vsel %vm17067_vm1, %v13281_v35, %v8808_v39  ;;  %v8713_v0 = vld [vmem:[#allocation3 + $0x84] sm:$0xe]  ;;  %v8818_v14 = vrot.slane %v18684_v27, 5  ;;  %v8714_v35 = vld [vmem:[#allocation3 + $0x90] sm:$0xe] }
 0x681   : > { %v13284_v49 = vrot.slane %v8713_v0, 9  ;;  %v8836_v27 = vrot.slane %v18723_v61, 5  ;;  %v15843_v0 = vld [vmem:[#allocation7 + $0xa0] sm:$0xff]  }
 0x687   : > { %14701 = vmatmul.mubr.bf16.vlgmr.msra.gmra.mrb[32].mxu1 %v13250_v12  ;;  %v13253_v12 = vcombine.low %v18539_v21, %v18544_v32  ;;  %v18842_v32 = vsel %vm17067_vm1, %v8810_v19, %v8811_v53  ;;  %v8825_v19 = vrot.slane %v18696_v24, 5  ;;  %v8829_v21 = vrot.slane %v18709_v63, 5 }
 0x688   : > { %14704 = vmatprep.mubr.bf16.mxu1 %v13251_v25  ;;  %14733 = vmatpush3.bf16.msra.mxu1 %v18584_v55  ;;  %v18826_v55 = vsel %vm17067_vm1, %v13280_v41, %v8801_v51  ;;  %v8822_v51 = vrot.slane %v18692_v3, 5  ;;  %v15840_v41 = vld [vmem:[#allocation7 + $0x98] sm:$0xff]   ;;  %v8759_v63 = vrot.slane %v18811_v16, 5  ;;  %v11227_v25 = vld [vmem:[#allocation3 + $0x60] sm:$0xf] }
 0x689   : > { %14734 = vmatprep.subr.bf16.mxu1 %v15834_v5 }
 0x68a   : > { %v18854_v53 = vsel %vm17067_vm1, %v13283_v6, %v8822_v51  ;;  %v8824_v43 = vrot.slane %v8822_v51, 4  ;;  %v8831_v51 = vrot.slane %v8829_v21, 4  ;;  %v18877_v6 = vsel %vm17067_vm1, %v13284_v49, %v8829_v21  ;;  %v8717_v49 = vld [vmem:[#allocation3 + $0xb4] sm:$0xe] }
 0x68b   : > { %v8850_v21 = vrot.slane %v18752_v40, 5  ;;  %v8762_v40 = vrot.slane %v15977_v7, 5 }
 0x68c   : > { %14735 = vmatpush3.bf16.msra.mxu1 %v15834_v5  ;;  %v8817_v5 = vrot.slane %v8815_v36, 4  ;;  %v8832_v36 = vrot.slane %v18716_v58, 5  ;;  %v18868_v24 = vsel %vm17067_vm1, %v8824_v43, %v8825_v19  ;;  %v13286_v19 = vrot.slane %v8715_v52, 9  ;;  %v15846_v43 = vld [vmem:[#allocation7 + $0xa8] sm:$0xff]  }
 0x68d   : > { %14736 = vmatprep.subr.bf16.mxu1 %v15837_v30  ;;  %v13255_v58 = vcombine.low %v18602_v18, %v18610_v46  ;;  %v8852_v22 = vrot.slane %v8850_v21, 4  ;;  %v8857_v52 = vrot.slane %v18765_v42, 5  ;;  %v13288_v18 = vrot.slane %v8717_v49, 9 }
 0x68e   : > { %v18860_v39 = vsel %vm17067_vm1, %v8817_v5, %v8818_v14  ;;  %v13254_v5 = vcombine.low %v18562_v56, %v18588_v9  ;;  %v8716_v14 = vld [vmem:[#allocation3 + $0xa8] sm:$0xe]  ;;  %v8843_v9 = vrot.slane %v18738_v8, 5  ;;  %v8703_v8 = vld [vmem:[#allocation3 + $0xc] sm:$0xe]  ;;  %v8780_v42 = vrot.slane %v15980_v2, 5 }
 0x68f   : > { %14705 = vmatmul.mubr.bf16.gmra.mrb[36].mxu1 %v13252_v59  ;;  %v13285_v59 = vrot.slane %v8714_v35, 9  ;;  %v18881_v35 = vsel %vm17067_vm1, %v8831_v51, %v8832_v36  ;;  %v8859_v36 = vrot.slane %v8857_v52, 4 }
 0x690   : > { %14708 = vmatprep.mubr.bf16.mxu1 %v13253_v12  ;;  %14737 = vmatpush3.bf16.msra.mxu1 %v15837_v30  ;;  %v8838_v12 = vrot.slane %v8836_v27, 4  ;;  %v8839_v30 = vrot.slane %v18728_v44, 5  ;;  %v8845_v51 = vrot.slane %v8843_v9, 4 }
 0x691   : > { %14738 = vmatprep.subr.bf16.mxu1 %v15840_v41  ;;  %v18885_v56 = vsel %vm17067_vm1, %v13285_v59, %v8836_v27  ;;  %v8846_v27 = vrot.slane %v18750_v47, 5  ;;  %v13287_v59 = vrot.slane %v8716_v14, 9  ;;  %v19125_v14 = vld [vmem:[#allocation3 + $0xa0] sm:$0xf] }
 0x692   : > { %v18892_v44 = vsel %vm17067_vm1, %v8838_v12, %v8839_v30  ;;  %v8853_v12 = vrot.slane %v18767_v23, 5 }
 0x693   : > { %v18908_v30 = vsel %vm17067_vm1, %v8845_v51, %v8846_v27  ;;  %v18912_v47 = vsel %vm17067_vm1, %v13287_v59, %v8850_v21  ;;  %v15849_v21 = vld [vmem:[#allocation7 + $0xb0] sm:$0xff]   ;;  %v13274_v51 = vrot.slane %v8703_v8, 9  ;;  %v13275_v59 = vrot.slane %v8704_v20, 9  ;;  %v8707_v20 = vld [vmem:[#allocation3 + $0x3c] sm:$0xe] }
 0x694   : > { %14739 = vmatpush3.bf16.msra.mxu1 %v15840_v41  ;;  %v18904_v41 = vsel %vm17067_vm1, %v13286_v19, %v8843_v9  ;;  %v18918_v23 = vsel %vm17067_vm1, %v8852_v22, %v8853_v12  ;;  %v8860_v9 = vrot.slane %v18771_v26, 5  ;;  %v15852_v26 = vld [vmem:[#allocation7 + $0xb8] sm:$0xff]   ;;  %v15979_v27 = vld [vmem:[#allocation3 + $0x28] sm:$0xf] }
 0x695   : > { %14740 = vmatprep.subr.bf16.mxu1 %v15843_v0  ;;  %v8773_v50 = vrot.slane %v15979_v27, 5  ;;  %v15857_v27 = vld [vmem:[#allocation7 + $0xe0] sm:$0xff]   ;;  %v10335_v19 = vld [vmem:[#allocation3 + $0x90] sm:$0xe] }
 0x696   : > { %v18929_v49 = vsel %vm17067_vm1, %v8859_v36, %v8860_v9  ;;  %v8767_v9 = vsel %vm17067_vm1, %v13275_v59, %v8766_v13 }
 0x697   : > { %14709 = vmatmul.mubr.bf16.gmra.mrb[40].mxu1 %v13254_v5  ;;  %v18925_v5 = vsel %vm17067_vm1, %v13288_v18, %v8857_v52  ;;  %v8760_v52 = vsel %vm17067_vm1, %v13274_v51, %v8759_v63 }
 0x698   : > { %14712 = vmatprep.mubr.bf16.mxu1 %v13255_v58  ;;  %14741 = vmatpush3.bf16.msra.mxu1 %v15843_v0  ;;  %v15853_v0 = vld [vmem:[#allocation7 + $0xc0] sm:$0xff]   ;;  %v15976_v58 = vld [vmem:[#allocation3 + $0x8] sm:$0x1] }
 0x699   : > { %14742 = vmatprep.subr.bf16.mxu1 %v15846_v43  ;;  %v8755_v62 = vrot.slane %v15976_v58, 5  ;;  %v15982_v58 = vld [vmem:[#allocation3 + $0x38] sm:$0x1] }
 0x69c   : > { %14743 = vmatpush3.bf16.msra.mxu1 %v15846_v43  ;;  %v15978_v43 = vld [vmem:[#allocation3 + $0x20] sm:$0x1] }
 0x69d   : > { %14744 = vmatprep.subr.bf16.mxu1 %v15849_v21  ;;  %v8769_v36 = vrot.slane %v15978_v43, 5 }
 0x69f   : > { %14713 = vmatmul.mubr.bf16.gmra.mrb[44].mxu1 %v13256_v34  ;;  %v13273_v34 = vrot.slane %v8702_v57, 9  ;;  %v15981_v57 = vld [vmem:[#allocation3 + $0x2c] sm:$0x1] }
 0x6a0   : > { %14716 = vmatprep.mubr.bf16.mxu1 %v13257_v28  ;;  %14745 = vmatpush3.bf16.msra.mxu1 %v15849_v21  ;;  %v8754_v28 = vrot.slane %v8752_v38, 4  ;;  %v15854_v21 = vld [vmem:[#allocation7 + $0xc8] sm:$0xff]  }
 0x6a1   : > { %14746 = vmatprep.subr.bf16.mxu1 %v15852_v26  ;;  %v8753_v3 = vsel %vm17067_vm1, %v13273_v34, %v8752_v38  ;;  %v8782_v38 = vrot.slane %v8780_v42, 4  ;;  %v8776_v34 = vrot.slane %v15981_v57, 5  ;;  %v18997_v57 = vld [vmem:[#allocation3 + $0x34] sm:$0xf] }
 0x6a2   : > { %v8756_v29 = vsel %vm17067_vm1, %v8754_v28, %v8755_v62  ;;  %v8706_v28 = vld [vmem:[#allocation3 + $0x30] sm:$0xe]  ;;  %v8783_v62 = vrot.slane %v15982_v58, 5 }
 0x6a3   : > { %v13289_v61 = vcombine.low %v8753_v3, %v8756_v29  ;;  %v15983_v29 = vld [vmem:[#allocation3 + $0x40] sm:$0xf] }
 0x6a4   : > { %14747 = vmatpush3.bf16.msra.mxu1 %v15852_v26 }
 0x6a5   : > { %14780 = vmatprep.subr.bf16.mxu1 %v15853_v0 }
 0x6a7   : > { %14717 = vmatmul.mubr.bf16.gmra.mrb[48].mxu1 %v13258_v1  ;;  %v8761_v1 = vrot.slane %v8759_v63, 4  ;;  %v8787_v63 = vrot.slane %v15983_v29, 5  ;;  %v10328_v29 = vld [vmem:[#allocation3 + $0x3c] sm:$0xe] }
 0x6a8   : > { %14720 = vmatprep.mubr.bf16.mxu1 %v13259_v15  ;;  %v8768_v15 = vrot.slane %v8766_v13, 4  ;;  %v13277_v13 = vrot.slane %v8706_v28, 9  ;;  %v19001_v28 = vld [vmem:[#allocation3 + $0x40] sm:$0xf] }
 0x6a9   : > { %v8763_v16 = vsel %vm17067_vm1, %v8761_v1, %v8762_v40  ;;  %v8794_v1 = vrot.slane %v18610_v46, 5  ;;  %v8789_v40 = vrot.slane %v8787_v63, 4  ;;  %v8797_v46 = vrot.slane %v18618_v10, 5  ;;  %v15858_v10 = vld [vmem:[#allocation7 + $0xe8] sm:$0xff]  }
 0x6aa   : > { %v8770_v12 = vsel %vm17067_vm1, %v8768_v15, %v8769_v36  ;;  %v13290_v18 = vcombine.low %v8760_v52, %v8763_v16  ;;  %v8781_v8 = vsel %vm17067_vm1, %v13277_v13, %v8780_v42  ;;  %v15856_v15 = vld [vmem:[#allocation7 + $0xd8] sm:$0xff]   ;;  %v15984_v36 = vld [vmem:[#allocation3 + $0x44] sm:$0x1]  ;;  %v8708_v16 = vld [vmem:[#allocation3 + $0x48] sm:$0xe] }
 0x6ab   : > { %v13291_v26 = vcombine.low %v8767_v9, %v8770_v12  ;;  %v8796_v43 = vrot.slane %v8794_v1, 4  ;;  %v8790_v51 = vrot.slane %v15984_v36, 5  ;;  %v13279_v12 = vrot.slane %v8708_v16, 9  ;;  %v19012_v13 = vld [vmem:[#allocation3 + $0x4c] sm:$0xf] }
 0x6ad   : > { %v8791_v59 = vsel %vm17067_vm1, %v8789_v40, %v8790_v51  ;;  %v8798_v2 = vsel %vm17067_vm1, %v8796_v43, %v8797_v46  ;;  %v13365_v40 = vrot.slane %v10328_v29, 9  ;;  %v19032_v43 = vld [vmem:[#allocation3 + $0x64] sm:$0xf]  ;;  %v10425_v46 = vrot.slane %v19012_v13, 5  ;;  %v10332_v29 = vld [vmem:[#allocation3 + $0x6c] sm:$0xe] }
 0x6af   : > { %14721 = vmatmul.mubr.bf16.gmra.mrb[52].mxu1 %v20456_v11  ;;  %v8775_v11 = vrot.slane %v8773_v50, 4 }
 0x6b0   : > { %14724 = vmatprep.mubr.bf16.mxu1 %v20457_v37  ;;  %v8705_v37 = vld [vmem:[#allocation3 + $0x24] sm:$0xe] }
 0x6b1   : > { %v8777_v3 = vsel %vm17067_vm1, %v8775_v11, %v8776_v34  ;;  %v18995_v11 = vld [vmem:[#allocation3 + $0x2c] sm:$0x1]  ;;  %v18999_v34 = vld [vmem:[#allocation3 + $0x38] sm:$0x1] }
 0x6b7   : > { %14725 = vmatmul.mubr.bf16.gmra.mrb[56].mxu1 %v20458_v17  ;;  %v15855_v17 = vld [vmem:[#allocation7 + $0xd0] sm:$0xff]  }
 0x6b8   : > { %14728 = vmatprep.mubr.bf16.mxu1 %v20459_v33  ;;  %v13276_v33 = vrot.slane %v8705_v37, 9  ;;  %v10326_v37 = vld [vmem:[#allocation3 + $0x24] sm:$0xe] }
 0x6bf   : > { %14729 = vmatmul.mubr.bf16.gmra.mrb[60].mxu1 %v20460_v45 }
 0x6c0   : > { %14748 = vmatprep.mubr.bf16.mxu1 %v13289_v61  ;;  %v8784_v61 = vsel %vm17067_vm1, %v8782_v38, %v8783_v62  ;;  %v15860_v38 = vld [vmem:[#allocation7 + $0xf8] sm:$0xff]  }
 0x6c1   : > { %v13293_v7 = vcombine.low %v8781_v8, %v8784_v61  ;;  %v10327_v62 = vld [vmem:[#allocation3 + $0x30] sm:$0xe]  ;;  %v19014_v61 = vld [vmem:[#allocation3 + $0x50] sm:$0x1]  ;;  %v10411_v8 = vrot.slane %v18997_v57, 5 }
 0x6c3   : > { %v10413_v51 = vrot.slane %v10411_v8, 4 }
 0x6c7   : > { %14749 = vmatmul.mubr.bf16.vlgmr.msra.gmra.mrb[32].mxu1 %v13290_v18  ;;  %v8795_v18 = vsel %vm17067_vm1, %v13279_v12, %v8794_v1 }
 0x6c8   : > { %14752 = vmatprep.mubr.bf16.mxu1 %v13291_v26  ;;  %14781 = vmatpush3.bf16.msra.mxu1 %v15853_v0  ;;  %v8774_v0 = vsel %vm17067_vm1, %v13276_v33, %v8773_v50  ;;  %v13278_v50 = vrot.slane %v8707_v20, 9  ;;  %v13295_v9 = vcombine.low %v8795_v18, %v8798_v2  ;;  %v18993_v26 = vld [vmem:[#allocation3 + $0x28] sm:$0xf]  ;;  %v19007_v33 = vld [vmem:[#allocation3 + $0x44] sm:$0x1]  ;;  %v10418_v20 = vrot.slane %v19001_v28, 5 }
 0x6c9   : > { %14782 = vmatprep.subr.bf16.mxu1 %v15854_v21  ;;  %v13292_v45 = vcombine.low %v8774_v0, %v8777_v3  ;;  %v10404_v58 = vrot.slane %v18993_v26, 5  ;;  %v13363_v3 = vrot.slane %v10326_v37, 9  ;;  %v10407_v0 = vrot.slane %v18995_v11, 5  ;;  %v10331_v37 = vld [vmem:[#allocation3 + $0x60] sm:$0xe] }
 0x6ca   : > { %v8788_v42 = vsel %vm17067_vm1, %v13278_v50, %v8787_v63  ;;  %v20462_v63 = vcombine.low %v18835_v54, %v18842_v32  ;;  %v10329_v54 = vld [vmem:[#allocation3 + $0x48] sm:$0xe]  ;;  %v19024_v32 = vld [vmem:[#allocation3 + $0x58] sm:$0xf]  ;;  %v10421_v16 = vrot.slane %v19007_v33, 5  ;;  %v19048_v2 = vsel %vm17067_vm1, %v13365_v40, %v10418_v20 }
 0x6cb   : > { %v13294_v52 = vcombine.low %v8788_v42, %v8791_v59  ;;  %v10406_v1 = vrot.slane %v10404_v58, 4  ;;  %v19038_v50 = vld [vmem:[#allocation3 + $0x5c] sm:$0x1]  ;;  %v19040_v59 = vld [vmem:[#allocation3 + $0x68] sm:$0x1]  ;;  %20466 = vst [vmem:[#allocation20_spill] sm:$0xff] %v19048_v2 }
 0x6cc   : > { %14783 = vmatpush3.bf16.msra.mxu1 %v15854_v21  ;;  %v15859_v21 = vld [vmem:[#allocation7 + $0xf0] sm:$0xff]   ;;  %v10420_v42 = vrot.slane %v10418_v20, 4  ;;  %v10435_v40 = vrot.slane %v19038_v50, 5  ;;  %v20472_v20 = vcombine.low %v18854_v53, %v18868_v24  ;;  %v10442_v53 = vrot.slane %v19040_v59, 5  ;;  %v19398_v2 = vld [vmem:[#allocation3 + $0x58] sm:$0xf] }
 0x6cd   : > { %14784 = vmatprep.subr.bf16.mxu1 %v15855_v17  ;;  %v13369_v24 = vrot.slane %v10332_v29, 9 }
 0x6cf   : > { %14753 = vmatmul.mubr.bf16.gmra.mrb[36].mxu1 %v13292_v45  ;;  %v19017_v45 = vld [vmem:[#allocation7 + $0x100] sm:$0xff]  }
 0x6d0   : > { %14756 = vmatprep.mubr.bf16.mxu1 %v13293_v7  ;;  %14785 = vmatpush3.bf16.msra.mxu1 %v15855_v17  ;;  %v20461_v17 = vcombine.low %v18826_v55, %v18831_v60  ;;  %v19021_v55 = vsel %vm17067_vm1, %v13363_v3, %v10404_v58  ;;  %v13364_v60 = vrot.slane %v10327_v62, 9  ;;  %v10414_v7 = vrot.slane %v18999_v34, 5 }
 0x6d1   : > { %14786 = vmatprep.subr.bf16.mxu1 %v15856_v15  ;;  %20463 = vst [vmem:[#allocation57_spill] sm:$0xff] %v19021_v55  ;;  %v19063_v62 = vsel %vm17067_vm1, %v10420_v42, %v10421_v16  ;;  %v13368_v16 = vrot.slane %v10331_v37, 9  ;;  %v19095_v42 = vld [vmem:[#allocation3 + $0x88] sm:$0xf] }
 0x6d2   : > { %v19044_v12 = vsel %vm17067_vm1, %v13364_v60, %v10411_v8  ;;  %v19053_v18 = vsel %vm17067_vm1, %v10413_v51, %v10414_v7  ;;  %20468 = vst [vmem:[#allocation29_spill] sm:$0xff] %v19063_v62  ;;  %v19074_v60 = vld [vmem:[#allocation3 + $0x7c] sm:$0xf]  ;;  %v10460_v22 = vrot.slane %v19095_v42, 5 }
 0x6d3   : > { %20465 = vst [vmem:[#allocation53_spill] sm:$0xff] %v19044_v12  ;;  %20467 = vst [vmem:[#allocation25_spill] sm:$0xff] %v19053_v18  ;;  %v15883_v18 = vld [vmem:[#allocation3 + $0xc0] sm:$0xff]  }
 0x6d4   : > { %14787 = vmatpush3.bf16.msra.mxu1 %v15856_v15  ;;  %v19028_v15 = vsel %vm17067_vm1, %v10406_v1, %v10407_v0  ;;  %v20470_v1 = vcombine.low %v18849_v4, %v18860_v39  ;;  %v19072_v0 = vld [vmem:[#allocation3 + $0x74] sm:$0x1]  ;;  %v19086_v39 = vld [vmem:[#allocation3 + $0x80] sm:$0x1]  ;;  %v9605_v4 = vld [vmem:[#allocation3 + $0x98] sm:$0x1] }
 0x6d5   : > { %14788 = vmatprep.subr.bf16.mxu1 %v15857_v27  ;;  %20464 = vst [vmem:[#allocation55_spill] sm:$0xff] %v19028_v15  ;;  %v10456_v36 = vrot.slane %v19086_v39, 5  ;;  %v11969_v12 = vld [vmem:[#allocation3 + $0x60] sm:$0xe]  ;;  %v11231_v15 = vld [vmem:[#allocation3 + $0x70] sm:$0xf] }
 0x6d7   : > { %14757 = vmatmul.mubr.bf16.gmra.mrb[40].mxu1 %v13294_v52  ;;  %v13366_v52 = vrot.slane %v10329_v54, 9 }
 0x6d8   : > { %14760 = vmatprep.mubr.bf16.mxu1 %v13295_v9  ;;  %14789 = vmatpush3.bf16.msra.mxu1 %v15857_v27  ;;  %v10330_v27 = vld [vmem:[#allocation3 + $0x54] sm:$0xe]  ;;  %v10428_v9 = vrot.slane %v19014_v61, 5 }
 0x6d9   : > { %14790 = vmatprep.subr.bf16.mxu1 %v15858_v10  ;;  %v13367_v3 = vrot.slane %v10330_v27, 9  ;;  %v10334_v27 = vld [vmem:[#allocation3 + $0x84] sm:$0xe] }
 0x6dc   : > { %14791 = vmatpush3.bf16.msra.mxu1 %v15858_v10  ;;  %v10427_v10 = vrot.slane %v10425_v46, 4 }
 0x6dd   : > { %14792 = vmatprep.subr.bf16.mxu1 %v15859_v21 }
 0x6de   : > { %v19080_v54 = vsel %vm17067_vm1, %v10427_v10, %v10428_v9  ;;  %v19103_v9 = vld [vmem:[#allocation3 + $0x94] sm:$0xf] }
 0x6df   : > { %14761 = vmatmul.mubr.bf16.gmra.mrb[44].mxu1 %v20461_v17  ;;  %v19067_v17 = vsel %vm17067_vm1, %v13366_v52, %v10425_v46  ;;  %20471 = vst [vmem:[#allocation31_spill] sm:$0xff] %v19080_v54  ;;  %v10439_v46 = vrot.slane %v19032_v43, 5 }
 0x6e0   : > { %14764 = vmatprep.mubr.bf16.mxu1 %v20462_v63  ;;  %14793 = vmatpush3.bf16.msra.mxu1 %v15859_v21  ;;  %v10432_v21 = vrot.slane %v19024_v32, 5  ;;  %20469 = vst [vmem:[#allocation30_spill] sm:$0xff] %v19067_v17  ;;  %v10333_v63 = vld [vmem:[#allocation3 + $0x78] sm:$0xe] }
 0x6e1   : > { %14794 = vmatprep.subr.bf16.mxu1 %v15860_v38  ;;  %v10441_v37 = vrot.slane %v10439_v46, 4  ;;  %v13370_v8 = vrot.slane %v10333_v63, 9 }
 0x6e2   : > { %v10434_v7 = vrot.slane %v10432_v21, 4  ;;  %v19092_v51 = vsel %vm17067_vm1, %v13367_v3, %v10432_v21  ;;  %v10449_v3 = vrot.slane %v19072_v0, 5 }
 0x6e3   : > { %20473 = vst [vmem:[#allocation32_spill] sm:$0xff] %v19092_v51  ;;  %v19121_v21 = vsel %vm17067_vm1, %v10441_v37, %v10442_v53  ;;  %v13371_v53 = vrot.slane %v10334_v27, 9  ;;  %v9610_v37 = vld [vmem:[#allocation3 + $0xac] sm:$0xf]  ;;  %v10474_v27 = vrot.slane %v19125_v14, 5 }
 0x6e4   : > { %14795 = vmatpush3.bf16.msra.mxu1 %v15860_v38  ;;  %v19057_v38 = vld [vmem:[#allocation3 + $0x70] sm:$0xf]  ;;  %v19099_v52 = vsel %vm17067_vm1, %v10434_v7, %v10435_v40  ;;  %v19113_v7 = vsel %vm17067_vm1, %v13368_v16, %v10439_v46  ;;  %20477 = vst [vmem:[#allocation35_spill] sm:$0xff] %v19121_v21  ;;  %v10462_v16 = vrot.slane %v10460_v22, 4 }
 0x6e5   : > { %14828 = vmatprep.subr.bf16.mxu1 %v19017_v45  ;;  %20474 = vst [vmem:[#allocation33_spill] sm:$0xff] %v19099_v52  ;;  %v10446_v10 = vrot.slane %v19057_v38, 5  ;;  %20475 = vst [vmem:[#allocation26_spill] sm:$0xff] %v19113_v7  ;;  %v10467_v52 = vrot.slane %v19103_v9, 5 }
 0x6e7   : > { %14765 = vmatmul.mubr.bf16.gmra.mrb[48].mxu1 %v20470_v1  ;;  %v10453_v1 = vrot.slane %v19074_v60, 5  ;;  %v19117_v29 = vsel %vm17067_vm1, %v13369_v24, %v10446_v10  ;;  %v10448_v40 = vrot.slane %v10446_v10, 4  ;;  %v10336_v24 = vld [vmem:[#allocation3 + $0x9c] sm:$0xe]  ;;  %v9608_v10 = vld [vmem:[#allocation3 + $0xa4] sm:$0x1] }
 0x6e8   : > { %14768 = vmatprep.mubr.bf16.mxu1 %v20472_v20  ;;  %v19109_v20 = vld [vmem:[#allocation3 + $0x8c] sm:$0x1]  ;;  %20476 = vst [vmem:[#allocation34_spill] sm:$0xff] %v19117_v29  ;;  %v9614_v29 = vld [vmem:[#allocation3 + $0xbc] sm:$0x1] }
 0x6e9   : > { %v10455_v58 = vrot.slane %v10453_v1, 4  ;;  %v19131_v46 = vsel %vm17067_vm1, %v10448_v40, %v10449_v3  ;;  %v19135_v63 = vsel %vm17067_vm1, %v13370_v8, %v10453_v1  ;;  %v10463_v21 = vrot.slane %v19109_v20, 5  ;;  %v9611_v8 = vld [vmem:[#allocation3 + $0xb0] sm:$0x1] }
 0x6ea   : > { %20478 = vst [vmem:[#allocation36_spill] sm:$0xff] %v19131_v46  ;;  %20479 = vst [vmem:[#allocation37_spill] sm:$0xff] %v19135_v63  ;;  %v20481_v3 = vcombine.low %v18877_v6, %v18881_v35  ;;  %v19151_v1 = vsel %vm17067_vm1, %v13371_v53, %v10460_v22  ;;  %v13372_v40 = vrot.slane %v10335_v19, 9  ;;  %v19157_v46 = vld [vmem:[#allocation3 + $0xb8] sm:$0xf]  ;;  %v10470_v35 = vrot.slane %v9605_v4, 5 }
 0x6eb   : > { %v19141_v51 = vsel %vm17067_vm1, %v10455_v58, %v10456_v36  ;;  %20482 = vst [vmem:[#allocation39_spill] sm:$0xff] %v19151_v1  ;;  %v10337_v36 = vld [vmem:[#allocation3 + $0xa8] sm:$0xe]  ;;  %v20483_v58 = vcombine.low %v18885_v56, %v18892_v44  ;;  %v19161_v6 = vsel %vm17067_vm1, %v10462_v16, %v10463_v21  ;;  %v10469_v22 = vrot.slane %v10467_v52, 4  ;;  %v10338_v63 = vld [vmem:[#allocation3 + $0xb4] sm:$0xe] }
 0x6ec   : > { %20480 = vst [vmem:[#allocation38_spill] sm:$0xff] %v19141_v51  ;;  %20484 = vst [vmem:[#allocation40_spill] sm:$0xff] %v19161_v6  ;;  %v10477_v53 = vrot.slane %v9608_v10, 5  ;;  %v10481_v51 = vrot.slane %v9610_v37, 5  ;;  %v19168_v56 = vsel %vm17067_vm1, %v13372_v40, %v10467_v52  ;;  %v10476_v4 = vrot.slane %v10474_v27, 4 }
 0x6ed   : > { %20485 = vst [vmem:[#allocation41_spill] sm:$0xff] %v19168_v56  ;;  %v13374_v21 = vrot.slane %v10337_v36, 9  ;;  %v9616_v16 = vld [vmem:[#allocation3 + $0xc4] sm:$0xf]  ;;  %v10484_v10 = vrot.slane %v9611_v8, 5  ;;  %v10488_v37 = vrot.slane %v19157_v46, 5 }
 0x6ee   : > { %v19183_v52 = vsel %vm17067_vm1, %v10476_v4, %v10477_v53  ;;  %v13375_v40 = vrot.slane %v10338_v63, 9  ;;  %v9617_v36 = vld [vmem:[#allocation3 + $0xc8] sm:$0x1]  ;;  %v10339_v19 = vld [vmem:[#allocation3 + $0xc0] sm:$0xe]  ;;  %v10495_v4 = vrot.slane %v9616_v16, 5 }
 0x6ef   : > { %14769 = vmatmul.mubr.bf16.gmra.mrb[52].mxu1 %v20481_v3  ;;  %v13373_v3 = vrot.slane %v10336_v24, 9  ;;  %v19176_v24 = vsel %vm17067_vm1, %v10469_v22, %v10470_v35  ;;  %20488 = vst [vmem:[#allocation42_spill] sm:$0xff] %v19183_v52  ;;  %v10491_v22 = vrot.slane %v9614_v29, 5  ;;  %v20494_v29 = vcombine.low %v18912_v47, %v18918_v23  ;;  %v15862_v23 = vld [vmem:[#allocation3 + $0x18] sm:$0xff]   ;;  %v9576_v35 = vld [vmem:[#allocation3 + $0x24] sm:$0xf] }
 0x6f0   : > { %14772 = vmatprep.mubr.bf16.mxu1 %v20483_v58  ;;  %20487 = vst [vmem:[#allocation28_spill] sm:$0xff] %v19176_v24  ;;  %v10483_v58 = vrot.slane %v10481_v51, 4  ;;  %v19202_v63 = vsel %vm17067_vm1, %v13375_v40, %v10488_v37  ;;  %v13376_v16 = vrot.slane %v10339_v19, 9  ;;  %v10498_v53 = vrot.slane %v9617_v36, 5  ;;  %v15861_v40 = vld [vmem:[#allocation3 + $0xc] sm:$0xff]   ;;  %v15866_v19 = vld [vmem:[#allocation7 + $0x108] sm:$0xff]  }
 0x6f1   : > { %v19172_v44 = vsel %vm17067_vm1, %v13373_v3, %v10474_v27  ;;  %v19187_v27 = vsel %vm17067_vm1, %v13374_v21, %v10481_v51  ;;  %v10490_v3 = vrot.slane %v10488_v37, 4  ;;  %v20491_v51 = vcombine.low %v18904_v41, %v18908_v30  ;;  %20492 = vst [vmem:[#allocation45_spill] sm:$0xff] %v19202_v63  ;;  %v15864_v36 = vld [vmem:[#allocation3 + $0x24] sm:$0xff]   ;;  %v9579_v24 = vld [vmem:[#allocation3 + $0x30] sm:$0xf] }
 0x6f2   : > { %20486 = vst [vmem:[#allocation27_spill] sm:$0xff] %v19172_v44  ;;  %20489 = vst [vmem:[#allocation43_spill] sm:$0xff] %v19187_v27  ;;  %v19193_v8 = vsel %vm17067_vm1, %v10483_v58, %v10484_v10  ;;  %v10497_v10 = vrot.slane %v10495_v4, 4  ;;  %v19215_v41 = vsel %vm17067_vm1, %v13376_v16, %v10495_v4  ;;  %v20497_v47 = vcombine.low %v18925_v5, %v18929_v49  ;;  %v15865_v16 = vld [vmem:[#allocation3 + $0x30] sm:$0xff]   ;;  %v15867_v49 = vld [vmem:[#allocation3 + $0x3c] sm:$0xff]  }
 0x6f3   : > { %20490 = vst [vmem:[#allocation44_spill] sm:$0xff] %v19193_v8  ;;  %v19206_v21 = vsel %vm17067_vm1, %v10490_v3, %v10491_v22  ;;  %20495 = vst [vmem:[#allocation47_spill] sm:$0xff] %v19215_v41  ;;  %v15869_v3 = vld [vmem:[#allocation7 + $0x110] sm:$0xff]   ;;  %v9571_v22 = vld [vmem:[#allocation3 + $0x10] sm:$0xf] }
 0x6f4   : > { %20493 = vst [vmem:[#allocation46_spill] sm:$0xff] %v19206_v21  ;;  %v19219_v30 = vsel %vm17067_vm1, %v10497_v10, %v10498_v53  ;;  %v9570_v53 = vld [vmem:[#allocation3 + $0xc] sm:$0xf]  ;;  %v9628_v4 = vshll.u32 %v9571_v22, 16  ;;  %v15872_v5 = vld [vmem:[#allocation7 + $0x118] sm:$0xff]  }
 0x6f5   : > { %20496 = vst [vmem:[#allocation48_spill] sm:$0xff] %v19219_v30  ;;  %v9574_v10 = vld [vmem:[#allocation3 + $0x1c] sm:$0xf]  ;;  %v19229_v30 = vld [vmem:[#allocation3 + $0x14] sm:$0x1] }
 0x6f6   : > { %v9652_v58 = vshll.u32 %v9574_v10, 16  ;;  %v15870_v27 = vld [vmem:[#allocation3 + $0x54] sm:$0xff]  }
 0x6f7   : > { %14773 = vmatmul.mubr.bf16.gmra.mrb[56].mxu1 %v20491_v51  ;;  %v9632_v51 = vshrl.u32 %v9571_v22, 16  ;;  %v9656_v22 = vshrl.u32 %v9574_v10, 16  ;;  %v9638_v10 = vshll.u32 %v19229_v30, 16 }
 0x6f8   : > { %14776 = vmatprep.mubr.bf16.mxu1 %v20494_v29  ;;  %v9573_v29 = vld [vmem:[#allocation3 + $0x18] sm:$0xf] }
 0x6f9   : > { %v9634_v37 = vrot.slane %v9632_v51, 4  ;;  %v19232_v51 = vrot.slane %v9652_v58, 5  ;;  %v9658_v8 = vrot.slane %v9656_v22, 4  ;;  %v9680_v22 = vshrl.u32 %v18993_v26, 16 }
 0x6fa   : > { %v9640_v44 = vrot.slane %v9638_v10, 5  ;;  %v9694_v10 = vshll.u32 %v9579_v24, 16 }
 0x6fb   : > { %v9659_v58 = vor.u32 %v9658_v8, %v19232_v51  ;;  %v15884_v8 = vld [vmem:[#allocation7 + $0x138] sm:$0xff]  }
 0x6ff   : > { %14777 = vmatmul.mubr.bf16.gmra.mrb[60].mxu1 %v20497_v47  ;;  %v9622_v47 = vshll.u32 %v9570_v53, 16 }
 0x700   : > { %14796 = vmatprep.mubr.bf16.mxu1 %v15861_v40  ;;  %v9619_v40 = vshrl.u32 %v9570_v53, 16 }
 0x701   : > { %v9624_v21 = vrot.slane %v9622_v47, 5 }
 0x702   : > { %v9621_v41 = vrot.slane %v9619_v40, 4 }
 0x704   : > { %v9625_v52 = vor.u32 %v9624_v21, %v9621_v41 }
 0x707   : > { %14797 = vmatmul.mubr.bf16.vlgmr.msra.gmra.mrb[32].mxu1 %v15862_v23  ;;  %v9643_v23 = vshrl.u32 %v9573_v29, 16 }
 0x708   : > { %14800 = vmatprep.mubr.bf16.mxu1 %v15864_v36  ;;  %14829 = vmatpush3.bf16.msra.mxu1 %v19017_v45  ;;  %v9646_v36 = vshll.u32 %v9573_v29, 16  ;;  %v19227_v45 = vrot.slane %v9628_v4, 5  ;;  %v9667_v29 = vshrl.u32 %v9576_v35, 16  ;;  %v15878_v4 = vld [vmem:[#allocation7 + $0x128] sm:$0xff]  }
 0x709   : > { %14830 = vmatprep.subr.bf16.mxu1 %v15866_v19  ;;  %v9645_v63 = vrot.slane %v9643_v23, 4 }
 0x70a   : > { %v9635_v53 = vor.u32 %v9634_v37, %v19227_v45  ;;  %v9669_v37 = vrot.slane %v9667_v29, 4  ;;  %v9660_v29 = vrot.slane %v9659_v58, 4 }
 0x70c   : > { %14831 = vmatpush3.bf16.msra.mxu1 %v15866_v19  ;;  %v15875_v19 = vld [vmem:[#allocation7 + $0x120] sm:$0xff]   ;;  %v9636_v47 = vrot.slane %v9635_v53, 4  ;;  %v15871_v53 = vld [vmem:[#allocation3 + $0x60] sm:$0xff]  }
 0x70d   : > { %14832 = vmatprep.subr.bf16.mxu1 %v15869_v3 }
 0x70f   : > { %14801 = vmatmul.mubr.bf16.gmra.mrb[36].mxu1 %v15865_v16  ;;  %v9648_v16 = vrot.slane %v9646_v36, 5  ;;  %v15881_v36 = vld [vmem:[#allocation7 + $0x130] sm:$0xff]  }
 0x710   : > { %14804 = vmatprep.mubr.bf16.mxu1 %v15867_v49  ;;  %14833 = vmatpush3.bf16.msra.mxu1 %v15869_v3  ;;  %v9670_v49 = vshll.u32 %v9576_v35, 16  ;;  %v15868_v3 = vld [vmem:[#allocation3 + $0x48] sm:$0xff]   ;;  %v9676_v35 = vshll.u32 %v18993_v26, 16  ;;  %v9682_v26 = vrot.slane %v9680_v22, 4 }
 0x711   : > { %14834 = vmatprep.subr.bf16.mxu1 %v15872_v5  ;;  %v9649_v40 = vor.u32 %v9648_v16, %v9645_v63  ;;  %v9641_v63 = vsel %vm16606_vm11, %v9636_v47, %v9640_v44  ;;  %v9686_v16 = vshll.u32 %v18995_v11, 16  ;;  %v9724_v11 = vshll.u32 %v19001_v28, 16  ;;  %v9585_v22 = vld [vmem:[#allocation3 + $0x48] sm:$0xf] }
 0x712   : > { %v9672_v23 = vrot.slane %v9670_v49, 5  ;;  %v9691_v49 = vshrl.u32 %v9579_v24, 16 }
 0x713   : > { %v9650_v21 = vrot.slane %v9649_v40, 4  ;;  %v9700_v40 = vshll.u32 %v18997_v57, 16  ;;  %v19260_v58 = vrot.slane %v9686_v16, 5  ;;  %v9739_v16 = vshrl.u32 %v9585_v22, 16 }
 0x714   : > { %14835 = vmatpush3.bf16.msra.mxu1 %v15872_v5  ;;  %v19235_v5 = vld [vmem:[#allocation3 + $0x20] sm:$0x1]  ;;  %v9673_v41 = vor.u32 %v9672_v23, %v9669_v37  ;;  %v9582_v37 = vld [vmem:[#allocation3 + $0x3c] sm:$0xf]  ;;  %v9728_v23 = vshrl.u32 %v19001_v28, 16 }
 0x715   : > { %14836 = vmatprep.subr.bf16.mxu1 %v15875_v19  ;;  %v9655_v24 = vsel %vm16606_vm11, %v9650_v21, %v19232_v51  ;;  %v9718_v51 = vshll.u32 %v9582_v37, 16  ;;  %v19269_v21 = vrot.slane %v9724_v11, 5  ;;  %v15876_v11 = vld [vmem:[#allocation3 + $0x84] sm:$0xff]   ;;  %v9741_v6 = vrot.slane %v9739_v16, 4 }
 0x717   : > { %14805 = vmatmul.mubr.bf16.gmra.mrb[40].mxu1 %v15868_v3  ;;  %v9626_v3 = vrot.slane %v9625_v52, 4  ;;  %v15873_v52 = vld [vmem:[#allocation3 + $0x6c] sm:$0xff]  }
 0x718   : > { %14808 = vmatprep.mubr.bf16.mxu1 %v15870_v27  ;;  %14837 = vmatpush3.bf16.msra.mxu1 %v15875_v19  ;;  %v9662_v27 = vshll.u32 %v19235_v5, 16  ;;  %v19243_v19 = vrot.slane %v9676_v35, 5 }
 0x719   : > { %14838 = vmatprep.subr.bf16.mxu1 %v15878_v4  ;;  %v9631_v44 = vsel %vm16606_vm11, %v9626_v3, %v19227_v45  ;;  %v19264_v3 = vld [vmem:[#allocation7 + $0x140] sm:$0xff]  }
 0x71a   : > { %v9664_v47 = vrot.slane %v9662_v27, 5  ;;  %v19253_v35 = vcombine.low %v9631_v44, %v9641_v63  ;;  %v9683_v28 = vor.u32 %v9682_v26, %v19243_v19  ;;  %v9696_v27 = vrot.slane %v9694_v10, 5  ;;  %v9588_v10 = vld [vmem:[#allocation3 + $0x54] sm:$0xf] }
 0x71b   : > { %v19267_v63 = vrot.slane %v9700_v40, 5  ;;  %v9742_v44 = vshll.u32 %v9585_v22, 16  ;;  %v9748_v26 = vshll.u32 %v19012_v13, 16  ;;  %v15874_v40 = vld [vmem:[#allocation3 + $0x78] sm:$0xff]   ;;  %v9591_v22 = vld [vmem:[#allocation3 + $0x60] sm:$0xf] }
 0x71c   : > { %14839 = vmatpush3.bf16.msra.mxu1 %v15878_v4  ;;  %v9704_v4 = vshrl.u32 %v18997_v57, 16  ;;  %v19258_v57 = vrot.slane %v9673_v41, 4  ;;  %v9665_v45 = vsel %vm16606_vm11, %v9660_v29, %v9664_v47  ;;  %v9730_v41 = vrot.slane %v9728_v23, 4 }
 0x71d   : > { %14840 = vmatprep.subr.bf16.mxu1 %v15881_v36  ;;  %v19271_v56 = vcombine.low %v9655_v24, %v9665_v45  ;;  %v9710_v47 = vshll.u32 %v18999_v34, 16  ;;  %v9734_v45 = vshll.u32 %v19007_v33, 16  ;;  %v19286_v34 = vrot.slane %v9748_v26, 5 }
 0x71e   : > { %v9679_v29 = vsel %vm16606_vm11, %v19258_v57, %v19243_v19  ;;  %v9720_v57 = vrot.slane %v9718_v51, 5  ;;  %v9763_v7 = vshrl.u32 %v9588_v10, 16 }
 0x71f   : > { %14809 = vmatmul.mubr.bf16.gmra.mrb[44].mxu1 %v15871_v53  ;;  %v9706_v53 = vrot.slane %v9704_v4, 4  ;;  %v9684_v4 = vrot.slane %v9683_v28, 4  ;;  %v9744_v28 = vrot.slane %v9742_v44, 5 }
 0x720   : > { %14812 = vmatprep.mubr.bf16.mxu1 %v15873_v52  ;;  %14841 = vmatpush3.bf16.msra.mxu1 %v15881_v36  ;;  %v9693_v36 = vrot.slane %v9691_v49, 4  ;;  %v9715_v52 = vshrl.u32 %v9582_v37, 16  ;;  %v9752_v49 = vshrl.u32 %v19012_v13, 16  ;;  %v9776_v37 = vshrl.u32 %v19024_v32, 16 }
 0x721   : > { %14842 = vmatprep.subr.bf16.mxu1 %v15884_v8  ;;  %v9707_v24 = vor.u32 %v9706_v53, %v19267_v63  ;;  %v9731_v13 = vor.u32 %v9730_v41, %v19269_v21  ;;  %v9790_v53 = vshll.u32 %v9591_v22, 16  ;;  %v9712_v41 = vrot.slane %v9710_v47, 5 }
 0x722   : > { %v9697_v23 = vor.u32 %v9696_v27, %v9693_v36  ;;  %v9717_v19 = vrot.slane %v9715_v52, 4  ;;  %v9754_v1 = vrot.slane %v9752_v49, 4  ;;  %v9778_v36 = vrot.slane %v9776_v37, 4  ;;  %v15877_v37 = vld [vmem:[#allocation3 + $0x90] sm:$0xff]  }
 0x723   : > { %v9787_v27 = vshrl.u32 %v9591_v22, 16  ;;  %v9689_v52 = vsel %vm16606_vm11, %v9684_v4, %v19260_v58  ;;  %v9708_v16 = vrot.slane %v9707_v24, 4  ;;  %v9732_v44 = vrot.slane %v9731_v13, 4  ;;  %v15879_v4 = vld [vmem:[#allocation3 + $0x9c] sm:$0xff]  }
 0x724   : > { %14843 = vmatpush3.bf16.msra.mxu1 %v15884_v8  ;;  %v9772_v8 = vshll.u32 %v19024_v32, 16  ;;  %v9766_v32 = vshll.u32 %v9588_v10, 16  ;;  %v9698_v51 = vrot.slane %v9697_v23, 4  ;;  %v9721_v33 = vor.u32 %v9720_v57, %v9717_v19 }
 0x725   : > { %14876 = vmatprep.subr.bf16.mxu1 %v19264_v3  ;;  %v9745_v26 = vor.u32 %v9744_v28, %v9741_v6  ;;  %v9755_v49 = vor.u32 %v9754_v1, %v19286_v34  ;;  %v9789_v17 = vrot.slane %v9787_v27, 4  ;;  %v9792_v62 = vrot.slane %v9790_v53, 5  ;;  %v9594_v1 = vld [vmem:[#allocation3 + $0x6c] sm:$0xf] }
 0x726   : > { %v19288_v54 = vrot.slane %v9772_v8, 5  ;;  %v9768_v10 = vrot.slane %v9766_v32, 5  ;;  %v9796_v8 = vshll.u32 %v19032_v43, 16  ;;  %v9800_v58 = vshrl.u32 %v19032_v43, 16 }
 0x727   : > { %14813 = vmatmul.mubr.bf16.gmra.mrb[48].mxu1 %v15874_v40  ;;  %v9736_v40 = vrot.slane %v9734_v45, 5  ;;  %v19297_v47 = vcombine.low %v9679_v29, %v9689_v52  ;;  %v9703_v6 = vsel %vm16606_vm11, %v9698_v51, %v19267_v63  ;;  %v9722_v23 = vrot.slane %v9721_v33, 4  ;;  %v19326_v51 = vld [vmem:[#allocation3 + $0x78] sm:$0xf] }
 0x728   : > { %14816 = vmatprep.mubr.bf16.mxu1 %v15876_v11  ;;  %v9765_v11 = vrot.slane %v9763_v7, 4  ;;  %v9779_v22 = vor.u32 %v9778_v36, %v19288_v54  ;;  %v9758_v7 = vshll.u32 %v19014_v61, 16  ;;  %v9713_v24 = vsel %vm16606_vm11, %v9708_v16, %v9712_v41  ;;  %v19328_v41 = vld [vmem:[#allocation3 + $0x1c] sm:$0xf]  ;;  %v19336_v16 = vld [vmem:[#allocation3 + $0x20] sm:$0x1] }
 0x729   : > { %v9737_v19 = vsel %vm16606_vm11, %v9732_v44, %v9736_v40  ;;  %v19307_v57 = vrot.slane %v9745_v26, 4  ;;  %v9782_v43 = vshll.u32 %v19038_v50, 16  ;;  %v19310_v29 = vrot.slane %v9755_v49, 4  ;;  %20498 = vst [vmem:[#allocation49_spill] sm:$0xff] %v19328_v41  ;;  %20499 = vst [vmem:[#allocation50_spill] sm:$0xff] %v19336_v16 }
 0x72a   : > { %v9769_v13 = vor.u32 %v9768_v10, %v9765_v11  ;;  %v19312_v63 = vrot.slane %v9796_v8, 5  ;;  %v9806_v61 = vshll.u32 %v19040_v59, 16  ;;  %v19315_v45 = vrot.slane %v9779_v22, 4  ;;  %v19350_v49 = vld [vmem:[#allocation3 + $0x28] sm:$0xf]  ;;  %v15882_v10 = vld [vmem:[#allocation3 + $0xb4] sm:$0xff]  }
 0x72b   : > { %v9793_v28 = vor.u32 %v9792_v62, %v9789_v17  ;;  %v19317_v32 = vrot.slane %v9800_v58, 4  ;;  %v9811_v36 = vshrl.u32 %v9594_v1, 16  ;;  %v19319_v27 = vcombine.low %v9703_v6, %v9713_v24  ;;  %20500 = vst [vmem:[#allocation52_spill] sm:$0xff] %v19350_v49  ;;  %v11963_v11 = vld [vmem:[#allocation3 + $0x18] sm:$0xe] }
 0x72c   : > { %v9727_v50 = vsel %vm16606_vm11, %v9722_v23, %v19269_v21  ;;  %v19324_v53 = vrot.slane %v9758_v7, 5  ;;  %v9814_v52 = vshll.u32 %v9594_v1, 16  ;;  %v19332_v33 = vrot.slane %v9782_v43, 5  ;;  %v19364_v6 = vld [vmem:[#allocation3 + $0x34] sm:$0xf] }
 0x72d   : > { %v19330_v59 = vcombine.low %v9727_v50, %v9737_v19  ;;  %v9820_v62 = vshll.u32 %v19057_v38, 16  ;;  %v9824_v17 = vshrl.u32 %v19057_v38, 16  ;;  %v19346_v40 = vrot.slane %v9769_v13, 4  ;;  %v15880_v38 = vld [vmem:[#allocation3 + $0xa8] sm:$0xff]   ;;  %20502 = vst [vmem:[#allocation62_spill] sm:$0xff] %v19364_v6 }
 0x72e   : > { %v19348_v26 = vrot.slane %v9806_v61, 5  ;;  %v19360_v58 = vrot.slane %v9811_v36, 4  ;;  %v19366_v23 = vrot.slane %v9814_v52, 5  ;;  %v19370_v24 = vld [vmem:[#allocation3 + $0x38] sm:$0x1]  ;;  %v12029_v19 = vrot.slane %v19328_v41, 5 }
 0x72f   : > { %14817 = vmatmul.mubr.bf16.gmra.mrb[52].mxu1 %v15877_v37  ;;  %v19356_v37 = vrot.slane %v9793_v28, 4  ;;  %20503 = vst [vmem:[#allocation66_spill] sm:$0xff] %v19370_v24  ;;  %v11964_v43 = vld [vmem:[#allocation3 + $0x24] sm:$0xe]  ;;  %v19373_v13 = vrot.slane %v9820_v62, 5  ;;  %v19375_v61 = vrot.slane %v9824_v17, 4 }
 0x730   : > { %14820 = vmatprep.mubr.bf16.mxu1 %v15879_v4  ;;  %v19362_v4 = vld [vmem:[#allocation3 + $0x2c] sm:$0x1]  ;;  %v19378_v36 = vld [vmem:[#allocation3 + $0x40] sm:$0xf]  ;;  %v13449_v50 = vrot.slane %v11963_v11, 9  ;;  %v12031_v21 = vrot.slane %v12029_v19, 4 }
 0x731   : > { %20501 = vst [vmem:[#allocation51_spill] sm:$0xff] %v19362_v4  ;;  %20504 = vst [vmem:[#allocation21_spill] sm:$0xff] %v19378_v36  ;;  %v11965_v52 = vld [vmem:[#allocation3 + $0x30] sm:$0xe]  ;;  %v11220_v8 = vld [vmem:[#allocation3 + $0x44] sm:$0x1] }
 0x732   : > { %v12032_v44 = vrot.slane %v19336_v16, 5  ;;  %v12036_v1 = vrot.slane %v19350_v49, 5  ;;  %v19388_v17 = vsel %vm17067_vm1, %v13449_v50, %v12029_v19  ;;  %v13450_v28 = vrot.slane %v11964_v43, 9  ;;  %v11966_v41 = vld [vmem:[#allocation3 + $0x3c] sm:$0xe] }
 0x733   : > { %20505 = vst [vmem:[#allocation56_spill] sm:$0xff] %v19388_v17  ;;  %v12043_v11 = vrot.slane %v19364_v6, 5  ;;  %v12039_v16 = vrot.slane %v19362_v4, 5  ;;  %v13451_v49 = vrot.slane %v11965_v52, 9  ;;  %v12046_v50 = vrot.slane %v19370_v24, 5 }
 0x734   : > { %v19393_v22 = vsel %vm17067_vm1, %v12031_v21, %v12032_v44  ;;  %v12038_v7 = vrot.slane %v12036_v1, 4  ;;  %v11967_v6 = vld [vmem:[#allocation3 + $0x48] sm:$0xe]  ;;  %v11226_v21 = vld [vmem:[#allocation3 + $0x5c] sm:$0x1]  ;;  %v19405_v44 = vsel %vm17067_vm1, %v13450_v28, %v12036_v1  ;;  %v12050_v19 = vrot.slane %v19378_v36, 5 }
 0x735   : > { %20506 = vst [vmem:[#allocation54_spill] sm:$0xff] %v19393_v22  ;;  %v12045_v43 = vrot.slane %v12043_v11, 4  ;;  %20507 = vst [vmem:[#allocation59_spill] sm:$0xff] %v19405_v44  ;;  %v19413_v62 = vsel %vm17067_vm1, %v13451_v49, %v12043_v11  ;;  %v11968_v22 = vld [vmem:[#allocation3 + $0x54] sm:$0xe]  ;;  %v13452_v28 = vrot.slane %v11966_v41, 9 }
 0x736   : > { %v19409_v52 = vsel %vm17067_vm1, %v12038_v7, %v12039_v16  ;;  %20509 = vst [vmem:[#allocation60_spill] sm:$0xff] %v19413_v62  ;;  %v19416_v17 = vld [vmem:[#allocation3 + $0x64] sm:$0xf]  ;;  %v11229_v24 = vld [vmem:[#allocation3 + $0x68] sm:$0x1]  ;;  %v12053_v16 = vrot.slane %v11220_v8, 5 }
 0x737   : > { %14821 = vmatmul.mubr.bf16.gmra.mrb[56].mxu1 %v15880_v38  ;;  %v19384_v38 = vld [vmem:[#allocation3 + $0x4c] sm:$0xf]  ;;  %20508 = vst [vmem:[#allocation58_spill] sm:$0xff] %v19409_v52  ;;  %20510 = vst [vmem:[#allocation61_spill] sm:$0xff] %v19416_v17  ;;  %v19422_v1 = vsel %vm17067_vm1, %v12045_v43, %v12046_v50  ;;  %v12052_v49 = vrot.slane %v12050_v19, 4  ;;  %v13453_v11 = vrot.slane %v11967_v6, 9  ;;  %v19429_v55 = vsel %vm17067_vm1, %v13452_v28, %v12050_v19 }
 0x738   : > { %14824 = vmatprep.mubr.bf16.mxu1 %v15882_v10  ;;  %v11223_v10 = vld [vmem:[#allocation3 + $0x50] sm:$0x1]  ;;  %20511 = vst [vmem:[#allocation67_spill] sm:$0xff] %v19422_v1  ;;  %v12057_v36 = vrot.slane %v19384_v38, 5  ;;  %20512 = vst [vmem:[#allocation68_spill] sm:$0xff] %v19429_v55  ;;  %v13454_v52 = vrot.slane %v11968_v22, 9 }
 0x739   : > { %v12060_v4 = vrot.slane %v11223_v10, 5  ;;  %v12064_v43 = vrot.slane %v19398_v2, 5  ;;  %v11232_v41 = vld [vmem:[#allocation3 + $0x74] sm:$0x1]  ;;  %v19435_v8 = vsel %vm17067_vm1, %v12052_v49, %v12053_v16  ;;  %v12067_v50 = vrot.slane %v11226_v21, 5 }
 0x73a   : > { %20513 = vst [vmem:[#allocation63_spill] sm:$0xff] %v19435_v8  ;;  %v19439_v6 = vsel %vm17067_vm1, %v13453_v11, %v12057_v36  ;;  %v11970_v7 = vld [vmem:[#allocation3 + $0x6c] sm:$0xe]  ;;  %v11234_v19 = vld [vmem:[#allocation3 + $0x7c] sm:$0xf]  ;;  %v13455_v28 = vrot.slane %v11969_v12, 9 }
 0x73b   : > { %20514 = vst [vmem:[#allocation72_spill] sm:$0xff] %v19439_v6  ;;  %v12066_v10 = vrot.slane %v12064_v43, 4  ;;  %v11235_v1 = vld [vmem:[#allocation3 + $0x80] sm:$0x1]  ;;  %v19450_v49 = vsel %vm17067_vm1, %v13454_v52, %v12064_v43  ;;  %v12078_v21 = vrot.slane %v11231_v15, 5  ;;  %v13456_v55 = vrot.slane %v11970_v7, 9 }
 0x73c   : > { %v11971_v11 = vld [vmem:[#allocation3 + $0x78] sm:$0xe]  ;;  %v11237_v62 = vld [vmem:[#allocation3 + $0x88] sm:$0xf]  ;;  %v11972_v44 = vld [vmem:[#allocation3 + $0x84] sm:$0xe] }
 0x73d   : > { %v19456_v12 = vsel %vm17067_vm1, %v12066_v10, %v12067_v50  ;;  %v12081_v43 = vrot.slane %v11232_v41, 5  ;;  %v11241_v22 = vld [vmem:[#allocation3 + $0x98] sm:$0x1]  ;;  %v19470_v7 = vsel %vm17067_vm1, %v13456_v55, %v12078_v21  ;;  %v13457_v10 = vrot.slane %v11971_v11, 9  ;;  %v11243_v6 = vld [vmem:[#allocation3 + $0xa0] sm:$0xf] }
 0x73e   : > { %20516 = vst [vmem:[#allocation64_spill] sm:$0xff] %v19456_v12  ;;  %20518 = vst [vmem:[#allocation69_spill] sm:$0xff] %v19470_v7  ;;  %v13458_v41 = vrot.slane %v11972_v44, 9  ;;  %v11973_v12 = vld [vmem:[#allocation3 + $0x90] sm:$0xe]  ;;  %v15887_v55 = vld [vmem:[#allocation7 + $0x150] sm:$0xff]  }
 0x73f   : > { %14825 = vmatmul.mubr.bf16.gmra.mrb[60].mxu1 %v15883_v18  ;;  %v12059_v18 = vrot.slane %v12057_v36, 4  ;;  %v12074_v36 = vrot.slane %v11229_v24, 5  ;;  %v12080_v24 = vrot.slane %v12078_v21, 4  ;;  %v12088_v21 = vrot.slane %v11235_v1, 5  ;;  %v11974_v11 = vld [vmem:[#allocation3 + $0x9c] sm:$0xe] }
 0x740   : > { %14844 = vmatprep.mubr.bf16.mxu1 %v19253_v35  ;;  %v12071_v35 = vrot.slane %v19416_v17, 5  ;;  %v15886_v17 = vld [vmem:[#allocation7 + $0x148] sm:$0xff]   ;;  %v11246_v44 = vld [vmem:[#allocation3 + $0xac] sm:$0xf]  ;;  %v11247_v52 = vld [vmem:[#allocation3 + $0xb0] sm:$0x1] }
 0x741   : > { %v19446_v16 = vsel %vm17067_vm1, %v12059_v18, %v12060_v4  ;;  %v11238_v4 = vld [vmem:[#allocation3 + $0x8c] sm:$0x1]  ;;  %v11240_v18 = vld [vmem:[#allocation3 + $0x94] sm:$0xf]  ;;  %v13459_v1 = vrot.slane %v11973_v12, 9  ;;  %v20523_v7 = vshll.u32 %v19074_v60, 16 }
 0x742   : > { %20515 = vst [vmem:[#allocation70_spill] sm:$0xff] %v19446_v16  ;;  %v12073_v8 = vrot.slane %v12071_v35, 4  ;;  %v19462_v15 = vsel %vm17067_vm1, %v13455_v28, %v12071_v35  ;;  %v12085_v16 = vrot.slane %v11234_v19, 5  ;;  %v19476_v28 = vsel %vm17067_vm1, %v12080_v24, %v12081_v43  ;;  %v15888_v12 = vld [vmem:[#allocation7 + $0x158] sm:$0xff]   ;;  %v20598_v31 = vld [vmem:[#allocation72_spill] sm:$0xff] }
 0x743   : > { %20519 = vst [vmem:[#allocation71_spill] sm:$0xff] %v19476_v28  ;;  %v12092_v35 = vrot.slane %v11237_v62, 5  ;;  %v12095_v24 = vrot.slane %v11238_v4, 5  ;;  %v12099_v43 = vrot.slane %v11240_v18, 5  ;;  %v11249_v28 = vld [vmem:[#allocation3 + $0xb8] sm:$0xf] }
 0x744   : > { %v19466_v50 = vsel %vm17067_vm1, %v12073_v8, %v12074_v36  ;;  %v11244_v8 = vld [vmem:[#allocation3 + $0xa4] sm:$0x1]  ;;  %v19483_v19 = vsel %vm17067_vm1, %v13457_v10, %v12085_v16  ;;  %v12087_v36 = vrot.slane %v12085_v16, 4  ;;  %v12102_v10 = vrot.slane %v11241_v22, 5 }
 0x745   : > { %20517 = vst [vmem:[#allocation65_spill] sm:$0xff] %v19466_v50  ;;  %v19489_v62 = vsel %vm17067_vm1, %v13458_v41, %v12092_v35  ;;  %v12101_v4 = vrot.slane %v12099_v43, 4  ;;  %v13460_v18 = vrot.slane %v11974_v11, 9  ;;  %v19503_v50 = vrot.slane %v20523_v7, 5 }
 0x746   : > { %20520 = vst [vmem:[#allocation73_spill] sm:$0xff] %v19489_v62  ;;  %v19493_v16 = vsel %vm17067_vm1, %v12087_v36, %v12088_v21  ;;  %v11976_v36 = vld [vmem:[#allocation3 + $0xb4] sm:$0xe]  ;;  %v11250_v21 = vld [vmem:[#allocation3 + $0xbc] sm:$0x1] }
 0x747   : > { %14845 = vmatmul.mubr.bf16.vlgmr.msra.gmra.mrb[32].mxu1 %v19271_v56  ;;  %v12094_v56 = vrot.slane %v12092_v35, 4  ;;  %20521 = vst [vmem:[#allocation74_spill] sm:$0xff] %v19493_v16  ;;  %v11975_v35 = vld [vmem:[#allocation3 + $0xa8] sm:$0xe]  ;;  %v19513_v11 = vsel %vm17067_vm1, %v12101_v4, %v12102_v10  ;;  %v11253_v62 = vld [vmem:[#allocation3 + $0xc8] sm:$0x1] }
 0x748   : > { %14848 = vmatprep.mubr.bf16.mxu1 %v19297_v47  ;;  %14877 = vmatpush3.bf16.msra.mxu1 %v19264_v3  ;;  %v12106_v47 = vrot.slane %v11243_v6, 5  ;;  %v12109_v6 = vrot.slane %v11244_v8, 5  ;;  %v11252_v3 = vld [vmem:[#allocation3 + $0xc4] sm:$0xf]  ;;  %20525 = vst [vmem:[#allocation77_spill] sm:$0xff] %v19513_v11  ;;  %v12123_v11 = vrot.slane %v11250_v21, 5 }
 0x749   : > { %14878 = vmatprep.subr.bf16.mxu1 %v15886_v17  ;;  %v19499_v41 = vsel %vm17067_vm1, %v12094_v56, %v12095_v24  ;;  %v19509_v56 = vsel %vm17067_vm1, %v13459_v1, %v12099_v43  ;;  %v12113_v24 = vrot.slane %v11246_v44, 5  ;;  %v13461_v43 = vrot.slane %v11975_v35, 9 }
 0x74a   : > { %20522 = vst [vmem:[#allocation75_spill] sm:$0xff] %v19499_v41  ;;  %v12108_v22 = vrot.slane %v12106_v47, 4  ;;  %20524 = vst [vmem:[#allocation76_spill] sm:$0xff] %v19509_v56  ;;  %v19517_v7 = vsel %vm17067_vm1, %v13460_v18, %v12106_v47  ;;  %v12120_v1 = vrot.slane %v11249_v28, 5  ;;  %v11977_v41 = vld [vmem:[#allocation3 + $0xc0] sm:$0xe] }
 0x74b   : > { %v12115_v4 = vrot.slane %v12113_v24, 4  ;;  %v12116_v47 = vrot.slane %v11247_v52, 5  ;;  %v13462_v18 = vrot.slane %v11976_v36, 9  ;;  %v20526_v44 = vshrl.u32 %v19074_v60, 16  ;;  %v15889_v52 = vld [vmem:[#allocation7 + $0x160] sm:$0xff]  }
 0x74c   : > { %14879 = vmatpush3.bf16.msra.mxu1 %v15886_v17  ;;  %v19523_v8 = vsel %vm17067_vm1, %v12108_v22, %v12109_v6  ;;  %v12122_v17 = vrot.slane %v12120_v1, 4  ;;  %v12127_v56 = vrot.slane %v11252_v3, 5  ;;  %v19533_v28 = vsel %vm17067_vm1, %v13461_v43, %v12113_v24  ;;  %v9600_v22 = vld [vmem:[#allocation3 + $0x84] sm:$0xf] }
 0x74d   : > { %14880 = vmatprep.subr.bf16.mxu1 %v15887_v55  ;;  %v13476_v10 = vcombine.low %v19517_v7, %v19523_v8  ;;  %v9850_v16 = vrot.slane %v20526_v44, 4  ;;  %v19537_v35 = vsel %vm17067_vm1, %v12115_v4, %v12116_v47  ;;  %v13463_v60 = vrot.slane %v11977_v41, 9  ;;  %v19926_v7 = vld [vmem:[%s20068_s11] ss:$0 sm:$0xff] }
 0x74e   : > { %v12129_v3 = vrot.slane %v12127_v56, 4  ;;  %v12130_v6 = vrot.slane %v11253_v62, 5  ;;  %v20527_v36 = vor.u32 %v19317_v32, %v19312_v63  ;;  %v9817_v24 = vor.u32 %v19366_v23, %v19360_v58 }
 0x74f   : > { %14849 = vmatmul.mubr.bf16.gmra.mrb[36].mxu1 %v19319_v27  ;;  %v19541_v27 = vsel %vm17067_vm1, %v13462_v18, %v12120_v1  ;;  %v20528_v41 = vshrl.u32 %v19326_v51, 16  ;;  %v9868_v4 = vshll.u32 %v19095_v42, 16  ;;  %v19562_v62 = vsel %vm17067_vm1, %v13463_v60, %v12127_v56 }
 0x750   : > { %14852 = vmatprep.mubr.bf16.mxu1 %v19330_v59  ;;  %14881 = vmatpush3.bf16.msra.mxu1 %v15887_v55  ;;  %v13477_v59 = vcombine.low %v19533_v28, %v19537_v35  ;;  %v19547_v55 = vsel %vm17067_vm1, %v12122_v17, %v12123_v11  ;;  %v9804_v21 = vrot.slane %v20527_v36, 4  ;;  %v9872_v11 = vshrl.u32 %v19095_v42, 16 }
 0x751   : > { %14882 = vmatprep.subr.bf16.mxu1 %v15888_v12  ;;  %v9837_v43 = vrot.slane %v20528_v41, 4  ;;  %v13478_v1 = vcombine.low %v19541_v27, %v19547_v55  ;;  %v19566_v32 = vsel %vm17067_vm1, %v12129_v3, %v12130_v6  ;;  %v20529_v58 = vshll.u32 %v19326_v51, 16  ;;  %v15890_v3 = vld [vmem:[#allocation7 + $0x168] sm:$0xff]  }
 0x752   : > { %v9859_v17 = vshrl.u32 %v9600_v22, 16  ;;  %v9862_v47 = vshll.u32 %v9600_v22, 16  ;;  %v13479_v18 = vcombine.low %v19562_v62, %v19566_v32  ;;  %v20530_v42 = vsel %vm16606_vm11, %v19310_v29, %v19324_v53 }
 0x753   : > { %v9840_v23 = vrot.slane %v20529_v58, 5  ;;  %v20531_v56 = vsel %vm16606_vm11, %v19307_v57, %v19286_v34  ;;  %v9775_v51 = vsel %vm16606_vm11, %v19346_v40, %v19288_v54  ;;  %v9851_v22 = vor.u32 %v9850_v16, %v19503_v50 }
 0x754   : > { %14883 = vmatpush3.bf16.msra.mxu1 %v15888_v12  ;;  %v13342_v44 = vcombine.low %v20531_v56, %v20530_v42  ;;  %v20532_v12 = vor.u32 %v19375_v61, %v19373_v13  ;;  %v20533_v29 = vsel %vm16606_vm11, %v19315_v45, %v19332_v33  ;;  %v9799_v57 = vsel %vm16606_vm11, %v19356_v37, %v19312_v63  ;;  %v9603_v45 = vld [vmem:[#allocation3 + $0x90] sm:$0xf] }
 0x755   : > { %14884 = vmatprep.subr.bf16.mxu1 %v15889_v52  ;;  %v13343_v34 = vcombine.low %v9775_v51, %v20533_v29  ;;  %v9809_v54 = vsel %vm16606_vm11, %v9804_v21, %v19348_v26  ;;  %v20534_v53 = vshll.u32 %v19072_v0, 16  ;;  %v9854_v61 = vshll.u32 %v19086_v39, 16  ;;  %v15891_v0 = vld [vmem:[#allocation7 + $0x170] sm:$0xff]  }
 0x756   : > { %v9828_v60 = vrot.slane %v20532_v12, 4  ;;  %v19605_v16 = vrot.slane %v9868_v4, 5  ;;  %v9874_v6 = vrot.slane %v9872_v11, 4  ;;  %v9818_v33 = vrot.slane %v9817_v24, 4  ;;  %v9606_v11 = vld [vmem:[#allocation3 + $0x9c] sm:$0xf] }
 0x757   : > { %14853 = vmatmul.mubr.bf16.gmra.mrb[40].mxu1 %v13342_v44  ;;  %v9832_v40 = vrot.slane %v20534_v53, 5  ;;  %v9841_v36 = vor.u32 %v9840_v23, %v9837_v43  ;;  %v9861_v41 = vrot.slane %v9859_v17, 4  ;;  %v9864_v58 = vrot.slane %v9862_v47, 5 }
 0x758   : > { %14856 = vmatprep.mubr.bf16.mxu1 %v13343_v34  ;;  %14885 = vmatpush3.bf16.msra.mxu1 %v15889_v52  ;;  %v13344_v63 = vcombine.low %v9799_v57, %v9809_v54  ;;  %v9852_v37 = vrot.slane %v9851_v22, 4  ;;  %v9883_v21 = vshrl.u32 %v9603_v45, 16  ;;  %v9886_v42 = vshll.u32 %v9603_v45, 16  ;;  %v15892_v22 = vld [vmem:[#allocation7 + $0x178] sm:$0xff]  }
 0x759   : > { %v9833_v26 = vsel %vm16606_vm11, %v9828_v60, %v9832_v40  ;;  %14886 = vmatprep.subr.bf16.mxu1 %v15890_v3  ;;  %v9892_v39 = vshll.u32 %v19103_v9, 16  ;;  %v9896_v4 = vshrl.u32 %v19103_v9, 16  ;;  %v9856_v56 = vrot.slane %v9854_v61, 5 }
 0x75a   : > { %v9875_v24 = vor.u32 %v9874_v6, %v19605_v16  ;;  %v9916_v43 = vshll.u32 %v19125_v14, 16  ;;  %v9920_v52 = vshrl.u32 %v19125_v14, 16  ;;  %v9823_v23 = vsel %vm16606_vm11, %v9818_v33, %v19373_v13  ;;  %v9609_v33 = vld [vmem:[#allocation3 + $0xa8] sm:$0xf] }
 0x75b   : > { %v9842_v17 = vrot.slane %v9841_v36, 4  ;;  %v9865_v47 = vor.u32 %v9864_v58, %v9861_v41  ;;  %v9878_v44 = vshll.u32 %v19109_v20, 16  ;;  %v13345_v51 = vcombine.low %v9823_v23, %v9833_v26  ;;  %v19627_v36 = vld [vmem:[#allocation7 + $0x180] sm:$0xff]   ;;  %v15987_v23 = vld [vmem:[#allocation3 + $0xa4] sm:$0x1] }
 0x75c   : > { %14887 = vmatpush3.bf16.msra.mxu1 %v15890_v3  ;;  %v9857_v9 = vsel %vm16606_vm11, %v9852_v37, %v9856_v56  ;;  %v9907_v12 = vshrl.u32 %v9606_v11, 16  ;;  %v9910_v60 = vshll.u32 %v9606_v11, 16  ;;  %v9885_v29 = vrot.slane %v9883_v21, 4  ;;  %v9612_v21 = vld [vmem:[#allocation3 + $0xb4] sm:$0xf] }
 0x75d   : > { %14888 = vmatprep.subr.bf16.mxu1 %v15891_v0  ;;  %v9888_v34 = vrot.slane %v9886_v42, 5  ;;  %v19620_v14 = vrot.slane %v9892_v39, 5  ;;  %v9898_v57 = vrot.slane %v9896_v4, 4  ;;  %v9876_v13 = vrot.slane %v9875_v24, 4  ;;  %v15986_v11 = vld [vmem:[#allocation3 + $0x98] sm:$0x1] }
 0x75e   : > { %v19622_v54 = vrot.slane %v9916_v43, 5  ;;  %v9922_v53 = vrot.slane %v9920_v52, 4  ;;  %v9847_v20 = vsel %vm16606_vm11, %v9842_v17, %v19503_v50  ;;  %v9866_v3 = vrot.slane %v9865_v47, 4 }
 0x75f   : > { %14857 = vmatmul.mubr.bf16.gmra.mrb[44].mxu1 %v13344_v63  ;;  %v13346_v40 = vcombine.low %v9847_v20, %v9857_v9  ;;  %v9880_v61 = vrot.slane %v9878_v44, 5  ;;  %v9909_v6 = vrot.slane %v9907_v12, 4  ;;  %v9912_v45 = vrot.slane %v9910_v60, 5  ;;  %v15985_v63 = vld [vmem:[#allocation3 + $0xac] sm:$0xf] }
 0x760   : > { %14860 = vmatprep.mubr.bf16.mxu1 %v13345_v51  ;;  %14889 = vmatpush3.bf16.msra.mxu1 %v15891_v0  ;;  %v9889_v41 = vor.u32 %v9888_v34, %v9885_v29  ;;  %v9899_v58 = vor.u32 %v9898_v57, %v19620_v14  ;;  %v9940_v26 = vshll.u32 %v15985_v63, 16  ;;  %v9944_v37 = vshrl.u32 %v15985_v63, 16 }
 0x761   : > { %14890 = vmatprep.subr.bf16.mxu1 %v15892_v22  ;;  %v9881_v50 = vsel %vm16606_vm11, %v9876_v13, %v9880_v61  ;;  %v9923_v0 = vor.u32 %v9922_v53, %v19622_v54  ;;  %v9964_v42 = vshll.u32 %v19157_v46, 16  ;;  %v9968_v39 = vshrl.u32 %v19157_v46, 16 }
 0x762   : > { %v9871_v4 = vsel %vm16606_vm11, %v9866_v3, %v19605_v16  ;;  %v9902_v56 = vshll.u32 %v15986_v11, 16  ;;  %v9931_v24 = vshrl.u32 %v9609_v33, 16  ;;  %v9934_v43 = vshll.u32 %v9609_v33, 16 }
 0x763   : > { %v9913_v52 = vor.u32 %v9912_v45, %v9909_v6  ;;  %v9926_v17 = vshll.u32 %v15987_v23, 16  ;;  %v9955_v47 = vshrl.u32 %v9612_v21, 16  ;;  %v9958_v44 = vshll.u32 %v9612_v21, 16  ;;  %v9615_v6 = vld [vmem:[#allocation3 + $0xc0] sm:$0xf] }
 0x764   : > { %14891 = vmatpush3.bf16.msra.mxu1 %v15892_v22  ;;  %v13347_v51 = vcombine.low %v9871_v4, %v9881_v50  ;;  %v9900_v9 = vrot.slane %v9899_v58, 4  ;;  %v9942_v12 = vrot.slane %v9940_v26, 5  ;;  %v9946_v46 = vrot.slane %v9944_v37, 4  ;;  %v15988_v58 = vld [vmem:[#allocation3 + $0xc4] sm:$0xf] }
 0x765   : > { %14924 = vmatprep.subr.bf16.mxu1 %v19627_v36  ;;  %v9890_v60 = vrot.slane %v9889_v41, 4  ;;  %v9924_v29 = vrot.slane %v9923_v0, 4  ;;  %v9966_v16 = vrot.slane %v9964_v42, 5  ;;  %v9970_v34 = vrot.slane %v9968_v39, 4  ;;  %v15989_v50 = vld [vmem:[#allocation3 + $0xb0] sm:$0x1] }
 0x766   : > { %v9904_v57 = vrot.slane %v9902_v56, 5  ;;  %v9933_v13 = vrot.slane %v9931_v24, 4  ;;  %v9936_v22 = vrot.slane %v9934_v43, 5  ;;  %v9914_v53 = vrot.slane %v9913_v52, 4  ;;  %v15990_v24 = vld [vmem:[#allocation3 + $0xbc] sm:$0x1] }
 0x767   : > { %14861 = vmatmul.mubr.bf16.gmra.mrb[48].mxu1 %v13346_v40  ;;  %v9928_v20 = vrot.slane %v9926_v17, 5  ;;  %v9957_v3 = vrot.slane %v9955_v47, 4  ;;  %v9960_v61 = vrot.slane %v9958_v44, 5  ;;  %v9947_v33 = vor.u32 %v9946_v46, %v9942_v12 }
 0x768   : > { %14864 = vmatprep.mubr.bf16.mxu1 %v13347_v51  ;;  %v9905_v45 = vsel %vm16606_vm11, %v9900_v9, %v9904_v57  ;;  %v9988_v63 = vshll.u32 %v15988_v58, 16  ;;  %v9992_v40 = vshrl.u32 %v15988_v58, 16  ;;  %v9895_v41 = vsel %vm16606_vm11, %v9890_v60, %v19620_v14 }
 0x769   : > { %v9929_v26 = vsel %vm16606_vm11, %v9924_v29, %v9928_v20  ;;  %v9971_v37 = vor.u32 %v9970_v34, %v9966_v16  ;;  %v9937_v21 = vor.u32 %v9936_v22, %v9933_v13  ;;  %v9950_v0 = vshll.u32 %v15989_v50, 16  ;;  %v15991_v13 = vld [vmem:[#allocation3 + $0x10] sm:$0xf] }
 0x76a   : > { %v9979_v42 = vshrl.u32 %v9615_v6, 16  ;;  %v9982_v39 = vshll.u32 %v9615_v6, 16  ;;  %v13348_v4 = vcombine.low %v9895_v41, %v9905_v45  ;;  %v9919_v11 = vsel %vm16606_vm11, %v9914_v53, %v19622_v54 }
 0x76b   : > { %v9961_v56 = vor.u32 %v9960_v61, %v9957_v3  ;;  %v9974_v43 = vshll.u32 %v15990_v24, 16  ;;  %v13349_v52 = vcombine.low %v9919_v11, %v9929_v26  ;;  %v9948_v23 = vrot.slane %v9947_v33, 4  ;;  %v15992_v3 = vld [vmem:[#allocation3 + $0xc8] sm:$0x1]  ;;  %v10324_v26 = vld [vmem:[#allocation3 + $0xc] sm:$0xe] }
 0x76c   : > { %v9990_v14 = vrot.slane %v9988_v63, 5  ;;  %v9994_v17 = vrot.slane %v9992_v40, 4  ;;  %v9972_v47 = vrot.slane %v9971_v37, 4  ;;  %v9938_v44 = vrot.slane %v9937_v21, 4  ;;  %v1574_v37 = vld [vmem:[#allocation3 + $0xcc] sm:$0x1] }
 0x76d   : > { %v9952_v51 = vrot.slane %v9950_v0, 5  ;;  %v9981_v9 = vrot.slane %v9979_v42, 4  ;;  %v9984_v46 = vrot.slane %v9982_v39, 5  ;;  %v9962_v60 = vrot.slane %v9961_v56, 4  ;;  %v15993_v0 = vld [vmem:[#allocation3 + $0x1c] sm:$0xf] }
 0x76e   : > { %v9976_v29 = vrot.slane %v9974_v43, 5  ;;  %v9995_v54 = vor.u32 %v9994_v17, %v9990_v14  ;;  %v10390_v22 = vrot.slane %v15991_v13, 5  ;;  %v9943_v53 = vsel %vm16606_vm11, %v9938_v44, %v9942_v12  ;;  %v10325_v24 = vld [vmem:[#allocation3 + $0x18] sm:$0xe]  ;;  %v20535_v44 = vld [vmem:[#allocation57_spill] sm:$0xff] }
 0x76f   : > { %14865 = vmatmul.mubr.bf16.gmra.mrb[52].mxu1 %v13348_v4  ;;  %v9953_v34 = vsel %vm16606_vm11, %v9948_v23, %v9952_v51  ;;  %v9985_v20 = vor.u32 %v9984_v46, %v9981_v9  ;;  %v9998_v61 = vshll.u32 %v15992_v3, 16  ;;  %v9967_v45 = vsel %vm16606_vm11, %v9962_v60, %v9966_v16  ;;  %v20536_v51 = vld [vmem:[#allocation55_spill] sm:$0xff]  ;;  %v15895_v46 = vld [vmem:[#allocation7 + $0x190] sm:$0xff]  }
 0x770   : > { %14868 = vmatprep.mubr.bf16.mxu1 %v13349_v52  ;;  %v9977_v57 = vsel %vm16606_vm11, %v9972_v47, %v9976_v29  ;;  %v13350_v6 = vcombine.low %v9943_v53, %v9953_v34  ;;  %v9996_v58 = vrot.slane %v9995_v54, 4  ;;  %v10392_v63 = vrot.slane %v10390_v22, 4  ;;  %v20538_v60 = vld [vmem:[#allocation53_spill] sm:$0xff]  ;;  %v20541_v54 = vld [vmem:[#allocation20_spill] sm:$0xff] }
 0x771   : > { %v13351_v33 = vcombine.low %v9967_v45, %v9977_v57  ;;  %v9986_v40 = vrot.slane %v9985_v20, 4  ;;  %v10000_v41 = vrot.slane %v9998_v61, 5  ;;  %v10393_v21 = vrot.slane %v19229_v30, 5  ;;  %v20539_v29 = vld [vmem:[#allocation25_spill] sm:$0xff]  ;;  %v15898_v53 = vld [vmem:[#allocation7 + $0x1a8] sm:$0xff]   ;;  %v20545_v20 = vld [vmem:[#allocation31_spill] sm:$0xff] }
 0x772   : > { %v1575_v12 = vsel %vm16538_vm8, 0, %v1574_v37  ;;  %v10397_v42 = vrot.slane %v15993_v0, 5  ;;  %v13361_v16 = vrot.slane %v10324_v26, 9  ;;  %v10400_v43 = vrot.slane %v19235_v5, 5  ;;  %v15896_v5 = vld [vmem:[#allocation7 + $0x198] sm:$0xff]   ;;  %v20542_v57 = vld [vmem:[#allocation29_spill] sm:$0xff] }
 0x773   : > { %v10001_v50 = vsel %vm16606_vm11, %v9996_v58, %v10000_v41  ;;  %1576 = vst [vmem:[#allocation3 + $0xcc] sm:$0x1] %v1575_v12  ;;  %v10394_v39 = vsel %vm17067_vm1, %v10392_v63, %v10393_v21  ;;  %v9991_v4 = vsel %vm16606_vm11, %v9986_v40, %v9990_v14  ;;  %v13362_v52 = vrot.slane %v10325_v24, 9  ;;  %v15894_v14 = vld [vmem:[#allocation7 + $0x188] sm:$0xff]   ;;  %v15900_v58 = vld [vmem:[#allocation7 + $0x1b8] sm:$0xff]   ;;  %v20551_v40 = vld [vmem:[#allocation35_spill] sm:$0xff] }
 0x774   : > { %v13352_v11 = vcombine.low %v9991_v4, %v10001_v50  ;;  %v10391_v30 = vsel %vm17067_vm1, %v13361_v16, %v10390_v22  ;;  %v10399_v48 = vrot.slane %v10397_v42, 4  ;;  %v20537_v9 = vcombine.low %v20535_v44, %v20536_v51  ;;  %v15897_v22 = vld [vmem:[#allocation7 + $0x1a0] sm:$0xff]   ;;  %v20547_v61 = vld [vmem:[#allocation32_spill] sm:$0xff]  ;;  %v20550_v63 = vld [vmem:[#allocation26_spill] sm:$0xff] }
 0x775   : > { %v13377_v56 = vcombine.low %v10391_v30, %v10394_v39  ;;  %v10398_v17 = vsel %vm17067_vm1, %v13362_v52, %v10397_v42  ;;  %v20540_v34 = vcombine.low %v20538_v60, %v20539_v29  ;;  %v20543_v13 = vcombine.low %v20541_v54, %v20542_v57  ;;  %v20553_v26 = vld [vmem:[#allocation34_spill] sm:$0xff]  ;;  %v20554_v37 = vld [vmem:[#allocation36_spill] sm:$0xff]  ;;  %v15903_v12 = vld [vmem:[#allocation7 + $0x1c0] sm:$0xff]  }
 0x776   : > { %v10401_v23 = vsel %vm17067_vm1, %v10399_v48, %v10400_v43  ;;  %v20552_v41 = vcombine.low %v20550_v63, %v20551_v40  ;;  %v20555_v21 = vcombine.low %v20553_v26, %v20554_v37  ;;  %v20556_v50 = vld [vmem:[#allocation37_spill] sm:$0xff]  ;;  %v20557_v0 = vld [vmem:[#allocation38_spill] sm:$0xff]  ;;  %v20559_v16 = vld [vmem:[#allocation39_spill] sm:$0xff] }
 0x777   : > { %14869 = vmatmul.mubr.bf16.gmra.mrb[56].mxu1 %v13350_v6  ;;  %v13378_v47 = vcombine.low %v10398_v17, %v10401_v23  ;;  %v20548_v6 = vld [vmem:[#allocation33_spill] sm:$0xff]  ;;  %v20558_v42 = vcombine.low %v20556_v50, %v20557_v0  ;;  %v20560_v39 = vld [vmem:[#allocation40_spill] sm:$0xff]  ;;  %v20565_v48 = vld [vmem:[#allocation27_spill] sm:$0xff] }
 0x778   : > { %14872 = vmatprep.mubr.bf16.mxu1 %v13351_v33  ;;  %v20549_v45 = vcombine.low %v20547_v61, %v20548_v6  ;;  %v15899_v33 = vld [vmem:[#allocation7 + $0x1b0] sm:$0xff]   ;;  %v20561_v4 = vcombine.low %v20559_v16, %v20560_v39  ;;  %v20563_v30 = vld [vmem:[#allocation28_spill] sm:$0xff]  ;;  %v20566_v24 = vld [vmem:[#allocation42_spill] sm:$0xff] }
 0x779   : > { %v20567_v43 = vcombine.low %v20565_v48, %v20566_v24  ;;  %v20568_v52 = vld [vmem:[#allocation43_spill] sm:$0xff]  ;;  %v20569_v23 = vld [vmem:[#allocation44_spill] sm:$0xff]  ;;  %v1628_v51 = vld [vmem:[#allocation3 + $0xd4] sm:$0x1] }
 0x77a   : > { %v20570_v17 = vcombine.low %v20568_v52, %v20569_v23  ;;  %v20575_v60 = vld [vmem:[#allocation47_spill] sm:$0xff]  ;;  %v20576_v29 = vld [vmem:[#allocation48_spill] sm:$0xff]  ;;  %v15924_v63 = vld [vmem:[#allocation7 + $0x1f8] sm:$0xff]  }
 0x77b   : > { %v15902_v54 = vld [vmem:[#allocation3 + $0x24] sm:$0xff]   ;;  %v15908_v61 = vld [vmem:[#allocation3 + $0x54] sm:$0xff]  }
 0x77c   : > { %v15906_v57 = vld [vmem:[#allocation7 + $0x1c8] sm:$0xff]   ;;  %v15913_v40 = vld [vmem:[#allocation3 + $0x78] sm:$0xff]   ;;  %v20578_v37 = vld [vmem:[#allocation49_spill] sm:$0xff] }
 0x77d   : > { %v15918_v6 = vld [vmem:[#allocation7 + $0x1e8] sm:$0xff]   ;;  %v19718_v26 = vld [vmem:[#allocation7 + $0x200] sm:$0xff]   ;;  %v15916_v16 = vld [vmem:[#allocation3 + $0x90] sm:$0xff]  }
 0x77e   : > { %v20579_v52 = vld [vmem:[#allocation52_spill] sm:$0xff] }
 0x77f   : > { %14873 = vmatmul.mubr.bf16.gmra.mrb[60].mxu1 %v13352_v11  ;;  %v20562_v11 = vld [vmem:[#allocation41_spill] sm:$0xff]  ;;  %v11291_v23 = vshll.u32 %v20579_v52, 16 }
 0x780   : > { %14892 = vmatprep.mubr.bf16.mxu1 %v13377_v56  ;;  %v20564_v56 = vcombine.low %v20562_v11, %v20563_v30  ;;  %v11212_v11 = vld [vmem:[#allocation3 + $0x24] sm:$0xf] }
 0x781   : > { %v11282_v48 = vshrl.u32 %v11212_v11, 16 }
 0x787   : > { %14893 = vmatmul.mubr.bf16.vlgmr.msra.gmra.mrb[32].mxu1 %v13378_v47  ;;  %v20571_v47 = vld [vmem:[#allocation45_spill] sm:$0xff] }
 0x788   : > { %14896 = vmatprep.mubr.bf16.mxu1 %v20537_v9  ;;  %14925 = vmatpush3.bf16.msra.mxu1 %v19627_v36  ;;  %v20544_v36 = vld [vmem:[#allocation30_spill] sm:$0xff]  ;;  %v15917_v9 = vld [vmem:[#allocation3 + $0x9c] sm:$0xff]  }
 0x789   : > { %14926 = vmatprep.subr.bf16.mxu1 %v15894_v14  ;;  %v20546_v3 = vcombine.low %v20544_v36, %v20545_v20  ;;  %v15912_v36 = vld [vmem:[#allocation7 + $0x1d8] sm:$0xff]   ;;  %v15907_v20 = vld [vmem:[#allocation3 + $0x48] sm:$0xff]  }
 0x78c   : > { %14927 = vmatpush3.bf16.msra.mxu1 %v15894_v14  ;;  %v20572_v14 = vld [vmem:[#allocation46_spill] sm:$0xff] }
 0x78d   : > { %14928 = vmatprep.subr.bf16.mxu1 %v15895_v46  ;;  %v20573_v44 = vcombine.low %v20571_v47, %v20572_v14  ;;  %v11215_v47 = vld [vmem:[#allocation3 + $0x30] sm:$0xf] }
 0x78f   : > { %14897 = vmatmul.mubr.bf16.gmra.mrb[36].mxu1 %v20540_v34  ;;  %v20577_v34 = vcombine.low %v20575_v60, %v20576_v29 }
 0x790   : > { %14900 = vmatprep.mubr.bf16.mxu1 %v20543_v13  ;;  %14929 = vmatpush3.bf16.msra.mxu1 %v15895_v46  ;;  %v1629_v46 = vsel %vm16531_vm7, 0, %v1628_v51  ;;  %v15904_v13 = vld [vmem:[#allocation3 + $0x30] sm:$0xff]  }
 0x791   : > { %14930 = vmatprep.subr.bf16.mxu1 %v15896_v5  ;;  %1630 = vst [vmem:[#allocation3 + $0xd4] sm:$0x1] %v1629_v46  ;;  %v11284_v46 = vrot.slane %v11282_v48, 4 }
 0x794   : > { %14931 = vmatpush3.bf16.msra.mxu1 %v15896_v5  ;;  %v15901_v5 = vld [vmem:[#allocation3 + $0x18] sm:$0xff]  }
 0x795   : > { %14932 = vmatprep.subr.bf16.mxu1 %v15897_v22 }
 0x797   : > { %14901 = vmatmul.mubr.bf16.gmra.mrb[40].mxu1 %v20546_v3  ;;  %v15915_v3 = vld [vmem:[#allocation7 + $0x1e0] sm:$0xff]  }
 0x798   : > { %14904 = vmatprep.mubr.bf16.mxu1 %v20549_v45  ;;  %14933 = vmatpush3.bf16.msra.mxu1 %v15897_v22  ;;  %v15909_v22 = vld [vmem:[#allocation7 + $0x1d0] sm:$0xff]   ;;  %v15910_v45 = vld [vmem:[#allocation3 + $0x60] sm:$0xff]  }
 0x799   : > { %14934 = vmatprep.subr.bf16.mxu1 %v15898_v53 }
 0x79c   : > { %14935 = vmatpush3.bf16.msra.mxu1 %v15898_v53  ;;  %v15905_v53 = vld [vmem:[#allocation3 + $0x3c] sm:$0xff]  }
 0x79d   : > { %14936 = vmatprep.subr.bf16.mxu1 %v15899_v33 }
 0x79f   : > { %14905 = vmatmul.mubr.bf16.gmra.mrb[44].mxu1 %v20552_v41  ;;  %v11209_v41 = vld [vmem:[#allocation3 + $0x18] sm:$0xf] }
 0x7a0   : > { %14908 = vmatprep.mubr.bf16.mxu1 %v20555_v21  ;;  %14937 = vmatpush3.bf16.msra.mxu1 %v15899_v33  ;;  %v15921_v33 = vld [vmem:[#allocation7 + $0x1f0] sm:$0xff]   ;;  %v11267_v21 = vshll.u32 %v20578_v37, 16  ;;  %v11258_v50 = vshrl.u32 %v11209_v41, 16  ;;  %v11261_v0 = vshll.u32 %v11209_v41, 16 }
 0x7a1   : > { %14938 = vmatprep.subr.bf16.mxu1 %v15900_v58 }
 0x7a2   : > { %v11269_v39 = vrot.slane %v11267_v21, 5  ;;  %v11260_v30 = vrot.slane %v11258_v50, 4 }
 0x7a4   : > { %14939 = vmatpush3.bf16.msra.mxu1 %v15900_v58  ;;  %v15911_v58 = vld [vmem:[#allocation3 + $0x6c] sm:$0xff]  }
 0x7a5   : > { %14972 = vmatprep.subr.bf16.mxu1 %v15903_v12 }
 0x7a7   : > { %14909 = vmatmul.mubr.bf16.gmra.mrb[48].mxu1 %v20558_v42  ;;  %v15914_v42 = vld [vmem:[#allocation3 + $0x84] sm:$0xff]  }
 0x7a8   : > { %14912 = vmatprep.mubr.bf16.mxu1 %v20561_v4 }
 0x7af   : > { %14913 = vmatmul.mubr.bf16.gmra.mrb[52].mxu1 %v20564_v56  ;;  %v11263_v56 = vrot.slane %v11261_v0, 5  ;;  %v15920_v0 = vld [vmem:[#allocation3 + $0xb4] sm:$0xff]  }
 0x7b0   : > { %14916 = vmatprep.mubr.bf16.mxu1 %v20567_v43  ;;  %v11285_v43 = vshll.u32 %v11212_v11, 16 }
 0x7b1   : > { %v11264_v14 = vor.u32 %v11263_v56, %v11260_v30  ;;  %v20583_v56 = vld [vmem:[#allocation66_spill] sm:$0xff] }
 0x7b2   : > { %v11287_v29 = vrot.slane %v11285_v43, 5  ;;  %v11325_v48 = vshll.u32 %v20583_v56, 16 }
 0x7b7   : > { %14917 = vmatmul.mubr.bf16.gmra.mrb[56].mxu1 %v20570_v17  ;;  %v11295_v17 = vshrl.u32 %v20579_v52, 16 }
 0x7b8   : > { %14920 = vmatprep.mubr.bf16.mxu1 %v20573_v44  ;;  %v20580_v44 = vld [vmem:[#allocation50_spill] sm:$0xff] }
 0x7b9   : > { %v11277_v51 = vshll.u32 %v20580_v44, 16  ;;  %v19743_v44 = vld [vmem:[#allocation3 + $0xd0] sm:$0xf] }
 0x7bf   : > { %14921 = vmatmul.mubr.bf16.gmra.mrb[60].mxu1 %v20577_v34  ;;  %v19726_v34 = vrot.slane %v11291_v23, 5  ;;  %v11221_v23 = vld [vmem:[#allocation3 + $0x48] sm:$0xf] }
 0x7c0   : > { %14940 = vmatprep.mubr.bf16.mxu1 %v15901_v5  ;;  %v15919_v5 = vld [vmem:[#allocation3 + $0xa8] sm:$0xff]  }
 0x7c7   : > { %14941 = vmatmul.mubr.bf16.vlgmr.msra.gmra.mrb[32].mxu1 %v15902_v54  ;;  %v11306_v54 = vshrl.u32 %v11215_v47, 16 }
 0x7c8   : > { %14944 = vmatprep.mubr.bf16.mxu1 %v15904_v13  ;;  %14973 = vmatpush3.bf16.msra.mxu1 %v15903_v12  ;;  %v11271_v12 = vshrl.u32 %v20578_v37, 16  ;;  %v11309_v13 = vshll.u32 %v11215_v47, 16 }
 0x7c9   : > { %14974 = vmatprep.subr.bf16.mxu1 %v15906_v57 }
 0x7ca   : > { %v11273_v4 = vrot.slane %v11271_v12, 4  ;;  %v11311_v41 = vrot.slane %v11309_v13, 5  ;;  %v11387_v13 = vshll.u32 %v19398_v2, 16 }
 0x7cc   : > { %14975 = vmatpush3.bf16.msra.mxu1 %v15906_v57  ;;  %v11274_v24 = vor.u32 %v11273_v4, %v11269_v39  ;;  %v11297_v57 = vrot.slane %v11295_v17, 4 }
 0x7cd   : > { %14976 = vmatprep.subr.bf16.mxu1 %v15909_v22 }
 0x7ce   : > { %v11275_v60 = vrot.slane %v11274_v24, 4  ;;  %v20584_v24 = vld [vmem:[#allocation21_spill] sm:$0xff] }
 0x7cf   : > { %14945 = vmatmul.mubr.bf16.gmra.mrb[36].mxu1 %v15905_v53  ;;  %v11339_v43 = vshll.u32 %v20584_v24, 16  ;;  %v11343_v52 = vshrl.u32 %v20584_v24, 16  ;;  %v15994_v24 = vld [vmem:[#allocation3 + $0x44] sm:$0x1] }
 0x7d0   : > { %14948 = vmatprep.mubr.bf16.mxu1 %v15907_v20  ;;  %14977 = vmatpush3.bf16.msra.mxu1 %v15909_v22  ;;  %v20581_v22 = vld [vmem:[#allocation62_spill] sm:$0xff]  ;;  %v11265_v20 = vrot.slane %v11264_v14, 4 }
 0x7d1   : > { %14978 = vmatprep.subr.bf16.mxu1 %v15912_v36  ;;  %v11315_v53 = vshll.u32 %v20581_v22, 16 }
 0x7d2   : > { %v11270_v12 = vsel %vm16606_vm11, %v11265_v20, %v11269_v39  ;;  %v11363_v39 = vshll.u32 %v19384_v38, 16  ;;  %v11345_v20 = vrot.slane %v11343_v52, 4 }
 0x7d3   : > { %v19734_v37 = vrot.slane %v11315_v53, 5 }
 0x7d4   : > { %14979 = vmatpush3.bf16.msra.mxu1 %v15912_v36  ;;  %v11319_v36 = vshrl.u32 %v20581_v22, 16  ;;  %v11391_v22 = vshrl.u32 %v19398_v2, 16 }
 0x7d5   : > { %14980 = vmatprep.subr.bf16.mxu1 %v15915_v3 }
 0x7d6   : > { %v11321_v21 = vrot.slane %v11319_v36, 4  ;;  %v19752_v36 = vrot.slane %v11339_v43, 5  ;;  %v11349_v43 = vshll.u32 %v15994_v24, 16 }
 0x7d7   : > { %14949 = vmatmul.mubr.bf16.gmra.mrb[40].mxu1 %v15908_v61  ;;  %v20582_v61 = vld [vmem:[#allocation51_spill] sm:$0xff] }
 0x7d8   : > { %14952 = vmatprep.mubr.bf16.mxu1 %v15910_v45  ;;  %14981 = vmatpush3.bf16.msra.mxu1 %v15915_v3  ;;  %v11279_v3 = vrot.slane %v11277_v51, 5  ;;  %v11218_v45 = vld [vmem:[#allocation3 + $0x3c] sm:$0xf]  ;;  %v11322_v14 = vor.u32 %v11321_v21, %v19734_v37  ;;  %v19745_v51 = vld [vmem:[#allocation3 + $0xd4] sm:$0x1]  ;;  %v11327_v21 = vrot.slane %v11325_v48, 5 }
 0x7d9   : > { %14982 = vmatprep.subr.bf16.mxu1 %v15918_v6  ;;  %v11330_v50 = vshrl.u32 %v11218_v45, 16  ;;  %v11333_v11 = vshll.u32 %v11218_v45, 16 }
 0x7da   : > { %v11323_v45 = vrot.slane %v11322_v14, 4 }
 0x7dc   : > { %14983 = vmatpush3.bf16.msra.mxu1 %v15918_v6  ;;  %v11301_v6 = vshll.u32 %v20582_v61, 16  ;;  %v11328_v48 = vsel %vm16606_vm11, %v11323_v45, %v11327_v21 }
 0x7dd   : > { %14984 = vmatprep.subr.bf16.mxu1 %v15921_v33 }
 0x7de   : > { %v11303_v4 = vrot.slane %v11301_v6, 5  ;;  %v15923_v6 = vld [vmem:[#allocation3 + $0xcc] sm:$0xff]  }
 0x7df   : > { %14953 = vmatmul.mubr.bf16.gmra.mrb[44].mxu1 %v15911_v58  ;;  %v11288_v58 = vor.u32 %v11287_v29, %v11284_v46  ;;  %v11367_v46 = vshrl.u32 %v19384_v38, 16  ;;  %v12137_v29 = vrot.slane %v19745_v51, 5  ;;  %v11357_v38 = vshll.u32 %v11221_v23, 16 }
 0x7e0   : > { %14956 = vmatprep.mubr.bf16.mxu1 %v15913_v40  ;;  %14985 = vmatpush3.bf16.msra.mxu1 %v15921_v33  ;;  %v11280_v33 = vsel %vm16606_vm11, %v11275_v60, %v11279_v3  ;;  %v11298_v40 = vor.u32 %v11297_v57, %v19726_v34  ;;  %v12134_v60 = vrot.slane %v19743_v44, 5  ;;  %v11224_v57 = vld [vmem:[#allocation3 + $0x54] sm:$0xf]  ;;  %v11354_v3 = vshrl.u32 %v11221_v23, 16 }
 0x7e1   : > { %14986 = vmatprep.subr.bf16.mxu1 %v15924_v63  ;;  %v11289_v30 = vrot.slane %v11288_v58, 4  ;;  %v11346_v23 = vor.u32 %v11345_v20, %v19752_v36  ;;  %v11351_v20 = vrot.slane %v11349_v43, 5 }
 0x7e2   : > { %v11299_v17 = vrot.slane %v11298_v40, 4  ;;  %v12136_v61 = vrot.slane %v12134_v60, 4  ;;  %v11378_v40 = vshrl.u32 %v11224_v57, 16  ;;  %v11356_v14 = vrot.slane %v11354_v3, 4  ;;  %v15996_v3 = vld [vmem:[#allocation3 + $0x5c] sm:$0x1] }
 0x7e4   : > { %14987 = vmatpush3.bf16.msra.mxu1 %v15924_v63  ;;  %v11308_v63 = vrot.slane %v11306_v54, 4  ;;  %v11335_v54 = vrot.slane %v11333_v11, 5  ;;  %v19762_v2 = vsel %vm17067_vm1, %v12136_v61, %v12137_v29  ;;  %v11304_v11 = vsel %vm16606_vm11, %v11299_v17, %v11303_v4  ;;  %v15995_v29 = vld [vmem:[#allocation3 + $0x50] sm:$0x1] }
 0x7e5   : > { %15020 = vmatprep.subr.bf16.mxu1 %v19718_v26  ;;  %v11402_v17 = vshrl.u32 %v11227_v25, 16  ;;  %v11397_v61 = vshll.u32 %v15996_v3, 16 }
 0x7e6   : > { %v11312_v47 = vor.u32 %v11311_v41, %v11308_v63  ;;  %v11369_v63 = vrot.slane %v11367_v46, 4  ;;  %v11381_v41 = vshll.u32 %v11224_v57, 16 }
 0x7e7   : > { %14957 = vmatmul.mubr.bf16.gmra.mrb[48].mxu1 %v15914_v42  ;;  %v15922_v42 = vld [vmem:[#allocation3 + $0xc0] sm:$0xff]   ;;  %v11404_v21 = vrot.slane %v11402_v17, 4  ;;  %v15998_v17 = vld [vmem:[#allocation3 + $0x68] sm:$0x1] }
 0x7e8   : > { %14960 = vmatprep.mubr.bf16.mxu1 %v15916_v16  ;;  %v13425_v16 = vcombine.low %v11270_v12, %v11280_v33  ;;  %v19754_v33 = vrot.slane %v11363_v39, 5  ;;  %v19764_v12 = vrot.slane %v11387_v13, 5  ;;  %v11313_v56 = vrot.slane %v11312_v47, 4  ;;  %v11230_v13 = vld [vmem:[#allocation3 + $0x6c] sm:$0xf] }
 0x7e9   : > { %v11359_v39 = vrot.slane %v11357_v38, 5  ;;  %v11405_v47 = vshll.u32 %v11227_v25, 16  ;;  %v11429_v24 = vshll.u32 %v11230_v13, 16  ;;  %v11399_v25 = vrot.slane %v11397_v61, 5 }
 0x7ea   : > { %v11370_v46 = vor.u32 %v11369_v63, %v19754_v33 }
 0x7eb   : > { %v11360_v45 = vor.u32 %v11359_v39, %v11356_v14  ;;  %v11233_v14 = vld [vmem:[#allocation3 + $0x78] sm:$0xf] }
 0x7ec   : > { %v11371_v38 = vrot.slane %v11370_v46, 4 }
 0x7ed   : > { %v11361_v46 = vrot.slane %v11360_v45, 4 }
 0x7ef   : > { %14961 = vmatmul.mubr.bf16.gmra.mrb[52].mxu1 %v15917_v9  ;;  %v11332_v9 = vrot.slane %v11330_v50, 4  ;;  %v11393_v50 = vrot.slane %v11391_v22, 4  ;;  %v11366_v3 = vsel %vm16606_vm11, %v11361_v46, %v19754_v33  ;;  %v15929_v46 = vld [vmem:[#allocation7 + $0x220] sm:$0xff]  }
 0x7f0   : > { %14964 = vmatprep.mubr.bf16.mxu1 %v15919_v5  ;;  %v11978_v5 = vld [vmem:[#allocation3 + $0xcc] sm:$0xe] }
 0x7f1   : > { %v13464_v53 = vrot.slane %v11978_v5, 9  ;;  %v11336_v52 = vor.u32 %v11335_v54, %v11332_v9  ;;  %v11394_v4 = vor.u32 %v11393_v50, %v19764_v12  ;;  %v11373_v9 = vshll.u32 %v15995_v29, 16  ;;  %v20585_v54 = vld [vmem:[#allocation61_spill] sm:$0xff] }
 0x7f2   : > { %v11411_v57 = vshll.u32 %v20585_v54, 16  ;;  %v11426_v50 = vshrl.u32 %v11230_v13, 16  ;;  %v15999_v13 = vld [vmem:[#allocation3 + $0x7c] sm:$0xf] }
 0x7f3   : > { %v19758_v58 = vsel %vm17067_vm1, %v13464_v53, %v12134_v60  ;;  %v11318_v60 = vsel %vm16606_vm11, %v11313_v56, %v19734_v37  ;;  %v11337_v53 = vrot.slane %v11336_v52, 4  ;;  %v11407_v37 = vrot.slane %v11405_v47, 5 }
 0x7f4   : > { %v13427_v22 = vcombine.low %v11318_v60, %v11328_v48  ;;  %v15997_v48 = vld [vmem:[#allocation3 + $0x70] sm:$0xf]  ;;  %v11421_v47 = vshll.u32 %v15998_v17, 16  ;;  %v11428_v60 = vrot.slane %v11426_v50, 4  ;;  %v16000_v50 = vld [vmem:[#allocation3 + $0x74] sm:$0x1] }
 0x7f5   : > { %v11342_v43 = vsel %vm16606_vm11, %v11337_v53, %v19752_v36  ;;  %v11435_v52 = vshll.u32 %v15997_v48, 16  ;;  %v11463_v53 = vshrl.u32 %v15999_v13, 16 }
 0x7f7   : > { %14965 = vmatmul.mubr.bf16.gmra.mrb[56].mxu1 %v15920_v0  ;;  %v13480_v0 = vcombine.low %v19758_v58, %v19762_v2 }
 0x7f8   : > { %14968 = vmatprep.mubr.bf16.mxu1 %v15922_v42  ;;  %v11294_v42 = vsel %vm16606_vm11, %v11289_v30, %v19726_v34  ;;  %v11380_v34 = vrot.slane %v11378_v40, 4  ;;  %v11383_v30 = vrot.slane %v11381_v41, 5  ;;  %v15926_v40 = vld [vmem:[#allocation7 + $0x208] sm:$0xff]   ;;  %v11395_v41 = vrot.slane %v11394_v4, 4 }
 0x7f9   : > { %v13426_v5 = vcombine.low %v11294_v42, %v11304_v11  ;;  %v11375_v42 = vrot.slane %v11373_v9, 5  ;;  %v19783_v11 = vrot.slane %v11411_v57, 5  ;;  %v11408_v4 = vor.u32 %v11407_v37, %v11404_v21  ;;  %v11236_v21 = vld [vmem:[#allocation3 + $0x84] sm:$0xf] }
 0x7fa   : > { %v11384_v63 = vor.u32 %v11383_v30, %v11380_v34  ;;  %v11400_v36 = vsel %vm16606_vm11, %v11395_v41, %v11399_v25  ;;  %v11450_v9 = vshrl.u32 %v11233_v14, 16  ;;  %v19796_v57 = vrot.slane %v11435_v52, 5  ;;  %v15928_v41 = vld [vmem:[#allocation7 + $0x218] sm:$0xff]  }
 0x7fb   : > { %v11376_v34 = vsel %vm16606_vm11, %v11371_v38, %v11375_v42  ;;  %v11409_v38 = vrot.slane %v11408_v4, 4  ;;  %v11445_v42 = vshll.u32 %v16000_v50, 16  ;;  %v11477_v52 = vshll.u32 %v11236_v21, 16 }
 0x7fc   : > { %v11385_v30 = vrot.slane %v11384_v63, 4  ;;  %v11423_v63 = vrot.slane %v11421_v47, 5 }
 0x7fd   : > { %v11414_v47 = vsel %vm16606_vm11, %v11409_v38, %v19783_v11 }
 0x7fe   : > { %v11390_v61 = vsel %vm16606_vm11, %v11385_v30, %v19764_v12  ;;  %v11465_v12 = vrot.slane %v11463_v53, 4  ;;  %v11479_v53 = vrot.slane %v11477_v52, 5 }
 0x7ff   : > { %14969 = vmatmul.mubr.bf16.gmra.mrb[60].mxu1 %v15923_v6  ;;  %v11347_v6 = vrot.slane %v11346_v23, 4  ;;  %v11439_v23 = vshrl.u32 %v15997_v48, 16  ;;  %v13430_v45 = vcombine.low %v11390_v61, %v11400_v36  ;;  %v11474_v48 = vshrl.u32 %v11236_v21, 16  ;;  %v16002_v36 = vld [vmem:[#allocation3 + $0x94] sm:$0xf] }
 0x800   : > { %14988 = vmatprep.mubr.bf16.mxu1 %v13425_v16  ;;  %v11415_v16 = vshrl.u32 %v20585_v54, 16  ;;  %v11453_v54 = vshll.u32 %v11233_v14, 16  ;;  %v11507_v4 = vshll.u32 %v16002_v36, 16  ;;  %v11511_v17 = vshrl.u32 %v16002_v36, 16  ;;  %v11242_v61 = vld [vmem:[#allocation3 + $0x9c] sm:$0xf] }
 0x801   : > { %v11352_v39 = vsel %vm16606_vm11, %v11347_v6, %v11351_v20  ;;  %v13429_v6 = vcombine.low %v11366_v3, %v11376_v34 }
 0x802   : > { %v11417_v56 = vrot.slane %v11415_v16, 4  ;;  %v11441_v16 = vrot.slane %v11439_v23, 4  ;;  %v13428_v20 = vcombine.low %v11342_v43, %v11352_v39  ;;  %v11239_v43 = vld [vmem:[#allocation3 + $0x90] sm:$0xf]  ;;  %v16001_v23 = vld [vmem:[#allocation3 + $0x88] sm:$0xf] }
 0x803   : > { %v11483_v14 = vshll.u32 %v16001_v23, 16  ;;  %v11487_v39 = vshrl.u32 %v16001_v23, 16  ;;  %v11498_v34 = vshrl.u32 %v11239_v43, 16  ;;  %v11501_v30 = vshll.u32 %v11239_v43, 16 }
 0x804   : > { %v11418_v29 = vor.u32 %v11417_v56, %v19783_v11  ;;  %v11452_v56 = vrot.slane %v11450_v9, 4  ;;  %v19815_v38 = vrot.slane %v11507_v4, 5  ;;  %v11513_v21 = vrot.slane %v11511_v17, 4  ;;  %v11245_v4 = vld [vmem:[#allocation3 + $0xa8] sm:$0xf] }
 0x805   : > { %v11489_v3 = vrot.slane %v11487_v39, 4  ;;  %v11500_v11 = vrot.slane %v11498_v34, 4  ;;  %v16005_v34 = vld [vmem:[#allocation3 + $0xa0] sm:$0xf]  ;;  %v16006_v17 = vld [vmem:[#allocation3 + $0x98] sm:$0x1] }
 0x806   : > { %v11419_v33 = vrot.slane %v11418_v29, 4  ;;  %v11447_v29 = vrot.slane %v11445_v42, 5  ;;  %v11535_v36 = vshrl.u32 %v16005_v34, 16 }
 0x807   : > { %14989 = vmatmul.mubr.bf16.vlgmr.msra.gmra.mrb[32].mxu1 %v13426_v5  ;;  %v15927_v5 = vld [vmem:[#allocation7 + $0x210] sm:$0xff]  }
 0x808   : > { %14992 = vmatprep.mubr.bf16.mxu1 %v13427_v22  ;;  %15021 = vmatpush3.bf16.msra.mxu1 %v19718_v26  ;;  %v11431_v26 = vrot.slane %v11429_v24, 5  ;;  %v11459_v22 = vshll.u32 %v15999_v13, 16  ;;  %v11455_v24 = vrot.slane %v11453_v54, 5 }
 0x809   : > { %15022 = vmatprep.subr.bf16.mxu1 %v15926_v40 }
 0x80a   : > { %v11432_v37 = vor.u32 %v11431_v26, %v11428_v60  ;;  %v19805_v25 = vrot.slane %v11459_v22, 5  ;;  %v11456_v26 = vor.u32 %v11455_v24, %v11452_v56  ;;  %v11476_v22 = vrot.slane %v11474_v48, 4  ;;  %v16004_v48 = vld [vmem:[#allocation3 + $0x8c] sm:$0x1] }
 0x80b   : > { %v11493_v52 = vshll.u32 %v16004_v48, 16 }
 0x80c   : > { %15023 = vmatpush3.bf16.msra.mxu1 %v15926_v40  ;;  %v11442_v40 = vor.u32 %v11441_v16, %v19796_v57  ;;  %v11433_v60 = vrot.slane %v11432_v37, 4  ;;  %v11466_v54 = vor.u32 %v11465_v12, %v19805_v25  ;;  %v16003_v16 = vld [vmem:[#allocation3 + $0x80] sm:$0x1]  ;;  %v11457_v50 = vrot.slane %v11456_v26, 4 }
 0x80d   : > { %15024 = vmatprep.subr.bf16.mxu1 %v15927_v5  ;;  %v11469_v13 = vshll.u32 %v16003_v16, 16  ;;  %v15930_v37 = vld [vmem:[#allocation7 + $0x228] sm:$0xff]   ;;  %v11480_v24 = vor.u32 %v11479_v53, %v11476_v22  ;;  %v11549_v53 = vshll.u32 %v11245_v4, 16 }
 0x80e   : > { %v11443_v9 = vrot.slane %v11442_v40, 4  ;;  %v11467_v56 = vrot.slane %v11466_v54, 4  ;;  %v11525_v40 = vshll.u32 %v11242_v61, 16  ;;  %v11462_v39 = vsel %vm16606_vm11, %v11457_v50, %v19805_v25 }
 0x80f   : > { %14993 = vmatmul.mubr.bf16.gmra.mrb[36].mxu1 %v13428_v20  ;;  %v19813_v20 = vrot.slane %v11483_v14, 5  ;;  %v11471_v12 = vrot.slane %v11469_v13, 5  ;;  %v15931_v14 = vld [vmem:[#allocation7 + $0x230] sm:$0xff]   ;;  %v11546_v25 = vshrl.u32 %v11245_v4, 16 }
 0x810   : > { %14996 = vmatprep.mubr.bf16.mxu1 %v13429_v6  ;;  %15025 = vmatpush3.bf16.msra.mxu1 %v15927_v5  ;;  %v11424_v5 = vsel %vm16606_vm11, %v11419_v33, %v11423_v63  ;;  %v11503_v6 = vrot.slane %v11501_v30, 5  ;;  %v11448_v42 = vsel %vm16606_vm11, %v11443_v9, %v11447_v29  ;;  %v11522_v33 = vshrl.u32 %v11242_v61, 16 }
 0x811   : > { %15026 = vmatprep.subr.bf16.mxu1 %v15928_v41  ;;  %v13431_v63 = vcombine.low %v11414_v47, %v11424_v5  ;;  %v11490_v43 = vor.u32 %v11489_v3, %v19813_v20  ;;  %v11531_v30 = vshll.u32 %v16005_v34, 16  ;;  %v11517_v47 = vshll.u32 %v16006_v17, 16  ;;  %v15932_v3 = vld [vmem:[#allocation7 + $0x238] sm:$0xff]   ;;  %v11251_v34 = vld [vmem:[#allocation3 + $0xc0] sm:$0xf] }
 0x812   : > { %v11504_v23 = vor.u32 %v11503_v6, %v11500_v11  ;;  %v11481_v5 = vrot.slane %v11480_v24, 4  ;;  %v11524_v54 = vrot.slane %v11522_v33, 4  ;;  %v11527_v16 = vrot.slane %v11525_v40, 5 }
 0x813   : > { %v11491_v9 = vrot.slane %v11490_v43, 4  ;;  %v11495_v11 = vrot.slane %v11493_v52, 5  ;;  %v19829_v6 = vrot.slane %v11531_v30, 5  ;;  %v16008_v43 = vld [vmem:[#allocation3 + $0xa4] sm:$0x1]  ;;  %v11548_v48 = vrot.slane %v11546_v25, 4 }
 0x814   : > { %15027 = vmatpush3.bf16.msra.mxu1 %v15928_v41  ;;  %v11438_v41 = vsel %vm16606_vm11, %v11433_v60, %v19796_v57  ;;  %v16007_v60 = vld [vmem:[#allocation3 + $0xac] sm:$0xf]  ;;  %v11505_v13 = vrot.slane %v11504_v23, 4  ;;  %v11528_v24 = vor.u32 %v11527_v16, %v11524_v54  ;;  %v11541_v33 = vshll.u32 %v16008_v43, 16 }
 0x815   : > { %15028 = vmatprep.subr.bf16.mxu1 %v15929_v46  ;;  %v13432_v57 = vcombine.low %v11438_v41, %v11448_v42  ;;  %v11555_v29 = vshll.u32 %v16007_v60, 16  ;;  %v11559_v26 = vshrl.u32 %v16007_v60, 16  ;;  %v11248_v42 = vld [vmem:[#allocation3 + $0xb4] sm:$0xf]  ;;  %v11551_v52 = vrot.slane %v11549_v53, 5 }
 0x816   : > { %v11510_v40 = vsel %vm16606_vm11, %v11505_v13, %v19815_v38  ;;  %v11543_v60 = vrot.slane %v11541_v33, 5  ;;  %v11597_v54 = vshll.u32 %v11251_v34, 16  ;;  %v11254_v16 = vld [vmem:[#allocation3 + $0xcc] sm:$0xf] }
 0x817   : > { %14997 = vmatmul.mubr.bf16.gmra.mrb[40].mxu1 %v13430_v45  ;;  %v11514_v45 = vor.u32 %v11513_v21, %v19815_v38  ;;  %v11537_v21 = vrot.slane %v11535_v36, 4  ;;  %v19831_v50 = vrot.slane %v11555_v29, 5  ;;  %v11561_v41 = vrot.slane %v11559_v26, 4  ;;  %v16010_v36 = vld [vmem:[#allocation3 + $0xc4] sm:$0xf] }
 0x818   : > { %15000 = vmatprep.mubr.bf16.mxu1 %v13431_v63  ;;  %15029 = vmatpush3.bf16.msra.mxu1 %v15929_v46  ;;  %v11472_v46 = vsel %vm16606_vm11, %v11467_v56, %v11471_v12  ;;  %v11519_v63 = vrot.slane %v11517_v47, 5  ;;  %v11496_v56 = vsel %vm16606_vm11, %v11491_v9, %v11495_v11  ;;  %v11603_v4 = vshll.u32 %v16010_v36, 16  ;;  %v16011_v26 = vld [vmem:[#allocation3 + $0xb0] sm:$0x1] }
 0x819   : > { %15030 = vmatprep.subr.bf16.mxu1 %v15930_v37  ;;  %v11515_v22 = vrot.slane %v11514_v45, 4  ;;  %v13433_v61 = vcombine.low %v11462_v39, %v11472_v46  ;;  %v11538_v23 = vor.u32 %v11537_v21, %v19829_v6  ;;  %v16009_v45 = vld [vmem:[#allocation3 + $0xb8] sm:$0xf]  ;;  %v11562_v30 = vor.u32 %v11561_v41, %v19831_v50 }
 0x81a   : > { %v11583_v39 = vshrl.u32 %v16009_v45, 16  ;;  %v11607_v46 = vshrl.u32 %v16010_v36, 16  ;;  %v11529_v47 = vrot.slane %v11528_v24, 4  ;;  %v11552_v29 = vor.u32 %v11551_v52, %v11548_v48 }
 0x81b   : > { %v11520_v12 = vsel %vm16606_vm11, %v11515_v22, %v11519_v63  ;;  %v11594_v9 = vshrl.u32 %v11251_v34, 16  ;;  %v11539_v13 = vrot.slane %v11538_v23, 4  ;;  %v11605_v21 = vrot.slane %v11603_v4, 5  ;;  %v16013_v4 = vld [vmem:[#allocation3 + $0xc8] sm:$0x1] }
 0x81c   : > { %15031 = vmatpush3.bf16.msra.mxu1 %v15930_v37  ;;  %v11486_v37 = vsel %vm16606_vm11, %v11481_v5, %v19813_v20  ;;  %v11570_v20 = vshrl.u32 %v11248_v42, 16  ;;  %v13435_v17 = vcombine.low %v11510_v40, %v11520_v12  ;;  %v11565_v5 = vshll.u32 %v16011_v26, 16 }
 0x81d   : > { %15032 = vmatprep.subr.bf16.mxu1 %v15931_v14  ;;  %v13434_v38 = vcombine.low %v11486_v37, %v11496_v56  ;;  %v11585_v53 = vrot.slane %v11583_v39, 4  ;;  %v11609_v63 = vrot.slane %v11607_v46, 4  ;;  %v11618_v41 = vshrl.u32 %v11254_v16, 16 }
 0x81e   : > { %v11572_v22 = vrot.slane %v11570_v20, 4  ;;  %v11631_v37 = vshrl.u32 %v19743_v44, 16  ;;  %v11553_v56 = vrot.slane %v11552_v29, 4  ;;  %v11567_v24 = vrot.slane %v11565_v5, 5  ;;  %v16012_v20 = vld [vmem:[#allocation3 + $0xbc] sm:$0x1] }
 0x81f   : > { %15001 = vmatmul.mubr.bf16.gmra.mrb[44].mxu1 %v13432_v57  ;;  %v11579_v57 = vshll.u32 %v16009_v45, 16  ;;  %v11596_v43 = vrot.slane %v11594_v9, 4  ;;  %v11599_v33 = vrot.slane %v11597_v54, 5  ;;  %v11534_v40 = vsel %vm16606_vm11, %v11529_v47, %v19829_v6 }
 0x820   : > { %15004 = vmatprep.mubr.bf16.mxu1 %v13433_v61  ;;  %15033 = vmatpush3.bf16.msra.mxu1 %v15931_v14  ;;  %v11573_v14 = vshll.u32 %v11248_v42, 16  ;;  %v11563_v61 = vrot.slane %v11562_v30, 4  ;;  %v11621_v42 = vshll.u32 %v11254_v16, 16  ;;  %v11544_v12 = vsel %vm16606_vm11, %v11539_v13, %v11543_v60 }
 0x821   : > { %15034 = vmatprep.subr.bf16.mxu1 %v15932_v3  ;;  %v11581_v25 = vrot.slane %v11579_v57, 5  ;;  %v11589_v45 = vshll.u32 %v16012_v20, 16  ;;  %v11610_v57 = vor.u32 %v11609_v63, %v11605_v21  ;;  %v11633_v30 = vrot.slane %v11631_v37, 4 }
 0x822   : > { %v11575_v11 = vrot.slane %v11573_v14, 5  ;;  %v11568_v52 = vsel %vm16606_vm11, %v11563_v61, %v11567_v24  ;;  %v11623_v39 = vrot.slane %v11621_v42, 5  ;;  %v13436_v14 = vcombine.low %v11534_v40, %v11544_v12  ;;  %v20593_v12 = vld [vmem:[#allocation67_spill] sm:$0xff] }
 0x823   : > { %v11586_v48 = vor.u32 %v11585_v53, %v11581_v25  ;;  %v11558_v6 = vsel %vm16606_vm11, %v11553_v56, %v19831_v50  ;;  %v11600_v36 = vor.u32 %v11599_v33, %v11596_v43  ;;  %v11613_v46 = vshll.u32 %v16013_v4, 16  ;;  %v20586_v56 = vld [vmem:[#allocation56_spill] sm:$0xff]  ;;  %v20589_v43 = vld [vmem:[#allocation59_spill] sm:$0xff]  ;;  %v20590_v33 = vld [vmem:[#allocation58_spill] sm:$0xff] }
 0x824   : > { %15035 = vmatpush3.bf16.msra.mxu1 %v15932_v3  ;;  %v11627_v3 = vshll.u32 %v19743_v44, 16  ;;  %v11576_v23 = vor.u32 %v11575_v11, %v11572_v22  ;;  %v11620_v44 = vrot.slane %v11618_v41, 4  ;;  %v11591_v47 = vrot.slane %v11589_v45, 5  ;;  %v20599_v45 = vld [vmem:[#allocation70_spill] sm:$0xff] }
 0x825   : > { %v11611_v60 = vrot.slane %v11610_v57, 4  ;;  %v11637_v9 = vshll.u32 %v19745_v51, 16  ;;  %v11601_v54 = vrot.slane %v11600_v36, 4  ;;  %v11615_v16 = vrot.slane %v11613_v46, 5  ;;  %v20608_v4 = vld [vmem:[#allocation74_spill] sm:$0xff] }
 0x826   : > { %v11629_v34 = vrot.slane %v11627_v3, 5  ;;  %v11577_v29 = vrot.slane %v11576_v23, 4  ;;  %v11624_v26 = vor.u32 %v11623_v39, %v11620_v44  ;;  %v20591_v40 = vcombine.low %v20589_v43, %v20590_v33  ;;  %v20596_v23 = vld [vmem:[#allocation63_spill] sm:$0xff]  ;;  %v20601_v44 = vld [vmem:[#allocation64_spill] sm:$0xff] }
 0x827   : > { %15005 = vmatmul.mubr.bf16.gmra.mrb[48].mxu1 %v13434_v38  ;;  %v13437_v38 = vcombine.low %v11558_v6, %v11568_v52  ;;  %v11616_v50 = vsel %vm16606_vm11, %v11611_v60, %v11615_v16  ;;  %v11639_v11 = vrot.slane %v11637_v9, 5  ;;  %v11606_v41 = vsel %vm16606_vm11, %v11601_v54, %v11605_v21  ;;  %v20592_v21 = vld [vmem:[#allocation60_spill] sm:$0xff]  ;;  %v20606_v6 = vld [vmem:[#allocation71_spill] sm:$0xff] }
 0x828   : > { %15008 = vmatprep.mubr.bf16.mxu1 %v13435_v17  ;;  %v11587_v17 = vrot.slane %v11586_v48, 4  ;;  %v11634_v5 = vor.u32 %v11633_v30, %v11629_v34  ;;  %v11582_v22 = vsel %vm16606_vm11, %v11577_v29, %v11581_v25  ;;  %v11625_v53 = vrot.slane %v11624_v26, 4  ;;  %v20587_v25 = vld [vmem:[#allocation54_spill] sm:$0xff]  ;;  %v20595_v52 = vld [vmem:[#allocation68_spill] sm:$0xff]  ;;  %v20614_v29 = vld [vmem:[#allocation77_spill] sm:$0xff] }
 0x829   : > { %v13439_v42 = vcombine.low %v11606_v41, %v11616_v50  ;;  %v20588_v24 = vcombine.low %v20586_v56, %v20587_v25  ;;  %v20594_v48 = vcombine.low %v20592_v21, %v20593_v12  ;;  %v20597_v20 = vcombine.low %v20595_v52, %v20596_v23  ;;  %v20613_v60 = vld [vmem:[#allocation76_spill] sm:$0xff] }
 0x82a   : > { %v11592_v13 = vsel %vm16606_vm11, %v11587_v17, %v11591_v47  ;;  %v11635_v61 = vrot.slane %v11634_v5, 4  ;;  %v11630_v51 = vsel %vm16606_vm11, %v11625_v53, %v11629_v34  ;;  %v20600_v57 = vcombine.low %v20598_v31, %v20599_v45  ;;  %v20603_v34 = vld [vmem:[#allocation65_spill] sm:$0xff]  ;;  %v20611_v17 = vld [vmem:[#allocation75_spill] sm:$0xff] }
 0x82b   : > { %v13438_v63 = vcombine.low %v11582_v22, %v11592_v13  ;;  %v20602_v39 = vcombine.low %v19450_v49, %v20601_v44  ;;  %v20604_v30 = vcombine.low %v19462_v15, %v20603_v34  ;;  %v20609_v46 = vcombine.low %v19483_v19, %v20608_v4  ;;  %v19921_v15 = vld [vmem:[%s20067_s10] ss:$0 sm:$0xff] }
 0x82c   : > { %v11640_v3 = vsel %vm16606_vm11, %v11635_v61, %v11639_v11  ;;  %v20615_v49 = vcombine.low %v20613_v60, %v20614_v29 }
 0x82d   : > { %v13440_v37 = vcombine.low %v11630_v51, %v11640_v3 }
 0x82f   : > { %15009 = vmatmul.mubr.bf16.gmra.mrb[52].mxu1 %v13436_v14  ;;  %v20605_v14 = vld [vmem:[#allocation69_spill] sm:$0xff] }
 0x830   : > { %15012 = vmatprep.mubr.bf16.mxu1 %v13437_v38  ;;  %v20607_v36 = vcombine.low %v20605_v14, %v20606_v6  ;;  %v20610_v38 = vld [vmem:[#allocation73_spill] sm:$0xff] }
 0x831   : > { %v20612_v47 = vcombine.low %v20610_v38, %v20611_v17 }
 0x837   : > { %15013 = vmatmul.mubr.bf16.gmra.mrb[56].mxu1 %v13438_v63 }
 0x838   : > { %15016 = vmatprep.mubr.bf16.mxu1 %v13439_v42 }
 0x83f   : > { %15017 = vmatmul.mubr.bf16.gmra.mrb[60].mxu1 %v13440_v37 }
 0x840   : > { %15036 = vmatprep.mubr.bf16.mxu1 %v20588_v24 }
 0x847   : > { %15037 = vmatmul.mubr.bf16.vlgmr.msra.gmra.mrb[32].mxu1 %v20591_v40 }
 0x848   : > { %15040 = vmatprep.mubr.bf16.mxu1 %v20594_v48 }
 0x84f   : > { %15041 = vmatmul.mubr.bf16.gmra.mrb[36].mxu1 %v20597_v20 }
 0x850   : > { %15044 = vmatprep.mubr.bf16.mxu1 %v20600_v57 }
 0x857   : > { %15045 = vmatmul.mubr.bf16.gmra.mrb[40].mxu1 %v20602_v39 }
 0x858   : > { %15048 = vmatprep.mubr.bf16.mxu1 %v20604_v30 }
 0x85f   : > { %15049 = vmatmul.mubr.bf16.gmra.mrb[44].mxu1 %v20607_v36 }
 0x860   : > { %15052 = vmatprep.mubr.bf16.mxu1 %v20609_v46 }
 0x867   : > { %15053 = vmatmul.mubr.bf16.gmra.mrb[48].mxu1 %v20612_v47 }
 0x868   : > { %15056 = vmatprep.mubr.bf16.mxu1 %v20615_v49 }
 0x86f   : > { %15057 = vmatmul.mubr.bf16.gmra.mrb[52].mxu1 %v13476_v10 }
 0x870   : > { %15060 = vmatprep.mubr.bf16.mxu1 %v13477_v59 }
 0x877   : > { %15061 = vmatmul.mubr.bf16.gmra.mrb[56].mxu1 %v13478_v1 }
 0x878   : > { %15064 = vmatprep.mubr.bf16.mxu1 %v13479_v18 }
 0x87f   : > { %15065 = vmatmul.mubr.bf16.gmra.mrb[60].mxu1 %v13480_v0 }
 0x91a   : > { %v15038_v19 = vpop.f32.mrb[32].mxu1 }
 0x91b   : > { %v12302_v8 = vpop.f32.mrb[33].mxu1  ;;  %v12470_v27 = vmul.f32 %v15038_v19, %v19921_v15 }
 0x91c   : > { %v12468_v10 = vmul.f32 %v19921_v15, %v12302_v8  ;;  %v15039_v28 = vpop.f32.mrb[34].mxu1 }
 0x91d   : > { %v12305_v35 = vpop.f32.mrb[35].mxu1  ;;  %v12509_v32 = vadd.f32 %v19926_v7, %v12470_v27  ;;  %v12471_v18 = vmul.f32 %v15039_v28, %v19921_v15 }
 0x91e   : > { %v12507_v59 = vadd.f32 %v19926_v7, %v12468_v10  ;;  %v12469_v55 = vmul.f32 %v19921_v15, %v12305_v35 }
 0x91f   : > { %v12510_v54 = vadd.f32 %v19926_v7, %v12471_v18  ;;  %v12573_v50 = vmul.f32 0.01, %v12509_v32  ;;  %vm12541_vm11 = vcmp.ge.f32.partialorder %v12509_v32, 0.0 }
 0x920   : > { %v12508_v1 = vadd.f32 %v19926_v7, %v12469_v55  ;;  %vm12539_vm7 = vcmp.ge.f32.partialorder %v12507_v59, 0.0  ;;  %v12571_v62 = vmul.f32 0.01, %v12507_v59 }
 0x921   : > { %v12605_v11 = vsel %vm12541_vm11, %v12509_v32, %v12573_v50  ;;  %v12574_v63 = vmul.f32 0.01, %v12510_v54  ;;  %vm12542_vm13 = vcmp.ge.f32.partialorder %v12510_v54, 0.0 }
 0x922   : > { %v15042_v58 = vpop.f32.mrb[36].mxu1  ;;  %v12603_v2 = vsel %vm12539_vm7, %v12507_v59, %v12571_v62  ;;  %v12572_v0 = vmul.f32 0.01, %v12508_v1  ;;  %vm12540_vm8 = vcmp.ge.f32.partialorder %v12508_v1, 0.0 }
 0x923   : > { %12635 = vxpose.xlu1.b32.start [1/16] (narrow) %v12603_v2, 8  ;;  %v12318_v26 = vpop.f32.mrb[37].mxu1  ;;  %v12474_v3 = vmul.f32 %v15042_v58, %v19921_v15  ;;  %v12606_v56 = vsel %vm12542_vm13, %v12510_v54, %v12574_v63 }
 0x924   : > { %v15043_v5 = vpop.f32.mrb[38].mxu1  ;;  %v12472_v16 = vmul.f32 %v19921_v15, %v12318_v26  ;;  %v12604_v13 = vsel %vm12540_vm8, %v12508_v1, %v12572_v0 }
 0x925   : > { %v12321_v9 = vpop.f32.mrb[39].mxu1  ;;  %v12475_v24 = vmul.f32 %v15043_v5, %v19921_v15  ;;  %v12513_v43 = vadd.f32 %v19926_v7, %v12474_v3 }
 0x926   : > { %v12511_v22 = vadd.f32 %v19926_v7, %v12472_v16  ;;  %v12473_v53 = vmul.f32 %v19921_v15, %v12321_v9 }
 0x927   : > { %12636 = vxpose.xlu1.b32.cont [2/16] (narrow) %v12604_v13, 8  ;;  %v12514_v52 = vadd.f32 %v19926_v7, %v12475_v24  ;;  %v12577_v45 = vmul.f32 0.01, %v12513_v43  ;;  %vm12545_vm4 = vcmp.ge.f32.partialorder %v12513_v43, 0.0 }
 0x928   : > { %v12512_v37 = vadd.f32 %v19926_v7, %v12473_v53  ;;  %v12575_v25 = vmul.f32 0.01, %v12511_v22  ;;  %vm12543_vm14 = vcmp.ge.f32.partialorder %v12511_v22, 0.0 }
 0x929   : > { %v12578_v39 = vmul.f32 0.01, %v12514_v52  ;;  %v12609_v30 = vsel %vm12545_vm4, %v12513_v43, %v12577_v45  ;;  %vm12546_vm5 = vcmp.ge.f32.partialorder %v12514_v52, 0.0 }
 0x92a   : > { %v15046_v61 = vpop.f32.mrb[40].mxu1  ;;  %v12607_v40 = vsel %vm12543_vm14, %v12511_v22, %v12575_v25  ;;  %v12576_v21 = vmul.f32 0.01, %v12512_v37  ;;  %vm12544_vm1 = vcmp.ge.f32.partialorder %v12512_v37, 0.0 }
 0x92b   : > { %12637 = vxpose.xlu1.b32.cont [3/16] (narrow) %v12605_v11, 8  ;;  %v12334_v41 = vpop.f32.mrb[41].mxu1  ;;  %v12478_v4 = vmul.f32 %v15046_v61, %v19921_v15  ;;  %v12610_v17 = vsel %vm12546_vm5, %v12514_v52, %v12578_v39 }
 0x92c   : > { %v15047_v42 = vpop.f32.mrb[42].mxu1  ;;  %v12476_v23 = vmul.f32 %v19921_v15, %v12334_v41  ;;  %v12608_v31 = vsel %vm12544_vm1, %v12512_v37, %v12576_v21 }
 0x92d   : > { %v12337_v51 = vpop.f32.mrb[43].mxu1  ;;  %v12479_v19 = vmul.f32 %v15047_v42, %v19921_v15  ;;  %v12517_v28 = vadd.f32 %v19926_v7, %v12478_v4 }
 0x92e   : > { %v12515_v57 = vadd.f32 %v19926_v7, %v12476_v23  ;;  %v12477_v44 = vmul.f32 %v19921_v15, %v12337_v51 }
 0x92f   : > { %12638 = vxpose.xlu1.b32.cont [4/16] (narrow) %v12606_v56, 8  ;;  %v12518_v18 = vadd.f32 %v19926_v7, %v12479_v19  ;;  %vm12549_vm15 = vcmp.ge.f32.partialorder %v12517_v28, 0.0  ;;  %v12581_v9 = vmul.f32 0.01, %v12517_v28 }
 0x930   : > { %v12516_v46 = vadd.f32 %v19926_v7, %v12477_v44  ;;  %v12579_v47 = vmul.f32 0.01, %v12515_v57  ;;  %vm12547_vm6 = vcmp.ge.f32.partialorder %v12515_v57, 0.0 }
 0x931   : > { %v12582_v22 = vmul.f32 0.01, %v12518_v18  ;;  %vm12550_vm2 = vcmp.ge.f32.partialorder %v12518_v18, 0.0  ;;  %v12613_v11 = vsel %vm12549_vm15, %v12517_v28, %v12581_v9 }
 0x932   : > { %v19943_v33 = vpop.f32.mrb[44].mxu1  ;;  %v12611_v27 = vsel %vm12547_vm6, %v12515_v57, %v12579_v47  ;;  %v12580_v62 = vmul.f32 0.01, %v12516_v46  ;;  %vm12548_vm10 = vcmp.ge.f32.partialorder %v12516_v46, 0.0 }
 0x933   : > { %12639 = vxpose.xlu1.b32.cont [5/16] (narrow) %v12607_v40, 8  ;;  %v12350_v12 = vpop.f32.mrb[45].mxu1  ;;  %v12482_v37 = vmul.f32 %v19943_v33, %v19921_v15  ;;  %v12614_v24 = vsel %vm12550_vm2, %v12518_v18, %v12582_v22 }
 0x934   : > { %v19945_v48 = vpop.f32.mrb[46].mxu1  ;;  %v12480_v2 = vmul.f32 %v19921_v15, %v12350_v12  ;;  %v12612_v16 = vsel %vm12548_vm10, %v12516_v46, %v12580_v62 }
 0x935   : > { %v12353_v20 = vpop.f32.mrb[47].mxu1 }
 0x936   : > { %v12519_v53 = vadd.f32 %v19926_v7, %v12480_v2  ;;  %v12481_v61 = vmul.f32 %v19921_v15, %v12353_v20 }
 0x937   : > { %12640 = vxpose.xlu1.b32.cont [6/16] (narrow) %v12608_v31, 8 }
 0x938   : > { %v12520_v43 = vadd.f32 %v19926_v7, %v12481_v61  ;;  %vm12551_vm7 = vcmp.ge.f32.partialorder %v12519_v53, 0.0  ;;  %v12583_v12 = vmul.f32 0.01, %v12519_v53 }
 0x93a   : > { %v15054_v34 = vpop.f32.mrb[48].mxu1  ;;  %v12615_v4 = vsel %vm12551_vm7, %v12519_v53, %v12583_v12  ;;  %v12584_v46 = vmul.f32 0.01, %v12520_v43  ;;  %vm12552_vm11 = vcmp.ge.f32.partialorder %v12520_v43, 0.0 }
 0x93b   : > { %12641 = vxpose.xlu1.b32.cont [7/16] (narrow) %v12609_v30, 8  ;;  %v12366_v14 = vpop.f32.mrb[49].mxu1  ;;  %v12486_v60 = vmul.f32 %v15054_v34, %v19921_v15  ;;  %v12521_v30 = vadd.f32 %v19926_v7, %v12482_v37 }
 0x93c   : > { %v12484_v6 = vmul.f32 %v19921_v15, %v12366_v14  ;;  %v15055_v36 = vpop.f32.mrb[50].mxu1  ;;  %v12483_v14 = vmul.f32 %v19945_v48, %v19921_v15 }
 0x93d   : > { %v12369_v38 = vpop.f32.mrb[51].mxu1  ;;  %v12487_v35 = vmul.f32 %v15055_v36, %v19921_v15  ;;  %v12525_v59 = vadd.f32 %v19926_v7, %v12486_v60  ;;  %vm12553_vm14 = vcmp.ge.f32.partialorder %v12521_v30, 0.0 }
 0x93e   : > { %v12523_v29 = vadd.f32 %v19926_v7, %v12484_v6  ;;  %v12485_v49 = vmul.f32 %v19921_v15, %v12369_v38  ;;  %v12522_v48 = vadd.f32 %v19926_v7, %v12483_v14 }
 0x93f   : > { %12642 = vxpose.xlu1.b32.cont [8/16] (narrow) %v12610_v17, 8  ;;  %v12526_v26 = vadd.f32 %v19926_v7, %v12487_v35  ;;  %v12589_v50 = vmul.f32 0.01, %v12525_v59  ;;  %vm12557_vm0 = vcmp.ge.f32.partialorder %v12525_v59, 0.0 }
 0x940   : > { %v12524_v8 = vadd.f32 %v19926_v7, %v12485_v49  ;;  %vm12555_vm9 = vcmp.ge.f32.partialorder %v12523_v29, 0.0  ;;  %v12587_v10 = vmul.f32 0.01, %v12523_v29  ;;  %vm12554_vm4 = vcmp.ge.f32.partialorder %v12522_v48, 0.0 }
 0x941   : > { %v12590_v63 = vmul.f32 0.01, %v12526_v26  ;;  %v12621_v3 = vsel %vm12557_vm0, %v12525_v59, %v12589_v50  ;;  %vm12558_vm3 = vcmp.ge.f32.partialorder %v12526_v26, 0.0 }
 0x942   : > { %v15058_v55 = vpop.f32.mrb[52].mxu1  ;;  %v12619_v1 = vsel %vm12555_vm9, %v12523_v29, %v12587_v10  ;;  %v12588_v32 = vmul.f32 0.01, %v12524_v8  ;;  %vm12556_vm12 = vcmp.ge.f32.partialorder %v12524_v8, 0.0  ;;  %v12585_v10 = vmul.f32 0.01, %v12521_v30 }
 0x943   : > { %12643 = vxpose.xlu1.b32.cont [9/16] (narrow) %v12611_v27, 8  ;;  %12667 = vxpose.xlu0.b32.start [1/16] (narrow) %v12619_v1, 8  ;;  %v12382_v58 = vpop.f32.mrb[53].mxu1  ;;  %v12490_v52 = vmul.f32 %v15058_v55, %v19921_v15  ;;  %v12622_v31 = vsel %vm12558_vm3, %v12526_v26, %v12590_v63  ;;  %v12616_v55 = vsel %vm12552_vm11, %v12520_v43, %v12584_v46 }
 0x944   : > { %v15059_v0 = vpop.f32.mrb[54].mxu1  ;;  %v12488_v54 = vmul.f32 %v19921_v15, %v12382_v58  ;;  %v12620_v13 = vsel %vm12556_vm12, %v12524_v8, %v12588_v32 }
 0x945   : > { %v12385_v5 = vpop.f32.mrb[55].mxu1  ;;  %v12491_v36 = vmul.f32 %v15059_v0, %v19921_v15  ;;  %v12529_v38 = vadd.f32 %v19926_v7, %v12490_v52  ;;  %v12617_v0 = vsel %vm12553_vm14, %v12521_v30, %v12585_v10 }
 0x946   : > { %v12527_v41 = vadd.f32 %v19926_v7, %v12488_v54  ;;  %v12489_v42 = vmul.f32 %v19921_v15, %v12385_v5  ;;  %v12586_v5 = vmul.f32 0.01, %v12522_v48 }
 0x947   : > { %12644 = vxpose.xlu1.b32.cont [10/16] (narrow) %v12612_v16, 8  ;;  %12668 = vxpose.xlu0.b32.cont [2/16] (narrow) %v12620_v13, 8  ;;  %v12530_v28 = vadd.f32 %v19926_v7, %v12491_v36  ;;  %v12593_v18 = vmul.f32 0.01, %v12529_v38  ;;  %vm12561_vm1 = vcmp.ge.f32.partialorder %v12529_v38, 0.0 }
 0x948   : > { %v12528_v45 = vadd.f32 %v19926_v7, %v12489_v42  ;;  %v12591_v39 = vmul.f32 0.01, %v12527_v41  ;;  %vm12559_vm8 = vcmp.ge.f32.partialorder %v12527_v41, 0.0  ;;  %v12618_v54 = vsel %vm12554_vm4, %v12522_v48, %v12586_v5 }
 0x949   : > { %v12625_v26 = vsel %vm12561_vm1, %v12529_v38, %v12593_v18  ;;  %v12594_v9 = vmul.f32 0.01, %v12530_v28  ;;  %vm12562_vm5 = vcmp.ge.f32.partialorder %v12530_v28, 0.0 }
 0x94a   : > { %v15062_v51 = vpop.f32.mrb[56].mxu1  ;;  %v12623_v47 = vsel %vm12559_vm8, %v12527_v41, %v12591_v39  ;;  %v12592_v60 = vmul.f32 0.01, %v12528_v45  ;;  %vm12560_vm13 = vcmp.ge.f32.partialorder %v12528_v45, 0.0 }
 0x94b   : > { %v12494_v56 = vmul.f32 %v15062_v51, %v19921_v15  ;;  %12645 = vxpose.xlu1.b32.cont [11/16] (narrow) %v12613_v11, 8  ;;  %12669 = vxpose.xlu0.b32.cont [3/16] (narrow) %v12621_v3, 8  ;;  %v12398_v25 = vpop.f32.mrb[57].mxu1 }
 0x94c   : > { %v12492_v40 = vmul.f32 %v19921_v15, %v12398_v25  ;;  %v15063_v21 = vpop.f32.mrb[58].mxu1  ;;  %v12624_v32 = vsel %vm12560_vm13, %v12528_v45, %v12592_v60 }
 0x94d   : > { %v19977_v23 = vadd.f32 %v19926_v7, %v12494_v56  ;;  %v12495_v33 = vmul.f32 %v15063_v21, %v19921_v15  ;;  %v12401_v20 = vpop.f32.mrb[59].mxu1 }
 0x94e   : > { %v12531_v57 = vadd.f32 %v19926_v7, %v12492_v40  ;;  %v12493_v44 = vmul.f32 %v19921_v15, %v12401_v20 }
 0x94f   : > { %v19985_v34 = vadd.f32 %v19926_v7, %v12495_v33  ;;  %12646 = vxpose.xlu1.b32.cont [12/16] (narrow) %v12614_v24, 8  ;;  %12670 = vxpose.xlu0.b32.cont [4/16] (narrow) %v12622_v31, 8  ;;  %vm12565_vm10 = vcmp.ge.f32.partialorder %v19977_v23, 0.0 }
 0x950   : > { %v12532_v6 = vadd.f32 %v19926_v7, %v12493_v44  ;;  %v12595_v16 = vmul.f32 0.01, %v12531_v57  ;;  %vm12563_vm6 = vcmp.ge.f32.partialorder %v12531_v57, 0.0 }
 0x951   : > { %v12598_v61 = vmul.f32 0.01, %v19985_v34  ;;  %vm12566_vm12 = vcmp.ge.f32.partialorder %v19985_v34, 0.0 }
 0x952   : > { %v15066_v17 = vpop.f32.mrb[60].mxu1  ;;  %v12627_v13 = vsel %vm12563_vm6, %v12531_v57, %v12595_v16  ;;  %v12596_v50 = vmul.f32 0.01, %v12532_v6  ;;  %vm12564_vm9 = vcmp.ge.f32.partialorder %v12532_v6, 0.0 }
 0x953   : > { %v12498_v29 = vmul.f32 %v15066_v17, %v19921_v15  ;;  %12647 = vxpose.xlu1.b32.cont [13/16] (narrow) %v12615_v4, 8  ;;  %12671 = vxpose.xlu0.b32.cont [5/16] (narrow) %v12623_v47, 8  ;;  %v12414_v49 = vpop.f32.mrb[61].mxu1  ;;  %v12630_v11 = vsel %vm12566_vm12, %v19985_v34, %v12598_v61 }
 0x954   : > { %v12496_v19 = vmul.f32 %v19921_v15, %v12414_v49  ;;  %v15067_v8 = vpop.f32.mrb[62].mxu1  ;;  %v12628_v22 = vsel %vm12564_vm9, %v12532_v6, %v12596_v50 }
 0x955   : > { %v12537_v35 = vadd.f32 %v19926_v7, %v12498_v29  ;;  %v12499_v27 = vmul.f32 %v15067_v8, %v19921_v15  ;;  %v12417_v59 = vpop.f32.mrb[63].mxu1 }
 0x956   : > { %v12535_v1 = vadd.f32 %v19926_v7, %v12496_v19  ;;  %v12497_v62 = vmul.f32 %v19921_v15, %v12417_v59  ;;  %v12626_v15 = vsel %vm12562_vm5, %v12530_v28, %v12594_v9 }
 0x957   : > { %v12538_v58 = vadd.f32 %v19926_v7, %v12499_v27  ;;  %12648 = vxpose.xlu1.b32.cont [14/16] (narrow) %v12616_v55, 8  ;;  %12672 = vxpose.xlu0.b32.cont [6/16] (narrow) %v12624_v32, 8  ;;  %v12601_v3 = vmul.f32 0.01, %v12537_v35  ;;  %vm12569_vm2 = vcmp.ge.f32.partialorder %v12537_v35, 0.0 }
 0x958   : > { %v12536_v2 = vadd.f32 %v19926_v7, %v12497_v62  ;;  %v12597_v7 = vmul.f32 0.01, %v19977_v23  ;;  %v12599_v63 = vmul.f32 0.01, %v12535_v1  ;;  %vm12567_vm15 = vcmp.ge.f32.partialorder %v12535_v1, 0.0 }
 0x959   : > { %v12633_v37 = vsel %vm12569_vm2, %v12537_v35, %v12601_v3  ;;  %v12602_v56 = vmul.f32 0.01, %v12538_v58  ;;  %vm12570_vm3 = vcmp.ge.f32.partialorder %v12538_v58, 0.0 }
 0x95a   : > { %v12629_v53 = vsel %vm12565_vm10, %v19977_v23, %v12597_v7  ;;  %v12631_v41 = vsel %vm12567_vm15, %v12535_v1, %v12599_v63  ;;  %v12600_v42 = vmul.f32 0.01, %v12536_v2  ;;  %vm12568_vm0 = vcmp.ge.f32.partialorder %v12536_v2, 0.0 }
 0x95b   : > { %12649 = vxpose.xlu1.b32.cont [15/16] (narrow) %v12617_v0, 8  ;;  %12673 = vxpose.xlu0.b32.cont [7/16] (narrow) %v12625_v26, 8  ;;  %v12634_v25 = vsel %vm12570_vm3, %v12538_v58, %v12602_v56 }
 0x95c   : > { %v12632_v51 = vsel %vm12568_vm0, %v12536_v2, %v12600_v42 }
 0x95f   : > { %12650 = vxpose.xlu1.b32.end [16/16] (narrow) %v12618_v54, 8  ;;  %12674 = vxpose.xlu0.b32.cont [8/16] (narrow) %v12626_v15, 8 }
 0x963   : > { %12675 = vxpose.xlu0.b32.cont [9/16] (narrow) %v12627_v13, 8 }
 0x967   : > { %12676 = vxpose.xlu0.b32.cont [10/16] (narrow) %v12628_v22, 8 }
 0x96b   : > { %12677 = vxpose.xlu0.b32.cont [11/16] (narrow) %v12629_v53, 8 }
 0x96f   : > { %12678 = vxpose.xlu0.b32.cont [12/16] (narrow) %v12630_v11, 8 }
 0x973   : > { %12679 = vxpose.xlu0.b32.cont [13/16] (narrow) %v12631_v41, 8 }
 0x977   : > { %12680 = vxpose.xlu0.b32.cont [14/16] (narrow) %v12632_v51, 8 }
 0x97b   : > { %12681 = vxpose.xlu0.b32.cont [15/16] (narrow) %v12633_v37, 8 }
 0x97f   : > { %12682 = vxpose.xlu0.b32.end [16/16] (narrow) %v12634_v25, 8 }
 0x9a3   : > { %v12651_v24 = vpop.trf.xlu1 }
 0x9a4   : > { %12699 = vst [vmem:[%s449_s20] sm:$0xff] %v12651_v24 }
 0x9c3   : > { %v12683_v43 = vpop.trf.xlu0 }
 0x9c4   : > { %12700 = vst [vmem:[%s449_s20 + $0x8] sm:$0xff] %v12683_v43 }
 0x9c5   : > { %16083 = shalt.err (!%p16080_p11)
}
 0x9c6   : > { %s16084_s17 = scalar_lea.hbm %s20017_s27, 256  ;;  %s16088_s14 = scalar_lea.hbm %s20069_s12, 512 }
 0x9c7   : > { %p16085_p13 = scmp.ne.s32.totalorder %s20017_s27, %s16084_s17  ;;  %p16089_p6 = scmp.lt.u32.totalorder %s20017_s27, %s20069_s12 }
 0x9c8   : > { %p16090_p9 = scmp.lt.u32.totalorder %s16088_s14, %s16084_s17  ;;  %p16092_p12 = scmp.lt.u32.totalorder %s16084_s17, %s20017_s27 }
 0x9c9   : > { %p16086_p5 = pnand %p16085_p13, %p20616_p1 }
 0x9ca   : > { %p16091_p10 = por %p16090_p9, %p16089_p6 }
 0x9cb   : > { %p16087_p0 = pneg %p16086_p5 }
 0x9cc   : > { %p16093_p2 = por %p16092_p12, %p16091_p10 }
 0x9ce   : > { %p16094_p3 = pnand %p16093_p2, %p16087_p0 }
 0x9d0   : > { %16097 = shalt.err (!%p16094_p3)
}
 0x9d1   : > { %15636 = dma.vmem_to_hbm [thread:$0]  (%p20616_p1), %s20012_s15, 256, %s20017_s27, %s12702_s28  }
 0x9d2 PF: > { %s20617_s30 = sld [smem:[#allocation15_spill]]  ;;  %s20618_s26 = sld [smem:[#allocation13_spill]] }
 0x9d3   : > { %s20619_s23 = sld [smem:[#allocation18_spill]] }
 0x9d8   : > { %p15653_p4 = scmp.ge.s32.totalorder %s20617_s30, 2  ;;  %s12728_s29 = sand.u32 1, %s20618_s26  }
 0x9d9   : > { %p20620_p7 = scmp.ne.s32.totalorder %s20619_s23, 0  ;;  %s12729_s16 = scalar_lea.sflag [#allocation6], %s12728_s29 }
 0x9db   : > { %p15646_p8 = pnand %p15653_p4, %p20620_p7 }
 0x9dd   : > { %16123 = dma.done.wait (!%p15646_p8), %s12729_s16, 256  }
 0x9de   : > { %16125 = vsyncadd (!%p15646_p8), %s12729_s16, 4294967040  ;;  %s20621_s24 = sld [smem:[#allocation16_spill]]  ;;  %s20622_s25 = sld [smem:[#allocation14_spill]] }
 0x9df   : > { %s20623_s23 = sld [smem:[#allocation17_spill]]  ;;  %s20624_s21 = smov %s16132_s22 }
 0x9e4   : > { %p24_p11 = scmp.ge.s32.totalorder %s20621_s24, 4   ;;  %s20625_s22 = smov %s20622_s25 }
 0x9e6   :  { %26 = sbr.rel (!%p24_p11) target bundleno = 5 (0x5), region = 137 }
 0x9ed   :  { %12734 = vsyncpa [#allocation5], 1 }
 0x9ee   :  { %12736 = vsyncpa [#allocation5 + $0x1], 1 }
 0x9ef   :  { %12737 = vsyncpa [#allocation8], 1 }
 0x9f0   :  { %12738 = vsyncpa [#allocation6], 1 }
 0x9f1   :  { %12740 = vsyncpa [#allocation6 + $0x1], 1 }

</bundles_post_ra>
